<compile_context>
chip_gen: v7x
topology: tpu7x:2x2x1
jax: 0.10.0
libtpu: 0.0.40
codegen_flags: <defaults>
</compile_context>

<pallas_src>
import functools

import numpy as np
import jax
import jax.numpy as jnp
from jax.experimental import pallas as pl
from jax.experimental.pallas import tpu as pltpu

# ----------------------------------------------------------------------------
# Model dimensions (fixed by the torch module).
# ----------------------------------------------------------------------------
C1, C2, K = 60, 120, 64      # conv1 channels, conv2 channels, kernel size
H1, NCLS = 20, 4             # classifier dims
C1P = 64                     # per-tap channel pad (C1=60 -> 64); was 128
S = 3 * K                    # 192: contraction width of the fused conv1 matmul
KC = K * C1P                 # 4096: conv2 im2col row width (lane index k*64 + c)

# ----------------------------------------------------------------------------
# Spectral-residual saliency ("anom.Silency(24,24,64).generate_anomaly_score").
# TODO(synk): FFT has no Pallas equivalent; this preprocessing runs on the host
# in numpy, exactly as the PyTorch module did via .cpu().numpy() per series.
# ----------------------------------------------------------------------------
_EPS = 1e-8
AMP_WINDOW = 24
SERIES_WINDOW = 24   # unused by generate_anomaly_score (kept for fidelity)
SCORE_WINDOW = 64


def _average_filter(values, n=3):
    if n >= len(values):
        n = len(values)
    res = np.cumsum(values, dtype=float)
    res[n:] = res[n:] - res[:-n]
    res[n:] = res[n:] / n
    for i in range(1, n):
        res[i] /= (i + 1)
    return res


def _predict_next(values):
    v_last = values[-1]
    n = len(values)
    slopes = [(v_last - v) / (n - 1 - i) for i, v in enumerate(values[:-1])]
    return values[1] + sum(slopes)


def _extend_series(values, extend_num=5, look_ahead=5):
    extension = [_predict_next(values[-look_ahead - 2:-1])] * extend_num
    return np.concatenate((values, extension), axis=0)


def _silency_map(values, amp_window):
    freq = np.fft.fft(values)
    mag = np.sqrt(freq.real ** 2 + freq.imag ** 2)
    mag_safe = np.clip(mag, _EPS, None)
    spectral = np.exp(np.log(mag_safe) - _average_filter(np.log(mag_safe), n=amp_window))
    freq = freq * spectral / mag_safe
    wave = np.fft.ifft(freq)
    return np.sqrt(wave.real ** 2 + wave.imag ** 2)


def generate_anomaly_score(values):
    extended = _extend_series(values)
    mag = _silency_map(extended, AMP_WINDOW)[: len(values)]
    ave_mag = _average_filter(mag, n=SCORE_WINDOW)
    safe = np.clip(ave_mag, _EPS, ave_mag.max())
    return (mag - ave_mag) / safe


# ----------------------------------------------------------------------------
# Fused Pallas kernel: conv1+pool -> conv2+pool -> classifier -> sigmoid.
# ----------------------------------------------------------------------------
def srcnn_fused_kernel(lhs_ref, w1e_ref, w1o_ref, b1_ref, w2_ref, b2_ref,
                       wc1_ref, bc1_ref, wc2_ref, bc2_ref, out_ref):
    """One batch tile.

    lhs_ref : (1, 2*TB, S)  bf16  rows = [p=0 batches | p=1 batches];
                                   row r holds the padded series slice xp[b, 2p : 2p+S]
    w1e_ref : (S, KC)       bf16  banded conv1 weights, even raw positions
    w1o_ref : (S, KC)       bf16  banded conv1 weights, odd raw positions
    b1_ref  : (1, KC)       f32   conv1 bias tiled as k*C1P + c
    w2_ref  : (KC, 128)     bf16  conv2 weights, rows ordered k*C1P + c
    b2_ref  : (1, 128)      f32
    wc1_ref : (128, 128)    bf16  Linear(120,20), zero-padded
    bc1_ref : (1, 128)      f32
    wc2_ref : (128, 128)    bf16  Linear(20,4), zero-padded
    bc2_ref : (1, 128)      f32
    out_ref : (1, TB, 128)  f32   sigmoid(logits); lanes >= 4 are padding
    """
    tb = out_ref.shape[1]

    lhs = lhs_ref[0]                                                     # (2*tb, S)

    # conv1 at even/odd raw positions for every (p, k): two banded bf16 matmuls,
    # max-combined immediately (= MaxPool1d(2,2) of conv1), bias added after.
    even = jnp.dot(lhs, w1e_ref[...], preferred_element_type=jnp.float32)   # (2*tb, KC)
    odd = jnp.dot(lhs, w1o_ref[...], preferred_element_type=jnp.float32)    # (2*tb, KC)
    patches = jnp.maximum(even, odd) + b1_ref[...]                          # (2*tb, KC)

    # conv2 (single matmul) + MaxPool1d(2,2) over the p=0 / p=1 row blocks.
    c2 = jnp.dot(patches.astype(jnp.bfloat16), w2_ref[...],
                 preferred_element_type=jnp.float32)                        # (2*tb, 128)
    feat = jnp.maximum(c2[:tb], c2[tb:]) + b2_ref[...]                      # (tb, 128)

    # classifier head: Linear(120,20) -> Tanh -> Linear(20,4) -> sigmoid.
    h = jnp.tanh(jnp.dot(feat.astype(jnp.bfloat16), wc1_ref[...],
                         preferred_element_type=jnp.float32) + bc1_ref[...])
    logits = jnp.dot(h.astype(jnp.bfloat16), wc2_ref[...],
                     preferred_element_type=jnp.float32) + bc2_ref[...]
    out_ref[0] = jax.nn.sigmoid(logits)


# ----------------------------------------------------------------------------
# Parameter init (torch layout, PyTorch-style uniform) + packing for the kernel.
# ----------------------------------------------------------------------------
def init_torch_params(key):
    ks = jax.random.split(key, 8)

    def uinit(k, shape, fan_in):
        bound = 1.0 / np.sqrt(fan_in)
        return jax.random.uniform(k, shape, jnp.float32, -bound, bound)

    return dict(
        w_conv1=uinit(ks[0], (C1, 1, K), 1 * K),      # (60, 1, 64)
        b_conv1=uinit(ks[1], (C1,), 1 * K),
        w_conv2=uinit(ks[2], (C2, C1, K), C1 * K),    # (120, 60, 64)
        b_conv2=uinit(ks[3], (C2,), C1 * K),
        w_fc1=uinit(ks[4], (H1, C2), C2),             # (20, 120)
        b_fc1=uinit(ks[5], (H1,), C2),
        w_fc2=uinit(ks[6], (NCLS, H1), H1),           # (4, 20)
        b_fc2=uinit(ks[7], (NCLS,), H1),
    )


def pack_params(tp):
    """Rearrange torch-layout weights into the fused-kernel layout (done once)."""
    w1 = np.asarray(tp["w_conv1"], np.float32)[:, 0, :]     # (60, 64)  [c, j]
    b1 = np.asarray(tp["b_conv1"], np.float32)
    w2 = np.asarray(tp["w_conv2"], np.float32)              # (120, 60, 64) [o, c, k]
    b2 = np.asarray(tp["b_conv2"], np.float32)
    wf1 = np.asarray(tp["w_fc1"], np.float32)               # (20, 120)
    bf1 = np.asarray(tp["b_fc1"], np.float32)
    wf2 = np.asarray(tp["w_fc2"], np.float32)               # (4, 20)
    bf2 = np.asarray(tp["b_fc2"], np.float32)

    # Banded conv1 weights. Column k*C1P+c of the "even" matrix computes
    #   conv1[c, 2*(p+k)]  = sum_j xp[2p + 2k + j] * w1[c, j]
    # and of the "odd" matrix conv1[c, 2*(p+k)+1], from the same LHS row
    # xp[2p : 2p + S].  Hence row s = 2k + j (even) / 2k + 1 + j (odd).
    w1e = np.zeros((S, KC), np.float32)
    w1o = np.zeros((S, KC), np.float32)
    w1T = w1.T                                               # (64, 60)  [j, c]
    for k in range(K):
        w1e[2 * k: 2 * k + K, k * C1P: k * C1P + C1] = w1T
        w1o[2 * k + 1: 2 * k + 1 + K, k * C1P: k * C1P + C1] = w1T

    b1t = np.tile(np.pad(b1, (0, C1P - C1)), K)[None, :]     # (1, 4096)

    w2m = np.zeros((K, C1P, 128), np.float32)                # [k, c, o]
    w2m[:, :C1, :C2] = np.transpose(w2, (2, 1, 0))
    w2m = w2m.reshape(KC, 128)                               # row index k*C1P + c
    b2p = np.zeros((1, 128), np.float32)
    b2p[0, :C2] = b2

    wc1 = np.zeros((128, 128), np.float32)
    wc1[:C2, :H1] = wf1.T
    bc1 = np.zeros((1, 128), np.float32)
    bc1[0, :H1] = bf1
    wc2 = np.zeros((128, 128), np.float32)
    wc2[:H1, :NCLS] = wf2.T
    bc2 = np.zeros((1, 128), np.float32)
    bc2[0, :NCLS] = bf2

    return dict(
        w1e=jnp.asarray(w1e, jnp.bfloat16),
        w1o=jnp.asarray(w1o, jnp.bfloat16),
        b1t=jnp.asarray(b1t, jnp.float32),
        w2=jnp.asarray(w2m, jnp.bfloat16),
        b2=jnp.asarray(b2p, jnp.float32),
        wc1=jnp.asarray(wc1, jnp.bfloat16),
        bc1=jnp.asarray(bc1, jnp.float32),
        wc2=jnp.asarray(wc2, jnp.bfloat16),
        bc2=jnp.asarray(bc2, jnp.float32),
    )


# ----------------------------------------------------------------------------
# Generation-aware configuration.
# ----------------------------------------------------------------------------
def _num_tensorcores():
    """2 for chips whose single JAX device spans 2 TensorCores (v4/v5p/v7x)."""
    try:
        kind = jax.devices()[0].device_kind.lower()
    except Exception:
        return 1
    return 2 if ("v7" in kind or "v4" in kind or "v5p" in kind) else 1


def _vmem_limit_bytes():
    """<= 48 MiB on 64-MiB-VMEM chips (v7x), 64 MiB on 128-MiB generations."""
    try:
        cap = int(pltpu.get_tpu_info().vmem_capacity_bytes)
    except Exception:
        cap = 64 * 1024 * 1024
    return min(64 * 1024 * 1024, (cap * 3) // 4)


def _pick_batch_tile(batch, vmem_limit):
    # TB=128 -> M = 2*TB = 256 rows: fills the 256-deep MXU (v6e/v7x) and is a
    # multiple of 128 for v5e's 4x128x128 MXU.  Scale down only if VMEM is tiny.
    if vmem_limit >= 40 * 1024 * 1024:
        max_tb = 128
    elif vmem_limit >= 24 * 1024 * 1024:
        max_tb = 64
    else:
        max_tb = 16
    ncores = _num_tensorcores()
    if batch >= ncores * max_tb:
        return max_tb
    # Small batch: single grid step on 1-TC chips (v5e/v6e); split across at
    # most `ncores` steps on 2-TC chips so both cores get work.
    return max(1, min(-(-batch // ncores), max_tb))


# ----------------------------------------------------------------------------
# Device-side forward (jitted): builds the tiny per-series LHS and calls the kernel.
# ----------------------------------------------------------------------------
def _const_spec(shape, single_buffer):
    """BlockSpec for a weight/bias whose block never changes across the grid."""
    idx = lambda i: (0,) * len(shape)
    if single_buffer:
        # Constant-index blocks don't need double buffering: reclaim the VMEM.
        return pl.BlockSpec(shape, idx, pipeline_mode=pl.Buffered(1))
    return pl.BlockSpec(shape, idx)


@functools.partial(jax.jit, static_argnums=(2, 3, 4))
def _device_forward(sr, packed, tb, single_buffer, vmem_limit):
    B, L = sr.shape
    num_tiles = -(-B // tb)
    Bp = num_tiles * tb
    sr = jnp.pad(sr, ((0, Bp - B), (0, 0)))

    # Conv1d padding=64 on both sides (plus a couple of extra zeros on the right
    # so the fixed-width S=192 window slices never run out of range).
    right = 64 + max(0, (S + 2) - (L + 128))
    xp = jnp.pad(sr, ((0, 0), (64, right)))                  # (Bp, >= 194)

    # Per series, only two S-wide slices are needed (conv2 positions p=0 / p=1).
    x0 = xp[:, 0:S]
    x1 = xp[:, 2:2 + S]
    lhs = jnp.stack([x0, x1], axis=1)                        # (Bp, 2, S) [b, p, s]
    lhs = (lhs.reshape(num_tiles, tb, 2, S)
               .transpose(0, 2, 1, 3)
               .reshape(num_tiles, 2 * tb, S)
               .astype(jnp.bfloat16))

    out = pl.pallas_call(
        srcnn_fused_kernel,
        out_shape=jax.ShapeDtypeStruct((num_tiles, tb, 128), jnp.float32),
        grid=(num_tiles,),
        in_specs=[
            pl.BlockSpec((1, 2 * tb, S), lambda i: (i, 0, 0)),   # per-tile LHS
            _const_spec((S, KC), single_buffer),                 # conv1 W (even)
            _const_spec((S, KC), single_buffer),                 # conv1 W (odd)
            _const_spec((1, KC), single_buffer),                 # conv1 bias (tiled)
            _const_spec((KC, 128), single_buffer),               # conv2 W
            _const_spec((1, 128), single_buffer),                # conv2 bias
            _const_spec((128, 128), single_buffer),              # fc1 W
            _const_spec((1, 128), single_buffer),                # fc1 b
            _const_spec((128, 128), single_buffer),              # fc2 W
            _const_spec((1, 128), single_buffer),                # fc2 b
        ],
        out_specs=pl.BlockSpec((1, tb, 128), lambda i: (i, 0, 0)),
        compiler_params=pltpu.CompilerParams(
            dimension_semantics=("parallel",),
            vmem_limit_bytes=vmem_limit,
        ),
    )(lhs, packed["w1e"], packed["w1o"], packed["b1t"], packed["w2"],
      packed["b2"], packed["wc1"], packed["bc1"], packed["wc2"], packed["bc2"])

    out = out.reshape(Bp, 128)
    return out[:B, :NCLS]


# ----------------------------------------------------------------------------
# Full forward (host SR preprocessing + fused device kernel).
# ----------------------------------------------------------------------------
_SINGLE_BUFFER_OK = None   # memoized: does this Pallas accept pl.Buffered(1)?


def base_lstm_forward(x, packed):
    global _SINGLE_BUFFER_OK
    B, L, _ = x.shape
    if not (65 <= L <= 68):
        raise ValueError("BaseLSTM forward is only well-posed for L in [65, 68]")

    # inputs.squeeze(-1) + 1e-5, then the per-series spectral-residual score on
    # the host — exactly the .cpu().numpy() path of the original torch module.
    x_np = np.asarray(x, dtype=np.float32)[:, :, 0] + np.float32(1e-5)
    sr = np.stack([generate_anomaly_score(row) for row in x_np], axis=0)
    sr = jnp.asarray(sr, dtype=jnp.float32)                  # (B, L)

    vmem_limit = _vmem_limit_bytes()
    tb = _pick_batch_tile(B, vmem_limit)

    if _SINGLE_BUFFER_OK is None:
        try:
            out = _device_forward(sr, packed, tb, True, vmem_limit)
            _SINGLE_BUFFER_OK = True
            return out
        except Exception:
            # pipeline_mode=pl.Buffered(1) not supported here: use default buffering.
            _SINGLE_BUFFER_OK = False
    return _device_forward(sr, packed, tb, bool(_SINGLE_BUFFER_OK), vmem_limit)


if __name__ == "__main__":
    # L must make the final conv/pool length equal 1 (module constraint): L=66.
    B, L = 2, 66
    key = jax.random.PRNGKey(0)
    k_x, k_p = jax.random.split(key)
    x = jax.random.normal(k_x, (B, L, 1), dtype=jnp.float32)

    params = pack_params(init_torch_params(k_p))
    out = base_lstm_forward(x, params)
    out = jax.block_until_ready(out)

    assert out.shape == (B, NCLS)
    assert bool(jnp.all(jnp.isfinite(out)))
    assert bool(jnp.all((out >= 0.0) & (out <= 1.0)))
    print("KERNEL_OK")
</pallas_src>

<mosaic_0001>
module attributes {stable_mosaic.version = 11 : i64} {
  func.func @srcnn_fused_kernel(%arg0: i32, %arg1: memref<1x4x192xbf16, #tpu.memory_space<vmem>>, %arg2: memref<192x4096xbf16, #tpu.memory_space<vmem>>, %arg3: memref<192x4096xbf16, #tpu.memory_space<vmem>>, %arg4: memref<1x4096xf32, #tpu.memory_space<vmem>>, %arg5: memref<4096x128xbf16, #tpu.memory_space<vmem>>, %arg6: memref<1x128xf32, #tpu.memory_space<vmem>>, %arg7: memref<128x128xbf16, #tpu.memory_space<vmem>>, %arg8: memref<1x128xf32, #tpu.memory_space<vmem>>, %arg9: memref<128x128xbf16, #tpu.memory_space<vmem>>, %arg10: memref<1x128xf32, #tpu.memory_space<vmem>>, %arg11: memref<1x2x128xf32, #tpu.memory_space<vmem>>) attributes {dimension_semantics = [#tpu.dimension_semantics<parallel>], iteration_bounds = array<i64: 1>, scalar_prefetch = 0 : i64, scratch_operands = 0 : i64, tpu.core_type = #tpu.core_type<tc>, window_params = [{transform_indices = @transform_0, window_bounds = array<i64: 1, 4, 192>}, {pipeline_mode = #tpu.pipeline_mode<synchronous>, transform_indices = @transform_1, window_bounds = array<i64: 192, 4096>}, {pipeline_mode = #tpu.pipeline_mode<synchronous>, transform_indices = @transform_2, window_bounds = array<i64: 192, 4096>}, {pipeline_mode = #tpu.pipeline_mode<synchronous>, transform_indices = @transform_3, window_bounds = array<i64: 1, 4096>}, {pipeline_mode = #tpu.pipeline_mode<synchronous>, transform_indices = @transform_4, window_bounds = array<i64: 4096, 128>}, {pipeline_mode = #tpu.pipeline_mode<synchronous>, transform_indices = @transform_5, window_bounds = array<i64: 1, 128>}, {pipeline_mode = #tpu.pipeline_mode<synchronous>, transform_indices = @transform_6, window_bounds = array<i64: 128, 128>}, {pipeline_mode = #tpu.pipeline_mode<synchronous>, transform_indices = @transform_7, window_bounds = array<i64: 1, 128>}, {pipeline_mode = #tpu.pipeline_mode<synchronous>, transform_indices = @transform_8, window_bounds = array<i64: 128, 128>}, {pipeline_mode = #tpu.pipeline_mode<synchronous>, transform_indices = @transform_9, window_bounds = array<i64: 1, 128>}, {transform_indices = @transform_10, window_bounds = array<i64: 1, 2, 128>}]} {
    %c0 = arith.constant 0 : index
    %c0_0 = arith.constant 0 : index
    %c0_1 = arith.constant 0 : index
    %0 = vector.load %arg1[%c0, %c0_0, %c0_1] : memref<1x4x192xbf16, #tpu.memory_space<vmem>>, vector<1x4x192xbf16>
    %1 = vector.shape_cast %0 : vector<1x4x192xbf16> to vector<4x192xbf16>
    %c0_2 = arith.constant 0 : index
    %c0_3 = arith.constant 0 : index
    %2 = vector.load %arg2[%c0_2, %c0_3] : memref<192x4096xbf16, #tpu.memory_space<vmem>>, vector<192x4096xbf16>
    %cst = arith.constant dense<0.000000e+00> : vector<4x4096xf32>
    %3 = tpu.matmul %1, %2, %cst {dimension_numbers = #tpu.dot_dimension_numbers<[1], [0], [0], [1], [0, 0, 1, 1], [], []>} : vector<4x192xbf16>, vector<192x4096xbf16>, vector<4x4096xf32> -> vector<4x4096xf32>
    %c0_4 = arith.constant 0 : index
    %c0_5 = arith.constant 0 : index
    %4 = vector.load %arg3[%c0_4, %c0_5] : memref<192x4096xbf16, #tpu.memory_space<vmem>>, vector<192x4096xbf16>
    %cst_6 = arith.constant dense<0.000000e+00> : vector<4x4096xf32>
    %5 = tpu.matmul %1, %4, %cst_6 {dimension_numbers = #tpu.dot_dimension_numbers<[1], [0], [0], [1], [0, 0, 1, 1], [], []>} : vector<4x192xbf16>, vector<192x4096xbf16>, vector<4x4096xf32> -> vector<4x4096xf32>
    %6 = arith.maximumf %3, %5 : vector<4x4096xf32>
    %c0_7 = arith.constant 0 : index
    %c0_8 = arith.constant 0 : index
    %7 = vector.load %arg4[%c0_7, %c0_8] : memref<1x4096xf32, #tpu.memory_space<vmem>>, vector<1x4096xf32>
    %8 = vector.broadcast %7 : vector<1x4096xf32> to vector<4x4096xf32>
    %9 = arith.addf %6, %8 : vector<4x4096xf32>
    %10 = arith.truncf %9 : vector<4x4096xf32> to vector<4x4096xbf16>
    %c0_9 = arith.constant 0 : index
    %c0_10 = arith.constant 0 : index
    %11 = vector.load %arg5[%c0_9, %c0_10] : memref<4096x128xbf16, #tpu.memory_space<vmem>>, vector<4096x128xbf16>
    %cst_11 = arith.constant dense<0.000000e+00> : vector<4x128xf32>
    %12 = tpu.matmul %10, %11, %cst_11 {dimension_numbers = #tpu.dot_dimension_numbers<[1], [0], [0], [1], [0, 0, 1, 1], [], []>} : vector<4x4096xbf16>, vector<4096x128xbf16>, vector<4x128xf32> -> vector<4x128xf32>
    %13 = vector.extract_strided_slice %12 {offsets = [0, 0], sizes = [2, 128], strides = [1, 1]} : vector<4x128xf32> to vector<2x128xf32>
    %14 = vector.extract_strided_slice %12 {offsets = [2, 0], sizes = [2, 128], strides = [1, 1]} : vector<4x128xf32> to vector<2x128xf32>
    %15 = arith.maximumf %13, %14 : vector<2x128xf32>
    %c0_12 = arith.constant 0 : index
    %c0_13 = arith.constant 0 : index
    %16 = vector.load %arg6[%c0_12, %c0_13] : memref<1x128xf32, #tpu.memory_space<vmem>>, vector<1x128xf32>
    %17 = vector.broadcast %16 : vector<1x128xf32> to vector<2x128xf32>
    %18 = arith.addf %15, %17 : vector<2x128xf32>
    %19 = arith.truncf %18 : vector<2x128xf32> to vector<2x128xbf16>
    %c0_14 = arith.constant 0 : index
    %c0_15 = arith.constant 0 : index
    %20 = vector.load %arg7[%c0_14, %c0_15] : memref<128x128xbf16, #tpu.memory_space<vmem>>, vector<128x128xbf16>
    %cst_16 = arith.constant dense<0.000000e+00> : vector<2x128xf32>
    %21 = tpu.matmul %19, %20, %cst_16 {dimension_numbers = #tpu.dot_dimension_numbers<[1], [0], [0], [1], [0, 0, 1, 1], [], []>} : vector<2x128xbf16>, vector<128x128xbf16>, vector<2x128xf32> -> vector<2x128xf32>
    %c0_17 = arith.constant 0 : index
    %c0_18 = arith.constant 0 : index
    %22 = vector.load %arg8[%c0_17, %c0_18] : memref<1x128xf32, #tpu.memory_space<vmem>>, vector<1x128xf32>
    %23 = vector.broadcast %22 : vector<1x128xf32> to vector<2x128xf32>
    %24 = arith.addf %21, %23 : vector<2x128xf32>
    %25 = math.tanh %24 : vector<2x128xf32>
    %26 = arith.truncf %25 : vector<2x128xf32> to vector<2x128xbf16>
    %c0_19 = arith.constant 0 : index
    %c0_20 = arith.constant 0 : index
    %27 = vector.load %arg9[%c0_19, %c0_20] : memref<128x128xbf16, #tpu.memory_space<vmem>>, vector<128x128xbf16>
    %cst_21 = arith.constant dense<0.000000e+00> : vector<2x128xf32>
    %28 = tpu.matmul %26, %27, %cst_21 {dimension_numbers = #tpu.dot_dimension_numbers<[1], [0], [0], [1], [0, 0, 1, 1], [], []>} : vector<2x128xbf16>, vector<128x128xbf16>, vector<2x128xf32> -> vector<2x128xf32>
    %c0_22 = arith.constant 0 : index
    %c0_23 = arith.constant 0 : index
    %29 = vector.load %arg10[%c0_22, %c0_23] : memref<1x128xf32, #tpu.memory_space<vmem>>, vector<1x128xf32>
    %30 = vector.broadcast %29 : vector<1x128xf32> to vector<2x128xf32>
    %31 = arith.addf %28, %30 : vector<2x128xf32>
    %32 = arith.negf %31 : vector<2x128xf32>
    %33 = math.exp %32 : vector<2x128xf32>
    %cst_24 = arith.constant 1.000000e+00 : f32
    %34 = vector.broadcast %cst_24 : f32 to vector<2x128xf32>
    %35 = arith.addf %34, %33 : vector<2x128xf32>
    %36 = arith.divf %34, %35 : vector<2x128xf32>
    %c0_25 = arith.constant 0 : index
    %c0_26 = arith.constant 0 : index
    %c0_27 = arith.constant 0 : index
    %37 = vector.load %arg11[%c0_25, %c0_26, %c0_27] : memref<1x2x128xf32, #tpu.memory_space<vmem>>, vector<1x2x128xf32>
    %38 = vector.shape_cast %37 : vector<1x2x128xf32> to vector<2x128xf32>
    %39 = vector.shape_cast %36 : vector<2x128xf32> to vector<1x2x128xf32>
    tpu.vector_store %arg11[%c0_25, %c0_26, %c0_27], %39 {strides = array<i32>} : memref<1x2x128xf32, #tpu.memory_space<vmem>>, vector<1x2x128xf32>,
    return
  }
  func.func @transform_0(%arg0: i32) -> (i32, i32, i32) {
    %c0_i32 = arith.constant 0 : i32
    %c0_i32_0 = arith.constant 0 : i32
    %c0_i32_1 = arith.constant 0 : i32
    return %arg0, %c0_i32, %c0_i32_0 : i32, i32, i32
  }
  func.func @transform_1(%arg0: i32) -> (i32, i32) {
    %c0_i32 = arith.constant 0 : i32
    %c0_i32_0 = arith.constant 0 : i32
    %c0_i32_1 = arith.constant 0 : i32
    return %c0_i32, %c0_i32_0 : i32, i32
  }
  func.func @transform_2(%arg0: i32) -> (i32, i32) {
    %c0_i32 = arith.constant 0 : i32
    %c0_i32_0 = arith.constant 0 : i32
    %c0_i32_1 = arith.constant 0 : i32
    return %c0_i32, %c0_i32_0 : i32, i32
  }
  func.func @transform_3(%arg0: i32) -> (i32, i32) {
    %c0_i32 = arith.constant 0 : i32
    %c0_i32_0 = arith.constant 0 : i32
    %c0_i32_1 = arith.constant 0 : i32
    return %c0_i32, %c0_i32_0 : i32, i32
  }
  func.func @transform_4(%arg0: i32) -> (i32, i32) {
    %c0_i32 = arith.constant 0 : i32
    %c0_i32_0 = arith.constant 0 : i32
    %c0_i32_1 = arith.constant 0 : i32
    return %c0_i32, %c0_i32_0 : i32, i32
  }
  func.func @transform_5(%arg0: i32) -> (i32, i32) {
    %c0_i32 = arith.constant 0 : i32
    %c0_i32_0 = arith.constant 0 : i32
    %c0_i32_1 = arith.constant 0 : i32
    return %c0_i32, %c0_i32_0 : i32, i32
  }
  func.func @transform_6(%arg0: i32) -> (i32, i32) {
    %c0_i32 = arith.constant 0 : i32
    %c0_i32_0 = arith.constant 0 : i32
    %c0_i32_1 = arith.constant 0 : i32
    return %c0_i32, %c0_i32_0 : i32, i32
  }
  func.func @transform_7(%arg0: i32) -> (i32, i32) {
    %c0_i32 = arith.constant 0 : i32
    %c0_i32_0 = arith.constant 0 : i32
    %c0_i32_1 = arith.constant 0 : i32
    return %c0_i32, %c0_i32_0 : i32, i32
  }
  func.func @transform_8(%arg0: i32) -> (i32, i32) {
    %c0_i32 = arith.constant 0 : i32
    %c0_i32_0 = arith.constant 0 : i32
    %c0_i32_1 = arith.constant 0 : i32
    return %c0_i32, %c0_i32_0 : i32, i32
  }
  func.func @transform_9(%arg0: i32) -> (i32, i32) {
    %c0_i32 = arith.constant 0 : i32
    %c0_i32_0 = arith.constant 0 : i32
    %c0_i32_1 = arith.constant 0 : i32
    return %c0_i32, %c0_i32_0 : i32, i32
  }
  func.func @transform_10(%arg0: i32) -> (i32, i32, i32) {
    %c0_i32 = arith.constant 0 : i32
    %c0_i32_0 = arith.constant 0 : i32
    %c0_i32_1 = arith.constant 0 : i32
    return %arg0, %c0_i32, %c0_i32_0 : i32, i32, i32
  }
}

module attributes {stable_mosaic.version = 11 : i64} {
  func.func @srcnn_fused_kernel(%arg0: i32, %arg1: memref<1x4x192xbf16, #tpu.memory_space<vmem>>, %arg2: memref<192x4096xbf16, #tpu.memory_space<vmem>>, %arg3: memref<192x4096xbf16, #tpu.memory_space<vmem>>, %arg4: memref<1x4096xf32, #tpu.memory_space<vmem>>, %arg5: memref<4096x128xbf16, #tpu.memory_space<vmem>>, %arg6: memref<1x128xf32, #tpu.memory_space<vmem>>, %arg7: memref<128x128xbf16, #tpu.memory_space<vmem>>, %arg8: memref<1x128xf32, #tpu.memory_space<vmem>>, %arg9: memref<128x128xbf16, #tpu.memory_space<vmem>>, %arg10: memref<1x128xf32, #tpu.memory_space<vmem>>, %arg11: memref<1x2x128xf32, #tpu.memory_space<vmem>>) attributes {dimension_semantics = [#tpu.dimension_semantics<parallel>], iteration_bounds = array<i64: 1>, scalar_prefetch = 0 : i64, scratch_operands = 0 : i64, tpu.core_type = #tpu.core_type<tc>, window_params = [{transform_indices = @transform_0, window_bounds = array<i64: 1, 4, 192>}, {pipeline_mode = #tpu.pipeline_mode<synchronous>, transform_indices = @transform_1, window_bounds = array<i64: 192, 4096>}, {pipeline_mode = #tpu.pipeline_mode<synchronous>, transform_indices = @transform_2, window_bounds = array<i64: 192, 4096>}, {pipeline_mode = #tpu.pipeline_mode<synchronous>, transform_indices = @transform_3, window_bounds = array<i64: 1, 4096>}, {pipeline_mode = #tpu.pipeline_mode<synchronous>, transform_indices = @transform_4, window_bounds = array<i64: 4096, 128>}, {pipeline_mode = #tpu.pipeline_mode<synchronous>, transform_indices = @transform_5, window_bounds = array<i64: 1, 128>}, {pipeline_mode = #tpu.pipeline_mode<synchronous>, transform_indices = @transform_6, window_bounds = array<i64: 128, 128>}, {pipeline_mode = #tpu.pipeline_mode<synchronous>, transform_indices = @transform_7, window_bounds = array<i64: 1, 128>}, {pipeline_mode = #tpu.pipeline_mode<synchronous>, transform_indices = @transform_8, window_bounds = array<i64: 128, 128>}, {pipeline_mode = #tpu.pipeline_mode<synchronous>, transform_indices = @transform_9, window_bounds = array<i64: 1, 128>}, {transform_indices = @transform_10, window_bounds = array<i64: 1, 2, 128>}]} {
    %c0 = arith.constant 0 : index
    %c0_0 = arith.constant 0 : index
    %c0_1 = arith.constant 0 : index
    %0 = vector.load %arg1[%c0, %c0_0, %c0_1] : memref<1x4x192xbf16, #tpu.memory_space<vmem>>, vector<1x4x192xbf16>
    %1 = vector.shape_cast %0 : vector<1x4x192xbf16> to vector<4x192xbf16>
    %c0_2 = arith.constant 0 : index
    %c0_3 = arith.constant 0 : index
    %2 = vector.load %arg2[%c0_2, %c0_3] : memref<192x4096xbf16, #tpu.memory_space<vmem>>, vector<192x4096xbf16>
    %cst = arith.constant dense<0.000000e+00> : vector<4x4096xf32>
    %3 = tpu.matmul %1, %2, %cst {dimension_numbers = #tpu.dot_dimension_numbers<[1], [0], [0], [1], [0, 0, 1, 1], [], []>} : vector<4x192xbf16>, vector<192x4096xbf16>, vector<4x4096xf32> -> vector<4x4096xf32>
    %c0_4 = arith.constant 0 : index
    %c0_5 = arith.constant 0 : index
    %4 = vector.load %arg3[%c0_4, %c0_5] : memref<192x4096xbf16, #tpu.memory_space<vmem>>, vector<192x4096xbf16>
    %cst_6 = arith.constant dense<0.000000e+00> : vector<4x4096xf32>
    %5 = tpu.matmul %1, %4, %cst_6 {dimension_numbers = #tpu.dot_dimension_numbers<[1], [0], [0], [1], [0, 0, 1, 1], [], []>} : vector<4x192xbf16>, vector<192x4096xbf16>, vector<4x4096xf32> -> vector<4x4096xf32>
    %6 = arith.maximumf %3, %5 : vector<4x4096xf32>
    %c0_7 = arith.constant 0 : index
    %c0_8 = arith.constant 0 : index
    %7 = vector.load %arg4[%c0_7, %c0_8] : memref<1x4096xf32, #tpu.memory_space<vmem>>, vector<1x4096xf32>
    %8 = vector.broadcast %7 : vector<1x4096xf32> to vector<4x4096xf32>
    %9 = arith.addf %6, %8 : vector<4x4096xf32>
    %10 = arith.truncf %9 : vector<4x4096xf32> to vector<4x4096xbf16>
    %c0_9 = arith.constant 0 : index
    %c0_10 = arith.constant 0 : index
    %11 = vector.load %arg5[%c0_9, %c0_10] : memref<4096x128xbf16, #tpu.memory_space<vmem>>, vector<4096x128xbf16>
    %cst_11 = arith.constant dense<0.000000e+00> : vector<4x128xf32>
    %12 = tpu.matmul %10, %11, %cst_11 {dimension_numbers = #tpu.dot_dimension_numbers<[1], [0], [0], [1], [0, 0, 1, 1], [], []>} : vector<4x4096xbf16>, vector<4096x128xbf16>, vector<4x128xf32> -> vector<4x128xf32>
    %13 = vector.extract_strided_slice %12 {offsets = [0, 0], sizes = [2, 128], strides = [1, 1]} : vector<4x128xf32> to vector<2x128xf32>
    %14 = vector.extract_strided_slice %12 {offsets = [2, 0], sizes = [2, 128], strides = [1, 1]} : vector<4x128xf32> to vector<2x128xf32>
    %15 = arith.maximumf %13, %14 : vector<2x128xf32>
    %c0_12 = arith.constant 0 : index
    %c0_13 = arith.constant 0 : index
    %16 = vector.load %arg6[%c0_12, %c0_13] : memref<1x128xf32, #tpu.memory_space<vmem>>, vector<1x128xf32>
    %17 = vector.broadcast %16 : vector<1x128xf32> to vector<2x128xf32>
    %18 = arith.addf %15, %17 : vector<2x128xf32>
    %19 = arith.truncf %18 : vector<2x128xf32> to vector<2x128xbf16>
    %c0_14 = arith.constant 0 : index
    %c0_15 = arith.constant 0 : index
    %20 = vector.load %arg7[%c0_14, %c0_15] : memref<128x128xbf16, #tpu.memory_space<vmem>>, vector<128x128xbf16>
    %cst_16 = arith.constant dense<0.000000e+00> : vector<2x128xf32>
    %21 = tpu.matmul %19, %20, %cst_16 {dimension_numbers = #tpu.dot_dimension_numbers<[1], [0], [0], [1], [0, 0, 1, 1], [], []>} : vector<2x128xbf16>, vector<128x128xbf16>, vector<2x128xf32> -> vector<2x128xf32>
    %c0_17 = arith.constant 0 : index
    %c0_18 = arith.constant 0 : index
    %22 = vector.load %arg8[%c0_17, %c0_18] : memref<1x128xf32, #tpu.memory_space<vmem>>, vector<1x128xf32>
    %23 = vector.broadcast %22 : vector<1x128xf32> to vector<2x128xf32>
    %24 = arith.addf %21, %23 : vector<2x128xf32>
    %25 = math.tanh %24 : vector<2x128xf32>
    %26 = arith.truncf %25 : vector<2x128xf32> to vector<2x128xbf16>
    %c0_19 = arith.constant 0 : index
    %c0_20 = arith.constant 0 : index
    %27 = vector.load %arg9[%c0_19, %c0_20] : memref<128x128xbf16, #tpu.memory_space<vmem>>, vector<128x128xbf16>
    %cst_21 = arith.constant dense<0.000000e+00> : vector<2x128xf32>
    %28 = tpu.matmul %26, %27, %cst_21 {dimension_numbers = #tpu.dot_dimension_numbers<[1], [0], [0], [1], [0, 0, 1, 1], [], []>} : vector<2x128xbf16>, vector<128x128xbf16>, vector<2x128xf32> -> vector<2x128xf32>
    %c0_22 = arith.constant 0 : index
    %c0_23 = arith.constant 0 : index
    %29 = vector.load %arg10[%c0_22, %c0_23] : memref<1x128xf32, #tpu.memory_space<vmem>>, vector<1x128xf32>
    %30 = vector.broadcast %29 : vector<1x128xf32> to vector<2x128xf32>
    %31 = arith.addf %28, %30 : vector<2x128xf32>
    %32 = arith.negf %31 : vector<2x128xf32>
    %33 = math.exp %32 : vector<2x128xf32>
    %cst_24 = arith.constant 1.000000e+00 : f32
    %34 = vector.broadcast %cst_24 : f32 to vector<2x128xf32>
    %35 = arith.addf %34, %33 : vector<2x128xf32>
    %36 = arith.divf %34, %35 : vector<2x128xf32>
    %c0_25 = arith.constant 0 : index
    %c0_26 = arith.constant 0 : index
    %c0_27 = arith.constant 0 : index
    %37 = vector.load %arg11[%c0_25, %c0_26, %c0_27] : memref<1x2x128xf32, #tpu.memory_space<vmem>>, vector<1x2x128xf32>
    %38 = vector.shape_cast %37 : vector<1x2x128xf32> to vector<2x128xf32>
    %39 = vector.shape_cast %36 : vector<2x128xf32> to vector<1x2x128xf32>
    tpu.vector_store %arg11[%c0_25, %c0_26, %c0_27], %39 {strides = array<i32>} : memref<1x2x128xf32, #tpu.memory_space<vmem>>, vector<1x2x128xf32>,
    return
  }
  func.func @transform_0(%arg0: i32) -> (i32, i32, i32) {
    %c0_i32 = arith.constant 0 : i32
    %c0_i32_0 = arith.constant 0 : i32
    %c0_i32_1 = arith.constant 0 : i32
    return %arg0, %c0_i32, %c0_i32_0 : i32, i32, i32
  }
  func.func @transform_1(%arg0: i32) -> (i32, i32) {
    %c0_i32 = arith.constant 0 : i32
    %c0_i32_0 = arith.constant 0 : i32
    %c0_i32_1 = arith.constant 0 : i32
    return %c0_i32, %c0_i32_0 : i32, i32
  }
  func.func @transform_2(%arg0: i32) -> (i32, i32) {
    %c0_i32 = arith.constant 0 : i32
    %c0_i32_0 = arith.constant 0 : i32
    %c0_i32_1 = arith.constant 0 : i32
    return %c0_i32, %c0_i32_0 : i32, i32
  }
  func.func @transform_3(%arg0: i32) -> (i32, i32) {
    %c0_i32 = arith.constant 0 : i32
    %c0_i32_0 = arith.constant 0 : i32
    %c0_i32_1 = arith.constant 0 : i32
    return %c0_i32, %c0_i32_0 : i32, i32
  }
  func.func @transform_4(%arg0: i32) -> (i32, i32) {
    %c0_i32 = arith.constant 0 : i32
    %c0_i32_0 = arith.constant 0 : i32
    %c0_i32_1 = arith.constant 0 : i32
    return %c0_i32, %c0_i32_0 : i32, i32
  }
  func.func @transform_5(%arg0: i32) -> (i32, i32) {
    %c0_i32 = arith.constant 0 : i32
    %c0_i32_0 = arith.constant 0 : i32
    %c0_i32_1 = arith.constant 0 : i32
    return %c0_i32, %c0_i32_0 : i32, i32
  }
  func.func @transform_6(%arg0: i32) -> (i32, i32) {
    %c0_i32 = arith.constant 0 : i32
    %c0_i32_0 = arith.constant 0 : i32
    %c0_i32_1 = arith.constant 0 : i32
    return %c0_i32, %c0_i32_0 : i32, i32
  }
  func.func @transform_7(%arg0: i32) -> (i32, i32) {
    %c0_i32 = arith.constant 0 : i32
    %c0_i32_0 = arith.constant 0 : i32
    %c0_i32_1 = arith.constant 0 : i32
    return %c0_i32, %c0_i32_0 : i32, i32
  }
  func.func @transform_8(%arg0: i32) -> (i32, i32) {
    %c0_i32 = arith.constant 0 : i32
    %c0_i32_0 = arith.constant 0 : i32
    %c0_i32_1 = arith.constant 0 : i32
    return %c0_i32, %c0_i32_0 : i32, i32
  }
  func.func @transform_9(%arg0: i32) -> (i32, i32) {
    %c0_i32 = arith.constant 0 : i32
    %c0_i32_0 = arith.constant 0 : i32
    %c0_i32_1 = arith.constant 0 : i32
    return %c0_i32, %c0_i32_0 : i32, i32
  }
  func.func @transform_10(%arg0: i32) -> (i32, i32, i32) {
    %c0_i32 = arith.constant 0 : i32
    %c0_i32_0 = arith.constant 0 : i32
    %c0_i32_1 = arith.constant 0 : i32
    return %arg0, %c0_i32, %c0_i32_0 : i32, i32, i32
  }
}

</mosaic_0001>

<bundles_post_ra>
// kernel: _device_forward.1
= control target key start
LH: loop header
LB: loop body
LE: loop exit
PB: predicated region body
PF: predicated region fallthrough
CT: control target
= control target key end

     0   :  { %15 = vsyncpa [#allocation3], 0  ;;  %s12049_s0 = inlined_call_operand.vmem [shape: bf16[1,4,192], index: 0, kind: input, shape index: {}]   ;;  %s12050_s1 = inlined_call_operand.hbm [shape: bf16[192,4096], index: 1, kind: input, shape index: {}]   ;;  %s12051_s2 = inlined_call_operand.hbm [shape: bf16[192,4096], index: 2, kind: input, shape index: {}]   ;;  %s12052_s3 = inlined_call_operand.hbm [shape: f32[1,4096], index: 3, kind: input, shape index: {}]   ;;  %s12053_s4 = inlined_call_operand.hbm [shape: bf16[4096,128], index: 4, kind: input, shape index: {}]   ;;  %s12054_s5 = inlined_call_operand.hbm [shape: f32[1,128], index: 5, kind: input, shape index: {}]   ;;  %s12055_s6 = inlined_call_operand.hbm [shape: bf16[128,128], index: 6, kind: input, shape index: {}]   ;;  %s12056_s7 = inlined_call_operand.hbm [shape: f32[1,128], index: 7, kind: input, shape index: {}]   ;;  %s12057_s8 = inlined_call_operand.hbm [shape: bf16[128,128], index: 8, kind: input, shape index: {}]   ;;  %s12058_s9 = inlined_call_operand.hbm [shape: f32[1,128], index: 9, kind: input, shape index: {}]   ;;  %s12059_s10 = inlined_call_operand.hbm [shape: f32[1,2,128], index: 10, kind: output, shape index: {}]  }
   0x1   :  { %16 = vsyncpa [#allocation6], 0 }
   0x2   :  { %17 = vsyncpa [#allocation9], 0 }
   0x3   :  { %18 = vsyncpa [#allocation12], 0 }
   0x4   :  { %19 = vsyncpa [#allocation15], 0 }
   0x5   :  { %20 = vsyncpa [#allocation4], 0  ;;  %s11318_s13 = smov [#allocation5]   ;;  %s11319_s15 = smov [#allocation8]  }
   0x6   :  { %s40_s14 = sshll.u32 %s11318_s13, 4  ;;  %s62_s16 = sshll.u32 %s11319_s15, 4  ;;  %s41_s14 = int_to_ptr.vmem [resolvable:$true] %s40_s14  ;;  %s11389_s16 = int_to_ptr.vmem [resolvable:$true] %s62_s16 }
   0x7   :  { %s11086_s19 = scalar_lea.hbm %s12051_s2, 49152 }
   0x8   :  { %p11087_p0 = scmp.ne.s32.totalorder %s12051_s2, %s11086_s19  ;;  %p11090_p1 = scmp.lt.u32.totalorder %s11086_s19, %s12051_s2 }
   0xa   :  { %p11092_p2 = pnand %p11090_p1, %p11087_p0 }
   0xc   :  { %11095 = shalt.err (!%p11092_p2)
}
   0xd   :  { %s11096_s24 = scalar_lea.vmem %s41_s14, 49152  ;;  %p11101_p4 = scmp.lt.s32.totalorder %s41_s14, %s41_s14 }
   0xe   :  { %p11097_p3 = scmp.ne.s32.totalorder %s41_s14, %s11096_s24  ;;  %p11102_p5 = scmp.lt.s32.totalorder %s11096_s24, %s11096_s24 }
  0x10   :  { %p11103_p6 = por %p11102_p5, %p11101_p4 }
  0x12   :  { %p11104_p7 = pnand %p11103_p6, %p11097_p3 }
  0x14   :  { %11107 = shalt.err (!%p11104_p7)
}
  0x15   :  { %s11320_s25 = smov 2048   ;;  %s11321_s26 = smov 128  }
  0x16   :  { %46 = dma.hbm_to_vmem [thread:$0]  %s12051_s2, 49152, %s41_s14, [#allocation6], %s11320_s25, %s11320_s25, %s11321_s26  }
  0x17   :  { %s11108_s11 = scalar_lea.hbm %s12053_s4, 32768 }
  0x18   :  { %p11109_p8 = scmp.ne.s32.totalorder %s12053_s4, %s11108_s11  ;;  %p11112_p9 = scmp.lt.u32.totalorder %s11108_s11, %s12053_s4 }
  0x1a   :  { %p11114_p10 = pnand %p11112_p9, %p11109_p8 }
  0x1c   :  { %11117 = shalt.err (!%p11114_p10)
}
  0x1d   :  { %s11118_s18 = scalar_lea.vmem %s11389_s16, 32768  ;;  %p11123_p12 = scmp.lt.s32.totalorder %s11389_s16, %s11389_s16 }
  0x1e   :  { %p11119_p11 = scmp.ne.s32.totalorder %s11389_s16, %s11118_s18  ;;  %p11124_p13 = scmp.lt.s32.totalorder %s11118_s18, %s11118_s18 }
  0x20   :  { %p11125_p0 = por %p11124_p13, %p11123_p12 }
  0x22   :  { %p11126_p1 = pnand %p11125_p0, %p11119_p11 }
  0x24   :  { %11129 = shalt.err (!%p11126_p1)
}
  0x25   :  { %s11322_s2 = smov 64   ;;  %s11323_s14 = smov 4  }
  0x26   :  { %68 = dma.hbm_to_vmem [thread:$0]  %s12053_s4, 32768, %s11389_s16, [#allocation9], %s11322_s2, %s11322_s2, %s11323_s14  }
  0x27   :  { %s11324_s21 = smov [#allocation11]   ;;  %s11325_s23 = smov [#allocation14]  }
  0x28   :  { %s84_s22 = sshll.u32 %s11324_s21, 4  ;;  %s106_s24 = sshll.u32 %s11325_s23, 4  ;;  %s85_s22 = int_to_ptr.vmem [resolvable:$true] %s84_s22  ;;  %s11426_s24 = int_to_ptr.vmem [resolvable:$true] %s106_s24 }
  0x29   :  { %s11130_s29 = scalar_lea.hbm %s12055_s6, 1024 }
  0x2a   :  { %p11131_p2 = scmp.ne.s32.totalorder %s12055_s6, %s11130_s29  ;;  %p11134_p3 = scmp.lt.u32.totalorder %s11130_s29, %s12055_s6 }
  0x2c   :  { %p11136_p4 = pnand %p11134_p3, %p11131_p2 }
  0x2e   :  { %11139 = shalt.err (!%p11136_p4)
}
  0x2f   :  { %s11140_s4 = scalar_lea.vmem %s85_s22, 1024  ;;  %p11145_p6 = scmp.lt.s32.totalorder %s85_s22, %s85_s22 }
  0x30   :  { %p11141_p5 = scmp.ne.s32.totalorder %s85_s22, %s11140_s4  ;;  %p11146_p7 = scmp.lt.s32.totalorder %s11140_s4, %s11140_s4 }
  0x32   :  { %p11147_p8 = por %p11146_p7, %p11145_p6 }
  0x34   :  { %p11148_p9 = pnand %p11147_p8, %p11141_p5 }
  0x36   :  { %11151 = shalt.err (!%p11148_p9)
}
  0x37   :  { %90 = dma.hbm_to_vmem [thread:$0]  %s12055_s6, 1024, %s85_s22, [#allocation12], %s11322_s2, %s11322_s2, %s11323_s14  }
  0x38   :  { %s11152_s19 = scalar_lea.hbm %s12057_s8, 1024 }
  0x39   :  { %p11153_p10 = scmp.ne.s32.totalorder %s12057_s8, %s11152_s19  ;;  %p11156_p11 = scmp.lt.u32.totalorder %s11152_s19, %s12057_s8 }
  0x3b   :  { %p11158_p12 = pnand %p11156_p11, %p11153_p10 }
  0x3d   :  { %11161 = shalt.err (!%p11158_p12)
}
  0x3e   :  { %s11162_s28 = scalar_lea.vmem %s11426_s24, 1024  ;;  %p11167_p0 = scmp.lt.s32.totalorder %s11426_s24, %s11426_s24 }
  0x3f   :  { %p11163_p13 = scmp.ne.s32.totalorder %s11426_s24, %s11162_s28  ;;  %p11168_p1 = scmp.lt.s32.totalorder %s11162_s28, %s11162_s28 }
  0x41   :  { %p11169_p2 = por %p11168_p1, %p11167_p0 }
  0x43   :  { %p11170_p3 = pnand %p11169_p2, %p11163_p13 }
  0x45   :  { %11173 = shalt.err (!%p11170_p3)
}
  0x46   :  { %112 = dma.hbm_to_vmem [thread:$0]  %s12057_s8, 1024, %s11426_s24, [#allocation15], %s11322_s2, %s11322_s2, %s11323_s14  }
  0x47   :  { %s11326_s29 = smov [#allocation2]   ;;  %s11327_s11 = smov [#allocation7]  }
  0x48   :  { %s28_s30 = sshll.u32 %s11326_s29, 4  ;;  %s53_s12 = sshll.u32 %s11327_s11, 4  ;;  %s29_s30 = int_to_ptr.vmem [resolvable:$true] %s28_s30  ;;  %s54_s12 = int_to_ptr.vmem [resolvable:$true] %s53_s12 }
  0x49   :  { %s11174_s16 = scalar_lea.hbm %s12050_s1, 49152 }
  0x4a   :  { %p11175_p4 = scmp.ne.s32.totalorder %s12050_s1, %s11174_s16  ;;  %p11178_p5 = scmp.lt.u32.totalorder %s11174_s16, %s12050_s1 }
  0x4c   :  { %p11180_p6 = pnand %p11178_p5, %p11175_p4 }
  0x4e   :  { %11183 = shalt.err (!%p11180_p6)
}
  0x4f   :  { %s11184_s8 = scalar_lea.vmem %s29_s30, 49152  ;;  %p11189_p8 = scmp.lt.s32.totalorder %s29_s30, %s29_s30 }
  0x50   :  { %p11185_p7 = scmp.ne.s32.totalorder %s29_s30, %s11184_s8  ;;  %p11190_p9 = scmp.lt.s32.totalorder %s11184_s8, %s11184_s8 }
  0x52   :  { %p11191_p10 = por %p11190_p9, %p11189_p8 }
  0x54   :  { %p11192_p11 = pnand %p11191_p10, %p11185_p7 }
  0x56   :  { %11195 = shalt.err (!%p11192_p11)
}
  0x57   :  { %34 = dma.hbm_to_vmem [thread:$0]  %s12050_s1, 49152, %s29_s30, [#allocation3], %s11320_s25, %s11320_s25, %s11321_s26  }
  0x58   :  { %s11196_s21 = scalar_lea.hbm %s12052_s3, 512 }
  0x59   :  { %p11197_p12 = scmp.ne.s32.totalorder %s12052_s3, %s11196_s21  ;;  %p11200_p13 = scmp.lt.u32.totalorder %s11196_s21, %s12052_s3 }
  0x5b   :  { %p11202_p0 = pnand %p11200_p13, %p11197_p12 }
  0x5d   :  { %11205 = shalt.err (!%p11202_p0)
}
  0x5e   :  { %s11206_s22 = scalar_lea.vmem %s54_s12, 512  ;;  %p11211_p2 = scmp.lt.s32.totalorder %s54_s12, %s54_s12 }
  0x5f   :  { %p11207_p1 = scmp.ne.s32.totalorder %s54_s12, %s11206_s22  ;;  %p11212_p3 = scmp.lt.s32.totalorder %s11206_s22, %s11206_s22 }
  0x61   :  { %p11213_p4 = por %p11212_p3, %p11211_p2 }
  0x63   :  { %p11214_p5 = pnand %p11213_p4, %p11207_p1 }
  0x65   :  { %11217 = shalt.err (!%p11214_p5)
}
  0x66   :  { %56 = dma.hbm_to_vmem [thread:$0]  %s12052_s3, 512, %s54_s12, [#allocation6]  }
  0x67   :  { %s11328_s26 = smov [#allocation10]   ;;  %s11329_s30 = smov [#allocation13]  }
  0x68   :  { %s75_s29 = sshll.u32 %s11328_s26, 4  ;;  %s97_s11 = sshll.u32 %s11329_s30, 4  ;;  %s76_s29 = int_to_ptr.vmem [resolvable:$true] %s75_s29  ;;  %s98_s11 = int_to_ptr.vmem [resolvable:$true] %s97_s11 }
  0x69   :  { %s11218_s16 = scalar_lea.hbm %s12054_s5, 16 }
  0x6a   :  { %p11219_p6 = scmp.ne.s32.totalorder %s12054_s5, %s11218_s16  ;;  %p11222_p7 = scmp.lt.u32.totalorder %s11218_s16, %s12054_s5 }
  0x6c   :  { %p11224_p8 = pnand %p11222_p7, %p11219_p6 }
  0x6e   :  { %11227 = shalt.err (!%p11224_p8)
}
  0x6f   :  { %s11228_s3 = scalar_lea.vmem %s76_s29, 16  ;;  %s11232_s12 = scalar_lea.vmem %s76_s29, 32 }
  0x70   :  { %p11229_p9 = scmp.ne.s32.totalorder %s76_s29, %s11228_s3  ;;  %p11233_p10 = scmp.lt.s32.totalorder %s76_s29, %s76_s29 }
  0x71   :  { %p11234_p11 = scmp.lt.s32.totalorder %s11232_s12, %s11228_s3 }
  0x73   :  { %p11235_p12 = por %p11234_p11, %p11233_p10 }
  0x75   :  { %p11236_p13 = pnand %p11235_p12, %p11229_p9 }
  0x77   :  { %11239 = shalt.err (!%p11236_p13)
}
  0x78   :  { %78 = dma.hbm_to_vmem [thread:$0]  %s12054_s5, 16, %s76_s29, [#allocation9]  }
  0x79   :  { %s11240_s20 = scalar_lea.hbm %s12056_s7, 16 }
  0x7a   :  { %p11241_p0 = scmp.ne.s32.totalorder %s12056_s7, %s11240_s20  ;;  %p11244_p1 = scmp.lt.u32.totalorder %s11240_s20, %s12056_s7 }
  0x7c   :  { %p11246_p2 = pnand %p11244_p1, %p11241_p0 }
  0x7e   :  { %11249 = shalt.err (!%p11246_p2)
}
  0x7f   :  { %s11250_s6 = scalar_lea.vmem %s98_s11, 16  ;;  %s11254_s22 = scalar_lea.vmem %s98_s11, 32 }
  0x80   :  { %p11251_p3 = scmp.ne.s32.totalorder %s98_s11, %s11250_s6  ;;  %p11255_p4 = scmp.lt.s32.totalorder %s98_s11, %s98_s11 }
  0x81   :  { %p11256_p5 = scmp.lt.s32.totalorder %s11254_s22, %s11250_s6 }
  0x83   :  { %p11257_p6 = por %p11256_p5, %p11255_p4 }
  0x85   :  { %p11258_p7 = pnand %p11257_p6, %p11251_p3 }
  0x87   :  { %11261 = shalt.err (!%p11258_p7)
}
  0x88   :  { %100 = dma.hbm_to_vmem [thread:$0]  %s12056_s7, 16, %s98_s11, [#allocation12]  }
  0x89   :  { %s11330_s25 = smov [#allocation16]   ;;  %s11262_s13 = scalar_lea.hbm %s12058_s9, 16 }
  0x8a   :  { %s119_s26 = sshll.u32 %s11330_s25, 4  ;;  %p11263_p8 = scmp.ne.s32.totalorder %s12058_s9, %s11262_s13  ;;  %s120_s26 = int_to_ptr.vmem [resolvable:$true] %s119_s26 }
  0x8b   :  { %p11266_p9 = scmp.lt.u32.totalorder %s11262_s13, %s12058_s9 }
  0x8d   :  { %p11268_p10 = pnand %p11266_p9, %p11263_p8 }
  0x8f   :  { %11271 = shalt.err (!%p11268_p10)
}
  0x90   :  { %s11272_s18 = scalar_lea.vmem %s120_s26, 16  ;;  %s11276_s7 = scalar_lea.vmem %s120_s26, 32 }
  0x91   :  { %p11273_p11 = scmp.ne.s32.totalorder %s120_s26, %s11272_s18  ;;  %p11277_p12 = scmp.lt.s32.totalorder %s120_s26, %s120_s26 }
  0x92   :  { %p11278_p13 = scmp.lt.s32.totalorder %s11276_s7, %s11272_s18 }
  0x94   :  { %p11279_p0 = por %p11278_p13, %p11277_p12 }
  0x96   :  { %p11280_p1 = pnand %p11279_p0, %p11273_p11 }
  0x98   :  { %11283 = shalt.err (!%p11280_p1)
}
  0x99   :  { %122 = dma.hbm_to_vmem [thread:$0]  %s12058_s9, 16, %s120_s26, [#allocation15]  }
  0x9a   :  { %11306 = dma.done.wait [#allocation3], 49152  }
  0x9b   :  { %11307 = vsyncadd [#allocation3], 4294918144 }
  0x9c   :  { %11308 = dma.done.wait [#allocation6], 49664  }
  0x9d   :  { %11309 = vsyncadd [#allocation6], 4294917632 }
  0x9e   :  { %11310 = dma.done.wait [#allocation9], 32784  }
  0x9f   :  { %11311 = vsyncadd [#allocation9], 4294934512 }
  0xa0   :  { %11312 = dma.done.wait [#allocation12], 1040  }
  0xa1   :  { %11313 = vsyncadd [#allocation12], 4294966256 }
  0xa2   :  { %11314 = dma.done.wait [#allocation15], 1040  }
  0xa3   :  { %11315 = vsyncadd [#allocation15], 4294966256  ;;  %v152_v0 = vld [vmem:[#allocation2] sm:$0xff]  ;;  %v153_v2 = vld [vmem:[#allocation2 + $0x8] sm:$0xff]  ;;  %vm2466_vm0 = vcmask 523264   ;;  %vm11332_vm1 = vmmov 0  }
  0xa4   :  { %v168_v1 = vld [vmem:[#allocation2 + $0x80] sm:$0xff]  ;;  %v169_v4 = vld [vmem:[#allocation2 + $0x88] sm:$0xff]  ;;  %v11529_v43 = vld.sshfl [vmem:[%s12049_s0] sm:$0x33 pattern:$0x76325410] }
  0xa5   :  { %v9303_v3 = vcombine.high %v152_v0, %v168_v1  ;;  %v9302_v5 = vcombine.low %v152_v0, %v168_v1  ;;  %v184_v6 = vld [vmem:[#allocation2 + $0x100] sm:$0xff]  ;;  %v9305_v8 = vcombine.high %v153_v2, %v169_v4  ;;  %v9304_v9 = vcombine.low %v153_v2, %v169_v4  ;;  %v185_v11 = vld [vmem:[#allocation2 + $0x108] sm:$0xff] }
  0xa6   :  { %v200_v7 = vld [vmem:[#allocation2 + $0x180] sm:$0xff]  ;;  %v201_v12 = vld [vmem:[#allocation2 + $0x188] sm:$0xff]  ;;  %v11533_v46 = vcombine.high %v11529_v43, %v11529_v43 }
  0xa7   :  { %v9335_v10 = vcombine.high %v184_v6, %v200_v7  ;;  %v216_v13 = vld [vmem:[#allocation2 + $0x200] sm:$0xff]  ;;  %2470 = vmatprep.subr.bf16.mxu0 %v9303_v3  ;;  %v9337_v14 = vcombine.high %v185_v11, %v201_v12  ;;  %v217_v16 = vld [vmem:[#allocation2 + $0x208] sm:$0xff]  ;;  %2511 = vmatprep.subr.bf16.mxu1 %v9305_v8  ;;  %v9334_v18 = vcombine.low %v184_v6, %v200_v7 }
  0xa8   :  { %v232_v15 = vld [vmem:[#allocation2 + $0x280] sm:$0xff]  ;;  %v233_v17 = vld [vmem:[#allocation2 + $0x288] sm:$0xff]  ;;  %2471 = vmatpush1.bf16.msra.mxu0 %v9302_v5  ;;  %2512 = vmatpush1.bf16.msra.mxu1 %v9304_v9  ;;  %v9336_v19 = vcombine.low %v185_v11, %v201_v12 }
  0xa9   :  { %2472 = vmatprep.subr.bf16.mxu0 %v9335_v10  ;;  %v9367_v20 = vcombine.high %v216_v13, %v232_v15  ;;  %2513 = vmatprep.subr.bf16.mxu1 %v9337_v14  ;;  %v9369_v21 = vcombine.high %v217_v16, %v233_v17  ;;  %v248_v22 = vld [vmem:[#allocation2 + $0x300] sm:$0xff]  ;;  %v249_v24 = vld [vmem:[#allocation2 + $0x308] sm:$0xff]  ;;  %v9366_v26 = vcombine.low %v216_v13, %v232_v15 }
  0xaa   :  { %v264_v23 = vld [vmem:[#allocation2 + $0x380] sm:$0xff]  ;;  %v265_v25 = vld [vmem:[#allocation2 + $0x388] sm:$0xff]  ;;  %v9368_v27 = vcombine.low %v217_v16, %v233_v17  ;;  %9686 = vmatprep.mubr.msk.bf16.mxu0 %vm2466_vm0, %v11533_v46  ;;  %9687 = vmatprep.mubr.msk.bf16.mxu1 %vm2466_vm0, %v11533_v46 }
  0xab   :  { %v9399_v28 = vcombine.high %v248_v22, %v264_v23  ;;  %v9401_v29 = vcombine.high %v249_v24, %v265_v25  ;;  %v280_v30 = vld [vmem:[#allocation2 + $0x400] sm:$0xff]  ;;  %v281_v32 = vld [vmem:[#allocation2 + $0x408] sm:$0xff]  ;;  %v9398_v34 = vcombine.low %v248_v22, %v264_v23  ;;  %v9400_v35 = vcombine.low %v249_v24, %v265_v25 }
  0xac   :  { %2473 = vmatpush1.bf16.msra.mxu0 %v9334_v18  ;;  %2514 = vmatpush1.bf16.msra.mxu1 %v9336_v19  ;;  %v296_v31 = vld [vmem:[#allocation2 + $0x480] sm:$0xff]  ;;  %v297_v33 = vld [vmem:[#allocation2 + $0x488] sm:$0xff] }
  0xad   :  { %2474 = vmatprep.subr.bf16.mxu0 %v9367_v20  ;;  %2515 = vmatprep.subr.bf16.mxu1 %v9369_v21  ;;  %v9431_v36 = vcombine.high %v280_v30, %v296_v31  ;;  %v9433_v37 = vcombine.high %v281_v32, %v297_v33  ;;  %v312_v38 = vld [vmem:[#allocation2 + $0x500] sm:$0xff]  ;;  %v313_v40 = vld [vmem:[#allocation2 + $0x508] sm:$0xff]  ;;  %v9430_v42 = vcombine.low %v280_v30, %v296_v31 }
  0xae   :  { %v328_v39 = vld [vmem:[#allocation2 + $0x580] sm:$0xff]  ;;  %v329_v41 = vld [vmem:[#allocation2 + $0x588] sm:$0xff]  ;;  %v9432_v44 = vcombine.low %v281_v32, %v297_v33  ;;  %v154_v32 = vld [vmem:[#allocation2 + $0x10] sm:$0xff] }
  0xaf   :  { %v9463_v45 = vcombine.high %v312_v38, %v328_v39  ;;  %v9465_v47 = vcombine.high %v313_v40, %v329_v41  ;;  %v344_v48 = vld [vmem:[#allocation2 + $0x600] sm:$0xff]  ;;  %v345_v50 = vld [vmem:[#allocation2 + $0x608] sm:$0xff]  ;;  %v9462_v52 = vcombine.low %v312_v38, %v328_v39  ;;  %v9464_v53 = vcombine.low %v313_v40, %v329_v41  ;;  %v170_v33 = vld [vmem:[#allocation2 + $0x90] sm:$0xff] }
  0xb0   :  { %2475 = vmatpush1.bf16.msra.mxu0 %v9366_v26  ;;  %2516 = vmatpush1.bf16.msra.mxu1 %v9368_v27  ;;  %v360_v49 = vld [vmem:[#allocation2 + $0x680] sm:$0xff]  ;;  %v361_v51 = vld [vmem:[#allocation2 + $0x688] sm:$0xff]  ;;  %v9307_v38 = vcombine.high %v154_v32, %v170_v33  ;;  %v186_v40 = vld [vmem:[#allocation2 + $0x110] sm:$0xff] }
  0xb1   :  { %2476 = vmatprep.subr.bf16.mxu0 %v9399_v28  ;;  %2517 = vmatprep.subr.bf16.mxu1 %v9401_v29  ;;  %v9495_v54 = vcombine.high %v344_v48, %v360_v49  ;;  %v9497_v55 = vcombine.high %v345_v50, %v361_v51  ;;  %v376_v56 = vld [vmem:[#allocation2 + $0x700] sm:$0xff]  ;;  %v377_v58 = vld [vmem:[#allocation2 + $0x708] sm:$0xff]  ;;  %v9494_v60 = vcombine.low %v344_v48, %v360_v49  ;;  %v202_v41 = vld [vmem:[#allocation2 + $0x190] sm:$0xff] }
  0xb2   :  { %v392_v57 = vld [vmem:[#allocation2 + $0x780] sm:$0xff]  ;;  %v393_v59 = vld [vmem:[#allocation2 + $0x788] sm:$0xff]  ;;  %v9496_v61 = vcombine.low %v345_v50, %v361_v51  ;;  %v9339_v48 = vcombine.high %v186_v40, %v202_v41  ;;  %v218_v50 = vld [vmem:[#allocation2 + $0x210] sm:$0xff] }
  0xb3   :  { %v9527_v62 = vcombine.high %v376_v56, %v392_v57  ;;  %v9529_v63 = vcombine.high %v377_v58, %v393_v59  ;;  %v408_v0 = vld [vmem:[#allocation2 + $0x800] sm:$0xff]  ;;  %v409_v2 = vld [vmem:[#allocation2 + $0x808] sm:$0xff]  ;;  %v9526_v4 = vcombine.low %v376_v56, %v392_v57  ;;  %v9528_v5 = vcombine.low %v377_v58, %v393_v59  ;;  %v234_v51 = vld [vmem:[#allocation2 + $0x290] sm:$0xff] }
  0xb4   :  { %2477 = vmatpush1.bf16.msra.mxu0 %v9398_v34  ;;  %2518 = vmatpush1.bf16.msra.mxu1 %v9400_v35  ;;  %v424_v1 = vld [vmem:[#allocation2 + $0x880] sm:$0xff]  ;;  %v425_v3 = vld [vmem:[#allocation2 + $0x888] sm:$0xff]  ;;  %v155_v34 = vld [vmem:[#allocation2 + $0x18] sm:$0xff]  ;;  %v9371_v56 = vcombine.high %v218_v50, %v234_v51 }
  0xb5   :  { %2478 = vmatprep.subr.bf16.mxu0 %v9431_v36  ;;  %2519 = vmatprep.subr.bf16.mxu1 %v9433_v37  ;;  %v9559_v6 = vcombine.high %v408_v0, %v424_v1  ;;  %v9561_v7 = vcombine.high %v409_v2, %v425_v3  ;;  %v440_v8 = vld [vmem:[#allocation2 + $0x900] sm:$0xff]  ;;  %v441_v10 = vld [vmem:[#allocation2 + $0x908] sm:$0xff]  ;;  %v9558_v12 = vcombine.low %v408_v0, %v424_v1  ;;  %v171_v35 = vld [vmem:[#allocation2 + $0x98] sm:$0xff] }
  0xb6   :  { %v456_v9 = vld [vmem:[#allocation2 + $0x980] sm:$0xff]  ;;  %v457_v11 = vld [vmem:[#allocation2 + $0x988] sm:$0xff]  ;;  %v9560_v13 = vcombine.low %v409_v2, %v425_v3  ;;  %v9309_v39 = vcombine.high %v155_v34, %v171_v35  ;;  %v250_v58 = vld [vmem:[#allocation2 + $0x310] sm:$0xff] }
  0xb7   :  { %v9591_v14 = vcombine.high %v440_v8, %v456_v9  ;;  %v9593_v15 = vcombine.high %v441_v10, %v457_v11  ;;  %v472_v16 = vld [vmem:[#allocation2 + $0xa00] sm:$0xff]  ;;  %v473_v18 = vld [vmem:[#allocation2 + $0xa08] sm:$0xff]  ;;  %v9590_v20 = vcombine.low %v440_v8, %v456_v9  ;;  %v9592_v21 = vcombine.low %v441_v10, %v457_v11  ;;  %v266_v59 = vld [vmem:[#allocation2 + $0x390] sm:$0xff] }
  0xb8   :  { %2479 = vmatpush1.bf16.msra.mxu0 %v9430_v42  ;;  %2520 = vmatpush1.bf16.msra.mxu1 %v9432_v44  ;;  %v488_v17 = vld [vmem:[#allocation2 + $0xa80] sm:$0xff]  ;;  %v489_v19 = vld [vmem:[#allocation2 + $0xa88] sm:$0xff]  ;;  %v187_v42 = vld [vmem:[#allocation2 + $0x118] sm:$0xff]  ;;  %v9403_v0 = vcombine.high %v250_v58, %v266_v59 }
  0xb9   :  { %2480 = vmatprep.subr.bf16.mxu0 %v9463_v45  ;;  %2521 = vmatprep.subr.bf16.mxu1 %v9465_v47  ;;  %v9623_v22 = vcombine.high %v472_v16, %v488_v17  ;;  %v9625_v23 = vcombine.high %v473_v18, %v489_v19  ;;  %v504_v24 = vld [vmem:[#allocation2 + $0xb00] sm:$0xff]  ;;  %v505_v26 = vld [vmem:[#allocation2 + $0xb08] sm:$0xff]  ;;  %v9622_v28 = vcombine.low %v472_v16, %v488_v17  ;;  %v203_v44 = vld [vmem:[#allocation2 + $0x198] sm:$0xff] }
  0xba   :  { %v520_v25 = vld [vmem:[#allocation2 + $0xb80] sm:$0xff]  ;;  %v521_v27 = vld [vmem:[#allocation2 + $0xb88] sm:$0xff]  ;;  %v9624_v29 = vcombine.low %v473_v18, %v489_v19  ;;  %v9306_v45 = vcombine.low %v154_v32, %v170_v33  ;;  %v9308_v47 = vcombine.low %v155_v34, %v171_v35  ;;  %v9341_v49 = vcombine.high %v187_v42, %v203_v44  ;;  %v282_v2 = vld [vmem:[#allocation2 + $0x410] sm:$0xff] }
  0xbb   :  { %v9655_v30 = vcombine.high %v504_v24, %v520_v25  ;;  %v9657_v31 = vcombine.high %v505_v26, %v521_v27  ;;  %v9654_v36 = vcombine.low %v504_v24, %v520_v25  ;;  %v9656_v37 = vcombine.low %v505_v26, %v521_v27  ;;  %v298_v3 = vld [vmem:[#allocation2 + $0x490] sm:$0xff]  ;;  %v347_v19 = vld [vmem:[#allocation2 + $0x618] sm:$0xff] }
  0xbc   :  { %2481 = vmatpush1.bf16.msra.mxu0 %v9462_v52  ;;  %2522 = vmatpush1.bf16.msra.mxu1 %v9464_v53  ;;  %v219_v52 = vld [vmem:[#allocation2 + $0x218] sm:$0xff]  ;;  %v9435_v8 = vcombine.high %v282_v2, %v298_v3  ;;  %v314_v10 = vld [vmem:[#allocation2 + $0x510] sm:$0xff] }
  0xbd   :  { %2482 = vmatprep.subr.bf16.mxu0 %v9495_v54  ;;  %2523 = vmatprep.subr.bf16.mxu1 %v9497_v55  ;;  %v235_v53 = vld [vmem:[#allocation2 + $0x298] sm:$0xff]  ;;  %v9338_v54 = vcombine.low %v186_v40, %v202_v41  ;;  %v9340_v55 = vcombine.low %v187_v42, %v203_v44  ;;  %v330_v11 = vld [vmem:[#allocation2 + $0x590] sm:$0xff] }
  0xbe   :  { %v9373_v57 = vcombine.high %v219_v52, %v235_v53  ;;  %v9467_v16 = vcombine.high %v314_v10, %v330_v11  ;;  %v346_v17 = vld [vmem:[#allocation2 + $0x610] sm:$0xff]  ;;  %v379_v27 = vld [vmem:[#allocation2 + $0x718] sm:$0xff] }
  0xbf   :  { %v362_v18 = vld [vmem:[#allocation2 + $0x690] sm:$0xff]  ;;  %v411_v35 = vld [vmem:[#allocation2 + $0x818] sm:$0xff] }
  0xc0   :  { %2483 = vmatpush1.bf16.msra.mxu0 %v9494_v60  ;;  %2524 = vmatpush1.bf16.msra.mxu1 %v9496_v61  ;;  %v251_v60 = vld [vmem:[#allocation2 + $0x318] sm:$0xff]  ;;  %v9499_v24 = vcombine.high %v346_v17, %v362_v18  ;;  %v378_v25 = vld [vmem:[#allocation2 + $0x710] sm:$0xff] }
  0xc1   :  { %2484 = vmatprep.subr.bf16.mxu0 %v9527_v62  ;;  %2525 = vmatprep.subr.bf16.mxu1 %v9529_v63  ;;  %v267_v61 = vld [vmem:[#allocation2 + $0x398] sm:$0xff]  ;;  %v9370_v62 = vcombine.low %v218_v50, %v234_v51  ;;  %v9372_v63 = vcombine.low %v219_v52, %v235_v53  ;;  %v394_v26 = vld [vmem:[#allocation2 + $0x790] sm:$0xff] }
  0xc2   :  { %v9405_v1 = vcombine.high %v251_v60, %v267_v61  ;;  %v9531_v32 = vcombine.high %v378_v25, %v394_v26  ;;  %v410_v33 = vld [vmem:[#allocation2 + $0x810] sm:$0xff]  ;;  %v443_v44 = vld [vmem:[#allocation2 + $0x918] sm:$0xff] }
  0xc3   :  { %v426_v34 = vld [vmem:[#allocation2 + $0x890] sm:$0xff]  ;;  %v475_v53 = vld [vmem:[#allocation2 + $0xa18] sm:$0xff] }
  0xc4   :  { %2485 = vmatpush1.bf16.msra.mxu0 %v9526_v4  ;;  %2526 = vmatpush1.bf16.msra.mxu1 %v9528_v5  ;;  %v283_v4 = vld [vmem:[#allocation2 + $0x418] sm:$0xff]  ;;  %v9563_v40 = vcombine.high %v410_v33, %v426_v34  ;;  %v442_v41 = vld [vmem:[#allocation2 + $0x910] sm:$0xff] }
  0xc5   :  { %2486 = vmatprep.subr.bf16.mxu0 %v9559_v6  ;;  %2527 = vmatprep.subr.bf16.mxu1 %v9561_v7  ;;  %v299_v5 = vld [vmem:[#allocation2 + $0x498] sm:$0xff]  ;;  %v9402_v6 = vcombine.low %v250_v58, %v266_v59  ;;  %v9404_v7 = vcombine.low %v251_v60, %v267_v61  ;;  %v458_v42 = vld [vmem:[#allocation2 + $0x990] sm:$0xff] }
  0xc6   :  { %v9437_v9 = vcombine.high %v283_v4, %v299_v5  ;;  %v9595_v50 = vcombine.high %v442_v41, %v458_v42  ;;  %v474_v51 = vld [vmem:[#allocation2 + $0xa10] sm:$0xff]  ;;  %v507_v61 = vld [vmem:[#allocation2 + $0xb18] sm:$0xff] }
  0xc7   :  { %v490_v52 = vld [vmem:[#allocation2 + $0xa90] sm:$0xff] }
  0xc8   :  { %2487 = vmatpush1.bf16.msra.mxu0 %v9558_v12  ;;  %2528 = vmatpush1.bf16.msra.mxu1 %v9560_v13  ;;  %v315_v12 = vld [vmem:[#allocation2 + $0x518] sm:$0xff]  ;;  %v9627_v58 = vcombine.high %v474_v51, %v490_v52  ;;  %v506_v59 = vld [vmem:[#allocation2 + $0xb10] sm:$0xff] }
  0xc9   :  { %2488 = vmatprep.subr.bf16.mxu0 %v9591_v14  ;;  %2529 = vmatprep.subr.bf16.mxu1 %v9593_v15  ;;  %v331_v13 = vld [vmem:[#allocation2 + $0x598] sm:$0xff]  ;;  %v9434_v14 = vcombine.low %v282_v2, %v298_v3  ;;  %v9436_v15 = vcombine.low %v283_v4, %v299_v5  ;;  %v522_v60 = vld [vmem:[#allocation2 + $0xb90] sm:$0xff]  ;;  %v156_v3 = vld [vmem:[#allocation2 + $0x20] sm:$0xff] }
  0xca   :  { %v9659_v2 = vcombine.high %v506_v59, %v522_v60  ;;  %v172_v4 = vld [vmem:[#allocation2 + $0xa0] sm:$0xff]  ;;  %v157_v5 = vld [vmem:[#allocation2 + $0x28] sm:$0xff] }
  0xcc   :  { %2489 = vmatpush1.bf16.msra.mxu0 %v9590_v20  ;;  %2530 = vmatpush1.bf16.msra.mxu1 %v9592_v21  ;;  %v9469_v20 = vcombine.high %v315_v12, %v331_v13  ;;  %v363_v21 = vld [vmem:[#allocation2 + $0x698] sm:$0xff] }
  0xcd   :  { %2490 = vmatprep.subr.bf16.mxu0 %v9623_v22  ;;  %2531 = vmatprep.subr.bf16.mxu1 %v9625_v23  ;;  %v9466_v22 = vcombine.low %v314_v10, %v330_v11  ;;  %v9468_v23 = vcombine.low %v315_v12, %v331_v13  ;;  %v9311_v10 = vcombine.high %v156_v3, %v172_v4  ;;  %v188_v11 = vld [vmem:[#allocation2 + $0x120] sm:$0xff]  ;;  %v189_v13 = vld [vmem:[#allocation2 + $0x128] sm:$0xff] }
  0xce   :  { %v204_v12 = vld [vmem:[#allocation2 + $0x1a0] sm:$0xff] }
  0xd0   :  { %2491 = vmatpush1.bf16.msra.mxu0 %v9622_v28  ;;  %2532 = vmatpush1.bf16.msra.mxu1 %v9624_v29  ;;  %v9501_v28 = vcombine.high %v347_v19, %v363_v21  ;;  %v395_v29 = vld [vmem:[#allocation2 + $0x798] sm:$0xff] }
  0xd1   :  { %2492 = vmatprep.subr.bf16.mxu0 %v9655_v30  ;;  %2533 = vmatprep.subr.bf16.mxu1 %v9657_v31  ;;  %v9498_v30 = vcombine.low %v346_v17, %v362_v18  ;;  %v9500_v31 = vcombine.low %v347_v19, %v363_v21  ;;  %v9343_v18 = vcombine.high %v188_v11, %v204_v12  ;;  %v220_v19 = vld [vmem:[#allocation2 + $0x220] sm:$0xff]  ;;  %v221_v21 = vld [vmem:[#allocation2 + $0x228] sm:$0xff] }
  0xd4   :  { %2493 = vmatpush1.bf16.msra.mxu0 %v9654_v36  ;;  %2534 = vmatpush1.bf16.msra.mxu1 %v9656_v37  ;;  %v9533_v36 = vcombine.high %v379_v27, %v395_v29  ;;  %v427_v37 = vld [vmem:[#allocation2 + $0x898] sm:$0xff] }
  0xd5   :  { %2552 = vmatprep.subr.bf16.mxu0 %v9307_v38  ;;  %2593 = vmatprep.subr.bf16.mxu1 %v9309_v39  ;;  %v9530_v38 = vcombine.low %v378_v25, %v394_v26  ;;  %v9532_v39 = vcombine.low %v379_v27, %v395_v29  ;;  %v252_v27 = vld [vmem:[#allocation2 + $0x320] sm:$0xff]  ;;  %v253_v29 = vld [vmem:[#allocation2 + $0x328] sm:$0xff] }
  0xd7   :  { %2503 = vmatmul.mubr.bf16.vlgmr.msra.gmra.mrb[0].mxu0 %v11529_v43  ;;  %2544 = vmatmul.mubr.bf16.vlgmr.msra.gmra.mrb[0].mxu1 %v11529_v43 }
  0xd8   :  { %2553 = vmatpush1.bf16.msra.mxu0 %v9306_v45  ;;  %2594 = vmatpush1.bf16.msra.mxu1 %v9308_v47  ;;  %v9565_v45 = vcombine.high %v411_v35, %v427_v37  ;;  %v459_v47 = vld [vmem:[#allocation2 + $0x998] sm:$0xff] }
  0xd9   :  { %2554 = vmatprep.subr.bf16.mxu0 %v9339_v48  ;;  %2595 = vmatprep.subr.bf16.mxu1 %v9341_v49  ;;  %v9562_v48 = vcombine.low %v410_v33, %v426_v34  ;;  %v9564_v49 = vcombine.low %v411_v35, %v427_v37  ;;  %v284_v34 = vld [vmem:[#allocation2 + $0x420] sm:$0xff] }
  0xda   :  { %9688 = vmatprep.mubr.msk.bf16.mxu0 %vm2466_vm0, %v11533_v46  ;;  %9689 = vmatprep.mubr.msk.bf16.mxu1 %vm2466_vm0, %v11533_v46  ;;  %v300_v35 = vld [vmem:[#allocation2 + $0x4a0] sm:$0xff] }
  0xdc   :  { %2555 = vmatpush1.bf16.msra.mxu0 %v9338_v54  ;;  %2596 = vmatpush1.bf16.msra.mxu1 %v9340_v55  ;;  %v9597_v54 = vcombine.high %v443_v44, %v459_v47  ;;  %v491_v55 = vld [vmem:[#allocation2 + $0xa98] sm:$0xff] }
  0xdd   :  { %2556 = vmatprep.subr.bf16.mxu0 %v9371_v56  ;;  %2597 = vmatprep.subr.bf16.mxu1 %v9373_v57  ;;  %v9594_v56 = vcombine.low %v442_v41, %v458_v42  ;;  %v9596_v57 = vcombine.low %v443_v44, %v459_v47  ;;  %v9439_v41 = vcombine.high %v284_v34, %v300_v35  ;;  %v316_v42 = vld [vmem:[#allocation2 + $0x520] sm:$0xff] }
  0xde   :  { %v332_v44 = vld [vmem:[#allocation2 + $0x5a0] sm:$0xff] }
  0xe0   :  { %2557 = vmatpush1.bf16.msra.mxu0 %v9370_v62  ;;  %2598 = vmatpush1.bf16.msra.mxu1 %v9372_v63  ;;  %v9629_v62 = vcombine.high %v475_v53, %v491_v55  ;;  %v523_v63 = vld [vmem:[#allocation2 + $0xb98] sm:$0xff] }
  0xe1   :  { %2558 = vmatprep.subr.bf16.mxu0 %v9403_v0  ;;  %2599 = vmatprep.subr.bf16.mxu1 %v9405_v1  ;;  %v9626_v0 = vcombine.low %v474_v51, %v490_v52  ;;  %v9628_v1 = vcombine.low %v475_v53, %v491_v55  ;;  %v9471_v51 = vcombine.high %v316_v42, %v332_v44  ;;  %v348_v52 = vld [vmem:[#allocation2 + $0x620] sm:$0xff] }
  0xe2   :  { %v364_v53 = vld [vmem:[#allocation2 + $0x6a0] sm:$0xff] }
  0xe4   :  { %2559 = vmatpush1.bf16.msra.mxu0 %v9402_v6  ;;  %2600 = vmatpush1.bf16.msra.mxu1 %v9404_v7  ;;  %v9661_v6 = vcombine.high %v507_v61, %v523_v63  ;;  %v173_v7 = vld [vmem:[#allocation2 + $0xa8] sm:$0xff] }
  0xe5   :  { %2560 = vmatprep.subr.bf16.mxu0 %v9435_v8  ;;  %2601 = vmatprep.subr.bf16.mxu1 %v9437_v9  ;;  %v9658_v8 = vcombine.low %v506_v59, %v522_v60  ;;  %v9660_v9 = vcombine.low %v507_v61, %v523_v63  ;;  %v9312_v17 = vcombine.low %v157_v5, %v173_v7  ;;  %v380_v60 = vld [vmem:[#allocation2 + $0x720] sm:$0xff] }
  0xe6   :  { %v9503_v59 = vcombine.high %v348_v52, %v364_v53  ;;  %v396_v61 = vld [vmem:[#allocation2 + $0x7a0] sm:$0xff] }
  0xe8   :  { %2561 = vmatpush1.bf16.msra.mxu0 %v9434_v14  ;;  %2602 = vmatpush1.bf16.msra.mxu1 %v9436_v15  ;;  %v9313_v14 = vcombine.high %v157_v5, %v173_v7  ;;  %v205_v15 = vld [vmem:[#allocation2 + $0x1a8] sm:$0xff]  ;;  %v428_v5 = vld [vmem:[#allocation2 + $0x8a0] sm:$0xff] }
  0xe9   :  { %2562 = vmatprep.subr.bf16.mxu0 %v9467_v16  ;;  %2603 = vmatprep.subr.bf16.mxu1 %v9469_v20  ;;  %v9310_v16 = vcombine.low %v156_v3, %v172_v4  ;;  %v236_v20 = vld [vmem:[#allocation2 + $0x2a0] sm:$0xff]  ;;  %v9344_v25 = vcombine.low %v189_v13, %v205_v15  ;;  %v9535_v3 = vcombine.high %v380_v60, %v396_v61 }
  0xea   :  { %v9375_v26 = vcombine.high %v220_v19, %v236_v20  ;;  %v412_v4 = vld [vmem:[#allocation2 + $0x820] sm:$0xff] }
  0xec   :  { %2563 = vmatpush1.bf16.msra.mxu0 %v9466_v22  ;;  %2604 = vmatpush1.bf16.msra.mxu1 %v9468_v23  ;;  %v9345_v22 = vcombine.high %v189_v13, %v205_v15  ;;  %v237_v23 = vld [vmem:[#allocation2 + $0x2a8] sm:$0xff]  ;;  %v460_v13 = vld [vmem:[#allocation2 + $0x9a0] sm:$0xff] }
  0xed   :  { %2564 = vmatprep.subr.bf16.mxu0 %v9499_v24  ;;  %2605 = vmatprep.subr.bf16.mxu1 %v9501_v28  ;;  %v9342_v24 = vcombine.low %v188_v11, %v204_v12  ;;  %v268_v28 = vld [vmem:[#allocation2 + $0x3a0] sm:$0xff]  ;;  %v9567_v11 = vcombine.high %v412_v4, %v428_v5 }
  0xee   :  { %v9407_v33 = vcombine.high %v252_v27, %v268_v28  ;;  %v444_v12 = vld [vmem:[#allocation2 + $0x920] sm:$0xff] }
  0xf0   :  { %2565 = vmatpush1.bf16.msra.mxu0 %v9498_v30  ;;  %2606 = vmatpush1.bf16.msra.mxu1 %v9500_v31  ;;  %v9377_v30 = vcombine.high %v221_v21, %v237_v23  ;;  %v269_v31 = vld [vmem:[#allocation2 + $0x3a8] sm:$0xff] }
  0xf1   :  { %2566 = vmatprep.subr.bf16.mxu0 %v9531_v32  ;;  %2607 = vmatprep.subr.bf16.mxu1 %v9533_v36  ;;  %v9376_v32 = vcombine.low %v221_v21, %v237_v23  ;;  %v285_v36 = vld [vmem:[#allocation2 + $0x428] sm:$0xff]  ;;  %v9409_v37 = vcombine.high %v253_v29, %v269_v31  ;;  %v492_v21 = vld [vmem:[#allocation2 + $0xaa0] sm:$0xff] }
  0xf4   :  { %2567 = vmatpush1.bf16.msra.mxu0 %v9530_v38  ;;  %2608 = vmatpush1.bf16.msra.mxu1 %v9532_v39  ;;  %v301_v38 = vld [vmem:[#allocation2 + $0x4a8] sm:$0xff]  ;;  %v9406_v39 = vcombine.low %v252_v27, %v268_v28  ;;  %v508_v28 = vld [vmem:[#allocation2 + $0xb20] sm:$0xff] }
  0xf5   :  { %2568 = vmatprep.subr.bf16.mxu0 %v9563_v40  ;;  %2609 = vmatprep.subr.bf16.mxu1 %v9565_v45  ;;  %v9408_v40 = vcombine.low %v253_v29, %v269_v31  ;;  %v317_v45 = vld [vmem:[#allocation2 + $0x528] sm:$0xff]  ;;  %v9441_v47 = vcombine.high %v285_v36, %v301_v38  ;;  %v524_v29 = vld [vmem:[#allocation2 + $0xba0] sm:$0xff] }
  0xf8   :  { %2569 = vmatpush1.bf16.msra.mxu0 %v9562_v48  ;;  %2610 = vmatpush1.bf16.msra.mxu1 %v9564_v49  ;;  %v333_v48 = vld [vmem:[#allocation2 + $0x5a8] sm:$0xff]  ;;  %v9438_v49 = vcombine.low %v284_v34, %v300_v35  ;;  %v9663_v34 = vcombine.high %v508_v28, %v524_v29  ;;  %v158_v35 = vld [vmem:[#allocation2 + $0x30] sm:$0xff] }
  0xf9   :  { %2570 = vmatprep.subr.bf16.mxu0 %v9595_v50  ;;  %2611 = vmatprep.subr.bf16.mxu1 %v9597_v54  ;;  %v9440_v50 = vcombine.low %v285_v36, %v301_v38  ;;  %v349_v54 = vld [vmem:[#allocation2 + $0x628] sm:$0xff]  ;;  %v9473_v55 = vcombine.high %v317_v45, %v333_v48  ;;  %v174_v36 = vld [vmem:[#allocation2 + $0xb0] sm:$0xff] }
  0xfc   :  { %2571 = vmatpush1.bf16.msra.mxu0 %v9594_v56  ;;  %2612 = vmatpush1.bf16.msra.mxu1 %v9596_v57  ;;  %v365_v56 = vld [vmem:[#allocation2 + $0x6a8] sm:$0xff]  ;;  %v9470_v57 = vcombine.low %v316_v42, %v332_v44  ;;  %v9315_v42 = vcombine.high %v158_v35, %v174_v36  ;;  %v190_v44 = vld [vmem:[#allocation2 + $0x130] sm:$0xff] }
  0xfd   :  { %2572 = vmatprep.subr.bf16.mxu0 %v9627_v58  ;;  %2613 = vmatprep.subr.bf16.mxu1 %v9629_v62  ;;  %v9472_v58 = vcombine.low %v317_v45, %v333_v48  ;;  %v381_v62 = vld [vmem:[#allocation2 + $0x728] sm:$0xff]  ;;  %v9505_v63 = vcombine.high %v349_v54, %v365_v56  ;;  %v206_v45 = vld [vmem:[#allocation2 + $0x1b0] sm:$0xff] }
 0x100   :  { %2573 = vmatpush1.bf16.msra.mxu0 %v9626_v0  ;;  %2614 = vmatpush1.bf16.msra.mxu1 %v9628_v1  ;;  %v397_v0 = vld [vmem:[#allocation2 + $0x7a8] sm:$0xff]  ;;  %v9502_v1 = vcombine.low %v348_v52, %v364_v53  ;;  %v9347_v52 = vcombine.high %v190_v44, %v206_v45  ;;  %v222_v53 = vld [vmem:[#allocation2 + $0x230] sm:$0xff] }
 0x101   :  { %2574 = vmatprep.subr.bf16.mxu0 %v9659_v2  ;;  %2615 = vmatprep.subr.bf16.mxu1 %v9661_v6  ;;  %v9504_v2 = vcombine.low %v349_v54, %v365_v56  ;;  %v413_v6 = vld [vmem:[#allocation2 + $0x828] sm:$0xff]  ;;  %v9537_v7 = vcombine.high %v381_v62, %v397_v0  ;;  %v238_v54 = vld [vmem:[#allocation2 + $0x2b0] sm:$0xff] }
 0x104   :  { %2575 = vmatpush1.bf16.msra.mxu0 %v9658_v8  ;;  %2616 = vmatpush1.bf16.msra.mxu1 %v9660_v9  ;;  %v429_v8 = vld [vmem:[#allocation2 + $0x8a8] sm:$0xff]  ;;  %v9534_v9 = vcombine.low %v380_v60, %v396_v61  ;;  %v9379_v61 = vcombine.high %v222_v53, %v238_v54 }
 0x105   :  { %2634 = vmatprep.subr.bf16.mxu0 %v9311_v10  ;;  %2675 = vmatprep.subr.bf16.mxu1 %v9313_v14  ;;  %v9536_v10 = vcombine.low %v381_v62, %v397_v0  ;;  %v445_v14 = vld [vmem:[#allocation2 + $0x928] sm:$0xff]  ;;  %v9569_v15 = vcombine.high %v413_v6, %v429_v8  ;;  %v254_v62 = vld [vmem:[#allocation2 + $0x330] sm:$0xff]  ;;  %v255_v0 = vld [vmem:[#allocation2 + $0x338] sm:$0xff] }
 0x107   :  { %2585 = vmatmul.mubr.bf16.vlgmr.msra.gmra.mrb[4].mxu0 %v11529_v43  ;;  %2626 = vmatmul.mubr.bf16.vlgmr.msra.gmra.mrb[4].mxu1 %v11529_v43  ;;  %v9374_v43 = vcombine.low %v220_v19, %v236_v20  ;;  %v9599_v19 = vcombine.high %v444_v12, %v460_v13  ;;  %v476_v20 = vld [vmem:[#allocation2 + $0xa20] sm:$0xff] }
 0x108   :  { %2635 = vmatpush1.bf16.msra.mxu0 %v9310_v16  ;;  %2676 = vmatpush1.bf16.msra.mxu1 %v9312_v17  ;;  %v461_v16 = vld [vmem:[#allocation2 + $0x9a8] sm:$0xff]  ;;  %v9566_v17 = vcombine.low %v412_v4, %v428_v5  ;;  %v9631_v27 = vcombine.high %v476_v20, %v492_v21 }
 0x109   :  { %2636 = vmatprep.subr.bf16.mxu0 %v9343_v18  ;;  %2677 = vmatprep.subr.bf16.mxu1 %v9345_v22  ;;  %v9568_v18 = vcombine.low %v413_v6, %v429_v8  ;;  %v477_v22 = vld [vmem:[#allocation2 + $0xa28] sm:$0xff]  ;;  %v9601_v23 = vcombine.high %v445_v14, %v461_v16  ;;  %v286_v6 = vld [vmem:[#allocation2 + $0x430] sm:$0xff]  ;;  %v287_v8 = vld [vmem:[#allocation2 + $0x438] sm:$0xff] }
 0x10a   :  { %9690 = vmatprep.mubr.msk.bf16.mxu0 %vm2466_vm0, %v11533_v46  ;;  %9691 = vmatprep.mubr.msk.bf16.mxu1 %vm2466_vm0, %v11533_v46 }
 0x10c   :  { %2637 = vmatpush1.bf16.msra.mxu0 %v9342_v24  ;;  %2678 = vmatpush1.bf16.msra.mxu1 %v9344_v25  ;;  %v493_v24 = vld [vmem:[#allocation2 + $0xaa8] sm:$0xff]  ;;  %v9598_v25 = vcombine.low %v444_v12, %v460_v13 }
 0x10d   :  { %2638 = vmatprep.subr.bf16.mxu0 %v9375_v26  ;;  %2679 = vmatprep.subr.bf16.mxu1 %v9377_v30  ;;  %v9600_v26 = vcombine.low %v445_v14, %v461_v16  ;;  %v509_v30 = vld [vmem:[#allocation2 + $0xb28] sm:$0xff]  ;;  %v9633_v31 = vcombine.high %v477_v22, %v493_v24  ;;  %v318_v14 = vld [vmem:[#allocation2 + $0x530] sm:$0xff]  ;;  %v319_v16 = vld [vmem:[#allocation2 + $0x538] sm:$0xff] }
 0x110   :  { %2639 = vmatpush1.bf16.msra.mxu0 %v9374_v43  ;;  %2680 = vmatpush1.bf16.msra.mxu1 %v9376_v32  ;;  %v525_v43 = vld [vmem:[#allocation2 + $0xba8] sm:$0xff]  ;;  %v9630_v32 = vcombine.low %v476_v20, %v492_v21 }
 0x111   :  { %2640 = vmatprep.subr.bf16.mxu0 %v9407_v33  ;;  %2681 = vmatprep.subr.bf16.mxu1 %v9409_v37  ;;  %v9632_v33 = vcombine.low %v477_v22, %v493_v24  ;;  %v159_v37 = vld [vmem:[#allocation2 + $0x38] sm:$0xff]  ;;  %v9665_v38 = vcombine.high %v509_v30, %v525_v43  ;;  %v350_v22 = vld [vmem:[#allocation2 + $0x630] sm:$0xff] }
 0x112   :  { %v351_v24 = vld [vmem:[#allocation2 + $0x638] sm:$0xff] }
 0x114   :  { %2641 = vmatpush1.bf16.msra.mxu0 %v9406_v39  ;;  %2682 = vmatpush1.bf16.msra.mxu1 %v9408_v40  ;;  %v175_v39 = vld [vmem:[#allocation2 + $0xb8] sm:$0xff]  ;;  %v9662_v40 = vcombine.low %v508_v28, %v524_v29 }
 0x115   :  { %2642 = vmatprep.subr.bf16.mxu0 %v9439_v41  ;;  %2683 = vmatprep.subr.bf16.mxu1 %v9441_v47  ;;  %v9664_v41 = vcombine.low %v509_v30, %v525_v43  ;;  %v191_v47 = vld [vmem:[#allocation2 + $0x138] sm:$0xff]  ;;  %v9317_v48 = vcombine.high %v159_v37, %v175_v39  ;;  %v382_v30 = vld [vmem:[#allocation2 + $0x730] sm:$0xff] }
 0x116   :  { %v383_v43 = vld [vmem:[#allocation2 + $0x738] sm:$0xff] }
 0x118   :  { %2643 = vmatpush1.bf16.msra.mxu0 %v9438_v49  ;;  %2684 = vmatpush1.bf16.msra.mxu1 %v9440_v50  ;;  %v207_v49 = vld [vmem:[#allocation2 + $0x1b8] sm:$0xff]  ;;  %v9314_v50 = vcombine.low %v158_v35, %v174_v36 }
 0x119   :  { %2644 = vmatprep.subr.bf16.mxu0 %v9471_v51  ;;  %2685 = vmatprep.subr.bf16.mxu1 %v9473_v55  ;;  %v9316_v51 = vcombine.low %v159_v37, %v175_v39  ;;  %v223_v55 = vld [vmem:[#allocation2 + $0x238] sm:$0xff]  ;;  %v9349_v56 = vcombine.high %v191_v47, %v207_v49  ;;  %v9348_v60 = vcombine.low %v191_v47, %v207_v49  ;;  %v414_v37 = vld [vmem:[#allocation2 + $0x830] sm:$0xff] }
 0x11a   :  { %v415_v39 = vld [vmem:[#allocation2 + $0x838] sm:$0xff]  ;;  %v446_v47 = vld [vmem:[#allocation2 + $0x930] sm:$0xff] }
 0x11b   :  { %v447_v49 = vld [vmem:[#allocation2 + $0x938] sm:$0xff] }
 0x11c   :  { %2645 = vmatpush1.bf16.msra.mxu0 %v9470_v57  ;;  %2686 = vmatpush1.bf16.msra.mxu1 %v9472_v58  ;;  %v239_v57 = vld [vmem:[#allocation2 + $0x2b8] sm:$0xff]  ;;  %v11554_v58 = vld.sshfl [vmem:[%s12049_s0] sm:$0x33 pattern:$0x76325410] }
 0x11d   :  { %2646 = vmatprep.subr.bf16.mxu0 %v9503_v59  ;;  %2687 = vmatprep.subr.bf16.mxu1 %v9505_v63  ;;  %v9346_v59 = vcombine.low %v190_v44, %v206_v45  ;;  %v270_v63 = vld [vmem:[#allocation2 + $0x3b0] sm:$0xff]  ;;  %v9380_v4 = vcombine.low %v223_v55, %v239_v57 }
 0x11e   :  { %v9411_v5 = vcombine.high %v254_v62, %v270_v63 }
 0x120   :  { %2647 = vmatpush1.bf16.msra.mxu0 %v9502_v1  ;;  %2688 = vmatpush1.bf16.msra.mxu1 %v9504_v2  ;;  %v9381_v1 = vcombine.high %v223_v55, %v239_v57  ;;  %v271_v2 = vld [vmem:[#allocation2 + $0x3b8] sm:$0xff]  ;;  %v478_v55 = vld [vmem:[#allocation2 + $0xa30] sm:$0xff] }
 0x121   :  { %2648 = vmatprep.subr.bf16.mxu0 %v9535_v3  ;;  %2689 = vmatprep.subr.bf16.mxu1 %v9537_v7  ;;  %v9378_v3 = vcombine.low %v222_v53, %v238_v54  ;;  %v302_v7 = vld [vmem:[#allocation2 + $0x4b0] sm:$0xff]  ;;  %v9412_v12 = vcombine.low %v255_v0, %v271_v2  ;;  %v479_v57 = vld [vmem:[#allocation2 + $0xa38] sm:$0xff] }
 0x122   :  { %v9443_v13 = vcombine.high %v286_v6, %v302_v7 }
 0x124   :  { %2649 = vmatpush1.bf16.msra.mxu0 %v9534_v9  ;;  %2690 = vmatpush1.bf16.msra.mxu1 %v9536_v10  ;;  %v9413_v9 = vcombine.high %v255_v0, %v271_v2  ;;  %v303_v10 = vld [vmem:[#allocation2 + $0x4b8] sm:$0xff]  ;;  %v510_v0 = vld [vmem:[#allocation2 + $0xb30] sm:$0xff] }
 0x125   :  { %2650 = vmatprep.subr.bf16.mxu0 %v9567_v11  ;;  %2691 = vmatprep.subr.bf16.mxu1 %v9569_v15  ;;  %v9410_v11 = vcombine.low %v254_v62, %v270_v63  ;;  %v334_v15 = vld [vmem:[#allocation2 + $0x5b0] sm:$0xff]  ;;  %v9444_v20 = vcombine.low %v287_v8, %v303_v10  ;;  %v511_v2 = vld [vmem:[#allocation2 + $0xb38] sm:$0xff] }
 0x126   :  { %v9475_v21 = vcombine.high %v318_v14, %v334_v15 }
 0x128   :  { %2651 = vmatpush1.bf16.msra.mxu0 %v9566_v17  ;;  %2692 = vmatpush1.bf16.msra.mxu1 %v9568_v18  ;;  %v9445_v17 = vcombine.high %v287_v8, %v303_v10  ;;  %v335_v18 = vld [vmem:[#allocation2 + $0x5b8] sm:$0xff]  ;;  %v160_v8 = vld [vmem:[#allocation2 + $0x40] sm:$0xff]  ;;  %v161_v10 = vld [vmem:[#allocation2 + $0x48] sm:$0xff] }
 0x129   :  { %2652 = vmatprep.subr.bf16.mxu0 %v9599_v19  ;;  %2693 = vmatprep.subr.bf16.mxu1 %v9601_v23  ;;  %v9442_v19 = vcombine.low %v286_v6, %v302_v7  ;;  %v366_v23 = vld [vmem:[#allocation2 + $0x6b0] sm:$0xff]  ;;  %v9476_v28 = vcombine.low %v319_v16, %v335_v18 }
 0x12a   :  { %v9507_v29 = vcombine.high %v350_v22, %v366_v23 }
 0x12c   :  { %2653 = vmatpush1.bf16.msra.mxu0 %v9598_v25  ;;  %2694 = vmatpush1.bf16.msra.mxu1 %v9600_v26  ;;  %v9477_v25 = vcombine.high %v319_v16, %v335_v18  ;;  %v367_v26 = vld [vmem:[#allocation2 + $0x6b8] sm:$0xff]  ;;  %v192_v16 = vld [vmem:[#allocation2 + $0x140] sm:$0xff]  ;;  %v193_v18 = vld [vmem:[#allocation2 + $0x148] sm:$0xff] }
 0x12d   :  { %2654 = vmatprep.subr.bf16.mxu0 %v9631_v27  ;;  %2695 = vmatprep.subr.bf16.mxu1 %v9633_v31  ;;  %v9474_v27 = vcombine.low %v318_v14, %v334_v15  ;;  %v398_v31 = vld [vmem:[#allocation2 + $0x7b0] sm:$0xff]  ;;  %v9508_v35 = vcombine.low %v351_v24, %v367_v26 }
 0x12e   :  { %v9539_v36 = vcombine.high %v382_v30, %v398_v31 }
 0x130   :  { %2655 = vmatpush1.bf16.msra.mxu0 %v9630_v32  ;;  %2696 = vmatpush1.bf16.msra.mxu1 %v9632_v33  ;;  %v9509_v32 = vcombine.high %v351_v24, %v367_v26  ;;  %v399_v33 = vld [vmem:[#allocation2 + $0x7b8] sm:$0xff]  ;;  %v224_v24 = vld [vmem:[#allocation2 + $0x240] sm:$0xff]  ;;  %v225_v26 = vld [vmem:[#allocation2 + $0x248] sm:$0xff] }
 0x131   :  { %2656 = vmatprep.subr.bf16.mxu0 %v9663_v34  ;;  %2697 = vmatprep.subr.bf16.mxu1 %v9665_v38  ;;  %v9506_v34 = vcombine.low %v350_v22, %v366_v23  ;;  %v430_v38 = vld [vmem:[#allocation2 + $0x8b0] sm:$0xff]  ;;  %v9540_v44 = vcombine.low %v383_v43, %v399_v33 }
 0x132   :  { %v9571_v45 = vcombine.high %v414_v37, %v430_v38 }
 0x134   :  { %2657 = vmatpush1.bf16.msra.mxu0 %v9662_v40  ;;  %2698 = vmatpush1.bf16.msra.mxu1 %v9664_v41  ;;  %v9541_v40 = vcombine.high %v383_v43, %v399_v33  ;;  %v431_v41 = vld [vmem:[#allocation2 + $0x8b8] sm:$0xff]  ;;  %v256_v43 = vld [vmem:[#allocation2 + $0x340] sm:$0xff]  ;;  %v257_v33 = vld [vmem:[#allocation2 + $0x348] sm:$0xff] }
 0x135   :  { %2716 = vmatprep.subr.bf16.mxu0 %v9315_v42  ;;  %2757 = vmatprep.subr.bf16.mxu1 %v9317_v48  ;;  %v9538_v42 = vcombine.low %v382_v30, %v398_v31  ;;  %v462_v48 = vld [vmem:[#allocation2 + $0x9b0] sm:$0xff]  ;;  %v9572_v53 = vcombine.low %v415_v39, %v431_v41 }
 0x136   :  { %v9603_v54 = vcombine.high %v446_v47, %v462_v48 }
 0x137   :  { %2667 = vmatmul.mubr.bf16.vlgmr.msra.gmra.mrb[8].mxu0 %v11554_v58  ;;  %2708 = vmatmul.mubr.bf16.vlgmr.msra.gmra.mrb[8].mxu1 %v11554_v58 }
 0x138   :  { %2717 = vmatpush1.bf16.msra.mxu0 %v9314_v50  ;;  %2758 = vmatpush1.bf16.msra.mxu1 %v9316_v51  ;;  %v9573_v50 = vcombine.high %v415_v39, %v431_v41  ;;  %v463_v51 = vld [vmem:[#allocation2 + $0x9b8] sm:$0xff]  ;;  %v288_v39 = vld [vmem:[#allocation2 + $0x440] sm:$0xff]  ;;  %v289_v41 = vld [vmem:[#allocation2 + $0x448] sm:$0xff] }
 0x139   :  { %2718 = vmatprep.subr.bf16.mxu0 %v9347_v52  ;;  %2759 = vmatprep.subr.bf16.mxu1 %v9349_v56  ;;  %v9570_v52 = vcombine.low %v414_v37, %v430_v38  ;;  %v494_v56 = vld [vmem:[#allocation2 + $0xab0] sm:$0xff]  ;;  %v9604_v62 = vcombine.low %v447_v49, %v463_v51 }
 0x13a   :  { %9692 = vmatprep.mubr.msk.bf16.mxu0 %vm2466_vm0, %v11533_v46  ;;  %9693 = vmatprep.mubr.msk.bf16.mxu1 %vm2466_vm0, %v11533_v46  ;;  %v9635_v63 = vcombine.high %v478_v55, %v494_v56 }
 0x13c   :  { %2719 = vmatpush1.bf16.msra.mxu0 %v9346_v59  ;;  %2760 = vmatpush1.bf16.msra.mxu1 %v9348_v60  ;;  %v9605_v59 = vcombine.high %v447_v49, %v463_v51  ;;  %v495_v60 = vld [vmem:[#allocation2 + $0xab8] sm:$0xff]  ;;  %v320_v49 = vld [vmem:[#allocation2 + $0x540] sm:$0xff]  ;;  %v321_v51 = vld [vmem:[#allocation2 + $0x548] sm:$0xff] }
 0x13d   :  { %2720 = vmatprep.subr.bf16.mxu0 %v9379_v61  ;;  %2761 = vmatprep.subr.bf16.mxu1 %v9381_v1  ;;  %v9602_v61 = vcombine.low %v446_v47, %v462_v48  ;;  %v526_v1 = vld [vmem:[#allocation2 + $0xbb0] sm:$0xff]  ;;  %v9636_v6 = vcombine.low %v479_v57, %v495_v60 }
 0x13e   :  { %v9667_v7 = vcombine.high %v510_v0, %v526_v1 }
 0x140   :  { %2721 = vmatpush1.bf16.msra.mxu0 %v9378_v3  ;;  %2762 = vmatpush1.bf16.msra.mxu1 %v9380_v4  ;;  %v9637_v3 = vcombine.high %v479_v57, %v495_v60  ;;  %v527_v4 = vld [vmem:[#allocation2 + $0xbb8] sm:$0xff]  ;;  %v352_v57 = vld [vmem:[#allocation2 + $0x640] sm:$0xff]  ;;  %v353_v60 = vld [vmem:[#allocation2 + $0x648] sm:$0xff] }
 0x141   :  { %2722 = vmatprep.subr.bf16.mxu0 %v9411_v5  ;;  %2763 = vmatprep.subr.bf16.mxu1 %v9413_v9  ;;  %v9634_v5 = vcombine.low %v478_v55, %v494_v56  ;;  %v176_v9 = vld [vmem:[#allocation2 + $0xc0] sm:$0xff]  ;;  %v9668_v14 = vcombine.low %v511_v2, %v527_v4 }
 0x142   :  { %v9319_v15 = vcombine.high %v160_v8, %v176_v9 }
 0x144   :  { %2723 = vmatpush1.bf16.msra.mxu0 %v9410_v11  ;;  %2764 = vmatpush1.bf16.msra.mxu1 %v9412_v12  ;;  %v9669_v11 = vcombine.high %v511_v2, %v527_v4  ;;  %v177_v12 = vld [vmem:[#allocation2 + $0xc8] sm:$0xff]  ;;  %v384_v2 = vld [vmem:[#allocation2 + $0x740] sm:$0xff] }
 0x145   :  { %2724 = vmatprep.subr.bf16.mxu0 %v9443_v13  ;;  %2765 = vmatprep.subr.bf16.mxu1 %v9445_v17  ;;  %v9666_v13 = vcombine.low %v510_v0, %v526_v1  ;;  %v208_v17 = vld [vmem:[#allocation2 + $0x1c0] sm:$0xff]  ;;  %v9320_v22 = vcombine.low %v161_v10, %v177_v12  ;;  %v385_v4 = vld [vmem:[#allocation2 + $0x748] sm:$0xff] }
 0x146   :  { %v9351_v23 = vcombine.high %v192_v16, %v208_v17 }
 0x148   :  { %2725 = vmatpush1.bf16.msra.mxu0 %v9442_v19  ;;  %2766 = vmatpush1.bf16.msra.mxu1 %v9444_v20  ;;  %v9321_v19 = vcombine.high %v161_v10, %v177_v12  ;;  %v209_v20 = vld [vmem:[#allocation2 + $0x1c8] sm:$0xff]  ;;  %v416_v10 = vld [vmem:[#allocation2 + $0x840] sm:$0xff] }
 0x149   :  { %2726 = vmatprep.subr.bf16.mxu0 %v9475_v21  ;;  %2767 = vmatprep.subr.bf16.mxu1 %v9477_v25  ;;  %v9318_v21 = vcombine.low %v160_v8, %v176_v9  ;;  %v240_v25 = vld [vmem:[#allocation2 + $0x2c0] sm:$0xff]  ;;  %v9352_v30 = vcombine.low %v193_v18, %v209_v20  ;;  %v417_v12 = vld [vmem:[#allocation2 + $0x848] sm:$0xff] }
 0x14a   :  { %v9383_v31 = vcombine.high %v224_v24, %v240_v25 }
 0x14c   :  { %2727 = vmatpush1.bf16.msra.mxu0 %v9474_v27  ;;  %2768 = vmatpush1.bf16.msra.mxu1 %v9476_v28  ;;  %v9353_v27 = vcombine.high %v193_v18, %v209_v20  ;;  %v241_v28 = vld [vmem:[#allocation2 + $0x2c8] sm:$0xff]  ;;  %v448_v18 = vld [vmem:[#allocation2 + $0x940] sm:$0xff] }
 0x14d   :  { %2728 = vmatprep.subr.bf16.mxu0 %v9507_v29  ;;  %2769 = vmatprep.subr.bf16.mxu1 %v9509_v32  ;;  %v9350_v29 = vcombine.low %v192_v16, %v208_v17  ;;  %v272_v32 = vld [vmem:[#allocation2 + $0x3c0] sm:$0xff]  ;;  %v9384_v37 = vcombine.low %v225_v26, %v241_v28  ;;  %v449_v20 = vld [vmem:[#allocation2 + $0x948] sm:$0xff] }
 0x14e   :  { %v9415_v38 = vcombine.high %v256_v43, %v272_v32 }
 0x150   :  { %2729 = vmatpush1.bf16.msra.mxu0 %v9506_v34  ;;  %2770 = vmatpush1.bf16.msra.mxu1 %v9508_v35  ;;  %v9385_v34 = vcombine.high %v225_v26, %v241_v28  ;;  %v273_v35 = vld [vmem:[#allocation2 + $0x3c8] sm:$0xff]  ;;  %v480_v26 = vld [vmem:[#allocation2 + $0xa40] sm:$0xff] }
 0x151   :  { %2730 = vmatprep.subr.bf16.mxu0 %v9539_v36  ;;  %2771 = vmatprep.subr.bf16.mxu1 %v9541_v40  ;;  %v9382_v36 = vcombine.low %v224_v24, %v240_v25  ;;  %v304_v40 = vld [vmem:[#allocation2 + $0x4c0] sm:$0xff]  ;;  %v9416_v47 = vcombine.low %v257_v33, %v273_v35  ;;  %v481_v28 = vld [vmem:[#allocation2 + $0xa48] sm:$0xff] }
 0x152   :  { %v9447_v48 = vcombine.high %v288_v39, %v304_v40 }
 0x154   :  { %2731 = vmatpush1.bf16.msra.mxu0 %v9538_v42  ;;  %2772 = vmatpush1.bf16.msra.mxu1 %v9540_v44  ;;  %v9417_v42 = vcombine.high %v257_v33, %v273_v35  ;;  %v305_v44 = vld [vmem:[#allocation2 + $0x4c8] sm:$0xff]  ;;  %v512_v33 = vld [vmem:[#allocation2 + $0xb40] sm:$0xff] }
 0x155   :  { %2732 = vmatprep.subr.bf16.mxu0 %v9571_v45  ;;  %2773 = vmatprep.subr.bf16.mxu1 %v9573_v50  ;;  %v9414_v45 = vcombine.low %v256_v43, %v272_v32  ;;  %v336_v50 = vld [vmem:[#allocation2 + $0x5c0] sm:$0xff]  ;;  %v9448_v55 = vcombine.low %v289_v41, %v305_v44  ;;  %v513_v35 = vld [vmem:[#allocation2 + $0xb48] sm:$0xff] }
 0x156   :  { %v9479_v56 = vcombine.high %v320_v49, %v336_v50 }
 0x158   :  { %2733 = vmatpush1.bf16.msra.mxu0 %v9570_v52  ;;  %2774 = vmatpush1.bf16.msra.mxu1 %v9572_v53  ;;  %v9449_v52 = vcombine.high %v289_v41, %v305_v44  ;;  %v337_v53 = vld [vmem:[#allocation2 + $0x5c8] sm:$0xff]  ;;  %v162_v41 = vld [vmem:[#allocation2 + $0x50] sm:$0xff]  ;;  %v163_v44 = vld [vmem:[#allocation2 + $0x58] sm:$0xff] }
 0x159   :  { %2734 = vmatprep.subr.bf16.mxu0 %v9603_v54  ;;  %2775 = vmatprep.subr.bf16.mxu1 %v9605_v59  ;;  %v9446_v54 = vcombine.low %v288_v39, %v304_v40  ;;  %v368_v59 = vld [vmem:[#allocation2 + $0x6c0] sm:$0xff]  ;;  %v9480_v0 = vcombine.low %v321_v51, %v337_v53 }
 0x15a   :  { %v9511_v1 = vcombine.high %v352_v57, %v368_v59 }
 0x15c   :  { %2735 = vmatpush1.bf16.msra.mxu0 %v9602_v61  ;;  %2776 = vmatpush1.bf16.msra.mxu1 %v9604_v62  ;;  %v9481_v61 = vcombine.high %v321_v51, %v337_v53  ;;  %v369_v62 = vld [vmem:[#allocation2 + $0x6c8] sm:$0xff]  ;;  %v194_v51 = vld [vmem:[#allocation2 + $0x150] sm:$0xff]  ;;  %v195_v53 = vld [vmem:[#allocation2 + $0x158] sm:$0xff] }
 0x15d   :  { %2736 = vmatprep.subr.bf16.mxu0 %v9635_v63  ;;  %2777 = vmatprep.subr.bf16.mxu1 %v9637_v3  ;;  %v9478_v63 = vcombine.low %v320_v49, %v336_v50  ;;  %v400_v3 = vld [vmem:[#allocation2 + $0x7c0] sm:$0xff]  ;;  %v9512_v8 = vcombine.low %v353_v60, %v369_v62 }
 0x15e   :  { %v9543_v9 = vcombine.high %v384_v2, %v400_v3 }
 0x160   :  { %2737 = vmatpush1.bf16.msra.mxu0 %v9634_v5  ;;  %2778 = vmatpush1.bf16.msra.mxu1 %v9636_v6  ;;  %v9513_v5 = vcombine.high %v353_v60, %v369_v62  ;;  %v401_v6 = vld [vmem:[#allocation2 + $0x7c8] sm:$0xff]  ;;  %v226_v60 = vld [vmem:[#allocation2 + $0x250] sm:$0xff]  ;;  %v227_v62 = vld [vmem:[#allocation2 + $0x258] sm:$0xff] }
 0x161   :  { %2738 = vmatprep.subr.bf16.mxu0 %v9667_v7  ;;  %2779 = vmatprep.subr.bf16.mxu1 %v9669_v11  ;;  %v9510_v7 = vcombine.low %v352_v57, %v368_v59  ;;  %v432_v11 = vld [vmem:[#allocation2 + $0x8c0] sm:$0xff]  ;;  %v9544_v16 = vcombine.low %v385_v4, %v401_v6 }
 0x162   :  { %v9575_v17 = vcombine.high %v416_v10, %v432_v11 }
 0x164   :  { %2739 = vmatpush1.bf16.msra.mxu0 %v9666_v13  ;;  %2780 = vmatpush1.bf16.msra.mxu1 %v9668_v14  ;;  %v9545_v13 = vcombine.high %v385_v4, %v401_v6  ;;  %v433_v14 = vld [vmem:[#allocation2 + $0x8c8] sm:$0xff]  ;;  %v258_v4 = vld [vmem:[#allocation2 + $0x350] sm:$0xff]  ;;  %v259_v6 = vld [vmem:[#allocation2 + $0x358] sm:$0xff] }
 0x165   :  { %2798 = vmatprep.subr.bf16.mxu0 %v9319_v15  ;;  %2839 = vmatprep.subr.bf16.mxu1 %v9321_v19  ;;  %v9542_v15 = vcombine.low %v384_v2, %v400_v3  ;;  %v464_v19 = vld [vmem:[#allocation2 + $0x9c0] sm:$0xff]  ;;  %v9576_v24 = vcombine.low %v417_v12, %v433_v14 }
 0x166   :  { %v9607_v25 = vcombine.high %v448_v18, %v464_v19 }
 0x167   :  { %2749 = vmatmul.mubr.bf16.vlgmr.msra.gmra.mrb[12].mxu0 %v11554_v58  ;;  %2790 = vmatmul.mubr.bf16.vlgmr.msra.gmra.mrb[12].mxu1 %v11554_v58 }
 0x168   :  { %2799 = vmatpush1.bf16.msra.mxu0 %v9318_v21  ;;  %2840 = vmatpush1.bf16.msra.mxu1 %v9320_v22  ;;  %v9577_v21 = vcombine.high %v417_v12, %v433_v14  ;;  %v465_v22 = vld [vmem:[#allocation2 + $0x9c8] sm:$0xff]  ;;  %v306_v12 = vld [vmem:[#allocation2 + $0x4d0] sm:$0xff] }
 0x169   :  { %2800 = vmatprep.subr.bf16.mxu0 %v9351_v23  ;;  %2841 = vmatprep.subr.bf16.mxu1 %v9353_v27  ;;  %v9574_v23 = vcombine.low %v416_v10, %v432_v11  ;;  %v496_v27 = vld [vmem:[#allocation2 + $0xac0] sm:$0xff]  ;;  %v9608_v43 = vcombine.low %v449_v20, %v465_v22  ;;  %v290_v11 = vld [vmem:[#allocation2 + $0x450] sm:$0xff] }
 0x16a   :  { %9694 = vmatprep.mubr.msk.bf16.mxu0 %vm2466_vm0, %v11533_v46  ;;  %9695 = vmatprep.mubr.msk.bf16.mxu1 %vm2466_vm0, %v11533_v46  ;;  %v9639_v32 = vcombine.high %v480_v26, %v496_v27 }
 0x16c   :  { %2801 = vmatpush1.bf16.msra.mxu0 %v9350_v29  ;;  %2842 = vmatpush1.bf16.msra.mxu1 %v9352_v30  ;;  %v9609_v29 = vcombine.high %v449_v20, %v465_v22  ;;  %v497_v30 = vld [vmem:[#allocation2 + $0xac8] sm:$0xff]  ;;  %v338_v20 = vld [vmem:[#allocation2 + $0x5d0] sm:$0xff] }
 0x16d   :  { %2802 = vmatprep.subr.bf16.mxu0 %v9383_v31  ;;  %2843 = vmatprep.subr.bf16.mxu1 %v9385_v34  ;;  %v9606_v31 = vcombine.low %v448_v18, %v464_v19  ;;  %v528_v34 = vld [vmem:[#allocation2 + $0xbc0] sm:$0xff]  ;;  %v9640_v39 = vcombine.low %v481_v28, %v497_v30  ;;  %v9451_v18 = vcombine.high %v290_v11, %v306_v12  ;;  %v322_v19 = vld [vmem:[#allocation2 + $0x550] sm:$0xff] }
 0x16e   :  { %v9671_v40 = vcombine.high %v512_v33, %v528_v34 }
 0x170   :  { %2803 = vmatpush1.bf16.msra.mxu0 %v9382_v36  ;;  %2844 = vmatpush1.bf16.msra.mxu1 %v9384_v37  ;;  %v9641_v36 = vcombine.high %v481_v28, %v497_v30  ;;  %v529_v37 = vld [vmem:[#allocation2 + $0xbc8] sm:$0xff]  ;;  %v370_v28 = vld [vmem:[#allocation2 + $0x6d0] sm:$0xff] }
 0x171   :  { %2804 = vmatprep.subr.bf16.mxu0 %v9415_v38  ;;  %2845 = vmatprep.subr.bf16.mxu1 %v9417_v42  ;;  %v9638_v38 = vcombine.low %v480_v26, %v496_v27  ;;  %v178_v42 = vld [vmem:[#allocation2 + $0xd0] sm:$0xff]  ;;  %v9672_v49 = vcombine.low %v513_v35, %v529_v37  ;;  %v9483_v26 = vcombine.high %v322_v19, %v338_v20 }
 0x172   :  { %v9323_v50 = vcombine.high %v162_v41, %v178_v42  ;;  %v354_v27 = vld [vmem:[#allocation2 + $0x650] sm:$0xff] }
 0x174   :  { %2805 = vmatpush1.bf16.msra.mxu0 %v9414_v45  ;;  %2846 = vmatpush1.bf16.msra.mxu1 %v9416_v47  ;;  %v9673_v45 = vcombine.high %v513_v35, %v529_v37  ;;  %v179_v47 = vld [vmem:[#allocation2 + $0xd8] sm:$0xff]  ;;  %v402_v35 = vld [vmem:[#allocation2 + $0x7d0] sm:$0xff] }
 0x175   :  { %2806 = vmatprep.subr.bf16.mxu0 %v9447_v48  ;;  %2847 = vmatprep.subr.bf16.mxu1 %v9449_v52  ;;  %v9670_v48 = vcombine.low %v512_v33, %v528_v34  ;;  %v210_v52 = vld [vmem:[#allocation2 + $0x1d0] sm:$0xff]  ;;  %v9324_v57 = vcombine.low %v163_v44, %v179_v47  ;;  %v9515_v33 = vcombine.high %v354_v27, %v370_v28 }
 0x176   :  { %v9355_v59 = vcombine.high %v194_v51, %v210_v52  ;;  %v386_v34 = vld [vmem:[#allocation2 + $0x750] sm:$0xff] }
 0x178   :  { %2807 = vmatpush1.bf16.msra.mxu0 %v9446_v54  ;;  %2848 = vmatpush1.bf16.msra.mxu1 %v9448_v55  ;;  %v9325_v54 = vcombine.high %v163_v44, %v179_v47  ;;  %v211_v55 = vld [vmem:[#allocation2 + $0x1d8] sm:$0xff] }
 0x179   :  { %2808 = vmatprep.subr.bf16.mxu0 %v9479_v56  ;;  %2849 = vmatprep.subr.bf16.mxu1 %v9481_v61  ;;  %v9322_v56 = vcombine.low %v162_v41, %v178_v42  ;;  %v242_v61 = vld [vmem:[#allocation2 + $0x2d0] sm:$0xff]  ;;  %v9356_v2 = vcombine.low %v195_v53, %v211_v55 }
 0x17a   :  { %v9387_v3 = vcombine.high %v226_v60, %v242_v61 }
 0x17c   :  { %2809 = vmatpush1.bf16.msra.mxu0 %v9478_v63  ;;  %2850 = vmatpush1.bf16.msra.mxu1 %v9480_v0  ;;  %v9357_v63 = vcombine.high %v195_v53, %v211_v55  ;;  %v243_v0 = vld [vmem:[#allocation2 + $0x2d8] sm:$0xff] }
 0x17d   :  { %2810 = vmatprep.subr.bf16.mxu0 %v9511_v1  ;;  %2851 = vmatprep.subr.bf16.mxu1 %v9513_v5  ;;  %v9354_v1 = vcombine.low %v194_v51, %v210_v52  ;;  %v274_v5 = vld [vmem:[#allocation2 + $0x3d0] sm:$0xff]  ;;  %v419_v53 = vld [vmem:[#allocation2 + $0x858] sm:$0xff] }
 0x17e   :  { %v9419_v10 = vcombine.high %v258_v4, %v274_v5  ;;  %v418_v51 = vld [vmem:[#allocation2 + $0x850] sm:$0xff] }
 0x17f   :  { %v434_v52 = vld [vmem:[#allocation2 + $0x8d0] sm:$0xff] }
 0x180   :  { %2811 = vmatpush1.bf16.msra.mxu0 %v9510_v7  ;;  %2852 = vmatpush1.bf16.msra.mxu1 %v9512_v8  ;;  %v9389_v7 = vcombine.high %v227_v62, %v243_v0  ;;  %v275_v8 = vld [vmem:[#allocation2 + $0x3d8] sm:$0xff] }
 0x181   :  { %2812 = vmatprep.subr.bf16.mxu0 %v9543_v9  ;;  %2853 = vmatprep.subr.bf16.mxu1 %v9545_v13  ;;  %v9388_v9 = vcombine.low %v227_v62, %v243_v0  ;;  %v291_v13 = vld [vmem:[#allocation2 + $0x458] sm:$0xff]  ;;  %v9421_v14 = vcombine.high %v259_v6, %v275_v8  ;;  %v466_v62 = vld [vmem:[#allocation2 + $0x9d0] sm:$0xff] }
 0x184   :  { %2813 = vmatpush1.bf16.msra.mxu0 %v9542_v15  ;;  %2854 = vmatpush1.bf16.msra.mxu1 %v9544_v16  ;;  %v307_v15 = vld [vmem:[#allocation2 + $0x4d8] sm:$0xff]  ;;  %v9418_v16 = vcombine.low %v258_v4, %v274_v5  ;;  %v482_v5 = vld [vmem:[#allocation2 + $0xa50] sm:$0xff] }
 0x185   :  { %2814 = vmatprep.subr.bf16.mxu0 %v9575_v17  ;;  %2855 = vmatprep.subr.bf16.mxu1 %v9577_v21  ;;  %v9420_v17 = vcombine.low %v259_v6, %v275_v8  ;;  %v323_v21 = vld [vmem:[#allocation2 + $0x558] sm:$0xff]  ;;  %v9453_v22 = vcombine.high %v291_v13, %v307_v15  ;;  %v498_v6 = vld [vmem:[#allocation2 + $0xad0] sm:$0xff] }
 0x188   :  { %2815 = vmatpush1.bf16.msra.mxu0 %v9574_v23  ;;  %2856 = vmatpush1.bf16.msra.mxu1 %v9576_v24  ;;  %v339_v23 = vld [vmem:[#allocation2 + $0x5d8] sm:$0xff]  ;;  %v9450_v24 = vcombine.low %v290_v11, %v306_v12  ;;  %v9643_v11 = vcombine.high %v482_v5, %v498_v6  ;;  %v514_v12 = vld [vmem:[#allocation2 + $0xb50] sm:$0xff] }
 0x189   :  { %2816 = vmatprep.subr.bf16.mxu0 %v9607_v25  ;;  %2857 = vmatprep.subr.bf16.mxu1 %v9609_v29  ;;  %v9452_v25 = vcombine.low %v291_v13, %v307_v15  ;;  %v355_v29 = vld [vmem:[#allocation2 + $0x658] sm:$0xff]  ;;  %v9485_v30 = vcombine.high %v323_v21, %v339_v23  ;;  %v530_v13 = vld [vmem:[#allocation2 + $0xbd0] sm:$0xff] }
 0x18c   :  { %2817 = vmatpush1.bf16.msra.mxu0 %v9606_v31  ;;  %2858 = vmatpush1.bf16.msra.mxu1 %v9608_v43  ;;  %v371_v31 = vld [vmem:[#allocation2 + $0x6d8] sm:$0xff]  ;;  %v9482_v43 = vcombine.low %v322_v19, %v338_v20  ;;  %v9675_v19 = vcombine.high %v514_v12, %v530_v13  ;;  %v164_v20 = vld [vmem:[#allocation2 + $0x60] sm:$0xff] }
 0x18d   :  { %2818 = vmatprep.subr.bf16.mxu0 %v9639_v32  ;;  %2859 = vmatprep.subr.bf16.mxu1 %v9641_v36  ;;  %v9484_v32 = vcombine.low %v323_v21, %v339_v23  ;;  %v387_v36 = vld [vmem:[#allocation2 + $0x758] sm:$0xff]  ;;  %v180_v21 = vld [vmem:[#allocation2 + $0xe0] sm:$0xff] }
 0x190   :  { %2819 = vmatpush1.bf16.msra.mxu0 %v9638_v38  ;;  %2860 = vmatpush1.bf16.msra.mxu1 %v9640_v39  ;;  %v9517_v38 = vcombine.high %v355_v29, %v371_v31  ;;  %v403_v39 = vld [vmem:[#allocation2 + $0x7d8] sm:$0xff] }
 0x191   :  { %2820 = vmatprep.subr.bf16.mxu0 %v9671_v40  ;;  %2861 = vmatprep.subr.bf16.mxu1 %v9673_v45  ;;  %v9514_v45 = vcombine.low %v354_v27, %v370_v28  ;;  %v9549_v55 = vcombine.high %v387_v36, %v403_v39  ;;  %v9327_v27 = vcombine.high %v164_v20, %v180_v21  ;;  %v196_v28 = vld [vmem:[#allocation2 + $0x160] sm:$0xff] }
 0x194   :  { %2821 = vmatpush1.bf16.msra.mxu0 %v9670_v48  ;;  %2862 = vmatpush1.bf16.msra.mxu1 %v9672_v49  ;;  %v9516_v49 = vcombine.low %v355_v29, %v371_v31  ;;  %v212_v29 = vld [vmem:[#allocation2 + $0x1e0] sm:$0xff] }
 0x195   :  { %2880 = vmatprep.subr.bf16.mxu0 %v9323_v50  ;;  %2921 = vmatprep.subr.bf16.mxu1 %v9325_v54  ;;  %v9547_v50 = vcombine.high %v386_v34, %v402_v35 }
 0x197   :  { %2831 = vmatmul.mubr.bf16.vlgmr.msra.gmra.mrb[16].mxu0 %v11554_v58  ;;  %2872 = vmatmul.mubr.bf16.vlgmr.msra.gmra.mrb[16].mxu1 %v11554_v58  ;;  %v9386_v58 = vcombine.low %v226_v60, %v242_v61  ;;  %v9579_v60 = vcombine.high %v418_v51, %v434_v52  ;;  %v450_v61 = vld [vmem:[#allocation2 + $0x950] sm:$0xff] }
 0x198   :  { %2881 = vmatpush1.bf16.msra.mxu0 %v9322_v56  ;;  %2922 = vmatpush1.bf16.msra.mxu1 %v9324_v57  ;;  %v435_v56 = vld [vmem:[#allocation2 + $0x8d8] sm:$0xff]  ;;  %v9546_v57 = vcombine.low %v386_v34, %v402_v35  ;;  %v9611_v4 = vcombine.high %v450_v61, %v466_v62  ;;  %v9359_v34 = vcombine.high %v196_v28, %v212_v29  ;;  %v228_v35 = vld [vmem:[#allocation2 + $0x260] sm:$0xff] }
 0x199   :  { %2882 = vmatprep.subr.bf16.mxu0 %v9355_v59  ;;  %2923 = vmatprep.subr.bf16.mxu1 %v9357_v63  ;;  %v9548_v59 = vcombine.low %v387_v36, %v403_v39  ;;  %v451_v63 = vld [vmem:[#allocation2 + $0x958] sm:$0xff]  ;;  %v9581_v0 = vcombine.high %v419_v53, %v435_v56  ;;  %v244_v36 = vld [vmem:[#allocation2 + $0x2e0] sm:$0xff] }
 0x19a   :  { %9696 = vmatprep.mubr.msk.bf16.mxu0 %vm2466_vm0, %v11533_v46  ;;  %9697 = vmatprep.mubr.msk.bf16.mxu1 %vm2466_vm0, %v11533_v46 }
 0x19c   :  { %2883 = vmatpush1.bf16.msra.mxu0 %v9354_v1  ;;  %2924 = vmatpush1.bf16.msra.mxu1 %v9356_v2  ;;  %v467_v1 = vld [vmem:[#allocation2 + $0x9d8] sm:$0xff]  ;;  %v9578_v2 = vcombine.low %v418_v51, %v434_v52  ;;  %v276_v51 = vld [vmem:[#allocation2 + $0x3e0] sm:$0xff]  ;;  %v261_v52 = vld [vmem:[#allocation2 + $0x368] sm:$0xff] }
 0x19d   :  { %2884 = vmatprep.subr.bf16.mxu0 %v9387_v3  ;;  %2925 = vmatprep.subr.bf16.mxu1 %v9389_v7  ;;  %v9580_v3 = vcombine.low %v419_v53, %v435_v56  ;;  %v483_v7 = vld [vmem:[#allocation2 + $0xa58] sm:$0xff]  ;;  %v9613_v8 = vcombine.high %v451_v63, %v467_v1 }
 0x1a0   :  { %2885 = vmatpush1.bf16.msra.mxu0 %v9386_v58  ;;  %2926 = vmatpush1.bf16.msra.mxu1 %v9388_v9  ;;  %v499_v58 = vld [vmem:[#allocation2 + $0xad8] sm:$0xff]  ;;  %v9610_v9 = vcombine.low %v450_v61, %v466_v62  ;;  %v293_v61 = vld [vmem:[#allocation2 + $0x468] sm:$0xff] }
 0x1a1   :  { %2886 = vmatprep.subr.bf16.mxu0 %v9419_v10  ;;  %2927 = vmatprep.subr.bf16.mxu1 %v9421_v14  ;;  %v9612_v10 = vcombine.low %v451_v63, %v467_v1  ;;  %v515_v14 = vld [vmem:[#allocation2 + $0xb58] sm:$0xff]  ;;  %v9645_v15 = vcombine.high %v483_v7, %v499_v58  ;;  %v309_v63 = vld [vmem:[#allocation2 + $0x4e8] sm:$0xff] }
 0x1a4   :  { %2887 = vmatpush1.bf16.msra.mxu0 %v9418_v16  ;;  %2928 = vmatpush1.bf16.msra.mxu1 %v9420_v17  ;;  %v531_v16 = vld [vmem:[#allocation2 + $0xbd8] sm:$0xff]  ;;  %v9642_v17 = vcombine.low %v482_v5, %v498_v6  ;;  %v325_v5 = vld [vmem:[#allocation2 + $0x568] sm:$0xff]  ;;  %v9457_v6 = vcombine.high %v293_v61, %v309_v63 }
 0x1a5   :  { %2888 = vmatprep.subr.bf16.mxu0 %v9451_v18  ;;  %2929 = vmatprep.subr.bf16.mxu1 %v9453_v22  ;;  %v9644_v18 = vcombine.low %v483_v7, %v499_v58  ;;  %v165_v22 = vld [vmem:[#allocation2 + $0x68] sm:$0xff]  ;;  %v9677_v23 = vcombine.high %v515_v14, %v531_v16  ;;  %v9456_v58 = vcombine.low %v293_v61, %v309_v63 }
 0x1a6   :  { %v341_v7 = vld [vmem:[#allocation2 + $0x5e8] sm:$0xff] }
 0x1a7   :  { %v501_v61 = vld [vmem:[#allocation2 + $0xae8] sm:$0xff] }
 0x1a8   :  { %2889 = vmatpush1.bf16.msra.mxu0 %v9450_v24  ;;  %2930 = vmatpush1.bf16.msra.mxu1 %v9452_v25  ;;  %v181_v24 = vld [vmem:[#allocation2 + $0xe8] sm:$0xff]  ;;  %v9674_v25 = vcombine.low %v514_v12, %v530_v13  ;;  %v9489_v13 = vcombine.high %v325_v5, %v341_v7 }
 0x1a9   :  { %2890 = vmatprep.subr.bf16.mxu0 %v9483_v26  ;;  %2931 = vmatprep.subr.bf16.mxu1 %v9485_v30  ;;  %v9676_v26 = vcombine.low %v515_v14, %v531_v16  ;;  %v197_v30 = vld [vmem:[#allocation2 + $0x168] sm:$0xff]  ;;  %v9329_v31 = vcombine.high %v165_v22, %v181_v24  ;;  %v9488_v16 = vcombine.low %v325_v5, %v341_v7 }
 0x1aa   :  { %v11574_v37 = vpop.f32.mrb[0].mxu0  ;;  %v11576_v40 = vpop.f32.mrb[0].mxu1  ;;  %v357_v12 = vld [vmem:[#allocation2 + $0x668] sm:$0xff] }
 0x1ab   :  { %v11578_v41 = vpop.f32.mrb[1].mxu0  ;;  %v11580_v42 = vpop.f32.mrb[1].mxu1  ;;  %v373_v14 = vld [vmem:[#allocation2 + $0x6e8] sm:$0xff] }
 0x1ac   :  { %v2508_v44 = vpop.f32.mrb[2].mxu0  ;;  %2891 = vmatpush1.bf16.msra.mxu0 %v9482_v43  ;;  %v2549_v47 = vpop.f32.mrb[2].mxu1  ;;  %2932 = vmatpush1.bf16.msra.mxu1 %v9484_v32  ;;  %v213_v43 = vld [vmem:[#allocation2 + $0x1e8] sm:$0xff]  ;;  %v9326_v32 = vcombine.low %v164_v20, %v180_v21 }
 0x1ad   :  { %v2509_v48 = vpop.f32.mrb[3].mxu0  ;;  %2892 = vmatprep.subr.bf16.mxu0 %v9515_v33  ;;  %v2550_v54 = vpop.f32.mrb[3].mxu1  ;;  %2933 = vmatprep.subr.bf16.mxu1 %v9517_v38  ;;  %v9328_v33 = vcombine.low %v165_v22, %v181_v24  ;;  %v229_v38 = vld [vmem:[#allocation2 + $0x268] sm:$0xff]  ;;  %v9361_v39 = vcombine.high %v197_v30, %v213_v43  ;;  %v9358_v47 = vcombine.low %v196_v28, %v212_v29 }
 0x1ae   :  { %v245_v44 = vld [vmem:[#allocation2 + $0x2e8] sm:$0xff]  ;;  %v9360_v48 = vcombine.low %v197_v30, %v213_v43  ;;  %v9521_v22 = vcombine.high %v357_v12, %v373_v14 }
 0x1af   :  { %v9393_v53 = vcombine.high %v229_v38, %v245_v44  ;;  %v277_v54 = vld [vmem:[#allocation2 + $0x3e8] sm:$0xff]  ;;  %v9392_v56 = vcombine.low %v229_v38, %v245_v44 }
 0x1b0   :  { %2893 = vmatpush1.bf16.msra.mxu0 %v9514_v45  ;;  %2934 = vmatpush1.bf16.msra.mxu1 %v9516_v49  ;;  %v11585_v45 = vld.sshfl [vmem:[%s12049_s0] sm:$0x33 pattern:$0x76325410]  ;;  %v9391_v49 = vcombine.high %v228_v35, %v244_v36  ;;  %v9425_v62 = vcombine.high %v261_v52, %v277_v54  ;;  %v9424_v1 = vcombine.low %v261_v52, %v277_v54  ;;  %v389_v20 = vld [vmem:[#allocation2 + $0x768] sm:$0xff] }
 0x1b1   :  { %2894 = vmatprep.subr.bf16.mxu0 %v9547_v50  ;;  %2935 = vmatprep.subr.bf16.mxu1 %v9549_v55  ;;  %v260_v50 = vld [vmem:[#allocation2 + $0x360] sm:$0xff]  ;;  %v9390_v55 = vcombine.low %v228_v35, %v244_v36  ;;  %v437_v38 = vld [vmem:[#allocation2 + $0x8e8] sm:$0xff] }
 0x1b2   :  { %v469_v52 = vld [vmem:[#allocation2 + $0x9e8] sm:$0xff] }
 0x1b3   :  { %v533_v5 = vld [vmem:[#allocation2 + $0xbe8] sm:$0xff] }
 0x1b4   :  { %2895 = vmatpush1.bf16.msra.mxu0 %v9546_v57  ;;  %2936 = vmatpush1.bf16.msra.mxu1 %v9548_v59  ;;  %v9423_v57 = vcombine.high %v260_v50, %v276_v51  ;;  %v292_v59 = vld [vmem:[#allocation2 + $0x460] sm:$0xff] }
 0x1b5   :  { %2896 = vmatprep.subr.bf16.mxu0 %v9579_v60  ;;  %2937 = vmatprep.subr.bf16.mxu1 %v9581_v0  ;;  %v308_v60 = vld [vmem:[#allocation2 + $0x4e0] sm:$0xff]  ;;  %v9422_v0 = vcombine.low %v260_v50, %v276_v51  ;;  %v453_v50 = vld [vmem:[#allocation2 + $0x968] sm:$0xff] }
 0x1b6   :  { %v9616_v63 = vcombine.low %v453_v50, %v469_v52 }
 0x1b8   :  { %2897 = vmatpush1.bf16.msra.mxu0 %v9578_v2  ;;  %2938 = vmatpush1.bf16.msra.mxu1 %v9580_v3  ;;  %v9455_v2 = vcombine.high %v292_v59, %v308_v60  ;;  %v324_v3 = vld [vmem:[#allocation2 + $0x560] sm:$0xff] }
 0x1b9   :  { %2898 = vmatprep.subr.bf16.mxu0 %v9611_v4  ;;  %2939 = vmatprep.subr.bf16.mxu1 %v9613_v8  ;;  %v340_v4 = vld [vmem:[#allocation2 + $0x5e0] sm:$0xff]  ;;  %v9454_v8 = vcombine.low %v292_v59, %v308_v60  ;;  %v485_v59 = vld [vmem:[#allocation2 + $0xa68] sm:$0xff]  ;;  %v9617_v60 = vcombine.high %v453_v50, %v469_v52  ;;  %v310_v52 = vld [vmem:[#allocation2 + $0x4f0] sm:$0xff] }
 0x1ba   :  { %v9648_v7 = vcombine.low %v485_v59, %v501_v61 }
 0x1bc   :  { %2899 = vmatpush1.bf16.msra.mxu0 %v9610_v9  ;;  %2940 = vmatpush1.bf16.msra.mxu1 %v9612_v10  ;;  %v9487_v9 = vcombine.high %v324_v3, %v340_v4  ;;  %v356_v10 = vld [vmem:[#allocation2 + $0x660] sm:$0xff] }
 0x1bd   :  { %2900 = vmatprep.subr.bf16.mxu0 %v9643_v11  ;;  %2941 = vmatprep.subr.bf16.mxu1 %v9645_v15  ;;  %v372_v11 = vld [vmem:[#allocation2 + $0x6e0] sm:$0xff]  ;;  %v9486_v15 = vcombine.low %v324_v3, %v340_v4  ;;  %v517_v3 = vld [vmem:[#allocation2 + $0xb68] sm:$0xff]  ;;  %v9649_v4 = vcombine.high %v485_v59, %v501_v61  ;;  %v342_v61 = vld [vmem:[#allocation2 + $0x5f0] sm:$0xff] }
 0x1be   :  { %v9518_v28 = vcombine.low %v356_v10, %v372_v11 }
 0x1c0   :  { %2901 = vmatpush1.bf16.msra.mxu0 %v9642_v17  ;;  %2942 = vmatpush1.bf16.msra.mxu1 %v9644_v18  ;;  %v9519_v17 = vcombine.high %v356_v10, %v372_v11  ;;  %v388_v18 = vld [vmem:[#allocation2 + $0x760] sm:$0xff]  ;;  %v167_v10 = vld [vmem:[#allocation2 + $0x78] sm:$0xff]  ;;  %v9681_v11 = vcombine.high %v517_v3, %v533_v5 }
 0x1c1   :  { %2902 = vmatprep.subr.bf16.mxu0 %v9675_v19  ;;  %2943 = vmatprep.subr.bf16.mxu1 %v9677_v23  ;;  %v404_v19 = vld [vmem:[#allocation2 + $0x7e0] sm:$0xff]  ;;  %v405_v23 = vld [vmem:[#allocation2 + $0x7e8] sm:$0xff] }
 0x1c2   :  { %v9551_v43 = vcombine.high %v388_v18, %v404_v19  ;;  %v9553_v36 = vcombine.high %v389_v20, %v405_v23  ;;  %v9552_v44 = vcombine.low %v389_v20, %v405_v23  ;;  %v215_v20 = vld [vmem:[#allocation2 + $0x1f8] sm:$0xff] }
 0x1c4   :  { %2903 = vmatpush1.bf16.msra.mxu0 %v9674_v25  ;;  %2944 = vmatpush1.bf16.msra.mxu1 %v9676_v26 }
 0x1c5   :  { %2962 = vmatprep.subr.bf16.mxu0 %v9327_v27  ;;  %3003 = vmatprep.subr.bf16.mxu1 %v9329_v31  ;;  %v9520_v31 = vcombine.low %v357_v12, %v373_v14  ;;  %v183_v12 = vld [vmem:[#allocation2 + $0xf8] sm:$0xff]  ;;  %v9680_v14 = vcombine.low %v517_v3, %v533_v5  ;;  %v374_v5 = vld [vmem:[#allocation2 + $0x6f0] sm:$0xff] }
 0x1c6   :  { %v9332_v23 = vcombine.low %v167_v10, %v183_v12 }
 0x1c7   :  { %2913 = vmatmul.mubr.bf16.vlgmr.msra.gmra.mrb[20].mxu0 %v11585_v45  ;;  %2954 = vmatmul.mubr.bf16.vlgmr.msra.gmra.mrb[20].mxu1 %v11585_v45 }
 0x1c8   :  { %2963 = vmatpush1.bf16.msra.mxu0 %v9326_v32  ;;  %3004 = vmatpush1.bf16.msra.mxu1 %v9328_v33  ;;  %v420_v32 = vld [vmem:[#allocation2 + $0x860] sm:$0xff] }
 0x1c9   :  { %2964 = vmatprep.subr.bf16.mxu0 %v9359_v34  ;;  %3005 = vmatprep.subr.bf16.mxu1 %v9361_v39  ;;  %v436_v33 = vld [vmem:[#allocation2 + $0x8e0] sm:$0xff]  ;;  %v421_v34 = vld [vmem:[#allocation2 + $0x868] sm:$0xff]  ;;  %v9550_v39 = vcombine.low %v388_v18, %v404_v19  ;;  %v199_v18 = vld [vmem:[#allocation2 + $0x178] sm:$0xff]  ;;  %v9333_v19 = vcombine.high %v167_v10, %v183_v12 }
 0x1ca   :  { %9698 = vmatprep.mubr.msk.bf16.mxu0 %vm2466_vm0, %v11533_v46  ;;  %9699 = vmatprep.mubr.msk.bf16.mxu1 %vm2466_vm0, %v11533_v46  ;;  %v9585_v51 = vcombine.high %v421_v34, %v437_v38  ;;  %v9584_v54 = vcombine.low %v421_v34, %v437_v38  ;;  %v278_v38 = vld [vmem:[#allocation2 + $0x3f0] sm:$0xff] }
 0x1cb   :  { %v390_v12 = vld [vmem:[#allocation2 + $0x770] sm:$0xff] }
 0x1cc   :  { %2965 = vmatpush1.bf16.msra.mxu0 %v9358_v47  ;;  %3006 = vmatpush1.bf16.msra.mxu1 %v9360_v48  ;;  %v9583_v47 = vcombine.high %v420_v32, %v436_v33  ;;  %v452_v48 = vld [vmem:[#allocation2 + $0x960] sm:$0xff] }
 0x1cd   :  { %2966 = vmatprep.subr.bf16.mxu0 %v9391_v49  ;;  %3007 = vmatprep.subr.bf16.mxu1 %v9393_v53  ;;  %v468_v49 = vld [vmem:[#allocation2 + $0x9e0] sm:$0xff]  ;;  %v9582_v53 = vcombine.low %v420_v32, %v436_v33  ;;  %v9364_v33 = vcombine.low %v199_v18, %v215_v20 }
 0x1d0   :  { %2967 = vmatpush1.bf16.msra.mxu0 %v9390_v55  ;;  %3008 = vmatpush1.bf16.msra.mxu1 %v9392_v56  ;;  %v9615_v55 = vcombine.high %v452_v48, %v468_v49  ;;  %v484_v56 = vld [vmem:[#allocation2 + $0xa60] sm:$0xff] }
 0x1d1   :  { %2968 = vmatprep.subr.bf16.mxu0 %v9423_v57  ;;  %3009 = vmatprep.subr.bf16.mxu1 %v9425_v62  ;;  %v500_v57 = vld [vmem:[#allocation2 + $0xae0] sm:$0xff]  ;;  %v9614_v62 = vcombine.low %v452_v48, %v468_v49 }
 0x1d4   :  { %2969 = vmatpush1.bf16.msra.mxu0 %v9422_v0  ;;  %3010 = vmatpush1.bf16.msra.mxu1 %v9424_v1  ;;  %v9647_v0 = vcombine.high %v484_v56, %v500_v57  ;;  %v516_v1 = vld [vmem:[#allocation2 + $0xb60] sm:$0xff] }
 0x1d5   :  { %2970 = vmatprep.subr.bf16.mxu0 %v9455_v2  ;;  %3011 = vmatprep.subr.bf16.mxu1 %v9457_v6  ;;  %v532_v2 = vld [vmem:[#allocation2 + $0xbe0] sm:$0xff]  ;;  %v9646_v6 = vcombine.low %v484_v56, %v500_v57 }
 0x1d8   :  { %2971 = vmatpush1.bf16.msra.mxu0 %v9454_v8  ;;  %3012 = vmatpush1.bf16.msra.mxu1 %v9456_v58  ;;  %v9679_v8 = vcombine.high %v516_v1, %v532_v2  ;;  %v166_v58 = vld [vmem:[#allocation2 + $0x70] sm:$0xff] }
 0x1d9   :  { %2972 = vmatprep.subr.bf16.mxu0 %v9487_v9  ;;  %3013 = vmatprep.subr.bf16.mxu1 %v9489_v13  ;;  %v182_v9 = vld [vmem:[#allocation2 + $0xf0] sm:$0xff]  ;;  %v9678_v13 = vcombine.low %v516_v1, %v532_v2 }
 0x1da   :  { %v11593_v21 = vpop.f32.mrb[4].mxu0  ;;  %v11595_v24 = vpop.f32.mrb[4].mxu1 }
 0x1db   :  { %v11597_v25 = vpop.f32.mrb[5].mxu0  ;;  %v11599_v26 = vpop.f32.mrb[5].mxu1 }
 0x1dc   :  { %v2590_v27 = vpop.f32.mrb[6].mxu0  ;;  %2973 = vmatpush1.bf16.msra.mxu0 %v9486_v15  ;;  %v2631_v29 = vpop.f32.mrb[6].mxu1  ;;  %3014 = vmatpush1.bf16.msra.mxu1 %v9488_v16  ;;  %v9331_v15 = vcombine.high %v166_v58, %v182_v9  ;;  %v198_v16 = vld [vmem:[#allocation2 + $0x170] sm:$0xff] }
 0x1dd   :  { %v2591_v30 = vpop.f32.mrb[7].mxu0  ;;  %2974 = vmatprep.subr.bf16.mxu0 %v9519_v17  ;;  %v2632_v35 = vpop.f32.mrb[7].mxu1  ;;  %3015 = vmatprep.subr.bf16.mxu1 %v9521_v22  ;;  %v214_v17 = vld [vmem:[#allocation2 + $0x1f0] sm:$0xff]  ;;  %v9330_v22 = vcombine.low %v166_v58, %v182_v9  ;;  %v9365_v29 = vcombine.high %v199_v18, %v215_v20 }
 0x1de   :  { %v9363_v27 = vcombine.high %v198_v16, %v214_v17  ;;  %v246_v30 = vld [vmem:[#allocation2 + $0x2f0] sm:$0xff]  ;;  %v9362_v32 = vcombine.low %v198_v16, %v214_v17  ;;  %v391_v16 = vld [vmem:[#allocation2 + $0x778] sm:$0xff] }
 0x1df   :  { %v407_v17 = vld [vmem:[#allocation2 + $0x7f8] sm:$0xff] }
 0x1e0   :  { %2975 = vmatpush1.bf16.msra.mxu0 %v9518_v28  ;;  %3016 = vmatpush1.bf16.msra.mxu1 %v9520_v31  ;;  %v230_v28 = vld [vmem:[#allocation2 + $0x270] sm:$0xff]  ;;  %v231_v31 = vld [vmem:[#allocation2 + $0x278] sm:$0xff] }
 0x1e1   :  { %2976 = vmatprep.subr.bf16.mxu0 %v9551_v43  ;;  %3017 = vmatprep.subr.bf16.mxu1 %v9553_v36  ;;  %v247_v43 = vld [vmem:[#allocation2 + $0x2f8] sm:$0xff]  ;;  %v9395_v34 = vcombine.high %v230_v28, %v246_v30  ;;  %v262_v36 = vld [vmem:[#allocation2 + $0x370] sm:$0xff] }
 0x1e2   :  { %v9397_v35 = vcombine.high %v231_v31, %v247_v43  ;;  %v9396_v48 = vcombine.low %v231_v31, %v247_v43  ;;  %v9427_v49 = vcombine.high %v262_v36, %v278_v38  ;;  %v422_v31 = vld [vmem:[#allocation2 + $0x870] sm:$0xff] }
 0x1e3   :  { %v438_v43 = vld [vmem:[#allocation2 + $0x8f0] sm:$0xff] }
 0x1e4   :  { %2977 = vmatpush1.bf16.msra.mxu0 %v9550_v39  ;;  %3018 = vmatpush1.bf16.msra.mxu1 %v9552_v44  ;;  %v263_v39 = vld [vmem:[#allocation2 + $0x378] sm:$0xff] }
 0x1e5   :  { %2978 = vmatprep.subr.bf16.mxu0 %v9583_v47  ;;  %3019 = vmatprep.subr.bf16.mxu1 %v9585_v51  ;;  %v279_v44 = vld [vmem:[#allocation2 + $0x3f8] sm:$0xff]  ;;  %v9394_v47 = vcombine.low %v230_v28, %v246_v30  ;;  %v294_v51 = vld [vmem:[#allocation2 + $0x470] sm:$0xff]  ;;  %v9557_v30 = vcombine.high %v391_v16, %v407_v17 }
 0x1e6   :  { %v9429_v50 = vcombine.high %v263_v39, %v279_v44  ;;  %v9428_v56 = vcombine.low %v263_v39, %v279_v44  ;;  %v9459_v57 = vcombine.high %v294_v51, %v310_v52  ;;  %v454_v39 = vld [vmem:[#allocation2 + $0x970] sm:$0xff] }
 0x1e7   :  { %v470_v44 = vld [vmem:[#allocation2 + $0x9f0] sm:$0xff] }
 0x1e8   :  { %2979 = vmatpush1.bf16.msra.mxu0 %v9582_v53  ;;  %3020 = vmatpush1.bf16.msra.mxu1 %v9584_v54  ;;  %v295_v53 = vld [vmem:[#allocation2 + $0x478] sm:$0xff] }
 0x1e9   :  { %2980 = vmatprep.subr.bf16.mxu0 %v9615_v55  ;;  %3021 = vmatprep.subr.bf16.mxu1 %v9617_v60  ;;  %v311_v54 = vld [vmem:[#allocation2 + $0x4f8] sm:$0xff]  ;;  %v9426_v55 = vcombine.low %v262_v36, %v278_v38  ;;  %v326_v60 = vld [vmem:[#allocation2 + $0x570] sm:$0xff]  ;;  %v9587_v36 = vcombine.high %v422_v31, %v438_v43 }
 0x1ea   :  { %v9461_v59 = vcombine.high %v295_v53, %v311_v54  ;;  %v9460_v1 = vcombine.low %v295_v53, %v311_v54  ;;  %v9491_v2 = vcombine.high %v326_v60, %v342_v61  ;;  %v486_v53 = vld [vmem:[#allocation2 + $0xa70] sm:$0xff] }
 0x1eb   :  { %v502_v54 = vld [vmem:[#allocation2 + $0xaf0] sm:$0xff] }
 0x1ec   :  { %2981 = vmatpush1.bf16.msra.mxu0 %v9614_v62  ;;  %3022 = vmatpush1.bf16.msra.mxu1 %v9616_v63  ;;  %v327_v62 = vld [vmem:[#allocation2 + $0x578] sm:$0xff] }
 0x1ed   :  { %2982 = vmatprep.subr.bf16.mxu0 %v9647_v0  ;;  %3023 = vmatprep.subr.bf16.mxu1 %v9649_v4  ;;  %v343_v63 = vld [vmem:[#allocation2 + $0x5f8] sm:$0xff]  ;;  %v9458_v0 = vcombine.low %v294_v51, %v310_v52  ;;  %v358_v4 = vld [vmem:[#allocation2 + $0x670] sm:$0xff]  ;;  %v9619_v51 = vcombine.high %v454_v39, %v470_v44 }
 0x1ee   :  { %v9493_v3 = vcombine.high %v327_v62, %v343_v63  ;;  %v9492_v58 = vcombine.low %v327_v62, %v343_v63  ;;  %v9523_v9 = vcombine.high %v358_v4, %v374_v5  ;;  %v9522_v20 = vcombine.low %v358_v4, %v374_v5  ;;  %v518_v62 = vld [vmem:[#allocation2 + $0xb70] sm:$0xff] }
 0x1ef   :  { %v534_v63 = vld [vmem:[#allocation2 + $0xbf0] sm:$0xff] }
 0x1f0   :  { %2983 = vmatpush1.bf16.msra.mxu0 %v9646_v6  ;;  %3024 = vmatpush1.bf16.msra.mxu1 %v9648_v7  ;;  %v359_v6 = vld [vmem:[#allocation2 + $0x678] sm:$0xff]  ;;  %v9683_v4 = vcombine.high %v518_v62, %v534_v63 }
 0x1f1   :  { %2984 = vmatprep.subr.bf16.mxu0 %v9679_v8  ;;  %3025 = vmatprep.subr.bf16.mxu1 %v9681_v11  ;;  %v375_v7 = vld [vmem:[#allocation2 + $0x6f8] sm:$0xff]  ;;  %v9490_v8 = vcombine.low %v326_v60, %v342_v61  ;;  %v9651_v60 = vcombine.high %v486_v53, %v502_v54 }
 0x1f2   :  { %v9525_v11 = vcombine.high %v359_v6, %v375_v7 }
 0x1f4   :  { %2985 = vmatpush1.bf16.msra.mxu0 %v9678_v13  ;;  %3026 = vmatpush1.bf16.msra.mxu1 %v9680_v14  ;;  %v406_v13 = vld [vmem:[#allocation2 + $0x7f0] sm:$0xff] }
 0x1f5   :  { %3044 = vmatprep.subr.bf16.mxu0 %v9331_v15  ;;  %3085 = vmatprep.subr.bf16.mxu1 %v9333_v19  ;;  %v9555_v28 = vcombine.high %v390_v12, %v406_v13 }
 0x1f7   :  { %2995 = vmatmul.mubr.bf16.vlgmr.msra.gmra.mrb[24].mxu0 %v11585_v45  ;;  %3036 = vmatmul.mubr.bf16.vlgmr.msra.gmra.mrb[24].mxu1 %v11585_v45 }
 0x1f8   :  { %3045 = vmatpush1.bf16.msra.mxu0 %v9330_v22  ;;  %3086 = vmatpush1.bf16.msra.mxu1 %v9332_v23 }
 0x1f9   :  { %3046 = vmatprep.subr.bf16.mxu0 %v9363_v27  ;;  %3087 = vmatprep.subr.bf16.mxu1 %v9365_v29  ;;  %v9524_v27 = vcombine.low %v359_v6, %v375_v7  ;;  %v3126_v6 = vld [vmem:[#allocation5] sm:$0xff] }
 0x1fa   :  { %9700 = vmatprep.mubr.msk.bf16.mxu0 %vm2466_vm0, %v11533_v46  ;;  %9701 = vmatprep.mubr.msk.bf16.mxu1 %vm2466_vm0, %v11533_v46  ;;  %v3142_v7 = vld [vmem:[#allocation5 + $0x80] sm:$0xff] }
 0x1fc   :  { %3047 = vmatpush1.bf16.msra.mxu0 %v9362_v32  ;;  %3088 = vmatpush1.bf16.msra.mxu1 %v9364_v33  ;;  %v423_v32 = vld [vmem:[#allocation2 + $0x878] sm:$0xff] }
 0x1fd   :  { %3048 = vmatprep.subr.bf16.mxu0 %v9395_v34  ;;  %3089 = vmatprep.subr.bf16.mxu1 %v9397_v35  ;;  %v439_v33 = vld [vmem:[#allocation2 + $0x8f8] sm:$0xff]  ;;  %v9554_v34 = vcombine.low %v390_v12, %v406_v13  ;;  %v9556_v35 = vcombine.low %v391_v16, %v407_v17  ;;  %v9703_v12 = vcombine.high %v3126_v6, %v3142_v7  ;;  %v3158_v16 = vld [vmem:[#allocation5 + $0x100] sm:$0xff] }
 0x1fe   :  { %v9589_v38 = vcombine.high %v423_v32, %v439_v33  ;;  %v3174_v17 = vld [vmem:[#allocation5 + $0x180] sm:$0xff] }
 0x200   :  { %3049 = vmatpush1.bf16.msra.mxu0 %v9394_v47  ;;  %3090 = vmatpush1.bf16.msra.mxu1 %v9396_v48  ;;  %v455_v47 = vld [vmem:[#allocation2 + $0x978] sm:$0xff] }
 0x201   :  { %3050 = vmatprep.subr.bf16.mxu0 %v9427_v49  ;;  %3091 = vmatprep.subr.bf16.mxu1 %v9429_v50  ;;  %v471_v48 = vld [vmem:[#allocation2 + $0x9f8] sm:$0xff]  ;;  %v9586_v49 = vcombine.low %v422_v31, %v438_v43  ;;  %v9588_v50 = vcombine.low %v423_v32, %v439_v33  ;;  %v3191_v31 = vld [vmem:[#allocation5 + $0x208] sm:$0xff]  ;;  %v9734_v32 = vcombine.low %v3158_v16, %v3174_v17 }
 0x202   :  { %v9621_v52 = vcombine.high %v455_v47, %v471_v48  ;;  %v3207_v43 = vld [vmem:[#allocation5 + $0x288] sm:$0xff] }
 0x204   :  { %3051 = vmatpush1.bf16.msra.mxu0 %v9426_v55  ;;  %3092 = vmatpush1.bf16.msra.mxu1 %v9428_v56  ;;  %v487_v55 = vld [vmem:[#allocation2 + $0xa78] sm:$0xff] }
 0x205   :  { %3052 = vmatprep.subr.bf16.mxu0 %v9459_v57  ;;  %3093 = vmatprep.subr.bf16.mxu1 %v9461_v59  ;;  %v503_v56 = vld [vmem:[#allocation2 + $0xaf8] sm:$0xff]  ;;  %v9618_v57 = vcombine.low %v454_v39, %v470_v44  ;;  %v9620_v59 = vcombine.low %v455_v47, %v471_v48  ;;  %v3223_v39 = vld [vmem:[#allocation5 + $0x308] sm:$0xff]  ;;  %v9768_v47 = vcombine.low %v3191_v31, %v3207_v43 }
 0x206   :  { %v9653_v61 = vcombine.high %v487_v55, %v503_v56  ;;  %v3239_v44 = vld [vmem:[#allocation5 + $0x388] sm:$0xff] }
 0x208   :  { %3053 = vmatpush1.bf16.msra.mxu0 %v9458_v0  ;;  %3094 = vmatpush1.bf16.msra.mxu1 %v9460_v1  ;;  %v519_v0 = vld [vmem:[#allocation2 + $0xb78] sm:$0xff] }
 0x209   :  { %3054 = vmatprep.subr.bf16.mxu0 %v9491_v2  ;;  %3095 = vmatprep.subr.bf16.mxu1 %v9493_v3  ;;  %v535_v1 = vld [vmem:[#allocation2 + $0xbf8] sm:$0xff]  ;;  %v9650_v2 = vcombine.low %v486_v53, %v502_v54  ;;  %v9652_v3 = vcombine.low %v487_v55, %v503_v56  ;;  %v3271_v53 = vld [vmem:[#allocation5 + $0x488] sm:$0xff]  ;;  %v9800_v55 = vcombine.low %v3223_v39, %v3239_v44 }
 0x20a   :  { %v11607_v10 = vpop.f32.mrb[8].mxu0  ;;  %v11609_v14 = vpop.f32.mrb[8].mxu1  ;;  %v9685_v5 = vcombine.high %v519_v0, %v535_v1 }
 0x20b   :  { %v11611_v15 = vpop.f32.mrb[9].mxu0  ;;  %v11613_v18 = vpop.f32.mrb[9].mxu1 }
 0x20c   :  { %v2672_v19 = vpop.f32.mrb[10].mxu0  ;;  %3055 = vmatpush1.bf16.msra.mxu0 %v9490_v8  ;;  %v2713_v22 = vpop.f32.mrb[10].mxu1  ;;  %3096 = vmatpush1.bf16.msra.mxu1 %v9492_v58  ;;  %v3127_v8 = vld [vmem:[#allocation5 + $0x8] sm:$0xff] }
 0x20d   :  { %v2673_v23 = vpop.f32.mrb[11].mxu0  ;;  %3056 = vmatprep.subr.bf16.mxu0 %v9523_v9  ;;  %v2714_v29 = vpop.f32.mrb[11].mxu1  ;;  %3097 = vmatprep.subr.bf16.mxu1 %v9525_v11  ;;  %v3143_v58 = vld [vmem:[#allocation5 + $0x88] sm:$0xff]  ;;  %v9682_v9 = vcombine.low %v518_v62, %v534_v63  ;;  %v9684_v11 = vcombine.low %v519_v0, %v535_v1  ;;  %v9702_v22 = vcombine.low %v3126_v6, %v3142_v7 }
 0x20e   :  { %v9705_v13 = vcombine.high %v3127_v8, %v3143_v58  ;;  %v3159_v19 = vld [vmem:[#allocation5 + $0x108] sm:$0xff]  ;;  %v9704_v23 = vcombine.low %v3127_v8, %v3143_v58  ;;  %v3190_v29 = vld [vmem:[#allocation5 + $0x200] sm:$0xff] }
 0x20f   :  { %v3303_v62 = vld [vmem:[#allocation5 + $0x588] sm:$0xff] }
 0x210   :  { %3057 = vmatpush1.bf16.msra.mxu0 %v9522_v20  ;;  %3098 = vmatpush1.bf16.msra.mxu1 %v9524_v27  ;;  %v3175_v20 = vld [vmem:[#allocation5 + $0x188] sm:$0xff]  ;;  %v9735_v27 = vcombine.high %v3158_v16, %v3174_v17 }
 0x211   :  { %3058 = vmatprep.subr.bf16.mxu0 %v9555_v28  ;;  %3099 = vmatprep.subr.bf16.mxu1 %v9557_v30  ;;  %v9737_v28 = vcombine.high %v3159_v19, %v3175_v20  ;;  %v3206_v30 = vld [vmem:[#allocation5 + $0x280] sm:$0xff]  ;;  %v9736_v33 = vcombine.low %v3159_v19, %v3175_v20  ;;  %v3335_v6 = vld [vmem:[#allocation5 + $0x688] sm:$0xff] }
 0x212   :  { %v3351_v19 = vld [vmem:[#allocation5 + $0x708] sm:$0xff] }
 0x213   :  { %v3367_v20 = vld [vmem:[#allocation5 + $0x788] sm:$0xff] }
 0x214   :  { %3059 = vmatpush1.bf16.msra.mxu0 %v9554_v34  ;;  %3100 = vmatpush1.bf16.msra.mxu1 %v9556_v35  ;;  %v9767_v34 = vcombine.high %v3190_v29, %v3206_v30  ;;  %v9769_v35 = vcombine.high %v3191_v31, %v3207_v43 }
 0x215   :  { %3060 = vmatprep.subr.bf16.mxu0 %v9587_v36  ;;  %3101 = vmatprep.subr.bf16.mxu1 %v9589_v38  ;;  %v3222_v36 = vld [vmem:[#allocation5 + $0x300] sm:$0xff] }
 0x216   :  { %v3238_v38 = vld [vmem:[#allocation5 + $0x380] sm:$0xff] }
 0x217   :  { %v9799_v48 = vcombine.high %v3222_v36, %v3238_v38  ;;  %v9798_v54 = vcombine.low %v3222_v36, %v3238_v38  ;;  %v3399_v36 = vld [vmem:[#allocation5 + $0x888] sm:$0xff] }
 0x218   :  { %3061 = vmatpush1.bf16.msra.mxu0 %v9586_v49  ;;  %3102 = vmatpush1.bf16.msra.mxu1 %v9588_v50  ;;  %v9801_v49 = vcombine.high %v3223_v39, %v3239_v44  ;;  %v3254_v50 = vld [vmem:[#allocation5 + $0x400] sm:$0xff]  ;;  %v9928_v39 = vcombine.low %v3351_v19, %v3367_v20 }
 0x219   :  { %3062 = vmatprep.subr.bf16.mxu0 %v9619_v51  ;;  %3103 = vmatprep.subr.bf16.mxu1 %v9621_v52  ;;  %v3270_v51 = vld [vmem:[#allocation5 + $0x480] sm:$0xff]  ;;  %v3255_v52 = vld [vmem:[#allocation5 + $0x408] sm:$0xff] }
 0x21a   :  { %v9831_v56 = vcombine.high %v3254_v50, %v3270_v51  ;;  %v9830_v63 = vcombine.low %v3254_v50, %v3270_v51  ;;  %v9832_v0 = vcombine.low %v3255_v52, %v3271_v53  ;;  %v3431_v50 = vld [vmem:[#allocation5 + $0x988] sm:$0xff] }
 0x21c   :  { %3063 = vmatpush1.bf16.msra.mxu0 %v9618_v57  ;;  %3104 = vmatpush1.bf16.msra.mxu1 %v9620_v59  ;;  %v9833_v57 = vcombine.high %v3255_v52, %v3271_v53  ;;  %v3286_v59 = vld [vmem:[#allocation5 + $0x500] sm:$0xff] }
 0x21d   :  { %3064 = vmatprep.subr.bf16.mxu0 %v9651_v60  ;;  %3105 = vmatprep.subr.bf16.mxu1 %v9653_v61  ;;  %v3302_v60 = vld [vmem:[#allocation5 + $0x580] sm:$0xff]  ;;  %v3287_v61 = vld [vmem:[#allocation5 + $0x508] sm:$0xff] }
 0x21e   :  { %v9863_v1 = vcombine.high %v3286_v59, %v3302_v60  ;;  %v9862_v7 = vcombine.low %v3286_v59, %v3302_v60  ;;  %v9864_v8 = vcombine.low %v3287_v61, %v3303_v62  ;;  %v3463_v59 = vld [vmem:[#allocation5 + $0xa88] sm:$0xff] }
 0x220   :  { %3065 = vmatpush1.bf16.msra.mxu0 %v9650_v2  ;;  %3106 = vmatpush1.bf16.msra.mxu1 %v9652_v3  ;;  %v9865_v2 = vcombine.high %v3287_v61, %v3303_v62  ;;  %v3318_v3 = vld [vmem:[#allocation5 + $0x600] sm:$0xff] }
 0x221   :  { %3066 = vmatprep.subr.bf16.mxu0 %v9683_v4  ;;  %3107 = vmatprep.subr.bf16.mxu1 %v9685_v5  ;;  %v3334_v4 = vld [vmem:[#allocation5 + $0x680] sm:$0xff]  ;;  %v3319_v5 = vld [vmem:[#allocation5 + $0x608] sm:$0xff] }
 0x222   :  { %v9895_v58 = vcombine.high %v3318_v3, %v3334_v4 }
 0x224   :  { %3067 = vmatpush1.bf16.msra.mxu0 %v9682_v9  ;;  %3108 = vmatpush1.bf16.msra.mxu1 %v9684_v11  ;;  %v9897_v11 = vcombine.high %v3319_v5, %v3335_v6 }
 0x225   :  { %5430 = vmatprep.subr.bf16.mxu0 %v9703_v12  ;;  %5471 = vmatprep.subr.bf16.mxu1 %v9705_v13  ;;  %v3350_v12 = vld [vmem:[#allocation5 + $0x700] sm:$0xff] }
 0x226   :  { %v3366_v13 = vld [vmem:[#allocation5 + $0x780] sm:$0xff] }
 0x227   :  { %3077 = vmatmul.mubr.bf16.vlgmr.msra.gmra.mrb[28].mxu0 %v11585_v45  ;;  %3118 = vmatmul.mubr.bf16.vlgmr.msra.gmra.mrb[28].mxu1 %v11585_v45  ;;  %v9766_v45 = vcombine.low %v3190_v29, %v3206_v30  ;;  %v9896_v30 = vcombine.low %v3319_v5, %v3335_v6  ;;  %v9927_v31 = vcombine.high %v3350_v12, %v3366_v13 }
 0x228   :  { %5431 = vmatpush1.bf16.msra.mxu0 %v9702_v22  ;;  %5472 = vmatpush1.bf16.msra.mxu1 %v9704_v23  ;;  %v9926_v38 = vcombine.low %v3350_v12, %v3366_v13  ;;  %v3145_v12 = vld [vmem:[#allocation5 + $0x98] sm:$0xff] }
 0x229   :  { %5432 = vmatprep.subr.bf16.mxu0 %v9735_v27  ;;  %5473 = vmatprep.subr.bf16.mxu1 %v9737_v28  ;;  %v9894_v27 = vcombine.low %v3318_v3, %v3334_v4  ;;  %v3495_v3 = vld [vmem:[#allocation5 + $0xb88] sm:$0xff] }
 0x22a   :  { %10086 = vmatprep.mubr.msk.bf16.mxu0 %vm2466_vm0, %v11533_v46  ;;  %10087 = vmatprep.mubr.msk.bf16.mxu1 %vm2466_vm0, %v11533_v46 }
 0x22c   :  { %5433 = vmatpush1.bf16.msra.mxu0 %v9734_v32  ;;  %5474 = vmatpush1.bf16.msra.mxu1 %v9736_v33  ;;  %v9929_v32 = vcombine.high %v3351_v19, %v3367_v20  ;;  %v3382_v33 = vld [vmem:[#allocation5 + $0x800] sm:$0xff] }
 0x22d   :  { %5434 = vmatprep.subr.bf16.mxu0 %v9767_v34  ;;  %5475 = vmatprep.subr.bf16.mxu1 %v9769_v35  ;;  %v3398_v34 = vld [vmem:[#allocation5 + $0x880] sm:$0xff]  ;;  %v3383_v35 = vld [vmem:[#allocation5 + $0x808] sm:$0xff] }
 0x22e   :  { %v9959_v44 = vcombine.high %v3382_v33, %v3398_v34  ;;  %v9958_v51 = vcombine.low %v3382_v33, %v3398_v34  ;;  %v9960_v52 = vcombine.low %v3383_v35, %v3399_v36  ;;  %v3192_v34 = vld [vmem:[#allocation5 + $0x210] sm:$0xff] }
 0x230   :  { %5435 = vmatpush1.bf16.msra.mxu0 %v9766_v45  ;;  %5476 = vmatpush1.bf16.msra.mxu1 %v9768_v47  ;;  %v9961_v45 = vcombine.high %v3383_v35, %v3399_v36  ;;  %v3414_v47 = vld [vmem:[#allocation5 + $0x900] sm:$0xff]  ;;  %v3208_v35 = vld [vmem:[#allocation5 + $0x290] sm:$0xff] }
 0x231   :  { %5436 = vmatprep.subr.bf16.mxu0 %v9799_v48  ;;  %5477 = vmatprep.subr.bf16.mxu1 %v9801_v49  ;;  %v3430_v48 = vld [vmem:[#allocation5 + $0x980] sm:$0xff]  ;;  %v3415_v49 = vld [vmem:[#allocation5 + $0x908] sm:$0xff]  ;;  %v11632_v36 = vld.sshfl [vmem:[%s12049_s0] sm:$0x33 pattern:$0x76325410] }
 0x232   :  { %v9991_v53 = vcombine.high %v3414_v47, %v3430_v48  ;;  %v9990_v60 = vcombine.low %v3414_v47, %v3430_v48  ;;  %v9992_v61 = vcombine.low %v3415_v49, %v3431_v50  ;;  %v9771_v47 = vcombine.high %v3192_v34, %v3208_v35 }
 0x234   :  { %5437 = vmatpush1.bf16.msra.mxu0 %v9798_v54  ;;  %5478 = vmatpush1.bf16.msra.mxu1 %v9800_v55  ;;  %v9993_v54 = vcombine.high %v3415_v49, %v3431_v50  ;;  %v3446_v55 = vld [vmem:[#allocation5 + $0xa00] sm:$0xff]  ;;  %v3224_v49 = vld [vmem:[#allocation5 + $0x310] sm:$0xff] }
 0x235   :  { %5438 = vmatprep.subr.bf16.mxu0 %v9831_v56  ;;  %5479 = vmatprep.subr.bf16.mxu1 %v9833_v57  ;;  %v3462_v56 = vld [vmem:[#allocation5 + $0xa80] sm:$0xff]  ;;  %v3447_v57 = vld [vmem:[#allocation5 + $0xa08] sm:$0xff]  ;;  %v3240_v50 = vld [vmem:[#allocation5 + $0x390] sm:$0xff] }
 0x236   :  { %v10023_v62 = vcombine.high %v3446_v55, %v3462_v56  ;;  %v10022_v4 = vcombine.low %v3446_v55, %v3462_v56  ;;  %v10024_v5 = vcombine.low %v3447_v57, %v3463_v59  ;;  %v9803_v55 = vcombine.high %v3224_v49, %v3240_v50 }
 0x238   :  { %5439 = vmatpush1.bf16.msra.mxu0 %v9830_v63  ;;  %5480 = vmatpush1.bf16.msra.mxu1 %v9832_v0  ;;  %v10025_v63 = vcombine.high %v3447_v57, %v3463_v59  ;;  %v3478_v0 = vld [vmem:[#allocation5 + $0xb00] sm:$0xff]  ;;  %v3256_v57 = vld [vmem:[#allocation5 + $0x410] sm:$0xff] }
 0x239   :  { %5440 = vmatprep.subr.bf16.mxu0 %v9863_v1  ;;  %5481 = vmatprep.subr.bf16.mxu1 %v9865_v2  ;;  %v3494_v1 = vld [vmem:[#allocation5 + $0xb80] sm:$0xff]  ;;  %v3479_v2 = vld [vmem:[#allocation5 + $0xb08] sm:$0xff]  ;;  %v3272_v59 = vld [vmem:[#allocation5 + $0x490] sm:$0xff] }
 0x23a   :  { %v11621_v9 = vpop.f32.mrb[12].mxu0  ;;  %v11623_v16 = vpop.f32.mrb[12].mxu1  ;;  %v10055_v6 = vcombine.high %v3478_v0, %v3494_v1  ;;  %v10054_v13 = vcombine.low %v3478_v0, %v3494_v1  ;;  %v10056_v19 = vcombine.low %v3479_v2, %v3495_v3  ;;  %v9835_v0 = vcombine.high %v3256_v57, %v3272_v59 }
 0x23b   :  { %v11625_v17 = vpop.f32.mrb[13].mxu0  ;;  %v11627_v22 = vpop.f32.mrb[13].mxu1 }
 0x23c   :  { %v2754_v23 = vpop.f32.mrb[14].mxu0  ;;  %5441 = vmatpush1.bf16.msra.mxu0 %v9862_v7  ;;  %v2795_v28 = vpop.f32.mrb[14].mxu1  ;;  %5482 = vmatpush1.bf16.msra.mxu1 %v9864_v8  ;;  %v10057_v7 = vcombine.high %v3479_v2, %v3495_v3  ;;  %v3128_v8 = vld [vmem:[#allocation5 + $0x10] sm:$0xff] }
 0x23d   :  { %v2755_v29 = vpop.f32.mrb[15].mxu0  ;;  %5442 = vmatprep.subr.bf16.mxu0 %v9895_v58  ;;  %v2796_v43 = vpop.f32.mrb[15].mxu1  ;;  %5483 = vmatprep.subr.bf16.mxu1 %v9897_v11  ;;  %v3144_v58 = vld [vmem:[#allocation5 + $0x90] sm:$0xff]  ;;  %v3129_v11 = vld [vmem:[#allocation5 + $0x18] sm:$0xff] }
 0x23e   :  { %v9707_v20 = vcombine.high %v3128_v8, %v3144_v58  ;;  %v9709_v23 = vcombine.high %v3129_v11, %v3145_v12  ;;  %v3176_v28 = vld [vmem:[#allocation5 + $0x190] sm:$0xff]  ;;  %v3161_v29 = vld [vmem:[#allocation5 + $0x118] sm:$0xff]  ;;  %v9708_v43 = vcombine.low %v3129_v11, %v3145_v12 }
 0x23f   :  { %v3288_v2 = vld [vmem:[#allocation5 + $0x510] sm:$0xff] }
 0x240   :  { %5443 = vmatpush1.bf16.msra.mxu0 %v9894_v27  ;;  %5484 = vmatpush1.bf16.msra.mxu1 %v9896_v30  ;;  %v3160_v27 = vld [vmem:[#allocation5 + $0x110] sm:$0xff]  ;;  %v3177_v30 = vld [vmem:[#allocation5 + $0x198] sm:$0xff] }
 0x241   :  { %5444 = vmatprep.subr.bf16.mxu0 %v9927_v31  ;;  %5485 = vmatprep.subr.bf16.mxu1 %v9929_v32  ;;  %v9706_v31 = vcombine.low %v3128_v8, %v3144_v58  ;;  %v9739_v32 = vcombine.high %v3160_v27, %v3176_v28  ;;  %v9741_v33 = vcombine.high %v3161_v29, %v3177_v30  ;;  %v3304_v3 = vld [vmem:[#allocation5 + $0x590] sm:$0xff] }
 0x242   :  { %v9867_v8 = vcombine.high %v3288_v2, %v3304_v3  ;;  %v3320_v11 = vld [vmem:[#allocation5 + $0x610] sm:$0xff] }
 0x243   :  { %v3336_v12 = vld [vmem:[#allocation5 + $0x690] sm:$0xff] }
 0x244   :  { %5445 = vmatpush1.bf16.msra.mxu0 %v9926_v38  ;;  %5486 = vmatpush1.bf16.msra.mxu1 %v9928_v39  ;;  %v3193_v38 = vld [vmem:[#allocation5 + $0x218] sm:$0xff] }
 0x245   :  { %5446 = vmatprep.subr.bf16.mxu0 %v9959_v44  ;;  %5487 = vmatprep.subr.bf16.mxu1 %v9961_v45  ;;  %v3209_v39 = vld [vmem:[#allocation5 + $0x298] sm:$0xff]  ;;  %v9738_v44 = vcombine.low %v3160_v27, %v3176_v28  ;;  %v9740_v45 = vcombine.low %v3161_v29, %v3177_v30  ;;  %v9899_v27 = vcombine.high %v3320_v11, %v3336_v12  ;;  %v3352_v30 = vld [vmem:[#allocation5 + $0x710] sm:$0xff] }
 0x246   :  { %v9773_v48 = vcombine.high %v3193_v38, %v3209_v39 }
 0x248   :  { %5447 = vmatpush1.bf16.msra.mxu0 %v9958_v51  ;;  %5488 = vmatpush1.bf16.msra.mxu1 %v9960_v52  ;;  %v3225_v51 = vld [vmem:[#allocation5 + $0x318] sm:$0xff] }
 0x249   :  { %5448 = vmatprep.subr.bf16.mxu0 %v9991_v53  ;;  %5489 = vmatprep.subr.bf16.mxu1 %v9993_v54  ;;  %v3241_v52 = vld [vmem:[#allocation5 + $0x398] sm:$0xff]  ;;  %v9770_v53 = vcombine.low %v3192_v34, %v3208_v35  ;;  %v9772_v54 = vcombine.low %v3193_v38, %v3209_v39  ;;  %v9898_v39 = vcombine.low %v3320_v11, %v3336_v12 }
 0x24a   :  { %v9805_v56 = vcombine.high %v3225_v51, %v3241_v52  ;;  %v3369_v34 = vld [vmem:[#allocation5 + $0x798] sm:$0xff] }
 0x24c   :  { %5449 = vmatpush1.bf16.msra.mxu0 %v9990_v60  ;;  %5490 = vmatpush1.bf16.msra.mxu1 %v9992_v61  ;;  %v3257_v60 = vld [vmem:[#allocation5 + $0x418] sm:$0xff] }
 0x24d   :  { %5450 = vmatprep.subr.bf16.mxu0 %v10023_v62  ;;  %5491 = vmatprep.subr.bf16.mxu1 %v10025_v63  ;;  %v3273_v61 = vld [vmem:[#allocation5 + $0x498] sm:$0xff]  ;;  %v9802_v62 = vcombine.low %v3224_v49, %v3240_v50  ;;  %v9804_v63 = vcombine.low %v3225_v51, %v3241_v52  ;;  %v3384_v51 = vld [vmem:[#allocation5 + $0x810] sm:$0xff] }
 0x24e   :  { %v9837_v1 = vcombine.high %v3257_v60, %v3273_v61  ;;  %v3400_v52 = vld [vmem:[#allocation5 + $0x890] sm:$0xff] }
 0x250   :  { %5451 = vmatpush1.bf16.msra.mxu0 %v10022_v4  ;;  %5492 = vmatpush1.bf16.msra.mxu1 %v10024_v5  ;;  %v3289_v4 = vld [vmem:[#allocation5 + $0x518] sm:$0xff] }
 0x251   :  { %5452 = vmatprep.subr.bf16.mxu0 %v10055_v6  ;;  %5493 = vmatprep.subr.bf16.mxu1 %v10057_v7  ;;  %v3305_v5 = vld [vmem:[#allocation5 + $0x598] sm:$0xff]  ;;  %v9834_v6 = vcombine.low %v3256_v57, %v3272_v59  ;;  %v9836_v7 = vcombine.low %v3257_v60, %v3273_v61  ;;  %v9963_v57 = vcombine.high %v3384_v51, %v3400_v52  ;;  %v3416_v60 = vld [vmem:[#allocation5 + $0x910] sm:$0xff] }
 0x252   :  { %v9869_v58 = vcombine.high %v3289_v4, %v3305_v5  ;;  %v3432_v61 = vld [vmem:[#allocation5 + $0x990] sm:$0xff] }
 0x254   :  { %5453 = vmatpush1.bf16.msra.mxu0 %v10054_v13  ;;  %5494 = vmatpush1.bf16.msra.mxu1 %v10056_v19  ;;  %v3321_v13 = vld [vmem:[#allocation5 + $0x618] sm:$0xff] }
 0x255   :  { %5512 = vmatprep.subr.bf16.mxu0 %v9707_v20  ;;  %5553 = vmatprep.subr.bf16.mxu1 %v9709_v23  ;;  %v3337_v19 = vld [vmem:[#allocation5 + $0x698] sm:$0xff]  ;;  %v9866_v20 = vcombine.low %v3288_v2, %v3304_v3  ;;  %v9868_v23 = vcombine.low %v3289_v4, %v3305_v5  ;;  %v9995_v2 = vcombine.high %v3416_v60, %v3432_v61  ;;  %v3448_v4 = vld [vmem:[#allocation5 + $0xa10] sm:$0xff] }
 0x256   :  { %v9901_v29 = vcombine.high %v3321_v13, %v3337_v19  ;;  %v3464_v5 = vld [vmem:[#allocation5 + $0xa90] sm:$0xff] }
 0x257   :  { %5463 = vmatmul.mubr.bf16.vlgmr.msra.gmra.mrb[32].mxu0 %v11632_v36  ;;  %5504 = vmatmul.mubr.bf16.vlgmr.msra.gmra.mrb[32].mxu1 %v11632_v36  ;;  %v10027_v11 = vcombine.high %v3448_v4, %v3464_v5 }
 0x258   :  { %5513 = vmatpush1.bf16.msra.mxu0 %v9706_v31  ;;  %5554 = vmatpush1.bf16.msra.mxu1 %v9708_v43  ;;  %v3368_v31 = vld [vmem:[#allocation5 + $0x790] sm:$0xff] }
 0x259   :  { %5514 = vmatprep.subr.bf16.mxu0 %v9739_v32  ;;  %5555 = vmatprep.subr.bf16.mxu1 %v9741_v33  ;;  %v3353_v33 = vld [vmem:[#allocation5 + $0x718] sm:$0xff] }
 0x25a   :  { %10088 = vmatprep.mubr.msk.bf16.mxu0 %vm2466_vm0, %v11533_v46  ;;  %10089 = vmatprep.mubr.msk.bf16.mxu1 %vm2466_vm0, %v11533_v46  ;;  %v9933_v50 = vcombine.high %v3353_v33, %v3369_v34 }
 0x25c   :  { %5515 = vmatpush1.bf16.msra.mxu0 %v9738_v44  ;;  %5556 = vmatpush1.bf16.msra.mxu1 %v9740_v45 }
 0x25d   :  { %5516 = vmatprep.subr.bf16.mxu0 %v9771_v47  ;;  %5557 = vmatprep.subr.bf16.mxu1 %v9773_v48  ;;  %v9900_v47 = vcombine.low %v3321_v13, %v3337_v19  ;;  %v9931_v48 = vcombine.high %v3352_v30, %v3368_v31  ;;  %v3480_v13 = vld [vmem:[#allocation5 + $0xb10] sm:$0xff] }
 0x25e   :  { %v3496_v19 = vld [vmem:[#allocation5 + $0xb90] sm:$0xff] }
 0x260   :  { %5517 = vmatpush1.bf16.msra.mxu0 %v9770_v53  ;;  %5558 = vmatpush1.bf16.msra.mxu1 %v9772_v54  ;;  %v3385_v53 = vld [vmem:[#allocation5 + $0x818] sm:$0xff] }
 0x261   :  { %5518 = vmatprep.subr.bf16.mxu0 %v9803_v55  ;;  %5559 = vmatprep.subr.bf16.mxu1 %v9805_v56  ;;  %v3401_v54 = vld [vmem:[#allocation5 + $0x898] sm:$0xff]  ;;  %v9930_v55 = vcombine.low %v3352_v30, %v3368_v31  ;;  %v9932_v56 = vcombine.low %v3353_v33, %v3369_v34  ;;  %v10059_v30 = vcombine.high %v3480_v13, %v3496_v19  ;;  %v3130_v33 = vld [vmem:[#allocation5 + $0x20] sm:$0xff] }
 0x262   :  { %v9965_v59 = vcombine.high %v3385_v53, %v3401_v54  ;;  %v3146_v34 = vld [vmem:[#allocation5 + $0xa0] sm:$0xff] }
 0x264   :  { %5519 = vmatpush1.bf16.msra.mxu0 %v9802_v62  ;;  %5560 = vmatpush1.bf16.msra.mxu1 %v9804_v63  ;;  %v3417_v62 = vld [vmem:[#allocation5 + $0x918] sm:$0xff] }
 0x265   :  { %5520 = vmatprep.subr.bf16.mxu0 %v9835_v0  ;;  %5561 = vmatprep.subr.bf16.mxu1 %v9837_v1  ;;  %v3433_v63 = vld [vmem:[#allocation5 + $0x998] sm:$0xff]  ;;  %v9962_v0 = vcombine.low %v3384_v51, %v3400_v52  ;;  %v9964_v1 = vcombine.low %v3385_v53, %v3401_v54  ;;  %v3163_v51 = vld [vmem:[#allocation5 + $0x128] sm:$0xff]  ;;  %v9710_v53 = vcombine.low %v3130_v33, %v3146_v34 }
 0x266   :  { %v9997_v3 = vcombine.high %v3417_v62, %v3433_v63  ;;  %v3179_v52 = vld [vmem:[#allocation5 + $0x1a8] sm:$0xff] }
 0x268   :  { %5521 = vmatpush1.bf16.msra.mxu0 %v9834_v6  ;;  %5562 = vmatpush1.bf16.msra.mxu1 %v9836_v7  ;;  %v3449_v6 = vld [vmem:[#allocation5 + $0xa18] sm:$0xff] }
 0x269   :  { %5522 = vmatprep.subr.bf16.mxu0 %v9867_v8  ;;  %5563 = vmatprep.subr.bf16.mxu1 %v9869_v58  ;;  %v3465_v7 = vld [vmem:[#allocation5 + $0xa98] sm:$0xff]  ;;  %v9994_v8 = vcombine.low %v3416_v60, %v3432_v61  ;;  %v9996_v58 = vcombine.low %v3417_v62, %v3433_v63  ;;  %v3195_v60 = vld [vmem:[#allocation5 + $0x228] sm:$0xff]  ;;  %v9744_v63 = vcombine.low %v3163_v51, %v3179_v52 }
 0x26a   :  { %v11640_v28 = vpop.f32.mrb[16].mxu0  ;;  %v11642_v43 = vpop.f32.mrb[16].mxu1  ;;  %v10029_v12 = vcombine.high %v3449_v6, %v3465_v7  ;;  %v3211_v61 = vld [vmem:[#allocation5 + $0x2a8] sm:$0xff] }
 0x26b   :  { %v11644_v32 = vpop.f32.mrb[17].mxu0  ;;  %v11646_v35 = vpop.f32.mrb[17].mxu1 }
 0x26c   :  { %v2836_v38 = vpop.f32.mrb[18].mxu0  ;;  %5523 = vmatpush1.bf16.msra.mxu0 %v9866_v20  ;;  %v2877_v44 = vpop.f32.mrb[18].mxu1  ;;  %5564 = vmatpush1.bf16.msra.mxu1 %v9868_v23  ;;  %v3481_v20 = vld [vmem:[#allocation5 + $0xb18] sm:$0xff] }
 0x26d   :  { %v2837_v45 = vpop.f32.mrb[19].mxu0  ;;  %5524 = vmatprep.subr.bf16.mxu0 %v9899_v27  ;;  %v2878_v49 = vpop.f32.mrb[19].mxu1  ;;  %5565 = vmatprep.subr.bf16.mxu1 %v9901_v29  ;;  %v3497_v23 = vld [vmem:[#allocation5 + $0xb98] sm:$0xff]  ;;  %v10026_v27 = vcombine.low %v3448_v4, %v3464_v5  ;;  %v10028_v29 = vcombine.low %v3449_v6, %v3465_v7  ;;  %v3131_v38 = vld [vmem:[#allocation5 + $0x28] sm:$0xff]  ;;  %v10058_v44 = vcombine.low %v3480_v13, %v3496_v19 }
 0x26e   :  { %v10061_v31 = vcombine.high %v3481_v20, %v3497_v23  ;;  %v10060_v45 = vcombine.low %v3481_v20, %v3497_v23  ;;  %v3162_v49 = vld [vmem:[#allocation5 + $0x120] sm:$0xff]  ;;  %v3227_v4 = vld [vmem:[#allocation5 + $0x328] sm:$0xff]  ;;  %v9776_v7 = vcombine.low %v3195_v60, %v3211_v61 }
 0x26f   :  { %v3243_v5 = vld [vmem:[#allocation5 + $0x3a8] sm:$0xff] }
 0x270   :  { %5525 = vmatpush1.bf16.msra.mxu0 %v9898_v39  ;;  %5566 = vmatpush1.bf16.msra.mxu1 %v9900_v47  ;;  %v3147_v39 = vld [vmem:[#allocation5 + $0xa8] sm:$0xff]  ;;  %v9711_v47 = vcombine.high %v3130_v33, %v3146_v34  ;;  %v9808_v23 = vcombine.low %v3227_v4, %v3243_v5 }
 0x271   :  { %5526 = vmatprep.subr.bf16.mxu0 %v9931_v48  ;;  %5567 = vmatprep.subr.bf16.mxu1 %v9933_v50  ;;  %v9713_v48 = vcombine.high %v3131_v38, %v3147_v39  ;;  %v3178_v50 = vld [vmem:[#allocation5 + $0x1a0] sm:$0xff]  ;;  %v9712_v54 = vcombine.low %v3131_v38, %v3147_v39  ;;  %v3259_v13 = vld [vmem:[#allocation5 + $0x428] sm:$0xff] }
 0x272   :  { %v9742_v62 = vcombine.low %v3162_v49, %v3178_v50  ;;  %v3275_v19 = vld [vmem:[#allocation5 + $0x4a8] sm:$0xff] }
 0x273   :  { %v3291_v33 = vld [vmem:[#allocation5 + $0x528] sm:$0xff]  ;;  %v9840_v39 = vcombine.low %v3259_v13, %v3275_v19 }
 0x274   :  { %5527 = vmatpush1.bf16.msra.mxu0 %v9930_v55  ;;  %5568 = vmatpush1.bf16.msra.mxu1 %v9932_v56  ;;  %v9743_v55 = vcombine.high %v3162_v49, %v3178_v50  ;;  %v9745_v56 = vcombine.high %v3163_v51, %v3179_v52  ;;  %v3307_v34 = vld [vmem:[#allocation5 + $0x5a8] sm:$0xff] }
 0x275   :  { %5528 = vmatprep.subr.bf16.mxu0 %v9963_v57  ;;  %5569 = vmatprep.subr.bf16.mxu1 %v9965_v59  ;;  %v3194_v57 = vld [vmem:[#allocation5 + $0x220] sm:$0xff]  ;;  %v3323_v49 = vld [vmem:[#allocation5 + $0x628] sm:$0xff]  ;;  %v9872_v52 = vcombine.low %v3291_v33, %v3307_v34 }
 0x276   :  { %v3210_v59 = vld [vmem:[#allocation5 + $0x2a0] sm:$0xff]  ;;  %v3339_v50 = vld [vmem:[#allocation5 + $0x6a8] sm:$0xff] }
 0x277   :  { %v9774_v6 = vcombine.low %v3194_v57, %v3210_v59 }
 0x278   :  { %5529 = vmatpush1.bf16.msra.mxu0 %v9962_v0  ;;  %5570 = vmatpush1.bf16.msra.mxu1 %v9964_v1  ;;  %v9775_v0 = vcombine.high %v3194_v57, %v3210_v59  ;;  %v9777_v1 = vcombine.high %v3195_v60, %v3211_v61  ;;  %v3370_v57 = vld [vmem:[#allocation5 + $0x7a0] sm:$0xff]  ;;  %v3355_v61 = vld [vmem:[#allocation5 + $0x728] sm:$0xff] }
 0x279   :  { %5530 = vmatprep.subr.bf16.mxu0 %v9995_v2  ;;  %5571 = vmatprep.subr.bf16.mxu1 %v9997_v3  ;;  %v3226_v2 = vld [vmem:[#allocation5 + $0x320] sm:$0xff] }
 0x27a   :  { %v3242_v3 = vld [vmem:[#allocation5 + $0x3a0] sm:$0xff] }
 0x27b   :  { %v9806_v20 = vcombine.low %v3226_v2, %v3242_v3 }
 0x27c   :  { %5531 = vmatpush1.bf16.msra.mxu0 %v9994_v8  ;;  %5572 = vmatpush1.bf16.msra.mxu1 %v9996_v58  ;;  %v9807_v8 = vcombine.high %v3226_v2, %v3242_v3  ;;  %v9809_v58 = vcombine.high %v3227_v4, %v3243_v5  ;;  %v9904_v4 = vcombine.low %v3323_v49, %v3339_v50 }
 0x27d   :  { %5532 = vmatprep.subr.bf16.mxu0 %v10027_v11  ;;  %5573 = vmatprep.subr.bf16.mxu1 %v10029_v12  ;;  %v3258_v11 = vld [vmem:[#allocation5 + $0x420] sm:$0xff] }
 0x27e   :  { %v3274_v12 = vld [vmem:[#allocation5 + $0x4a0] sm:$0xff] }
 0x27f   :  { %v9838_v38 = vcombine.low %v3258_v11, %v3274_v12 }
 0x280   :  { %5533 = vmatpush1.bf16.msra.mxu0 %v10026_v27  ;;  %5574 = vmatpush1.bf16.msra.mxu1 %v10028_v29  ;;  %v9839_v27 = vcombine.high %v3258_v11, %v3274_v12  ;;  %v9841_v29 = vcombine.high %v3259_v13, %v3275_v19  ;;  %v3387_v11 = vld [vmem:[#allocation5 + $0x828] sm:$0xff] }
 0x281   :  { %5534 = vmatprep.subr.bf16.mxu0 %v10059_v30  ;;  %5575 = vmatprep.subr.bf16.mxu1 %v10061_v31  ;;  %v3290_v30 = vld [vmem:[#allocation5 + $0x520] sm:$0xff]  ;;  %v3403_v12 = vld [vmem:[#allocation5 + $0x8a8] sm:$0xff] }
 0x282   :  { %v3306_v31 = vld [vmem:[#allocation5 + $0x5a0] sm:$0xff] }
 0x283   :  { %v9870_v51 = vcombine.low %v3290_v30, %v3306_v31 }
 0x284   :  { %5535 = vmatpush1.bf16.msra.mxu0 %v10058_v44  ;;  %5576 = vmatpush1.bf16.msra.mxu1 %v10060_v45  ;;  %v9871_v44 = vcombine.high %v3290_v30, %v3306_v31  ;;  %v9873_v45 = vcombine.high %v3291_v33, %v3307_v34  ;;  %v3419_v30 = vld [vmem:[#allocation5 + $0x928] sm:$0xff]  ;;  %v9968_v34 = vcombine.low %v3387_v11, %v3403_v12 }
 0x285   :  { %5594 = vmatprep.subr.bf16.mxu0 %v9711_v47  ;;  %5635 = vmatprep.subr.bf16.mxu1 %v9713_v48  ;;  %v3322_v47 = vld [vmem:[#allocation5 + $0x620] sm:$0xff]  ;;  %v3435_v31 = vld [vmem:[#allocation5 + $0x9a8] sm:$0xff] }
 0x286   :  { %v3338_v48 = vld [vmem:[#allocation5 + $0x6a0] sm:$0xff] }
 0x287   :  { %5545 = vmatmul.mubr.bf16.vlgmr.msra.gmra.mrb[36].mxu0 %v11632_v36  ;;  %5586 = vmatmul.mubr.bf16.vlgmr.msra.gmra.mrb[36].mxu1 %v11632_v36 }
 0x288   :  { %5595 = vmatpush1.bf16.msra.mxu0 %v9710_v53  ;;  %5636 = vmatpush1.bf16.msra.mxu1 %v9712_v54  ;;  %v9903_v53 = vcombine.high %v3322_v47, %v3338_v48 }
 0x289   :  { %5596 = vmatprep.subr.bf16.mxu0 %v9743_v55  ;;  %5637 = vmatprep.subr.bf16.mxu1 %v9745_v56  ;;  %v9905_v55 = vcombine.high %v3323_v49, %v3339_v50  ;;  %v3354_v56 = vld [vmem:[#allocation5 + $0x720] sm:$0xff]  ;;  %v10000_v50 = vcombine.low %v3419_v30, %v3435_v31 }
 0x28a   :  { %10090 = vmatprep.mubr.msk.bf16.mxu0 %vm2466_vm0, %v11533_v46  ;;  %10091 = vmatprep.mubr.msk.bf16.mxu1 %vm2466_vm0, %v11533_v46  ;;  %v9935_v5 = vcombine.high %v3354_v56, %v3370_v57  ;;  %v9934_v13 = vcombine.low %v3354_v56, %v3370_v57  ;;  %v3483_v56 = vld [vmem:[#allocation5 + $0xb28] sm:$0xff] }
 0x28b   :  { %v3499_v57 = vld [vmem:[#allocation5 + $0xba8] sm:$0xff] }
 0x28c   :  { %5597 = vmatpush1.bf16.msra.mxu0 %v9742_v62  ;;  %5638 = vmatpush1.bf16.msra.mxu1 %v9744_v63  ;;  %v3371_v62 = vld [vmem:[#allocation5 + $0x7a8] sm:$0xff] }
 0x28d   :  { %5598 = vmatprep.subr.bf16.mxu0 %v9775_v0  ;;  %5639 = vmatprep.subr.bf16.mxu1 %v9777_v1  ;;  %v9902_v1 = vcombine.low %v3322_v47, %v3338_v48  ;;  %v9936_v19 = vcombine.low %v3355_v61, %v3371_v62  ;;  %v3451_v47 = vld [vmem:[#allocation5 + $0xa28] sm:$0xff] }
 0x28e   :  { %v3467_v48 = vld [vmem:[#allocation5 + $0xaa8] sm:$0xff] }
 0x290   :  { %5599 = vmatpush1.bf16.msra.mxu0 %v9774_v6  ;;  %5640 = vmatpush1.bf16.msra.mxu1 %v9776_v7  ;;  %v9937_v7 = vcombine.high %v3355_v61, %v3371_v62  ;;  %v10032_v62 = vcombine.low %v3451_v47, %v3467_v48 }
 0x291   :  { %5600 = vmatprep.subr.bf16.mxu0 %v9807_v8  ;;  %5641 = vmatprep.subr.bf16.mxu1 %v9809_v58  ;;  %v3386_v8 = vld [vmem:[#allocation5 + $0x820] sm:$0xff] }
 0x292   :  { %v3402_v58 = vld [vmem:[#allocation5 + $0x8a0] sm:$0xff] }
 0x293   :  { %v9966_v33 = vcombine.low %v3386_v8, %v3402_v58 }
 0x294   :  { %5601 = vmatpush1.bf16.msra.mxu0 %v9806_v20  ;;  %5642 = vmatpush1.bf16.msra.mxu1 %v9808_v23  ;;  %v9967_v20 = vcombine.high %v3386_v8, %v3402_v58  ;;  %v9969_v23 = vcombine.high %v3387_v11, %v3403_v12  ;;  %v3164_v11 = vld [vmem:[#allocation5 + $0x130] sm:$0xff] }
 0x295   :  { %5602 = vmatprep.subr.bf16.mxu0 %v9839_v27  ;;  %5643 = vmatprep.subr.bf16.mxu1 %v9841_v29  ;;  %v3418_v27 = vld [vmem:[#allocation5 + $0x920] sm:$0xff]  ;;  %v3180_v12 = vld [vmem:[#allocation5 + $0x1b0] sm:$0xff] }
 0x296   :  { %v3434_v29 = vld [vmem:[#allocation5 + $0x9a0] sm:$0xff] }
 0x297   :  { %v9998_v49 = vcombine.low %v3418_v27, %v3434_v29 }
 0x298   :  { %5603 = vmatpush1.bf16.msra.mxu0 %v9838_v38  ;;  %5644 = vmatpush1.bf16.msra.mxu1 %v9840_v39  ;;  %v9999_v38 = vcombine.high %v3418_v27, %v3434_v29  ;;  %v10001_v39 = vcombine.high %v3419_v30, %v3435_v31  ;;  %v9747_v27 = vcombine.high %v3164_v11, %v3180_v12  ;;  %v3196_v30 = vld [vmem:[#allocation5 + $0x230] sm:$0xff] }
 0x299   :  { %5604 = vmatprep.subr.bf16.mxu0 %v9871_v44  ;;  %5645 = vmatprep.subr.bf16.mxu1 %v9873_v45  ;;  %v3450_v44 = vld [vmem:[#allocation5 + $0xa20] sm:$0xff]  ;;  %v3212_v31 = vld [vmem:[#allocation5 + $0x2b0] sm:$0xff] }
 0x29a   :  { %v11654_v54 = vpop.f32.mrb[20].mxu0  ;;  %v11656_v59 = vpop.f32.mrb[20].mxu1  ;;  %v3466_v45 = vld [vmem:[#allocation5 + $0xaa0] sm:$0xff] }
 0x29b   :  { %v11658_v60 = vpop.f32.mrb[21].mxu0  ;;  %v11660_v63 = vpop.f32.mrb[21].mxu1  ;;  %v10030_v61 = vcombine.low %v3450_v44, %v3466_v45 }
 0x29c   :  { %v2918_v0 = vpop.f32.mrb[22].mxu0  ;;  %5605 = vmatpush1.bf16.msra.mxu0 %v9870_v51  ;;  %v2959_v2 = vpop.f32.mrb[22].mxu1  ;;  %5646 = vmatpush1.bf16.msra.mxu1 %v9872_v52  ;;  %v10031_v51 = vcombine.high %v3450_v44, %v3466_v45  ;;  %v10033_v52 = vcombine.high %v3451_v47, %v3467_v48  ;;  %v9779_v44 = vcombine.high %v3196_v30, %v3212_v31  ;;  %v3228_v47 = vld [vmem:[#allocation5 + $0x330] sm:$0xff] }
 0x29d   :  { %v2919_v3 = vpop.f32.mrb[23].mxu0  ;;  %5606 = vmatprep.subr.bf16.mxu0 %v9903_v53  ;;  %v2960_v6 = vpop.f32.mrb[23].mxu1  ;;  %5647 = vmatprep.subr.bf16.mxu1 %v9905_v55  ;;  %v3482_v53 = vld [vmem:[#allocation5 + $0xb20] sm:$0xff]  ;;  %v3132_v2 = vld [vmem:[#allocation5 + $0x30] sm:$0xff] }
 0x29e   :  { %v3498_v55 = vld [vmem:[#allocation5 + $0xba0] sm:$0xff]  ;;  %v3148_v3 = vld [vmem:[#allocation5 + $0xb0] sm:$0xff] }
 0x29f   :  { %v10063_v0 = vcombine.high %v3482_v53, %v3498_v55  ;;  %v10062_v6 = vcombine.low %v3482_v53, %v3498_v55  ;;  %v9715_v8 = vcombine.high %v3132_v2, %v3148_v3  ;;  %v3244_v48 = vld [vmem:[#allocation5 + $0x3b0] sm:$0xff] }
 0x2a0   :  { %5607 = vmatpush1.bf16.msra.mxu0 %v9902_v1  ;;  %5648 = vmatpush1.bf16.msra.mxu1 %v9904_v4  ;;  %v10065_v1 = vcombine.high %v3483_v56, %v3499_v57  ;;  %v3133_v4 = vld [vmem:[#allocation5 + $0x38] sm:$0xff]  ;;  %v9811_v53 = vcombine.high %v3228_v47, %v3244_v48 }
 0x2a1   :  { %5608 = vmatprep.subr.bf16.mxu0 %v9935_v5  ;;  %5649 = vmatprep.subr.bf16.mxu1 %v9937_v7  ;;  %v3149_v5 = vld [vmem:[#allocation5 + $0xb8] sm:$0xff]  ;;  %v10064_v7 = vcombine.low %v3483_v56, %v3499_v57  ;;  %v3260_v56 = vld [vmem:[#allocation5 + $0x430] sm:$0xff] }
 0x2a2   :  { %v9717_v58 = vcombine.high %v3133_v4, %v3149_v5  ;;  %v3276_v57 = vld [vmem:[#allocation5 + $0x4b0] sm:$0xff] }
 0x2a4   :  { %5609 = vmatpush1.bf16.msra.mxu0 %v9934_v13  ;;  %5650 = vmatpush1.bf16.msra.mxu1 %v9936_v19  ;;  %v3165_v13 = vld [vmem:[#allocation5 + $0x138] sm:$0xff] }
 0x2a5   :  { %5610 = vmatprep.subr.bf16.mxu0 %v9967_v20  ;;  %5651 = vmatprep.subr.bf16.mxu1 %v9969_v23  ;;  %v3181_v19 = vld [vmem:[#allocation5 + $0x1b8] sm:$0xff]  ;;  %v9714_v20 = vcombine.low %v3132_v2, %v3148_v3  ;;  %v9716_v23 = vcombine.low %v3133_v4, %v3149_v5  ;;  %v9843_v2 = vcombine.high %v3260_v56, %v3276_v57  ;;  %v3292_v4 = vld [vmem:[#allocation5 + $0x530] sm:$0xff] }
 0x2a6   :  { %v9749_v29 = vcombine.high %v3165_v13, %v3181_v19  ;;  %v3308_v5 = vld [vmem:[#allocation5 + $0x5b0] sm:$0xff] }
 0x2a8   :  { %5611 = vmatpush1.bf16.msra.mxu0 %v9966_v33  ;;  %5652 = vmatpush1.bf16.msra.mxu1 %v9968_v34  ;;  %v3197_v33 = vld [vmem:[#allocation5 + $0x238] sm:$0xff] }
 0x2a9   :  { %5612 = vmatprep.subr.bf16.mxu0 %v9999_v38  ;;  %5653 = vmatprep.subr.bf16.mxu1 %v10001_v39  ;;  %v3213_v34 = vld [vmem:[#allocation5 + $0x2b8] sm:$0xff]  ;;  %v9746_v38 = vcombine.low %v3164_v11, %v3180_v12  ;;  %v9748_v39 = vcombine.low %v3165_v13, %v3181_v19  ;;  %v9875_v11 = vcombine.high %v3292_v4, %v3308_v5  ;;  %v3324_v13 = vld [vmem:[#allocation5 + $0x630] sm:$0xff] }
 0x2aa   :  { %v9781_v45 = vcombine.high %v3197_v33, %v3213_v34  ;;  %v3340_v19 = vld [vmem:[#allocation5 + $0x6b0] sm:$0xff] }
 0x2ac   :  { %5613 = vmatpush1.bf16.msra.mxu0 %v9998_v49  ;;  %5654 = vmatpush1.bf16.msra.mxu1 %v10000_v50  ;;  %v3229_v49 = vld [vmem:[#allocation5 + $0x338] sm:$0xff] }
 0x2ad   :  { %5614 = vmatprep.subr.bf16.mxu0 %v10031_v51  ;;  %5655 = vmatprep.subr.bf16.mxu1 %v10033_v52  ;;  %v3245_v50 = vld [vmem:[#allocation5 + $0x3b8] sm:$0xff]  ;;  %v9778_v51 = vcombine.low %v3196_v30, %v3212_v31  ;;  %v9780_v52 = vcombine.low %v3197_v33, %v3213_v34  ;;  %v9907_v30 = vcombine.high %v3324_v13, %v3340_v19  ;;  %v3356_v34 = vld [vmem:[#allocation5 + $0x730] sm:$0xff] }
 0x2ae   :  { %v9813_v55 = vcombine.high %v3229_v49, %v3245_v50 }
 0x2b0   :  { %5615 = vmatpush1.bf16.msra.mxu0 %v10030_v61  ;;  %5656 = vmatpush1.bf16.msra.mxu1 %v10032_v62  ;;  %v3261_v61 = vld [vmem:[#allocation5 + $0x438] sm:$0xff] }
 0x2b1   :  { %5616 = vmatprep.subr.bf16.mxu0 %v10063_v0  ;;  %5657 = vmatprep.subr.bf16.mxu1 %v10065_v1  ;;  %v3277_v62 = vld [vmem:[#allocation5 + $0x4b8] sm:$0xff]  ;;  %v9810_v0 = vcombine.low %v3228_v47, %v3244_v48  ;;  %v9812_v1 = vcombine.low %v3229_v49, %v3245_v50  ;;  %v9906_v50 = vcombine.low %v3324_v13, %v3340_v19 }
 0x2b2   :  { %v9845_v3 = vcombine.high %v3261_v61, %v3277_v62  ;;  %v3373_v47 = vld [vmem:[#allocation5 + $0x7b8] sm:$0xff] }
 0x2b4   :  { %5617 = vmatpush1.bf16.msra.mxu0 %v10062_v6  ;;  %5658 = vmatpush1.bf16.msra.mxu1 %v10064_v7  ;;  %v3293_v6 = vld [vmem:[#allocation5 + $0x538] sm:$0xff] }
 0x2b5   :  { %5676 = vmatprep.subr.bf16.mxu0 %v9715_v8  ;;  %5717 = vmatprep.subr.bf16.mxu1 %v9717_v58  ;;  %v3309_v7 = vld [vmem:[#allocation5 + $0x5b8] sm:$0xff]  ;;  %v9842_v8 = vcombine.low %v3260_v56, %v3276_v57  ;;  %v9844_v58 = vcombine.low %v3261_v61, %v3277_v62  ;;  %v3388_v61 = vld [vmem:[#allocation5 + $0x830] sm:$0xff] }
 0x2b6   :  { %v9877_v12 = vcombine.high %v3293_v6, %v3309_v7  ;;  %v3404_v62 = vld [vmem:[#allocation5 + $0x8b0] sm:$0xff] }
 0x2b7   :  { %5627 = vmatmul.mubr.bf16.vlgmr.msra.gmra.mrb[40].mxu0 %v11632_v36  ;;  %5668 = vmatmul.mubr.bf16.vlgmr.msra.gmra.mrb[40].mxu1 %v11632_v36 }
 0x2b8   :  { %5677 = vmatpush1.bf16.msra.mxu0 %v9714_v20  ;;  %5718 = vmatpush1.bf16.msra.mxu1 %v9716_v23  ;;  %v3325_v20 = vld [vmem:[#allocation5 + $0x638] sm:$0xff] }
 0x2b9   :  { %5678 = vmatprep.subr.bf16.mxu0 %v9747_v27  ;;  %5719 = vmatprep.subr.bf16.mxu1 %v9749_v29  ;;  %v3341_v23 = vld [vmem:[#allocation5 + $0x6b8] sm:$0xff]  ;;  %v9874_v27 = vcombine.low %v3292_v4, %v3308_v5  ;;  %v9876_v29 = vcombine.low %v3293_v6, %v3309_v7  ;;  %v9971_v4 = vcombine.high %v3388_v61, %v3404_v62  ;;  %v3420_v6 = vld [vmem:[#allocation5 + $0x930] sm:$0xff] }
 0x2ba   :  { %10092 = vmatprep.mubr.msk.bf16.mxu0 %vm2466_vm0, %v11533_v46  ;;  %10093 = vmatprep.mubr.msk.bf16.mxu1 %vm2466_vm0, %v11533_v46  ;;  %v9909_v33 = vcombine.high %v3325_v20, %v3341_v23  ;;  %v3436_v7 = vld [vmem:[#allocation5 + $0x9b0] sm:$0xff] }
 0x2bb   :  { %v10003_v13 = vcombine.high %v3420_v6, %v3436_v7 }
 0x2bc   :  { %5679 = vmatpush1.bf16.msra.mxu0 %v9746_v38  ;;  %5720 = vmatpush1.bf16.msra.mxu1 %v9748_v39  ;;  %v3372_v38 = vld [vmem:[#allocation5 + $0x7b0] sm:$0xff] }
 0x2bd   :  { %5680 = vmatprep.subr.bf16.mxu0 %v9779_v44  ;;  %5721 = vmatprep.subr.bf16.mxu1 %v9781_v45  ;;  %v3357_v45 = vld [vmem:[#allocation5 + $0x738] sm:$0xff] }
 0x2be   :  { %v9941_v57 = vcombine.high %v3357_v45, %v3373_v47 }
 0x2c0   :  { %5681 = vmatpush1.bf16.msra.mxu0 %v9778_v51  ;;  %5722 = vmatpush1.bf16.msra.mxu1 %v9780_v52 }
 0x2c1   :  { %5682 = vmatprep.subr.bf16.mxu0 %v9811_v53  ;;  %5723 = vmatprep.subr.bf16.mxu1 %v9813_v55  ;;  %v9908_v53 = vcombine.low %v3325_v20, %v3341_v23  ;;  %v9939_v55 = vcombine.high %v3356_v34, %v3372_v38  ;;  %v3452_v20 = vld [vmem:[#allocation5 + $0xa30] sm:$0xff] }
 0x2c2   :  { %v3468_v23 = vld [vmem:[#allocation5 + $0xab0] sm:$0xff] }
 0x2c4   :  { %5683 = vmatpush1.bf16.msra.mxu0 %v9810_v0  ;;  %5724 = vmatpush1.bf16.msra.mxu1 %v9812_v1  ;;  %v3389_v0 = vld [vmem:[#allocation5 + $0x838] sm:$0xff] }
 0x2c5   :  { %5684 = vmatprep.subr.bf16.mxu0 %v9843_v2  ;;  %5725 = vmatprep.subr.bf16.mxu1 %v9845_v3  ;;  %v3405_v1 = vld [vmem:[#allocation5 + $0x8b8] sm:$0xff]  ;;  %v9938_v2 = vcombine.low %v3356_v34, %v3372_v38  ;;  %v9940_v3 = vcombine.low %v3357_v45, %v3373_v47  ;;  %v10035_v34 = vcombine.high %v3452_v20, %v3468_v23  ;;  %v3484_v45 = vld [vmem:[#allocation5 + $0xb30] sm:$0xff] }
 0x2c6   :  { %v9973_v5 = vcombine.high %v3389_v0, %v3405_v1  ;;  %v3500_v47 = vld [vmem:[#allocation5 + $0xbb0] sm:$0xff] }
 0x2c8   :  { %5685 = vmatpush1.bf16.msra.mxu0 %v9842_v8  ;;  %5726 = vmatpush1.bf16.msra.mxu1 %v9844_v58  ;;  %v3421_v8 = vld [vmem:[#allocation5 + $0x938] sm:$0xff] }
 0x2c9   :  { %5686 = vmatprep.subr.bf16.mxu0 %v9875_v11  ;;  %5727 = vmatprep.subr.bf16.mxu1 %v9877_v12  ;;  %v3437_v58 = vld [vmem:[#allocation5 + $0x9b8] sm:$0xff]  ;;  %v9970_v11 = vcombine.low %v3388_v61, %v3404_v62  ;;  %v9972_v12 = vcombine.low %v3389_v0, %v3405_v1  ;;  %v3135_v61 = vld [vmem:[#allocation5 + $0x48] sm:$0xff]  ;;  %v10066_v0 = vcombine.low %v3484_v45, %v3500_v47 }
 0x2ca   :  { %v11668_v31 = vpop.f32.mrb[24].mxu0  ;;  %v11670_v39 = vpop.f32.mrb[24].mxu1  ;;  %v10005_v19 = vcombine.high %v3421_v8, %v3437_v58  ;;  %v3151_v62 = vld [vmem:[#allocation5 + $0xc8] sm:$0xff] }
 0x2cb   :  { %12063 = vst [vmem:[#allocation24_spill] sm:$0xff] %v11670_v39  ;;  %v11672_v44 = vpop.f32.mrb[25].mxu0  ;;  %v11674_v48 = vpop.f32.mrb[25].mxu1 }
 0x2cc   :  { %12064 = vst [vmem:[#allocation25_spill] sm:$0xff] %v11672_v44  ;;  %12065 = vst [vmem:[#allocation26_spill] sm:$0xff] %v11674_v48  ;;  %v3000_v49 = vpop.f32.mrb[26].mxu0  ;;  %5687 = vmatpush1.bf16.msra.mxu0 %v9874_v27  ;;  %v3041_v51 = vpop.f32.mrb[26].mxu1  ;;  %5728 = vmatpush1.bf16.msra.mxu1 %v9876_v29  ;;  %v3453_v27 = vld [vmem:[#allocation5 + $0xa38] sm:$0xff]  ;;  %v3412_v48 = vld [vmem:[#allocation5 + $0x8f0] sm:$0xff] }
 0x2cd   :  { %v3001_v52 = vpop.f32.mrb[27].mxu0  ;;  %5688 = vmatprep.subr.bf16.mxu0 %v9907_v30  ;;  %v3042_v56 = vpop.f32.mrb[27].mxu1  ;;  %5729 = vmatprep.subr.bf16.mxu1 %v9909_v33  ;;  %v3469_v29 = vld [vmem:[#allocation5 + $0xab8] sm:$0xff]  ;;  %v10002_v30 = vcombine.low %v3420_v6, %v3436_v7  ;;  %v10004_v33 = vcombine.low %v3421_v8, %v3437_v58  ;;  %v10034_v51 = vcombine.low %v3452_v20, %v3468_v23  ;;  %v3167_v6 = vld [vmem:[#allocation5 + $0x148] sm:$0xff] }
 0x2ce   :  { %v10037_v38 = vcombine.high %v3453_v27, %v3469_v29  ;;  %v3485_v49 = vld [vmem:[#allocation5 + $0xb38] sm:$0xff]  ;;  %v10036_v52 = vcombine.low %v3453_v27, %v3469_v29  ;;  %v3134_v56 = vld [vmem:[#allocation5 + $0x40] sm:$0xff]  ;;  %v3183_v7 = vld [vmem:[#allocation5 + $0x1c8] sm:$0xff]  ;;  %v9720_v58 = vcombine.low %v3135_v61, %v3151_v62 }
 0x2cf   :  { %v3199_v20 = vld [vmem:[#allocation5 + $0x248] sm:$0xff]  ;;  %v9752_v29 = vcombine.low %v3167_v6, %v3183_v7  ;;  %v3413_v44 = vld [vmem:[#allocation5 + $0x8f8] sm:$0xff] }
 0x2d0   :  { %5689 = vmatpush1.bf16.msra.mxu0 %v9906_v50  ;;  %5730 = vmatpush1.bf16.msra.mxu1 %v9908_v53  ;;  %v3501_v50 = vld [vmem:[#allocation5 + $0xbb8] sm:$0xff]  ;;  %v10067_v53 = vcombine.high %v3484_v45, %v3500_v47  ;;  %v3215_v23 = vld [vmem:[#allocation5 + $0x2c8] sm:$0xff] }
 0x2d1   :  { %5690 = vmatprep.subr.bf16.mxu0 %v9939_v55  ;;  %5731 = vmatprep.subr.bf16.mxu1 %v9941_v57  ;;  %v10069_v55 = vcombine.high %v3485_v49, %v3501_v50  ;;  %v3150_v57 = vld [vmem:[#allocation5 + $0xc0] sm:$0xff]  ;;  %v10068_v1 = vcombine.low %v3485_v49, %v3501_v50  ;;  %v3231_v45 = vld [vmem:[#allocation5 + $0x348] sm:$0xff]  ;;  %v9784_v49 = vcombine.low %v3199_v20, %v3215_v23 }
 0x2d2   :  { %v9718_v8 = vcombine.low %v3134_v56, %v3150_v57  ;;  %v3247_v47 = vld [vmem:[#allocation5 + $0x3c8] sm:$0xff] }
 0x2d4   :  { %5691 = vmatpush1.bf16.msra.mxu0 %v9938_v2  ;;  %5732 = vmatpush1.bf16.msra.mxu1 %v9940_v3  ;;  %v9719_v2 = vcombine.high %v3134_v56, %v3150_v57  ;;  %v9721_v3 = vcombine.high %v3135_v61, %v3151_v62  ;;  %v3279_v56 = vld [vmem:[#allocation5 + $0x4c8] sm:$0xff]  ;;  %v9816_v61 = vcombine.low %v3231_v45, %v3247_v47 }
 0x2d5   :  { %5692 = vmatprep.subr.bf16.mxu0 %v9971_v4  ;;  %5733 = vmatprep.subr.bf16.mxu1 %v9973_v5  ;;  %v3166_v4 = vld [vmem:[#allocation5 + $0x140] sm:$0xff] }
 0x2d6   :  { %v3182_v5 = vld [vmem:[#allocation5 + $0x1c0] sm:$0xff] }
 0x2d7   :  { %v9750_v27 = vcombine.low %v3166_v4, %v3182_v5 }
 0x2d8   :  { %5693 = vmatpush1.bf16.msra.mxu0 %v9970_v11  ;;  %5734 = vmatpush1.bf16.msra.mxu1 %v9972_v12  ;;  %v9751_v11 = vcombine.high %v3166_v4, %v3182_v5  ;;  %v9753_v12 = vcombine.high %v3167_v6, %v3183_v7  ;;  %v3311_v4 = vld [vmem:[#allocation5 + $0x5c8] sm:$0xff] }
 0x2d9   :  { %5694 = vmatprep.subr.bf16.mxu0 %v10003_v13  ;;  %5735 = vmatprep.subr.bf16.mxu1 %v10005_v19  ;;  %v3198_v13 = vld [vmem:[#allocation5 + $0x240] sm:$0xff] }
 0x2da   :  { %v3214_v19 = vld [vmem:[#allocation5 + $0x2c0] sm:$0xff] }
 0x2dc   :  { %5695 = vmatpush1.bf16.msra.mxu0 %v10002_v30  ;;  %5736 = vmatpush1.bf16.msra.mxu1 %v10004_v33  ;;  %v9783_v30 = vcombine.high %v3198_v13, %v3214_v19  ;;  %v9785_v33 = vcombine.high %v3199_v20, %v3215_v23 }
 0x2dd   :  { %5696 = vmatprep.subr.bf16.mxu0 %v10035_v34  ;;  %5737 = vmatprep.subr.bf16.mxu1 %v10037_v38  ;;  %v3230_v34 = vld [vmem:[#allocation5 + $0x340] sm:$0xff] }
 0x2de   :  { %v3246_v38 = vld [vmem:[#allocation5 + $0x3c0] sm:$0xff] }
 0x2df   :  { %v9815_v50 = vcombine.high %v3230_v34, %v3246_v38  ;;  %v9814_v57 = vcombine.low %v3230_v34, %v3246_v38 }
 0x2e0   :  { %5697 = vmatpush1.bf16.msra.mxu0 %v10034_v51  ;;  %5738 = vmatpush1.bf16.msra.mxu1 %v10036_v52  ;;  %v9817_v51 = vcombine.high %v3231_v45, %v3247_v47  ;;  %v3262_v52 = vld [vmem:[#allocation5 + $0x440] sm:$0xff]  ;;  %v3359_v45 = vld [vmem:[#allocation5 + $0x748] sm:$0xff] }
 0x2e1   :  { %5698 = vmatprep.subr.bf16.mxu0 %v10067_v53  ;;  %5739 = vmatprep.subr.bf16.mxu1 %v10069_v55  ;;  %v3278_v53 = vld [vmem:[#allocation5 + $0x4c0] sm:$0xff]  ;;  %v3263_v55 = vld [vmem:[#allocation5 + $0x448] sm:$0xff] }
 0x2e2   :  { %v9847_v62 = vcombine.high %v3262_v52, %v3278_v53  ;;  %v9846_v5 = vcombine.low %v3262_v52, %v3278_v53  ;;  %v9848_v6 = vcombine.low %v3263_v55, %v3279_v56  ;;  %v3375_v47 = vld [vmem:[#allocation5 + $0x7c8] sm:$0xff] }
 0x2e4   :  { %5699 = vmatpush1.bf16.msra.mxu0 %v10066_v0  ;;  %5740 = vmatpush1.bf16.msra.mxu1 %v10068_v1  ;;  %v9849_v0 = vcombine.high %v3263_v55, %v3279_v56  ;;  %v3294_v1 = vld [vmem:[#allocation5 + $0x540] sm:$0xff] }
 0x2e5   :  { %5758 = vmatprep.subr.bf16.mxu0 %v9719_v2  ;;  %5799 = vmatprep.subr.bf16.mxu1 %v9721_v3  ;;  %v3310_v2 = vld [vmem:[#allocation5 + $0x5c0] sm:$0xff]  ;;  %v3295_v3 = vld [vmem:[#allocation5 + $0x548] sm:$0xff] }
 0x2e6   :  { %v9879_v7 = vcombine.high %v3294_v1, %v3310_v2  ;;  %v9880_v20 = vcombine.low %v3295_v3, %v3311_v4 }
 0x2e7   :  { %5709 = vmatmul.mubr.bf16.vlgmr.msra.gmra.mrb[44].mxu0 %v11632_v36  ;;  %5750 = vmatmul.mubr.bf16.vlgmr.msra.gmra.mrb[44].mxu1 %v11632_v36  ;;  %v9782_v36 = vcombine.low %v3198_v13, %v3214_v19  ;;  %v3343_v13 = vld [vmem:[#allocation5 + $0x6c8] sm:$0xff]  ;;  %v9878_v19 = vcombine.low %v3294_v1, %v3310_v2 }
 0x2e8   :  { %5759 = vmatpush1.bf16.msra.mxu0 %v9718_v8  ;;  %5800 = vmatpush1.bf16.msra.mxu1 %v9720_v58  ;;  %v9881_v8 = vcombine.high %v3295_v3, %v3311_v4  ;;  %v3326_v58 = vld [vmem:[#allocation5 + $0x640] sm:$0xff]  ;;  %v3407_v1 = vld [vmem:[#allocation5 + $0x8c8] sm:$0xff]  ;;  %v9944_v3 = vcombine.low %v3359_v45, %v3375_v47 }
 0x2e9   :  { %5760 = vmatprep.subr.bf16.mxu0 %v9751_v11  ;;  %5801 = vmatprep.subr.bf16.mxu1 %v9753_v12  ;;  %v3342_v11 = vld [vmem:[#allocation5 + $0x6c0] sm:$0xff]  ;;  %v3327_v12 = vld [vmem:[#allocation5 + $0x648] sm:$0xff] }
 0x2ea   :  { %10094 = vmatprep.mubr.msk.bf16.mxu0 %vm2466_vm0, %v11533_v46  ;;  %10095 = vmatprep.mubr.msk.bf16.mxu1 %vm2466_vm0, %v11533_v46  ;;  %v9911_v23 = vcombine.high %v3326_v58, %v3342_v11  ;;  %v9912_v53 = vcombine.low %v3327_v12, %v3343_v13 }
 0x2ec   :  { %5761 = vmatpush1.bf16.msra.mxu0 %v9750_v27  ;;  %5802 = vmatpush1.bf16.msra.mxu1 %v9752_v29  ;;  %v9913_v29 = vcombine.high %v3327_v12, %v3343_v13 }
 0x2ed   :  { %5762 = vmatprep.subr.bf16.mxu0 %v9783_v30  ;;  %5803 = vmatprep.subr.bf16.mxu1 %v9785_v33  ;;  %v3358_v30 = vld [vmem:[#allocation5 + $0x740] sm:$0xff] }
 0x2ee   :  { %v3374_v33 = vld [vmem:[#allocation5 + $0x7c0] sm:$0xff] }
 0x2ef   :  { %v9943_v55 = vcombine.high %v3358_v30, %v3374_v33  ;;  %v9942_v2 = vcombine.low %v3358_v30, %v3374_v33  ;;  %v3471_v30 = vld [vmem:[#allocation5 + $0xac8] sm:$0xff] }
 0x2f0   :  { %5763 = vmatpush1.bf16.msra.mxu0 %v9782_v36  ;;  %5804 = vmatpush1.bf16.msra.mxu1 %v9784_v49 }
 0x2f1   :  { %5764 = vmatprep.subr.bf16.mxu0 %v9815_v50  ;;  %5805 = vmatprep.subr.bf16.mxu1 %v9817_v51  ;;  %v9910_v50 = vcombine.low %v3326_v58, %v3342_v11  ;;  %v3439_v58 = vld [vmem:[#allocation5 + $0x9c8] sm:$0xff] }
 0x2f4   :  { %5765 = vmatpush1.bf16.msra.mxu0 %v9814_v57  ;;  %5806 = vmatpush1.bf16.msra.mxu1 %v9816_v61  ;;  %v9945_v57 = vcombine.high %v3359_v45, %v3375_v47  ;;  %v3390_v61 = vld [vmem:[#allocation5 + $0x840] sm:$0xff] }
 0x2f5   :  { %5766 = vmatprep.subr.bf16.mxu0 %v9847_v62  ;;  %5807 = vmatprep.subr.bf16.mxu1 %v9849_v0  ;;  %v3406_v62 = vld [vmem:[#allocation5 + $0x8c0] sm:$0xff]  ;;  %v3391_v0 = vld [vmem:[#allocation5 + $0x848] sm:$0xff] }
 0x2f6   :  { %v9975_v4 = vcombine.high %v3390_v61, %v3406_v62  ;;  %v9974_v11 = vcombine.low %v3390_v61, %v3406_v62  ;;  %v9976_v12 = vcombine.low %v3391_v0, %v3407_v1  ;;  %v3136_v62 = vld [vmem:[#allocation5 + $0x50] sm:$0xff] }
 0x2f8   :  { %5767 = vmatpush1.bf16.msra.mxu0 %v9846_v5  ;;  %5808 = vmatpush1.bf16.msra.mxu1 %v9848_v6  ;;  %v9977_v5 = vcombine.high %v3391_v0, %v3407_v1  ;;  %v3422_v6 = vld [vmem:[#allocation5 + $0x940] sm:$0xff]  ;;  %v3152_v0 = vld [vmem:[#allocation5 + $0xd0] sm:$0xff]  ;;  %v3137_v1 = vld [vmem:[#allocation5 + $0x58] sm:$0xff] }
 0x2f9   :  { %5768 = vmatprep.subr.bf16.mxu0 %v9879_v7  ;;  %5809 = vmatprep.subr.bf16.mxu1 %v9881_v8  ;;  %v3438_v7 = vld [vmem:[#allocation5 + $0x9c0] sm:$0xff]  ;;  %v3423_v8 = vld [vmem:[#allocation5 + $0x948] sm:$0xff] }
 0x2fa   :  { %v11682_v27 = vpop.f32.mrb[28].mxu0  ;;  %v11684_v34 = vpop.f32.mrb[28].mxu1  ;;  %v10007_v13 = vcombine.high %v3422_v6, %v3438_v7  ;;  %v10006_v33 = vcombine.low %v3422_v6, %v3438_v7  ;;  %v10008_v45 = vcombine.low %v3423_v8, %v3439_v58  ;;  %v3168_v7 = vld [vmem:[#allocation5 + $0x150] sm:$0xff] }
 0x2fb   :  { %12066 = vst [vmem:[#allocation27_spill] sm:$0xff] %v11682_v27  ;;  %12067 = vst [vmem:[#allocation28_spill] sm:$0xff] %v11684_v34  ;;  %v11686_v38 = vpop.f32.mrb[29].mxu0  ;;  %v11688_v36 = vpop.f32.mrb[29].mxu1  ;;  %v3411_v34 = vld [vmem:[#allocation5 + $0x8e8] sm:$0xff]  ;;  %v3396_v27 = vld [vmem:[#allocation5 + $0x870] sm:$0xff] }
 0x2fc   :  { %12068 = vst [vmem:[#allocation29_spill] sm:$0xff] %v11686_v38  ;;  %12069 = vst [vmem:[#allocation30_spill] sm:$0xff] %v11688_v36  ;;  %v3082_v49 = vpop.f32.mrb[30].mxu0  ;;  %5769 = vmatpush1.bf16.msra.mxu0 %v9878_v19  ;;  %v3123_v51 = vpop.f32.mrb[30].mxu1  ;;  %5810 = vmatpush1.bf16.msra.mxu1 %v9880_v20  ;;  %v10009_v19 = vcombine.high %v3423_v8, %v3439_v58  ;;  %v3454_v20 = vld [vmem:[#allocation5 + $0xa40] sm:$0xff]  ;;  %v3184_v8 = vld [vmem:[#allocation5 + $0x1d0] sm:$0xff] }
 0x2fd   :  { %v3083_v52 = vpop.f32.mrb[31].mxu0  ;;  %5770 = vmatprep.subr.bf16.mxu0 %v9911_v23  ;;  %v3124_v56 = vpop.f32.mrb[31].mxu1  ;;  %5811 = vmatprep.subr.bf16.mxu1 %v9913_v29  ;;  %v3470_v23 = vld [vmem:[#allocation5 + $0xac0] sm:$0xff]  ;;  %v3455_v29 = vld [vmem:[#allocation5 + $0xa48] sm:$0xff]  ;;  %v3169_v58 = vld [vmem:[#allocation5 + $0x158] sm:$0xff] }
 0x2fe   :  { %v10039_v47 = vcombine.high %v3454_v20, %v3470_v23  ;;  %v10041_v49 = vcombine.high %v3455_v29, %v3471_v30  ;;  %v3502_v51 = vld [vmem:[#allocation5 + $0xbc0] sm:$0xff]  ;;  %v3487_v52 = vld [vmem:[#allocation5 + $0xb48] sm:$0xff]  ;;  %v10040_v56 = vcombine.low %v3455_v29, %v3471_v30  ;;  %v3216_v29 = vld [vmem:[#allocation5 + $0x2d0] sm:$0xff] }
 0x2ff   :  { %v11693_v30 = vld.sshfl [vmem:[%s12049_s0] sm:$0x33 pattern:$0x76325410]  ;;  %v3394_v36 = vld [vmem:[#allocation5 + $0x860] sm:$0xff]  ;;  %s11333_s0 = smov [#allocation17]  }
 0x300   :  { %5771 = vmatpush1.bf16.msra.mxu0 %v9910_v50  ;;  %5812 = vmatpush1.bf16.msra.mxu1 %v9912_v53  ;;  %v3486_v50 = vld [vmem:[#allocation5 + $0xb40] sm:$0xff]  ;;  %v3503_v53 = vld [vmem:[#allocation5 + $0xbc8] sm:$0xff]  ;;  %s9288_s27 = sshll.u32 %s11333_s0, 4  ;;  %s9289_s27 = int_to_ptr.vmem [resolvable:$true] %s9288_s27 }
 0x301   :  { %5772 = vmatprep.subr.bf16.mxu0 %v9943_v55  ;;  %5813 = vmatprep.subr.bf16.mxu1 %v9945_v57  ;;  %v10038_v55 = vcombine.low %v3454_v20, %v3470_v23  ;;  %v10071_v57 = vcombine.high %v3486_v50, %v3502_v51  ;;  %v10073_v61 = vcombine.high %v3487_v52, %v3503_v53  ;;  %v3200_v23 = vld [vmem:[#allocation5 + $0x250] sm:$0xff]  ;;  %v3410_v38 = vld [vmem:[#allocation5 + $0x8e0] sm:$0xff]  ;;  %s11284_s28 = scalar_lea.vmem %s9289_s27, 32  ;;  %p11289_p3 = scmp.lt.s32.totalorder %s9289_s27, %s9289_s27 }
 0x302   :  { %p11285_p2 = scmp.ne.s32.totalorder %s9289_s27, %s11284_s28  ;;  %p11290_p4 = scmp.lt.s32.totalorder %s11284_s28, %s11284_s28 }
 0x304   :  { %5773 = vmatpush1.bf16.msra.mxu0 %v9942_v2  ;;  %5814 = vmatpush1.bf16.msra.mxu1 %v9944_v3  ;;  %v3153_v2 = vld [vmem:[#allocation5 + $0xd8] sm:$0xff]  ;;  %v10070_v3 = vcombine.low %v3486_v50, %v3502_v51  ;;  %v9787_v50 = vcombine.high %v3200_v23, %v3216_v29  ;;  %p11291_p5 = por %p11290_p4, %p11289_p3 }
 0x305   :  { %5774 = vmatprep.subr.bf16.mxu0 %v9975_v4  ;;  %5815 = vmatprep.subr.bf16.mxu1 %v9977_v5  ;;  %v10072_v4 = vcombine.low %v3487_v52, %v3503_v53  ;;  %v9723_v5 = vcombine.high %v3136_v62, %v3152_v0  ;;  %v9725_v6 = vcombine.high %v3137_v1, %v3153_v2  ;;  %v3232_v52 = vld [vmem:[#allocation5 + $0x350] sm:$0xff] }
 0x306   :  { %v3248_v53 = vld [vmem:[#allocation5 + $0x3d0] sm:$0xff]  ;;  %p11292_p6 = pnand %p11291_p5, %p11285_p2 }
 0x308   :  { %5775 = vmatpush1.bf16.msra.mxu0 %v9974_v11  ;;  %5816 = vmatpush1.bf16.msra.mxu1 %v9976_v12  ;;  %v3185_v11 = vld [vmem:[#allocation5 + $0x1d8] sm:$0xff]  ;;  %v9722_v12 = vcombine.low %v3136_v62, %v3152_v0  ;;  %v9819_v62 = vcombine.high %v3232_v52, %v3248_v53 }
 0x309   :  { %5776 = vmatprep.subr.bf16.mxu0 %v10007_v13  ;;  %5817 = vmatprep.subr.bf16.mxu1 %v10009_v19  ;;  %v9724_v13 = vcombine.low %v3137_v1, %v3153_v2  ;;  %v9755_v19 = vcombine.high %v3168_v7, %v3184_v8  ;;  %v9757_v20 = vcombine.high %v3169_v58, %v3185_v11  ;;  %v3264_v1 = vld [vmem:[#allocation5 + $0x450] sm:$0xff] }
 0x30a   :  { %v3280_v2 = vld [vmem:[#allocation5 + $0x4d0] sm:$0xff] }
 0x30c   :  { %5777 = vmatpush1.bf16.msra.mxu0 %v10006_v33  ;;  %5818 = vmatpush1.bf16.msra.mxu1 %v10008_v45  ;;  %v3201_v33 = vld [vmem:[#allocation5 + $0x258] sm:$0xff] }
 0x30d   :  { %5778 = vmatprep.subr.bf16.mxu0 %v10039_v47  ;;  %5819 = vmatprep.subr.bf16.mxu1 %v10041_v49  ;;  %v3217_v45 = vld [vmem:[#allocation5 + $0x2d8] sm:$0xff]  ;;  %v9754_v47 = vcombine.low %v3168_v7, %v3184_v8  ;;  %v9756_v49 = vcombine.low %v3169_v58, %v3185_v11  ;;  %v9851_v7 = vcombine.high %v3264_v1, %v3280_v2  ;;  %v3296_v58 = vld [vmem:[#allocation5 + $0x550] sm:$0xff] }
 0x30e   :  { %v9789_v51 = vcombine.high %v3201_v33, %v3217_v45  ;;  %v3312_v11 = vld [vmem:[#allocation5 + $0x5d0] sm:$0xff] }
 0x310   :  { %5779 = vmatpush1.bf16.msra.mxu0 %v10038_v55  ;;  %5820 = vmatpush1.bf16.msra.mxu1 %v10040_v56  ;;  %v3233_v55 = vld [vmem:[#allocation5 + $0x358] sm:$0xff] }
 0x311   :  { %5780 = vmatprep.subr.bf16.mxu0 %v10071_v57  ;;  %5821 = vmatprep.subr.bf16.mxu1 %v10073_v61  ;;  %v3249_v56 = vld [vmem:[#allocation5 + $0x3d8] sm:$0xff]  ;;  %v9786_v57 = vcombine.low %v3200_v23, %v3216_v29  ;;  %v9788_v61 = vcombine.low %v3201_v33, %v3217_v45  ;;  %v9883_v23 = vcombine.high %v3296_v58, %v3312_v11  ;;  %v3328_v33 = vld [vmem:[#allocation5 + $0x650] sm:$0xff] }
 0x312   :  { %v9821_v0 = vcombine.high %v3233_v55, %v3249_v56  ;;  %v3344_v45 = vld [vmem:[#allocation5 + $0x6d0] sm:$0xff] }
 0x314   :  { %5781 = vmatpush1.bf16.msra.mxu0 %v10070_v3  ;;  %5822 = vmatpush1.bf16.msra.mxu1 %v10072_v4  ;;  %v3265_v3 = vld [vmem:[#allocation5 + $0x458] sm:$0xff] }
 0x315   :  { %5840 = vmatprep.subr.bf16.mxu0 %v9723_v5  ;;  %5881 = vmatprep.subr.bf16.mxu1 %v9725_v6  ;;  %v3281_v4 = vld [vmem:[#allocation5 + $0x4d8] sm:$0xff]  ;;  %v9818_v5 = vcombine.low %v3232_v52, %v3248_v53  ;;  %v9820_v6 = vcombine.low %v3233_v55, %v3249_v56  ;;  %v9915_v52 = vcombine.high %v3328_v33, %v3344_v45  ;;  %v3360_v56 = vld [vmem:[#allocation5 + $0x750] sm:$0xff] }
 0x316   :  { %v9853_v8 = vcombine.high %v3265_v3, %v3281_v4 }
 0x317   :  { %5791 = vmatmul.mubr.bf16.vlgmr.msra.gmra.mrb[48].mxu0 %v11693_v30  ;;  %5832 = vmatmul.mubr.bf16.vlgmr.msra.gmra.mrb[48].mxu1 %v11693_v30 }
 0x318   :  { %5841 = vmatpush1.bf16.msra.mxu0 %v9722_v12  ;;  %5882 = vmatpush1.bf16.msra.mxu1 %v9724_v13  ;;  %v3297_v12 = vld [vmem:[#allocation5 + $0x558] sm:$0xff] }
 0x319   :  { %5842 = vmatprep.subr.bf16.mxu0 %v9755_v19  ;;  %5883 = vmatprep.subr.bf16.mxu1 %v9757_v20  ;;  %v3313_v13 = vld [vmem:[#allocation5 + $0x5d8] sm:$0xff]  ;;  %v9850_v19 = vcombine.low %v3264_v1, %v3280_v2  ;;  %v9852_v20 = vcombine.low %v3265_v3, %v3281_v4 }
 0x31a   :  { %10096 = vmatprep.mubr.msk.bf16.mxu0 %vm2466_vm0, %v11533_v46  ;;  %10097 = vmatprep.mubr.msk.bf16.mxu1 %vm2466_vm0, %v11533_v46  ;;  %v9885_v29 = vcombine.high %v3297_v12, %v3313_v13  ;;  %v3361_v1 = vld [vmem:[#allocation5 + $0x758] sm:$0xff] }
 0x31b   :  { %v3377_v2 = vld [vmem:[#allocation5 + $0x7d8] sm:$0xff] }
 0x31c   :  { %5843 = vmatpush1.bf16.msra.mxu0 %v9754_v47  ;;  %5884 = vmatpush1.bf16.msra.mxu1 %v9756_v49  ;;  %v3329_v47 = vld [vmem:[#allocation5 + $0x658] sm:$0xff] }
 0x31d   :  { %5844 = vmatprep.subr.bf16.mxu0 %v9787_v50  ;;  %5885 = vmatprep.subr.bf16.mxu1 %v9789_v51  ;;  %v3345_v49 = vld [vmem:[#allocation5 + $0x6d8] sm:$0xff]  ;;  %v9882_v50 = vcombine.low %v3296_v58, %v3312_v11  ;;  %v9884_v51 = vcombine.low %v3297_v12, %v3313_v13 }
 0x31e   :  { %v9917_v55 = vcombine.high %v3329_v47, %v3345_v49  ;;  %v9916_v12 = vcombine.low %v3329_v47, %v3345_v49  ;;  %v3393_v3 = vld [vmem:[#allocation5 + $0x858] sm:$0xff] }
 0x31f   :  { %v3441_v47 = vld [vmem:[#allocation5 + $0x9d8] sm:$0xff] }
 0x320   :  { %5845 = vmatpush1.bf16.msra.mxu0 %v9786_v57  ;;  %5886 = vmatpush1.bf16.msra.mxu1 %v9788_v61  ;;  %v3376_v57 = vld [vmem:[#allocation5 + $0x7d0] sm:$0xff]  ;;  %v3409_v61 = vld [vmem:[#allocation5 + $0x8d8] sm:$0xff] }
 0x321   :  { %5846 = vmatprep.subr.bf16.mxu0 %v9819_v62  ;;  %5887 = vmatprep.subr.bf16.mxu1 %v9821_v0  ;;  %v9947_v13 = vcombine.high %v3360_v56, %v3376_v57 }
 0x324   :  { %5847 = vmatpush1.bf16.msra.mxu0 %v9818_v5  ;;  %5888 = vmatpush1.bf16.msra.mxu1 %v9820_v6 }
 0x325   :  { %5848 = vmatprep.subr.bf16.mxu0 %v9851_v7  ;;  %5889 = vmatprep.subr.bf16.mxu1 %v9853_v8  ;;  %v9914_v7 = vcombine.low %v3328_v33, %v3344_v45  ;;  %v9948_v33 = vcombine.low %v3361_v1, %v3377_v2 }
 0x328   :  { %5849 = vmatpush1.bf16.msra.mxu0 %v9850_v19  ;;  %5890 = vmatpush1.bf16.msra.mxu1 %v9852_v20  ;;  %v9949_v20 = vcombine.high %v3361_v1, %v3377_v2 }
 0x329   :  { %5850 = vmatprep.subr.bf16.mxu0 %v9883_v23  ;;  %5891 = vmatprep.subr.bf16.mxu1 %v9885_v29  ;;  %v3392_v23 = vld [vmem:[#allocation5 + $0x850] sm:$0xff] }
 0x32a   :  { %v11701_v53 = vpop.f32.mrb[32].mxu0  ;;  %v11705_v62 = vpop.f32.mrb[32].mxu1  ;;  %v3408_v29 = vld [vmem:[#allocation5 + $0x8d0] sm:$0xff] }
 0x32b   :  { %v11707_v0 = vpop.f32.mrb[33].mxu0  ;;  %v11713_v5 = vpop.f32.mrb[33].mxu1  ;;  %v9979_v45 = vcombine.high %v3392_v23, %v3408_v29  ;;  %v9978_v49 = vcombine.low %v3392_v23, %v3408_v29  ;;  %v3504_v23 = vld [vmem:[#allocation5 + $0xbd0] sm:$0xff]  ;;  %v3489_v29 = vld [vmem:[#allocation5 + $0xb58] sm:$0xff] }
 0x32c   :  { %v5468_v6 = vpop.f32.mrb[34].mxu0  ;;  %5851 = vmatpush1.bf16.msra.mxu0 %v9882_v50  ;;  %v5509_v58 = vpop.f32.mrb[34].mxu1  ;;  %5892 = vmatpush1.bf16.msra.mxu1 %v9884_v51  ;;  %v9981_v50 = vcombine.high %v3393_v3, %v3409_v61  ;;  %v3424_v51 = vld [vmem:[#allocation5 + $0x950] sm:$0xff] }
 0x32d   :  { %v5469_v11 = vpop.f32.mrb[35].mxu0  ;;  %5852 = vmatprep.subr.bf16.mxu0 %v9915_v52  ;;  %v5510_v19 = vpop.f32.mrb[35].mxu1  ;;  %5893 = vmatprep.subr.bf16.mxu1 %v9917_v55  ;;  %v9946_v6 = vcombine.low %v3360_v56, %v3376_v57  ;;  %v3440_v58 = vld [vmem:[#allocation5 + $0x9d0] sm:$0xff]  ;;  %v3425_v52 = vld [vmem:[#allocation5 + $0x958] sm:$0xff]  ;;  %v9980_v55 = vcombine.low %v3393_v3, %v3409_v61 }
 0x32e   :  { %v10011_v11 = vcombine.high %v3424_v51, %v3440_v58  ;;  %v10013_v19 = vcombine.high %v3425_v52, %v3441_v47  ;;  %v3472_v56 = vld [vmem:[#allocation5 + $0xad0] sm:$0xff]  ;;  %v3457_v57 = vld [vmem:[#allocation5 + $0xa58] sm:$0xff]  ;;  %v10010_v1 = vcombine.low %v3424_v51, %v3440_v58  ;;  %v10012_v2 = vcombine.low %v3425_v52, %v3441_v47  ;;  %v3154_v51 = vld [vmem:[#allocation5 + $0xe0] sm:$0xff] }
 0x32f   :  { %v3139_v58 = vld [vmem:[#allocation5 + $0x68] sm:$0xff] }
 0x330   :  { %5853 = vmatpush1.bf16.msra.mxu0 %v9914_v7  ;;  %5894 = vmatpush1.bf16.msra.mxu1 %v9916_v12  ;;  %v3456_v7 = vld [vmem:[#allocation5 + $0xa50] sm:$0xff]  ;;  %v3473_v12 = vld [vmem:[#allocation5 + $0xad8] sm:$0xff] }
 0x331   :  { %5854 = vmatprep.subr.bf16.mxu0 %v9947_v13  ;;  %5895 = vmatprep.subr.bf16.mxu1 %v9949_v20  ;;  %v10043_v13 = vcombine.high %v3456_v7, %v3472_v56  ;;  %v10045_v20 = vcombine.high %v3457_v57, %v3473_v12  ;;  %v10042_v61 = vcombine.low %v3456_v7, %v3472_v56  ;;  %v3186_v7 = vld [vmem:[#allocation5 + $0x1e0] sm:$0xff]  ;;  %v3171_v56 = vld [vmem:[#allocation5 + $0x168] sm:$0xff] }
 0x332   :  { %v10044_v3 = vcombine.low %v3457_v57, %v3473_v12 }
 0x334   :  { %5855 = vmatpush1.bf16.msra.mxu0 %v9946_v6  ;;  %5896 = vmatpush1.bf16.msra.mxu1 %v9948_v33  ;;  %v3488_v6 = vld [vmem:[#allocation5 + $0xb50] sm:$0xff]  ;;  %v3505_v33 = vld [vmem:[#allocation5 + $0xbd8] sm:$0xff] }
 0x335   :  { %5856 = vmatprep.subr.bf16.mxu0 %v9979_v45  ;;  %5897 = vmatprep.subr.bf16.mxu1 %v9981_v50  ;;  %v10075_v45 = vcombine.high %v3488_v6, %v3504_v23  ;;  %v10077_v50 = vcombine.high %v3489_v29, %v3505_v33  ;;  %v10074_v52 = vcombine.low %v3488_v6, %v3504_v23  ;;  %v3218_v6 = vld [vmem:[#allocation5 + $0x2e0] sm:$0xff]  ;;  %v3203_v23 = vld [vmem:[#allocation5 + $0x268] sm:$0xff] }
 0x336   :  { %v10076_v47 = vcombine.low %v3489_v29, %v3505_v33  ;;  %v3219_v29 = vld [vmem:[#allocation5 + $0x2e8] sm:$0xff] }
 0x338   :  { %5857 = vmatpush1.bf16.msra.mxu0 %v9978_v49  ;;  %5898 = vmatpush1.bf16.msra.mxu1 %v9980_v55  ;;  %v3138_v49 = vld [vmem:[#allocation5 + $0x60] sm:$0xff]  ;;  %v3155_v55 = vld [vmem:[#allocation5 + $0xe8] sm:$0xff] }
 0x339   :  { %5858 = vmatprep.subr.bf16.mxu0 %v10011_v11  ;;  %5899 = vmatprep.subr.bf16.mxu1 %v10013_v19  ;;  %v9727_v11 = vcombine.high %v3138_v49, %v3154_v51  ;;  %v9729_v19 = vcombine.high %v3139_v58, %v3155_v55  ;;  %v9726_v57 = vcombine.low %v3138_v49, %v3154_v51  ;;  %v3234_v49 = vld [vmem:[#allocation5 + $0x360] sm:$0xff] }
 0x33a   :  { %v9728_v12 = vcombine.low %v3139_v58, %v3155_v55  ;;  %v3250_v51 = vld [vmem:[#allocation5 + $0x3e0] sm:$0xff]  ;;  %v3235_v58 = vld [vmem:[#allocation5 + $0x368] sm:$0xff] }
 0x33b   :  { %v3251_v55 = vld [vmem:[#allocation5 + $0x3e8] sm:$0xff] }
 0x33c   :  { %5859 = vmatpush1.bf16.msra.mxu0 %v10010_v1  ;;  %5900 = vmatpush1.bf16.msra.mxu1 %v10012_v2  ;;  %v3170_v1 = vld [vmem:[#allocation5 + $0x160] sm:$0xff]  ;;  %v3187_v2 = vld [vmem:[#allocation5 + $0x1e8] sm:$0xff] }
 0x33d   :  { %5860 = vmatprep.subr.bf16.mxu0 %v10043_v13  ;;  %5901 = vmatprep.subr.bf16.mxu1 %v10045_v20  ;;  %v9759_v13 = vcombine.high %v3170_v1, %v3186_v7  ;;  %v9761_v20 = vcombine.high %v3171_v56, %v3187_v2  ;;  %v9758_v33 = vcombine.low %v3170_v1, %v3186_v7  ;;  %v3266_v1 = vld [vmem:[#allocation5 + $0x460] sm:$0xff] }
 0x33e   :  { %v3282_v7 = vld [vmem:[#allocation5 + $0x4e0] sm:$0xff] }
 0x340   :  { %5861 = vmatpush1.bf16.msra.mxu0 %v10042_v61  ;;  %5902 = vmatpush1.bf16.msra.mxu1 %v10044_v3  ;;  %v3202_v61 = vld [vmem:[#allocation5 + $0x260] sm:$0xff]  ;;  %v9760_v3 = vcombine.low %v3171_v56, %v3187_v2  ;;  %v3267_v56 = vld [vmem:[#allocation5 + $0x468] sm:$0xff] }
 0x341   :  { %5862 = vmatprep.subr.bf16.mxu0 %v10075_v45  ;;  %5903 = vmatprep.subr.bf16.mxu1 %v10077_v50  ;;  %v9791_v45 = vcombine.high %v3202_v61, %v3218_v6  ;;  %v9793_v50 = vcombine.high %v3203_v23, %v3219_v29  ;;  %v3283_v2 = vld [vmem:[#allocation5 + $0x4e8] sm:$0xff] }
 0x344   :  { %5863 = vmatpush1.bf16.msra.mxu0 %v10074_v52  ;;  %5904 = vmatpush1.bf16.msra.mxu1 %v10076_v47  ;;  %v9790_v52 = vcombine.low %v3202_v61, %v3218_v6  ;;  %v9792_v47 = vcombine.low %v3203_v23, %v3219_v29  ;;  %v3314_v61 = vld [vmem:[#allocation5 + $0x5e0] sm:$0xff]  ;;  %v3299_v6 = vld [vmem:[#allocation5 + $0x568] sm:$0xff]  ;;  %v9854_v23 = vcombine.low %v3266_v1, %v3282_v7 }
 0x345   :  { %5922 = vmatprep.subr.bf16.mxu0 %v9727_v11  ;;  %5963 = vmatprep.subr.bf16.mxu1 %v9729_v19  ;;  %v9823_v11 = vcombine.high %v3234_v49, %v3250_v51  ;;  %v9825_v19 = vcombine.high %v3235_v58, %v3251_v55  ;;  %v9856_v29 = vcombine.low %v3267_v56, %v3283_v2 }
 0x347   :  { %5873 = vmatmul.mubr.bf16.vlgmr.msra.gmra.mrb[52].mxu0 %v11693_v30  ;;  %5914 = vmatmul.mubr.bf16.vlgmr.msra.gmra.mrb[52].mxu1 %v11693_v30 }
 0x348   :  { %5923 = vmatpush1.bf16.msra.mxu0 %v9726_v57  ;;  %5964 = vmatpush1.bf16.msra.mxu1 %v9728_v12  ;;  %v9822_v57 = vcombine.low %v3234_v49, %v3250_v51  ;;  %v9824_v12 = vcombine.low %v3235_v58, %v3251_v55  ;;  %v3346_v49 = vld [vmem:[#allocation5 + $0x6e0] sm:$0xff]  ;;  %v3331_v51 = vld [vmem:[#allocation5 + $0x668] sm:$0xff] }
 0x349   :  { %5924 = vmatprep.subr.bf16.mxu0 %v9759_v13  ;;  %5965 = vmatprep.subr.bf16.mxu1 %v9761_v20  ;;  %v9855_v13 = vcombine.high %v3266_v1, %v3282_v7  ;;  %v9857_v20 = vcombine.high %v3267_v56, %v3283_v2  ;;  %v3362_v7 = vld [vmem:[#allocation5 + $0x760] sm:$0xff] }
 0x34a   :  { %10098 = vmatprep.mubr.msk.bf16.mxu0 %vm2466_vm0, %v11533_v46  ;;  %10099 = vmatprep.mubr.msk.bf16.mxu1 %vm2466_vm0, %v11533_v46 }
 0x34c   :  { %5925 = vmatpush1.bf16.msra.mxu0 %v9758_v33  ;;  %5966 = vmatpush1.bf16.msra.mxu1 %v9760_v3  ;;  %v3298_v33 = vld [vmem:[#allocation5 + $0x560] sm:$0xff]  ;;  %v3315_v3 = vld [vmem:[#allocation5 + $0x5e8] sm:$0xff] }
 0x34d   :  { %5926 = vmatprep.subr.bf16.mxu0 %v9791_v45  ;;  %5967 = vmatprep.subr.bf16.mxu1 %v9793_v50  ;;  %v9887_v45 = vcombine.high %v3298_v33, %v3314_v61  ;;  %v9889_v50 = vcombine.high %v3299_v6, %v3315_v3  ;;  %v9886_v58 = vcombine.low %v3298_v33, %v3314_v61  ;;  %v3395_v61 = vld [vmem:[#allocation5 + $0x868] sm:$0xff] }
 0x34e   :  { %v9888_v55 = vcombine.low %v3299_v6, %v3315_v3 }
 0x350   :  { %5927 = vmatpush1.bf16.msra.mxu0 %v9790_v52  ;;  %5968 = vmatpush1.bf16.msra.mxu1 %v9792_v47  ;;  %v3330_v52 = vld [vmem:[#allocation5 + $0x660] sm:$0xff]  ;;  %v3347_v47 = vld [vmem:[#allocation5 + $0x6e8] sm:$0xff] }
 0x351   :  { %5928 = vmatprep.subr.bf16.mxu0 %v9823_v11  ;;  %5969 = vmatprep.subr.bf16.mxu1 %v9825_v19  ;;  %v9919_v11 = vcombine.high %v3330_v52, %v3346_v49  ;;  %v9921_v1 = vcombine.high %v3331_v51, %v3347_v47  ;;  %v9920_v56 = vcombine.low %v3331_v51, %v3347_v47  ;;  %v3443_v51 = vld [vmem:[#allocation5 + $0x9e8] sm:$0xff] }
 0x352   :  { %v9984_v47 = vcombine.low %v3395_v61, %v3411_v34 }
 0x354   :  { %5929 = vmatpush1.bf16.msra.mxu0 %v9822_v57  ;;  %5970 = vmatpush1.bf16.msra.mxu1 %v9824_v12  ;;  %v3378_v57 = vld [vmem:[#allocation5 + $0x7e0] sm:$0xff] }
 0x355   :  { %5930 = vmatprep.subr.bf16.mxu0 %v9855_v13  ;;  %5971 = vmatprep.subr.bf16.mxu1 %v9857_v20  ;;  %v3363_v13 = vld [vmem:[#allocation5 + $0x768] sm:$0xff]  ;;  %v9951_v8 = vcombine.high %v3362_v7, %v3378_v57 }
 0x356   :  { %v3379_v20 = vld [vmem:[#allocation5 + $0x7e8] sm:$0xff] }
 0x357   :  { %v9953_v33 = vcombine.high %v3363_v13, %v3379_v20 }
 0x358   :  { %5931 = vmatpush1.bf16.msra.mxu0 %v9854_v23  ;;  %5972 = vmatpush1.bf16.msra.mxu1 %v9856_v29  ;;  %v9918_v23 = vcombine.low %v3330_v52, %v3346_v49  ;;  %v9952_v52 = vcombine.low %v3363_v13, %v3379_v20  ;;  %v9983_v49 = vcombine.high %v3394_v36, %v3410_v38 }
 0x359   :  { %5932 = vmatprep.subr.bf16.mxu0 %v9887_v45  ;;  %5973 = vmatprep.subr.bf16.mxu1 %v9889_v50 }
 0x35a   :  { %v11723_v19 = vpop.f32.mrb[36].mxu0  ;;  %v11727_v2 = vpop.f32.mrb[36].mxu1 }
 0x35b   :  { %v11729_v12 = vpop.f32.mrb[37].mxu0  ;;  %v11735_v6 = vpop.f32.mrb[37].mxu1 }
 0x35c   :  { %v5550_v3 = vpop.f32.mrb[38].mxu0  ;;  %5933 = vmatpush1.bf16.msra.mxu0 %v9886_v58  ;;  %v5591_v45 = vpop.f32.mrb[38].mxu1  ;;  %5974 = vmatpush1.bf16.msra.mxu1 %v9888_v55  ;;  %v9985_v58 = vcombine.high %v3395_v61, %v3411_v34  ;;  %v3426_v55 = vld [vmem:[#allocation5 + $0x960] sm:$0xff] }
 0x35d   :  { %v5551_v50 = vpop.f32.mrb[39].mxu0  ;;  %5934 = vmatprep.subr.bf16.mxu0 %v9919_v11  ;;  %v5592_v4 = vpop.f32.mrb[39].mxu1  ;;  %5975 = vmatprep.subr.bf16.mxu1 %v9921_v1  ;;  %v9950_v3 = vcombine.low %v3362_v7, %v3378_v57  ;;  %v3442_v45 = vld [vmem:[#allocation5 + $0x9e0] sm:$0xff]  ;;  %v3427_v11 = vld [vmem:[#allocation5 + $0x968] sm:$0xff] }
 0x35e   :  { %v9982_v4 = vcombine.low %v3394_v36, %v3410_v38  ;;  %v10015_v1 = vcombine.high %v3426_v55, %v3442_v45  ;;  %v10017_v50 = vcombine.high %v3427_v11, %v3443_v51  ;;  %v3474_v7 = vld [vmem:[#allocation5 + $0xae0] sm:$0xff]  ;;  %v3459_v57 = vld [vmem:[#allocation5 + $0xa68] sm:$0xff]  ;;  %v10016_v13 = vcombine.low %v3427_v11, %v3443_v51 }
 0x35f   :  { %v3506_v38 = vld [vmem:[#allocation5 + $0xbe0] sm:$0xff]  ;;  %v3491_v36 = vld [vmem:[#allocation5 + $0xb68] sm:$0xff] }
 0x360   :  { %5935 = vmatpush1.bf16.msra.mxu0 %v9918_v23  ;;  %5976 = vmatpush1.bf16.msra.mxu1 %v9920_v56  ;;  %v3458_v23 = vld [vmem:[#allocation5 + $0xa60] sm:$0xff]  ;;  %v10014_v56 = vcombine.low %v3426_v55, %v3442_v45  ;;  %v3156_v55 = vld [vmem:[#allocation5 + $0xf0] sm:$0xff]  ;;  %v3141_v45 = vld [vmem:[#allocation5 + $0x78] sm:$0xff] }
 0x361   :  { %5936 = vmatprep.subr.bf16.mxu0 %v9951_v8  ;;  %5977 = vmatprep.subr.bf16.mxu1 %v9953_v33  ;;  %v3475_v8 = vld [vmem:[#allocation5 + $0xae8] sm:$0xff]  ;;  %v10047_v20 = vcombine.high %v3458_v23, %v3474_v7  ;;  %v10046_v34 = vcombine.low %v3458_v23, %v3474_v7  ;;  %v3188_v23 = vld [vmem:[#allocation5 + $0x1f0] sm:$0xff]  ;;  %v3173_v7 = vld [vmem:[#allocation5 + $0x178] sm:$0xff] }
 0x362   :  { %v10049_v33 = vcombine.high %v3459_v57, %v3475_v8  ;;  %v10048_v61 = vcombine.low %v3459_v57, %v3475_v8 }
 0x364   :  { %5937 = vmatpush1.bf16.msra.mxu0 %v9950_v3  ;;  %5978 = vmatpush1.bf16.msra.mxu1 %v9952_v52  ;;  %v3490_v3 = vld [vmem:[#allocation5 + $0xb60] sm:$0xff]  ;;  %v3507_v52 = vld [vmem:[#allocation5 + $0xbe8] sm:$0xff] }
 0x365   :  { %5938 = vmatprep.subr.bf16.mxu0 %v9983_v49  ;;  %5979 = vmatprep.subr.bf16.mxu1 %v9985_v58  ;;  %v10079_v49 = vcombine.high %v3490_v3, %v3506_v38  ;;  %v10081_v58 = vcombine.high %v3491_v36, %v3507_v52  ;;  %v10078_v11 = vcombine.low %v3490_v3, %v3506_v38  ;;  %v3220_v3 = vld [vmem:[#allocation5 + $0x2f0] sm:$0xff]  ;;  %v3205_v38 = vld [vmem:[#allocation5 + $0x278] sm:$0xff] }
 0x366   :  { %v10080_v51 = vcombine.low %v3491_v36, %v3507_v52  ;;  %v3221_v36 = vld [vmem:[#allocation5 + $0x2f8] sm:$0xff] }
 0x368   :  { %5939 = vmatpush1.bf16.msra.mxu0 %v9982_v4  ;;  %5980 = vmatpush1.bf16.msra.mxu1 %v9984_v47  ;;  %v3140_v4 = vld [vmem:[#allocation5 + $0x70] sm:$0xff]  ;;  %v3157_v47 = vld [vmem:[#allocation5 + $0xf8] sm:$0xff] }
 0x369   :  { %5940 = vmatprep.subr.bf16.mxu0 %v10015_v1  ;;  %5981 = vmatprep.subr.bf16.mxu1 %v10017_v50  ;;  %v9731_v1 = vcombine.high %v3140_v4, %v3156_v55  ;;  %v9733_v50 = vcombine.high %v3141_v45, %v3157_v47  ;;  %v9730_v57 = vcombine.low %v3140_v4, %v3156_v55  ;;  %v3236_v4 = vld [vmem:[#allocation5 + $0x370] sm:$0xff] }
 0x36a   :  { %v9732_v8 = vcombine.low %v3141_v45, %v3157_v47  ;;  %v3252_v55 = vld [vmem:[#allocation5 + $0x3f0] sm:$0xff]  ;;  %v3237_v45 = vld [vmem:[#allocation5 + $0x378] sm:$0xff] }
 0x36b   :  { %v3253_v47 = vld [vmem:[#allocation5 + $0x3f8] sm:$0xff] }
 0x36c   :  { %5941 = vmatpush1.bf16.msra.mxu0 %v10014_v56  ;;  %5982 = vmatpush1.bf16.msra.mxu1 %v10016_v13  ;;  %v3172_v56 = vld [vmem:[#allocation5 + $0x170] sm:$0xff]  ;;  %v3189_v13 = vld [vmem:[#allocation5 + $0x1f8] sm:$0xff] }
 0x36d   :  { %5942 = vmatprep.subr.bf16.mxu0 %v10047_v20  ;;  %5983 = vmatprep.subr.bf16.mxu1 %v10049_v33  ;;  %v9763_v20 = vcombine.high %v3172_v56, %v3188_v23  ;;  %v9765_v33 = vcombine.high %v3173_v7, %v3189_v13  ;;  %v9762_v52 = vcombine.low %v3172_v56, %v3188_v23  ;;  %v3268_v56 = vld [vmem:[#allocation5 + $0x470] sm:$0xff] }
 0x36e   :  { %v3284_v23 = vld [vmem:[#allocation5 + $0x4f0] sm:$0xff] }
 0x370   :  { %5943 = vmatpush1.bf16.msra.mxu0 %v10046_v34  ;;  %5984 = vmatpush1.bf16.msra.mxu1 %v10048_v61  ;;  %v3204_v34 = vld [vmem:[#allocation5 + $0x270] sm:$0xff]  ;;  %v9764_v61 = vcombine.low %v3173_v7, %v3189_v13  ;;  %v3269_v7 = vld [vmem:[#allocation5 + $0x478] sm:$0xff] }
 0x371   :  { %5944 = vmatprep.subr.bf16.mxu0 %v10079_v49  ;;  %5985 = vmatprep.subr.bf16.mxu1 %v10081_v58  ;;  %v9795_v49 = vcombine.high %v3204_v34, %v3220_v3  ;;  %v9797_v58 = vcombine.high %v3205_v38, %v3221_v36  ;;  %v3285_v13 = vld [vmem:[#allocation5 + $0x4f8] sm:$0xff] }
 0x374   :  { %5945 = vmatpush1.bf16.msra.mxu0 %v10078_v11  ;;  %5986 = vmatpush1.bf16.msra.mxu1 %v10080_v51  ;;  %v9794_v11 = vcombine.low %v3204_v34, %v3220_v3  ;;  %v9796_v51 = vcombine.low %v3205_v38, %v3221_v36  ;;  %v3316_v34 = vld [vmem:[#allocation5 + $0x5f0] sm:$0xff]  ;;  %v3301_v3 = vld [vmem:[#allocation5 + $0x578] sm:$0xff]  ;;  %v9858_v38 = vcombine.low %v3268_v56, %v3284_v23 }
 0x375   :  { %6004 = vmatprep.subr.bf16.mxu0 %v9731_v1  ;;  %6045 = vmatprep.subr.bf16.mxu1 %v9733_v50  ;;  %v9827_v1 = vcombine.high %v3236_v4, %v3252_v55  ;;  %v9829_v50 = vcombine.high %v3237_v45, %v3253_v47  ;;  %v9860_v36 = vcombine.low %v3269_v7, %v3285_v13 }
 0x377   :  { %5955 = vmatmul.mubr.bf16.vlgmr.msra.gmra.mrb[56].mxu0 %v11693_v30  ;;  %5996 = vmatmul.mubr.bf16.vlgmr.msra.gmra.mrb[56].mxu1 %v11693_v30 }
 0x378   :  { %6005 = vmatpush1.bf16.msra.mxu0 %v9730_v57  ;;  %6046 = vmatpush1.bf16.msra.mxu1 %v9732_v8  ;;  %v9826_v57 = vcombine.low %v3236_v4, %v3252_v55  ;;  %v9828_v8 = vcombine.low %v3237_v45, %v3253_v47  ;;  %v3348_v4 = vld [vmem:[#allocation5 + $0x6f0] sm:$0xff]  ;;  %v3333_v55 = vld [vmem:[#allocation5 + $0x678] sm:$0xff] }
 0x379   :  { %6006 = vmatprep.subr.bf16.mxu0 %v9763_v20  ;;  %6047 = vmatprep.subr.bf16.mxu1 %v9765_v33  ;;  %v9859_v20 = vcombine.high %v3268_v56, %v3284_v23  ;;  %v3300_v33 = vld [vmem:[#allocation5 + $0x570] sm:$0xff] }
 0x37a   :  { %10100 = vmatprep.mubr.msk.bf16.mxu0 %vm2466_vm0, %v11533_v46  ;;  %10101 = vmatprep.mubr.msk.bf16.mxu1 %vm2466_vm0, %v11533_v46  ;;  %v9861_v46 = vcombine.high %v3269_v7, %v3285_v13  ;;  %v9890_v45 = vcombine.low %v3300_v33, %v3316_v34  ;;  %v3364_v56 = vld [vmem:[#allocation5 + $0x770] sm:$0xff] }
 0x37b   :  { %v3380_v23 = vld [vmem:[#allocation5 + $0x7f0] sm:$0xff] }
 0x37c   :  { %6007 = vmatpush1.bf16.msra.mxu0 %v9762_v52  ;;  %6048 = vmatpush1.bf16.msra.mxu1 %v9764_v61  ;;  %v3317_v52 = vld [vmem:[#allocation5 + $0x5f8] sm:$0xff]  ;;  %v9891_v61 = vcombine.high %v3300_v33, %v3316_v34  ;;  %v9955_v7 = vcombine.high %v3364_v56, %v3380_v23 }
 0x37d   :  { %6008 = vmatprep.subr.bf16.mxu0 %v9795_v49  ;;  %6049 = vmatprep.subr.bf16.mxu1 %v9797_v58  ;;  %v9893_v49 = vcombine.high %v3301_v3, %v3317_v52  ;;  %v3332_v58 = vld [vmem:[#allocation5 + $0x670] sm:$0xff]  ;;  %v9892_v47 = vcombine.low %v3301_v3, %v3317_v52  ;;  %v3397_v33 = vld [vmem:[#allocation5 + $0x878] sm:$0xff] }
 0x37e   :  { %v9922_v52 = vcombine.low %v3332_v58, %v3348_v4 }
 0x380   :  { %6009 = vmatpush1.bf16.msra.mxu0 %v9794_v11  ;;  %6050 = vmatpush1.bf16.msra.mxu1 %v9796_v51  ;;  %v3349_v11 = vld [vmem:[#allocation5 + $0x6f8] sm:$0xff]  ;;  %v9923_v51 = vcombine.high %v3332_v58, %v3348_v4  ;;  %v9987_v4 = vcombine.high %v3396_v27, %v3412_v48 }
 0x381   :  { %6010 = vmatprep.subr.bf16.mxu0 %v9827_v1  ;;  %6051 = vmatprep.subr.bf16.mxu1 %v9829_v50  ;;  %v9925_v50 = vcombine.high %v3333_v55, %v3349_v11 }
 0x384   :  { %6011 = vmatpush1.bf16.msra.mxu0 %v9826_v57  ;;  %6052 = vmatpush1.bf16.msra.mxu1 %v9828_v8  ;;  %v3365_v8 = vld [vmem:[#allocation5 + $0x778] sm:$0xff] }
 0x385   :  { %6012 = vmatprep.subr.bf16.mxu0 %v9859_v20  ;;  %6053 = vmatprep.subr.bf16.mxu1 %v9861_v46  ;;  %v3381_v20 = vld [vmem:[#allocation5 + $0x7f8] sm:$0xff] }
 0x386   :  { %v9957_v46 = vcombine.high %v3365_v8, %v3381_v20  ;;  %v9956_v58 = vcombine.low %v3365_v8, %v3381_v20  ;;  %v3461_v8 = vld [vmem:[#allocation5 + $0xa78] sm:$0xff] }
 0x387   :  { %v3477_v20 = vld [vmem:[#allocation5 + $0xaf8] sm:$0xff] }
 0x388   :  { %6013 = vmatpush1.bf16.msra.mxu0 %v9858_v38  ;;  %6054 = vmatpush1.bf16.msra.mxu1 %v9860_v36 }
 0x389   :  { %6014 = vmatprep.subr.bf16.mxu0 %v9891_v61  ;;  %6055 = vmatprep.subr.bf16.mxu1 %v9893_v49  ;;  %v9924_v49 = vcombine.low %v3333_v55, %v3349_v11  ;;  %v3429_v55 = vld [vmem:[#allocation5 + $0x978] sm:$0xff] }
 0x38a   :  { %v11745_v1 = vpop.f32.mrb[40].mxu0  ;;  %v11749_v13 = vpop.f32.mrb[40].mxu1  ;;  %v3445_v11 = vld [vmem:[#allocation5 + $0x9f8] sm:$0xff] }
 0x38b   :  { %v11751_v57 = vpop.f32.mrb[41].mxu0  ;;  %v11757_v34 = vpop.f32.mrb[41].mxu1 }
 0x38c   :  { %v5632_v3 = vpop.f32.mrb[42].mxu0  ;;  %6015 = vmatpush1.bf16.msra.mxu0 %v9890_v45  ;;  %v5673_v36 = vpop.f32.mrb[42].mxu1  ;;  %6056 = vmatpush1.bf16.msra.mxu1 %v9892_v47  ;;  %v9989_v45 = vcombine.high %v3397_v33, %v3413_v44  ;;  %v3428_v47 = vld [vmem:[#allocation5 + $0x970] sm:$0xff] }
 0x38d   :  { %v5633_v61 = vpop.f32.mrb[43].mxu0  ;;  %6016 = vmatprep.subr.bf16.mxu0 %v9923_v51  ;;  %v5674_v29 = vpop.f32.mrb[43].mxu1  ;;  %6057 = vmatprep.subr.bf16.mxu1 %v9925_v50  ;;  %v9954_v3 = vcombine.low %v3364_v56, %v3380_v23  ;;  %v3444_v36 = vld [vmem:[#allocation5 + $0x9f0] sm:$0xff]  ;;  %v6126_v51 = vlaneseq  ;;  %v9988_v50 = vcombine.low %v3397_v33, %v3413_v44  ;;  %v3493_v33 = vld [vmem:[#allocation5 + $0xb78] sm:$0xff] }
 0x38e   :  { %v9986_v29 = vcombine.low %v3396_v27, %v3412_v48  ;;  %v10019_v61 = vcombine.high %v3428_v47, %v3444_v36  ;;  %v3460_v56 = vld [vmem:[#allocation5 + $0xa70] sm:$0xff]  ;;  %v10053_v48 = vcombine.high %v3461_v8, %v3477_v20 }
 0x38f   :  { %v3476_v23 = vld [vmem:[#allocation5 + $0xaf0] sm:$0xff] }
 0x390   :  { %6017 = vmatpush1.bf16.msra.mxu0 %v9922_v52  ;;  %6058 = vmatpush1.bf16.msra.mxu1 %v9924_v49  ;;  %v10021_v52 = vcombine.high %v3429_v55, %v3445_v11  ;;  %v10020_v49 = vcombine.low %v3429_v55, %v3445_v11  ;;  %v10051_v38 = vcombine.high %v3460_v56, %v3476_v23  ;;  %v3492_v27 = vld [vmem:[#allocation5 + $0xb70] sm:$0xff] }
 0x391   :  { %6018 = vmatprep.subr.bf16.mxu0 %v9955_v7  ;;  %6059 = vmatprep.subr.bf16.mxu1 %v9957_v46  ;;  %v11761_v7 = vshrl.u32 %v6126_v51, 7  ;;  %v10018_v46 = vcombine.low %v3428_v47, %v3444_v36  ;;  %v10050_v47 = vcombine.low %v3460_v56, %v3476_v23  ;;  %v10052_v36 = vcombine.low %v3461_v8, %v3477_v20  ;;  %v10805_v56 = vld [vmem:[#allocation8 + $0xc0] sm:$0xff]  }
 0x392   :  { %v12071_v8 = vmax.f32 %v11580_v42, %v11713_v5  ;;  %v10811_v42 = vld [vmem:[#allocation8 + $0x88] sm:$0xff]   ;;  %v10813_v5 = vld [vmem:[#allocation8 + $0xd0] sm:$0xff]  }
 0x393   :  { %v11764_v44 = vsub.s32 1, %v11761_v7 }
 0x394   :  { %6019 = vmatpush1.bf16.msra.mxu0 %v9954_v3  ;;  %6060 = vmatpush1.bf16.msra.mxu1 %v9956_v58  ;;  %v3508_v3 = vld [vmem:[#allocation5 + $0xbf0] sm:$0xff]  ;;  %v3509_v58 = vld [vmem:[#allocation5 + $0xbf8] sm:$0xff] }
 0x395   :  { %6020 = vmatprep.subr.bf16.mxu0 %v9987_v4  ;;  %6061 = vmatprep.subr.bf16.mxu1 %v9989_v45  ;;  %v11766_v4 = vld [vmem:[#allocation7] sm:$0xff]  ;;  %v11769_v45 = vsub.s32 3, %v11761_v7  ;;  %v10083_v51 = vcombine.high %v3492_v27, %v3508_v3  ;;  %v10085_v55 = vcombine.high %v3493_v33, %v3509_v58 }
 0x396   :  { %v6133_v11 = vrot.slane %v11766_v4, %v11764_v44 }
 0x398   :  { %6021 = vmatpush1.bf16.msra.mxu0 %v9986_v29  ;;  %6062 = vmatpush1.bf16.msra.mxu1 %v9988_v50  ;;  %v6141_v29 = vrot.slane %v11766_v4, %v11769_v45  ;;  %v10082_v50 = vcombine.low %v3492_v27, %v3508_v3  ;;  %v10809_v3 = vld [vmem:[#allocation8 + $0xc8] sm:$0xff]  }
 0x399   :  { %6022 = vmatprep.subr.bf16.mxu0 %v10019_v61  ;;  %6063 = vmatprep.subr.bf16.mxu1 %v10021_v52  ;;  %v10084_v61 = vcombine.low %v3493_v33, %v3509_v58  ;;  %v10804_v52 = vld [vmem:[#allocation8 + $0x40] sm:$0xff]   ;;  %v10814_v58 = vld [vmem:[#allocation8 + $0x10] sm:$0xff]  }
 0x39a   :  { %v6289_v20 = vadd.f32 %v6141_v29, %v12071_v8  ;;  %v10821_v29 = vld [vmem:[#allocation8 + $0xe0] sm:$0xff]   ;;  %v10827_v8 = vld [vmem:[#allocation8 + $0xa8] sm:$0xff]  }
 0x39c   :  { %6023 = vmatpush1.bf16.msra.mxu0 %v10018_v46  ;;  %6064 = vmatpush1.bf16.msra.mxu1 %v10020_v49  ;;  %v10806_v46 = vld [vmem:[#allocation8] sm:$0xff]   ;;  %v6321_v33 = vpack.c.bf16 %v6289_v20, %v6289_v20  ;;  %v10828_v20 = vld [vmem:[#allocation8 + $0x70] sm:$0xff]  }
 0x39d   :  { %6024 = vmatprep.subr.bf16.mxu0 %v10051_v38  ;;  %6065 = vmatprep.subr.bf16.mxu1 %v10053_v48  ;;  %v12070_v38 = vmax.f32 %v11578_v41, %v11707_v0  ;;  %v10807_v49 = vld [vmem:[#allocation8 + $0x80] sm:$0xff]   ;;  %v10808_v48 = vld [vmem:[#allocation8 + $0x48] sm:$0xff]   ;;  %v10812_v0 = vld [vmem:[#allocation8 + $0x50] sm:$0xff]  }
 0x39e   :  { %v10810_v41 = vld [vmem:[#allocation8 + $0x8] sm:$0xff]  }
 0x39f   :  { %v6287_v23 = vadd.f32 %v6133_v11, %v12070_v38  ;;  %v10820_v11 = vld [vmem:[#allocation8 + $0x60] sm:$0xff]   ;;  %v10826_v38 = vld [vmem:[#allocation8 + $0x28] sm:$0xff]  }
 0x3a0   :  { %6025 = vmatpush1.bf16.msra.mxu0 %v10050_v47  ;;  %6066 = vmatpush1.bf16.msra.mxu1 %v10052_v36  ;;  %v10815_v47 = vld [vmem:[#allocation8 + $0x90] sm:$0xff]   ;;  %v10816_v36 = vld [vmem:[#allocation8 + $0x58] sm:$0xff]  }
 0x3a1   :  { %6026 = vmatprep.subr.bf16.mxu0 %v10083_v51  ;;  %6067 = vmatprep.subr.bf16.mxu1 %v10085_v55  ;;  %v6319_v27 = vpack.c.bf16 %v6287_v23, %v6287_v23  ;;  %v10817_v51 = vld [vmem:[#allocation8 + $0xd8] sm:$0xff]   ;;  %v11784_v23 = vsub.s32 0, %v11761_v7 }
 0x3a2   :  { %v10819_v55 = vld [vmem:[#allocation8 + $0x98] sm:$0xff]  }
 0x3a4   :  { %6027 = vmatpush1.bf16.msra.mxu0 %v10082_v50  ;;  %6068 = vmatpush1.bf16.msra.mxu1 %v10084_v61  ;;  %v10822_v50 = vld [vmem:[#allocation8 + $0x20] sm:$0xff]  }
 0x3a5   :  { %10378 = vmatprep.subr.bf16.mxu0 %v10804_v52  ;;  %10400 = vmatprep.subr.bf16.mxu1 %v10805_v56  ;;  %v10823_v61 = vld [vmem:[#allocation8 + $0xa0] sm:$0xff]   ;;  %v10824_v52 = vld [vmem:[#allocation8 + $0x68] sm:$0xff]  }
 0x3a6   :  { %v10825_v56 = vld [vmem:[#allocation8 + $0xe8] sm:$0xff]  }
 0x3a7   :  { %6037 = vmatmul.mubr.bf16.vlgmr.msra.gmra.mrb[60].mxu0 %v11693_v30  ;;  %6078 = vmatmul.mubr.bf16.vlgmr.msra.gmra.mrb[60].mxu1 %v11693_v30  ;;  %v10818_v30 = vld [vmem:[#allocation8 + $0x18] sm:$0xff]  }
 0x3a8   :  { %10379 = vmatpush3.bf16.msra.mxu0 %v10806_v46  ;;  %8430 = vmatprep.mubr.bf16.mxu0 %v6319_v27  ;;  %v11787_v46 = vsub.s32 2, %v11761_v7  ;;  %v11792_v27 = vsub.s32 5, %v11761_v7 }
 0x3a9   :  { %10401 = vmatpush3.bf16.msra.mxu1 %v10807_v49  ;;  %8470 = vmatprep.mubr.bf16.mxu1 %v6321_v33 }
 0x3aa   :  { %10380 = vmatprep.subr.bf16.mxu0 %v10808_v48  ;;  %10402 = vmatprep.subr.bf16.mxu1 %v10809_v3  ;;  %v10829_v48 = vld [vmem:[#allocation8 + $0xf0] sm:$0xff]   ;;  %v10837_v3 = vld [vmem:[#allocation8 + $0x1c0] sm:$0xff]  }
 0x3ac   :  { %10381 = vmatpush3.bf16.msra.mxu0 %v10810_v41 }
 0x3ad   :  { %10403 = vmatpush3.bf16.msra.mxu1 %v10811_v42  ;;  %10382 = vmatprep.subr.bf16.mxu0 %v10812_v0  ;;  %v11801_v42 = vsub.s32 7, %v11761_v7  ;;  %v10834_v0 = vld [vmem:[#allocation8 + $0x38] sm:$0xff]  }
 0x3ae   :  { %10404 = vmatprep.subr.bf16.mxu1 %v10813_v5 }
 0x3b0   :  { %10383 = vmatpush3.bf16.msra.mxu0 %v10814_v58 }
 0x3b1   :  { %10405 = vmatpush3.bf16.msra.mxu1 %v10815_v47  ;;  %10384 = vmatprep.subr.bf16.mxu0 %v10816_v36  ;;  %v10830_v36 = vld [vmem:[#allocation8 + $0x30] sm:$0xff]  }
 0x3b2   :  { %10406 = vmatprep.subr.bf16.mxu1 %v10817_v51  ;;  %v6129_v51 = vrot.slane %v11766_v4, %v11784_v23 }
 0x3b4   :  { %10385 = vmatpush3.bf16.msra.mxu0 %v10818_v30  ;;  %v12074_v30 = vmax.f32 %v11597_v25, %v11729_v12  ;;  %v10842_v25 = vld [vmem:[#allocation8 + $0x108] sm:$0xff]   ;;  %v10844_v12 = vld [vmem:[#allocation8 + $0x150] sm:$0xff]  }
 0x3b5   :  { %10407 = vmatpush3.bf16.msra.mxu1 %v10819_v55  ;;  %10386 = vmatprep.subr.bf16.mxu0 %v10820_v11 }
 0x3b6   :  { %10408 = vmatprep.subr.bf16.mxu1 %v10821_v29  ;;  %v10831_v29 = vld [vmem:[#allocation8 + $0xb0] sm:$0xff]  }
 0x3b8   :  { %10387 = vmatpush3.bf16.msra.mxu0 %v10822_v50  ;;  %v10832_v50 = vld [vmem:[#allocation8 + $0x78] sm:$0xff]  }
 0x3b9   :  { %10409 = vmatpush3.bf16.msra.mxu1 %v10823_v61  ;;  %10388 = vmatprep.subr.bf16.mxu0 %v10824_v52  ;;  %v6137_v61 = vrot.slane %v11766_v4, %v11787_v46 }
 0x3ba   :  { %v11789_v49 = vpop.f32.mrb[44].mxu0  ;;  %10410 = vmatprep.subr.bf16.mxu1 %v10825_v56  ;;  %v11796_v33 = vpop.f32.mrb[44].mxu1  ;;  %v10833_v56 = vld [vmem:[#allocation8 + $0xf8] sm:$0xff]  }
 0x3bb   :  { %v11798_v41 = vpop.f32.mrb[45].mxu0  ;;  %v11807_v58 = vpop.f32.mrb[45].mxu1 }
 0x3bc   :  { %v5714_v47 = vpop.f32.mrb[46].mxu0  ;;  %10389 = vmatpush3.bf16.msra.mxu0 %v10826_v38  ;;  %v5755_v55 = vpop.f32.mrb[46].mxu1  ;;  %v6149_v38 = vrot.slane %v11766_v4, %v11792_v27 }
 0x3bd   :  { %10411 = vmatpush3.bf16.msra.mxu1 %v10827_v8  ;;  %v5715_v11 = vpop.f32.mrb[47].mxu0  ;;  %10390 = vmatprep.subr.bf16.mxu0 %v10828_v20  ;;  %v5756_v52 = vpop.f32.mrb[47].mxu1  ;;  %v6157_v47 = vrot.slane %v11766_v4, %v11801_v42  ;;  %v12072_v8 = vmax.f32 %v11574_v37, %v11701_v53  ;;  %v10835_v55 = vld [vmem:[#allocation8 + $0xb8] sm:$0xff]   ;;  %v10838_v37 = vld [vmem:[#allocation8 + $0x100] sm:$0xff]  }
 0x3be   :  { %10412 = vmatprep.subr.bf16.mxu1 %v10829_v48  ;;  %v10836_v11 = vld [vmem:[#allocation8 + $0x140] sm:$0xff]   ;;  %v12073_v48 = vmax.f32 %v11576_v40, %v11705_v62  ;;  %v6291_v5 = vadd.f32 %v6149_v38, %v12074_v30  ;;  %v10840_v40 = vld [vmem:[#allocation8 + $0x148] sm:$0xff]   ;;  %v10849_v30 = vld [vmem:[#allocation8 + $0x1d8] sm:$0xff]  }
 0x3bf   :  { %v6286_v20 = vadd.f32 %v6129_v51, %v12072_v8  ;;  %v10839_v51 = vld [vmem:[#allocation8 + $0x180] sm:$0xff]  }
 0x3c0   :  { %10391 = vmatpush3.bf16.msra.mxu0 %v10830_v36  ;;  %v6288_v52 = vadd.f32 %v6137_v61, %v12073_v48  ;;  %v12075_v36 = vmax.f32 %v11599_v26, %v11735_v6  ;;  %v6323_v62 = vpack.c.bf16 %v6291_v5, %v6291_v5  ;;  %v10843_v26 = vld [vmem:[#allocation8 + $0x188] sm:$0xff]   ;;  %v10845_v6 = vld [vmem:[#allocation8 + $0x1d0] sm:$0xff]   ;;  %v10848_v5 = vld [vmem:[#allocation8 + $0x158] sm:$0xff]  }
 0x3c1   :  { %10413 = vmatpush3.bf16.msra.mxu1 %v10831_v29  ;;  %10392 = vmatprep.subr.bf16.mxu0 %v10832_v50  ;;  %v6318_v53 = vpack.c.bf16 %v6286_v20, %v6286_v20  ;;  %v10841_v50 = vld [vmem:[#allocation8 + $0x1c8] sm:$0xff]   ;;  %v10852_v38 = vld [vmem:[#allocation8 + $0x160] sm:$0xff]  }
 0x3c2   :  { %10414 = vmatprep.subr.bf16.mxu1 %v10833_v56  ;;  %v6293_v39 = vadd.f32 %v6157_v47, %v12075_v36  ;;  %v6320_v29 = vpack.c.bf16 %v6288_v52, %v6288_v52  ;;  %v10851_v56 = vld [vmem:[#allocation8 + $0x198] sm:$0xff]   ;;  %v10853_v47 = vld [vmem:[#allocation8 + $0x1e0] sm:$0xff]   ;;  %v10858_v48 = vld [vmem:[#allocation8 + $0x128] sm:$0xff]   ;;  %v11832_v52 = vsub.s32 4, %v11761_v7 }
 0x3c3   :  { %v10854_v8 = vld [vmem:[#allocation8 + $0x120] sm:$0xff]   ;;  %v10859_v36 = vld [vmem:[#allocation8 + $0x1a8] sm:$0xff]  }
 0x3c4   :  { %10393 = vmatpush3.bf16.msra.mxu0 %v10834_v0  ;;  %v6325_v61 = vpack.c.bf16 %v6293_v39, %v6293_v39  ;;  %v10846_v0 = vld [vmem:[#allocation8 + $0x110] sm:$0xff]   ;;  %v10850_v39 = vld [vmem:[#allocation8 + $0x118] sm:$0xff]   ;;  %v10855_v20 = vld [vmem:[#allocation8 + $0x1a0] sm:$0xff]  }
 0x3c5   :  { %10415 = vmatpush3.bf16.msra.mxu1 %v10835_v55  ;;  %10422 = vmatprep.subr.bf16.mxu0 %v10836_v11  ;;  %v10856_v55 = vld [vmem:[#allocation8 + $0x168] sm:$0xff]  }
 0x3c6   :  { %10444 = vmatprep.subr.bf16.mxu1 %v10837_v3  ;;  %v10847_v3 = vld [vmem:[#allocation8 + $0x190] sm:$0xff]   ;;  %v10857_v11 = vld [vmem:[#allocation8 + $0x1e8] sm:$0xff]  }
 0x3c7   :  { %8431 = vmatmul.mubr.bf16.vlgmr.msra.gmra.mrb[64].mxu0 %v6318_v53  ;;  %v11835_v53 = vsub.s32 6, %v11761_v7 }
 0x3c8   :  { %8471 = vmatmul.mubr.bf16.vlgmr.msra.gmra.mrb[64].mxu1 %v6320_v29  ;;  %10423 = vmatpush3.bf16.msra.mxu0 %v10838_v37  ;;  %v10860_v37 = vld [vmem:[#allocation8 + $0x170] sm:$0xff]   ;;  %v11837_v29 = vld [vmem:[#allocation7 + $0x8] sm:$0xff] }
 0x3c9   :  { %8510 = vmatprep.mubr.bf16.mxu0 %v6323_v62  ;;  %10445 = vmatpush3.bf16.msra.mxu1 %v10839_v51  ;;  %v10861_v51 = vld [vmem:[#allocation8 + $0x1f0] sm:$0xff]   ;;  %v6145_v62 = vrot.slane %v11766_v4, %v11832_v52  ;;  %v6165_v7 = vrot.slane %v11837_v29, %v11764_v44 }
 0x3ca   :  { %8550 = vmatprep.mubr.bf16.mxu1 %v6325_v61  ;;  %10424 = vmatprep.subr.bf16.mxu0 %v10840_v40  ;;  %v10862_v40 = vld [vmem:[#allocation8 + $0x130] sm:$0xff]   ;;  %v10864_v61 = vld [vmem:[#allocation8 + $0x178] sm:$0xff]  }
 0x3cb   :  { %10446 = vmatprep.subr.bf16.mxu1 %v10841_v50  ;;  %v10863_v50 = vld [vmem:[#allocation8 + $0x1b0] sm:$0xff]  }
 0x3cc   :  { %10425 = vmatpush3.bf16.msra.mxu0 %v10842_v25  ;;  %v6153_v25 = vrot.slane %v11766_v4, %v11835_v53  ;;  %v12077_v4 = vmax.f32 %v11595_v24, %v11727_v2  ;;  %v10872_v24 = vld [vmem:[#allocation8 + $0x248] sm:$0xff]  }
 0x3cd   :  { %10447 = vmatpush3.bf16.msra.mxu1 %v10843_v26  ;;  %10426 = vmatprep.subr.bf16.mxu0 %v10844_v12  ;;  %v10865_v26 = vld [vmem:[#allocation8 + $0x1f8] sm:$0xff]   ;;  %v6173_v12 = vrot.slane %v11837_v29, %v11769_v45 }
 0x3ce   :  { %10448 = vmatprep.subr.bf16.mxu1 %v10845_v6  ;;  %v10866_v6 = vld [vmem:[#allocation8 + $0x138] sm:$0xff]  }
 0x3d0   :  { %10427 = vmatpush3.bf16.msra.mxu0 %v10846_v0  ;;  %v12076_v0 = vmax.f32 %v11593_v21, %v11723_v19  ;;  %v10870_v21 = vld [vmem:[#allocation8 + $0x200] sm:$0xff]  }
 0x3d1   :  { %10449 = vmatpush3.bf16.msra.mxu1 %v10847_v3  ;;  %10428 = vmatprep.subr.bf16.mxu0 %v10848_v5  ;;  %v10867_v5 = vld [vmem:[#allocation8 + $0x1b8] sm:$0xff]  }
 0x3d2   :  { %10450 = vmatprep.subr.bf16.mxu1 %v10849_v30  ;;  %v6290_v3 = vadd.f32 %v6145_v62, %v12076_v0  ;;  %v10868_v30 = vld [vmem:[#allocation8 + $0x240] sm:$0xff]  }
 0x3d4   :  { %10429 = vmatpush3.bf16.msra.mxu0 %v10850_v39  ;;  %v6292_v39 = vadd.f32 %v6153_v25, %v12077_v4  ;;  %v6322_v19 = vpack.c.bf16 %v6290_v3, %v6290_v3  ;;  %v10879_v3 = vld [vmem:[#allocation8 + $0x290] sm:$0xff]   ;;  %v10881_v4 = vld [vmem:[#allocation8 + $0x2d8] sm:$0xff]  }
 0x3d5   :  { %10451 = vmatpush3.bf16.msra.mxu1 %v10851_v56  ;;  %10430 = vmatprep.subr.bf16.mxu0 %v10852_v38  ;;  %v10869_v56 = vld [vmem:[#allocation8 + $0x2c0] sm:$0xff]   ;;  %v12078_v38 = vmax.f32 %v11611_v15, %v11751_v57  ;;  %v10874_v15 = vld [vmem:[#allocation8 + $0x208] sm:$0xff]   ;;  %v10876_v57 = vld [vmem:[#allocation8 + $0x250] sm:$0xff]  }
 0x3d6   :  { %10452 = vmatprep.subr.bf16.mxu1 %v10853_v47 }
 0x3d7   :  { %v6295_v47 = vadd.f32 %v6165_v7, %v12078_v38  ;;  %v10878_v7 = vld [vmem:[#allocation8 + $0x210] sm:$0xff]   ;;  %v10884_v38 = vld [vmem:[#allocation8 + $0x260] sm:$0xff]  }
 0x3d8   :  { %10431 = vmatpush3.bf16.msra.mxu0 %v10854_v8  ;;  %v12079_v8 = vmax.f32 %v11613_v18, %v11757_v34  ;;  %v10875_v18 = vld [vmem:[#allocation8 + $0x288] sm:$0xff]  }
 0x3d9   :  { %10453 = vmatpush3.bf16.msra.mxu1 %v10855_v20  ;;  %10432 = vmatprep.subr.bf16.mxu0 %v10856_v55  ;;  %v10871_v55 = vld [vmem:[#allocation8 + $0x280] sm:$0xff]   ;;  %v6327_v2 = vpack.c.bf16 %v6295_v47, %v6295_v47 }
 0x3da   :  { %10454 = vmatprep.subr.bf16.mxu1 %v10857_v11  ;;  %v6297_v20 = vadd.f32 %v6173_v12, %v12079_v8  ;;  %v6324_v11 = vpack.c.bf16 %v6292_v39, %v6292_v39  ;;  %v10882_v39 = vld [vmem:[#allocation8 + $0x218] sm:$0xff]   ;;  %v10885_v47 = vld [vmem:[#allocation8 + $0x2e0] sm:$0xff]  }
 0x3db   :  { %v10886_v8 = vld [vmem:[#allocation8 + $0x220] sm:$0xff]  }
 0x3dc   :  { %10433 = vmatpush3.bf16.msra.mxu0 %v10858_v48  ;;  %v10873_v48 = vld [vmem:[#allocation8 + $0x2c8] sm:$0xff]  }
 0x3dd   :  { %10455 = vmatpush3.bf16.msra.mxu1 %v10859_v36  ;;  %10434 = vmatprep.subr.bf16.mxu0 %v10860_v37  ;;  %v6329_v36 = vpack.c.bf16 %v6297_v20, %v6297_v20  ;;  %v10877_v37 = vld [vmem:[#allocation8 + $0x2d0] sm:$0xff]   ;;  %v10887_v20 = vld [vmem:[#allocation8 + $0x2a0] sm:$0xff]  }
 0x3de   :  { %10456 = vmatprep.subr.bf16.mxu1 %v10861_v51 }
 0x3e0   :  { %10435 = vmatpush3.bf16.msra.mxu0 %v10862_v40 }
 0x3e1   :  { %10457 = vmatpush3.bf16.msra.mxu1 %v10863_v50  ;;  %10436 = vmatprep.subr.bf16.mxu0 %v10864_v61 }
 0x3e2   :  { %10458 = vmatprep.subr.bf16.mxu1 %v10865_v26 }
 0x3e4   :  { %10437 = vmatpush3.bf16.msra.mxu0 %v10866_v6 }
 0x3e5   :  { %10459 = vmatpush3.bf16.msra.mxu1 %v10867_v5  ;;  %10466 = vmatprep.subr.bf16.mxu0 %v10868_v30  ;;  %v10880_v5 = vld [vmem:[#allocation8 + $0x258] sm:$0xff]  }
 0x3e6   :  { %10488 = vmatprep.subr.bf16.mxu1 %v10869_v56  ;;  %v10883_v56 = vld [vmem:[#allocation8 + $0x298] sm:$0xff]  }
 0x3e7   :  { %8511 = vmatmul.mubr.bf16.vlgmr.msra.gmra.mrb[68].mxu0 %v6322_v19  ;;  %v10889_v19 = vld [vmem:[#allocation8 + $0x2e8] sm:$0xff]  }
 0x3e8   :  { %8551 = vmatmul.mubr.bf16.vlgmr.msra.gmra.mrb[68].mxu1 %v6324_v11  ;;  %10467 = vmatpush3.bf16.msra.mxu0 %v10870_v21  ;;  %v10888_v21 = vld [vmem:[#allocation8 + $0x268] sm:$0xff]  }
 0x3e9   :  { %8590 = vmatprep.mubr.bf16.mxu0 %v6327_v2  ;;  %10489 = vmatpush3.bf16.msra.mxu1 %v10871_v55  ;;  %v10890_v55 = vld [vmem:[#allocation8 + $0x228] sm:$0xff]   ;;  %v10893_v2 = vld [vmem:[#allocation8 + $0x2f0] sm:$0xff]  }
 0x3ea   :  { %8630 = vmatprep.mubr.bf16.mxu1 %v6329_v36  ;;  %v11859_v34 = vpop.f32.mrb[48].mxu0  ;;  %10468 = vmatprep.subr.bf16.mxu0 %v10872_v24  ;;  %v11863_v40 = vpop.f32.mrb[48].mxu1  ;;  %v10891_v11 = vld [vmem:[#allocation8 + $0x2a8] sm:$0xff]   ;;  %v10892_v24 = vld [vmem:[#allocation8 + $0x270] sm:$0xff]   ;;  %v6161_v36 = vrot.slane %v11837_v29, %v11784_v23 }
 0x3eb   :  { %v6102_v51 = vmax.f32 %v11640_v28, %v11859_v34  ;;  %v11865_v62 = vpop.f32.mrb[49].mxu0  ;;  %10490 = vmatprep.subr.bf16.mxu1 %v10873_v48  ;;  %v6104_v50 = vmax.f32 %v11642_v43, %v11863_v40  ;;  %v11871_v25 = vpop.f32.mrb[49].mxu1  ;;  %v10894_v48 = vld [vmem:[#allocation8 + $0x230] sm:$0xff]   ;;  %v10966_v28 = vld [vmem:[#allocation8 + $0x500] sm:$0xff]   ;;  %v10968_v43 = vld [vmem:[#allocation8 + $0x548] sm:$0xff]  }
 0x3ec   :  { %v6103_v61 = vmax.f32 %v11644_v32, %v11865_v62  ;;  %v5796_v26 = vpop.f32.mrb[50].mxu0  ;;  %10469 = vmatpush3.bf16.msra.mxu0 %v10874_v15  ;;  %v6105_v12 = vmax.f32 %v11646_v35, %v11871_v25  ;;  %v5837_v6 = vpop.f32.mrb[50].mxu1  ;;  %v10895_v15 = vld [vmem:[#allocation8 + $0x2b0] sm:$0xff]   ;;  %v10938_v32 = vld [vmem:[#allocation8 + $0x408] sm:$0xff]  }
 0x3ed   :  { %10491 = vmatpush3.bf16.msra.mxu1 %v10875_v18  ;;  %v5797_v0 = vpop.f32.mrb[51].mxu0  ;;  %10470 = vmatprep.subr.bf16.mxu0 %v10876_v57  ;;  %v5838_v30 = vpop.f32.mrb[51].mxu1  ;;  %v10896_v18 = vld [vmem:[#allocation8 + $0x278] sm:$0xff]   ;;  %v6169_v57 = vrot.slane %v11837_v29, %v11787_v46  ;;  %v6181_v26 = vrot.slane %v11837_v29, %v11792_v27  ;;  %v10939_v35 = vld [vmem:[#allocation8 + $0x488] sm:$0xff]   ;;  %v10940_v62 = vld [vmem:[#allocation8 + $0x450] sm:$0xff]  }
 0x3ee   :  { %10492 = vmatprep.subr.bf16.mxu1 %v10877_v37  ;;  %v10897_v37 = vld [vmem:[#allocation8 + $0x2f8] sm:$0xff]   ;;  %v12080_v0 = vmax.f32 %v11607_v10, %v11745_v1  ;;  %v10900_v30 = vld [vmem:[#allocation8 + $0x340] sm:$0xff]   ;;  %v10942_v25 = vld [vmem:[#allocation8 + $0x410] sm:$0xff]  }
 0x3ef   :  { %v10898_v6 = vld [vmem:[#allocation8 + $0x238] sm:$0xff]   ;;  %v10902_v10 = vld [vmem:[#allocation8 + $0x300] sm:$0xff]  }
 0x3f0   :  { %10471 = vmatpush3.bf16.msra.mxu0 %v10878_v7  ;;  %v6189_v7 = vrot.slane %v11837_v29, %v11801_v42 }
 0x3f1   :  { %10493 = vmatpush3.bf16.msra.mxu1 %v10879_v3  ;;  %10472 = vmatprep.subr.bf16.mxu0 %v10880_v5  ;;  %v6294_v3 = vadd.f32 %v6161_v36, %v12080_v0  ;;  %v10899_v5 = vld [vmem:[#allocation8 + $0x2b8] sm:$0xff]   ;;  %v10921_v0 = vld [vmem:[#allocation8 + $0x3e8] sm:$0xff]  }
 0x3f2   :  { %10494 = vmatprep.subr.bf16.mxu1 %v10881_v4  ;;  %v12081_v4 = vmax.f32 %v11609_v14, %v11749_v13  ;;  %v10904_v14 = vld [vmem:[#allocation8 + $0x348] sm:$0xff]   ;;  %v10913_v36 = vld [vmem:[#allocation8 + $0x3d8] sm:$0xff]  }
 0x3f3   :  { %v6326_v1 = vpack.c.bf16 %v6294_v3, %v6294_v3  ;;  %v10922_v3 = vld [vmem:[#allocation8 + $0x328] sm:$0xff]  }
 0x3f4   :  { %10473 = vmatpush3.bf16.msra.mxu0 %v10882_v39  ;;  %v6296_v39 = vadd.f32 %v6169_v57, %v12081_v4  ;;  %v10916_v57 = vld [vmem:[#allocation8 + $0x360] sm:$0xff]  }
 0x3f5   :  { %10495 = vmatpush3.bf16.msra.mxu1 %v10883_v56  ;;  %10474 = vmatprep.subr.bf16.mxu0 %v10884_v38  ;;  %v10901_v56 = vld [vmem:[#allocation8 + $0x3c0] sm:$0xff]   ;;  %v12082_v38 = vmax.f32 %v11625_v17, %v11798_v41  ;;  %v10906_v17 = vld [vmem:[#allocation8 + $0x308] sm:$0xff]   ;;  %v10908_v41 = vld [vmem:[#allocation8 + $0x350] sm:$0xff]  }
 0x3f6   :  { %10496 = vmatprep.subr.bf16.mxu1 %v10885_v47 }
 0x3f7   :  { %v6299_v47 = vadd.f32 %v6181_v26, %v12082_v38  ;;  %v10918_v26 = vld [vmem:[#allocation8 + $0x320] sm:$0xff]  }
 0x3f8   :  { %10475 = vmatpush3.bf16.msra.mxu0 %v10886_v8  ;;  %v12083_v8 = vmax.f32 %v11627_v22, %v11807_v58  ;;  %v10907_v22 = vld [vmem:[#allocation8 + $0x388] sm:$0xff]   ;;  %v10909_v58 = vld [vmem:[#allocation8 + $0x3d0] sm:$0xff]  }
 0x3f9   :  { %10497 = vmatpush3.bf16.msra.mxu1 %v10887_v20  ;;  %10476 = vmatprep.subr.bf16.mxu0 %v10888_v21  ;;  %v10903_v21 = vld [vmem:[#allocation8 + $0x380] sm:$0xff]   ;;  %v6331_v13 = vpack.c.bf16 %v6299_v47, %v6299_v47 }
 0x3fa   :  { %10498 = vmatprep.subr.bf16.mxu1 %v10889_v19  ;;  %v6301_v20 = vadd.f32 %v6189_v7, %v12083_v8  ;;  %v6328_v19 = vpack.c.bf16 %v6296_v39, %v6296_v39  ;;  %v10919_v7 = vld [vmem:[#allocation8 + $0x3a0] sm:$0xff]   ;;  %v10925_v39 = vld [vmem:[#allocation8 + $0x3f0] sm:$0xff]  }
 0x3fb   :  { %v11903_v8 = vld [vmem:[#allocation7 + $0x10] sm:$0xff] }
 0x3fc   :  { %10477 = vmatpush3.bf16.msra.mxu0 %v10890_v55  ;;  %v10905_v55 = vld [vmem:[#allocation8 + $0x3c8] sm:$0xff]  }
 0x3fd   :  { %10499 = vmatpush3.bf16.msra.mxu1 %v10891_v11  ;;  %10478 = vmatprep.subr.bf16.mxu0 %v10892_v24  ;;  %v6333_v11 = vpack.c.bf16 %v6301_v20, %v6301_v20  ;;  %v10910_v24 = vld [vmem:[#allocation8 + $0x310] sm:$0xff]  }
 0x3fe   :  { %10500 = vmatprep.subr.bf16.mxu1 %v10893_v2  ;;  %v10911_v2 = vld [vmem:[#allocation8 + $0x390] sm:$0xff]  }
 0x400   :  { %10479 = vmatpush3.bf16.msra.mxu0 %v10894_v48  ;;  %v10912_v48 = vld [vmem:[#allocation8 + $0x358] sm:$0xff]  }
 0x401   :  { %10501 = vmatpush3.bf16.msra.mxu1 %v10895_v15  ;;  %10480 = vmatprep.subr.bf16.mxu0 %v10896_v18  ;;  %v10914_v15 = vld [vmem:[#allocation8 + $0x318] sm:$0xff]  }
 0x402   :  { %10502 = vmatprep.subr.bf16.mxu1 %v10897_v37  ;;  %v10915_v18 = vld [vmem:[#allocation8 + $0x398] sm:$0xff]   ;;  %v10917_v37 = vld [vmem:[#allocation8 + $0x3e0] sm:$0xff]  }
 0x404   :  { %10481 = vmatpush3.bf16.msra.mxu0 %v10898_v6  ;;  %v10920_v6 = vld [vmem:[#allocation8 + $0x368] sm:$0xff]  }
 0x405   :  { %10503 = vmatpush3.bf16.msra.mxu1 %v10899_v5  ;;  %10510 = vmatprep.subr.bf16.mxu0 %v10900_v30  ;;  %v10923_v5 = vld [vmem:[#allocation8 + $0x3a8] sm:$0xff]   ;;  %v10924_v30 = vld [vmem:[#allocation8 + $0x370] sm:$0xff]  }
 0x406   :  { %10532 = vmatprep.subr.bf16.mxu1 %v10901_v56 }
 0x407   :  { %8591 = vmatmul.mubr.bf16.vlgmr.msra.gmra.mrb[72].mxu0 %v6326_v1 }
 0x408   :  { %8631 = vmatmul.mubr.bf16.vlgmr.msra.gmra.mrb[72].mxu1 %v6328_v19  ;;  %10511 = vmatpush3.bf16.msra.mxu0 %v10902_v10  ;;  %v10926_v19 = vld [vmem:[#allocation8 + $0x330] sm:$0xff]  }
 0x409   :  { %8670 = vmatprep.mubr.bf16.mxu0 %v6331_v13  ;;  %10533 = vmatpush3.bf16.msra.mxu1 %v10903_v21 }
 0x40a   :  { %8710 = vmatprep.mubr.bf16.mxu1 %v6333_v11  ;;  %10512 = vmatprep.subr.bf16.mxu0 %v10904_v14  ;;  %v6177_v14 = vrot.slane %v11837_v29, %v11832_v52 }
 0x40b   :  { %10534 = vmatprep.subr.bf16.mxu1 %v10905_v55 }
 0x40c   :  { %10513 = vmatpush3.bf16.msra.mxu0 %v10906_v17  ;;  %v10927_v17 = vld [vmem:[#allocation8 + $0x3b0] sm:$0xff]  }
 0x40d   :  { %10535 = vmatpush3.bf16.msra.mxu1 %v10907_v22  ;;  %10514 = vmatprep.subr.bf16.mxu0 %v10908_v41  ;;  %v10928_v22 = vld [vmem:[#allocation8 + $0x378] sm:$0xff]   ;;  %v6185_v41 = vrot.slane %v11837_v29, %v11835_v53  ;;  %v12085_v29 = vmax.f32 %v11623_v16, %v11796_v33  ;;  %v10936_v16 = vld [vmem:[#allocation8 + $0x448] sm:$0xff]  }
 0x40e   :  { %10536 = vmatprep.subr.bf16.mxu1 %v10909_v58 }
 0x410   :  { %10515 = vmatpush3.bf16.msra.mxu0 %v10910_v24  ;;  %v10929_v24 = vld [vmem:[#allocation8 + $0x3f8] sm:$0xff]  }
 0x411   :  { %10537 = vmatpush3.bf16.msra.mxu1 %v10911_v2  ;;  %10516 = vmatprep.subr.bf16.mxu0 %v10912_v48  ;;  %v6197_v2 = vrot.slane %v11903_v8, %v11764_v44  ;;  %v6205_v48 = vrot.slane %v11903_v8, %v11769_v45 }
 0x412   :  { %10538 = vmatprep.subr.bf16.mxu1 %v10913_v36  ;;  %v10930_v36 = vld [vmem:[#allocation8 + $0x338] sm:$0xff]  }
 0x414   :  { %10517 = vmatpush3.bf16.msra.mxu0 %v10914_v15  ;;  %v12084_v15 = vmax.f32 %v11621_v9, %v11789_v49  ;;  %v10934_v9 = vld [vmem:[#allocation8 + $0x400] sm:$0xff]  }
 0x415   :  { %10539 = vmatpush3.bf16.msra.mxu1 %v10915_v18  ;;  %10518 = vmatprep.subr.bf16.mxu0 %v10916_v57  ;;  %v10931_v57 = vld [vmem:[#allocation8 + $0x3b8] sm:$0xff]  }
 0x416   :  { %10540 = vmatprep.subr.bf16.mxu1 %v10917_v37  ;;  %v6298_v18 = vadd.f32 %v6177_v14, %v12084_v15  ;;  %v10932_v37 = vld [vmem:[#allocation8 + $0x440] sm:$0xff]   ;;  %v10946_v14 = vld [vmem:[#allocation8 + $0x418] sm:$0xff]   ;;  %v10957_v15 = vld [vmem:[#allocation8 + $0x4f0] sm:$0xff]  }
 0x418   :  { %10519 = vmatpush3.bf16.msra.mxu0 %v10918_v26  ;;  %v6300_v26 = vadd.f32 %v6185_v41, %v12085_v29  ;;  %v6330_v49 = vpack.c.bf16 %v6298_v18, %v6298_v18  ;;  %v10951_v41 = vld [vmem:[#allocation8 + $0x4a0] sm:$0xff]   ;;  %v10958_v18 = vld [vmem:[#allocation8 + $0x430] sm:$0xff]   ;;  %v10960_v29 = vld [vmem:[#allocation8 + $0x478] sm:$0xff]  }
 0x419   :  { %10541 = vmatpush3.bf16.msra.mxu1 %v10919_v7  ;;  %10520 = vmatprep.subr.bf16.mxu0 %v10920_v6  ;;  %v10933_v7 = vld [vmem:[#allocation8 + $0x4c0] sm:$0xff]   ;;  %v6303_v6 = vadd.f32 %v6197_v2, %v6103_v61  ;;  %v10941_v61 = vld [vmem:[#allocation8 + $0x4d0] sm:$0xff]   ;;  %v10954_v2 = vld [vmem:[#allocation8 + $0x428] sm:$0xff]  }
 0x41a   :  { %v11895_v4 = vpop.f32.mrb[52].mxu0  ;;  %10542 = vmatprep.subr.bf16.mxu1 %v10921_v0  ;;  %v11899_v38 = vpop.f32.mrb[52].mxu1  ;;  %v6305_v0 = vadd.f32 %v6205_v48, %v6105_v12  ;;  %v10943_v12 = vld [vmem:[#allocation8 + $0x490] sm:$0xff]   ;;  %v10955_v48 = vld [vmem:[#allocation8 + $0x4a8] sm:$0xff]  }
 0x41b   :  { %v6106_v56 = vmax.f32 %v11654_v54, %v11895_v4  ;;  %v11901_v47 = vpop.f32.mrb[53].mxu0  ;;  %v6108_v20 = vmax.f32 %v11656_v59, %v11899_v38  ;;  %v11909_v1 = vpop.f32.mrb[53].mxu1  ;;  %v6335_v33 = vpack.c.bf16 %v6303_v6, %v6303_v6  ;;  %v6213_v6 = vrot.slane %v11903_v8, %v11792_v27  ;;  %v11000_v4 = vld [vmem:[#allocation8 + $0x648] sm:$0xff]  }
 0x41c   :  { %v6107_v10 = vmax.f32 %v11658_v60, %v11901_v47  ;;  %v5878_v21 = vpop.f32.mrb[54].mxu0  ;;  %10521 = vmatpush3.bf16.msra.mxu0 %v10922_v3  ;;  %v6109_v13 = vmax.f32 %v11660_v63, %v11909_v1  ;;  %v5919_v55 = vpop.f32.mrb[54].mxu1  ;;  %v10935_v3 = vld [vmem:[#allocation8 + $0x480] sm:$0xff]   ;;  %v10970_v60 = vld [vmem:[#allocation8 + $0x508] sm:$0xff]   ;;  %v10972_v47 = vld [vmem:[#allocation8 + $0x550] sm:$0xff]  }
 0x41d   :  { %10543 = vmatpush3.bf16.msra.mxu1 %v10923_v5  ;;  %v5879_v11 = vpop.f32.mrb[55].mxu0  ;;  %10522 = vmatprep.subr.bf16.mxu0 %v10924_v30  ;;  %v5920_v58 = vpop.f32.mrb[55].mxu1  ;;  %v6332_v5 = vpack.c.bf16 %v6300_v26, %v6300_v26  ;;  %v10937_v30 = vld [vmem:[#allocation8 + $0x4c8] sm:$0xff]   ;;  %v10944_v21 = vld [vmem:[#allocation8 + $0x458] sm:$0xff]   ;;  %v6201_v26 = vrot.slane %v11903_v8, %v11787_v46  ;;  %v10973_v1 = vld [vmem:[#allocation8 + $0x5d0] sm:$0xff]  }
 0x41e   :  { %10544 = vmatprep.subr.bf16.mxu1 %v10925_v39  ;;  %v6337_v39 = vpack.c.bf16 %v6305_v0, %v6305_v0  ;;  %v10947_v55 = vld [vmem:[#allocation8 + $0x498] sm:$0xff]   ;;  %v10948_v11 = vld [vmem:[#allocation8 + $0x460] sm:$0xff]   ;;  %v10952_v58 = vld [vmem:[#allocation8 + $0x468] sm:$0xff]   ;;  %v6221_v0 = vrot.slane %v11903_v8, %v11801_v42 }
 0x41f   :  { %v10971_v63 = vld [vmem:[#allocation8 + $0x588] sm:$0xff]  }
 0x420   :  { %10523 = vmatpush3.bf16.msra.mxu0 %v10926_v19  ;;  %v10945_v19 = vld [vmem:[#allocation8 + $0x4d8] sm:$0xff]   ;;  %v11002_v59 = vld [vmem:[#allocation8 + $0x608] sm:$0xff]  }
 0x421   :  { %10545 = vmatpush3.bf16.msra.mxu1 %v10927_v17  ;;  %10524 = vmatprep.subr.bf16.mxu0 %v10928_v22  ;;  %v10949_v17 = vld [vmem:[#allocation8 + $0x4e0] sm:$0xff]   ;;  %v11003_v38 = vld [vmem:[#allocation8 + $0x688] sm:$0xff]  }
 0x422   :  { %10546 = vmatprep.subr.bf16.mxu1 %v10929_v24  ;;  %v10950_v22 = vld [vmem:[#allocation8 + $0x420] sm:$0xff]   ;;  %v10953_v24 = vld [vmem:[#allocation8 + $0x4e8] sm:$0xff]  }
 0x424   :  { %10525 = vmatpush3.bf16.msra.mxu0 %v10930_v36  ;;  %v10956_v36 = vld [vmem:[#allocation8 + $0x470] sm:$0xff]  }
 0x425   :  { %10547 = vmatpush3.bf16.msra.mxu1 %v10931_v57  ;;  %10554 = vmatprep.subr.bf16.mxu0 %v10932_v37  ;;  %v6193_v57 = vrot.slane %v11903_v8, %v11784_v23  ;;  %v10959_v37 = vld [vmem:[#allocation8 + $0x4b0] sm:$0xff]  }
 0x426   :  { %10576 = vmatprep.subr.bf16.mxu1 %v10933_v7  ;;  %v10961_v7 = vld [vmem:[#allocation8 + $0x4f8] sm:$0xff]  }
 0x427   :  { %8671 = vmatmul.mubr.bf16.vlgmr.msra.gmra.mrb[76].mxu0 %v6330_v49  ;;  %v6302_v49 = vadd.f32 %v6193_v57, %v6102_v51  ;;  %v10967_v51 = vld [vmem:[#allocation8 + $0x580] sm:$0xff]  }
 0x428   :  { %8711 = vmatmul.mubr.bf16.vlgmr.msra.gmra.mrb[76].mxu1 %v6332_v5  ;;  %10555 = vmatpush3.bf16.msra.mxu0 %v10934_v9  ;;  %v10962_v9 = vld [vmem:[#allocation8 + $0x438] sm:$0xff]   ;;  %v10964_v5 = vld [vmem:[#allocation8 + $0x540] sm:$0xff]  }
 0x429   :  { %8750 = vmatprep.mubr.bf16.mxu0 %v6335_v33  ;;  %10577 = vmatpush3.bf16.msra.mxu1 %v10935_v3  ;;  %v10963_v3 = vld [vmem:[#allocation8 + $0x4b8] sm:$0xff]   ;;  %v10965_v33 = vld [vmem:[#allocation8 + $0x5c0] sm:$0xff]   ;;  %v6334_v34 = vpack.c.bf16 %v6302_v49, %v6302_v49  ;;  %v10988_v49 = vld [vmem:[#allocation8 + $0x570] sm:$0xff]  }
 0x42a   :  { %8790 = vmatprep.mubr.bf16.mxu1 %v6337_v39  ;;  %10556 = vmatprep.subr.bf16.mxu0 %v10936_v16  ;;  %v6304_v16 = vadd.f32 %v6201_v26, %v6104_v50  ;;  %v6309_v39 = vadd.f32 %v6221_v0, %v6109_v13  ;;  %v10969_v50 = vld [vmem:[#allocation8 + $0x5c8] sm:$0xff]   ;;  %v10980_v57 = vld [vmem:[#allocation8 + $0x560] sm:$0xff]  }
 0x42b   :  { %10578 = vmatprep.subr.bf16.mxu1 %v10937_v30  ;;  %v6307_v30 = vadd.f32 %v6213_v6, %v6107_v10  ;;  %v10983_v26 = vld [vmem:[#allocation8 + $0x5a0] sm:$0xff]   ;;  %v10985_v6 = vld [vmem:[#allocation8 + $0x5e8] sm:$0xff]  }
 0x42c   :  { %10557 = vmatpush3.bf16.msra.mxu0 %v10938_v32  ;;  %v6336_v32 = vpack.c.bf16 %v6304_v16, %v6304_v16  ;;  %v10986_v0 = vld [vmem:[#allocation8 + $0x528] sm:$0xff]   ;;  %v10990_v16 = vld [vmem:[#allocation8 + $0x530] sm:$0xff]  }
 0x42d   :  { %10579 = vmatpush3.bf16.msra.mxu1 %v10939_v35  ;;  %10558 = vmatprep.subr.bf16.mxu0 %v10940_v62  ;;  %v6339_v40 = vpack.c.bf16 %v6307_v30, %v6307_v30  ;;  %v6341_v35 = vpack.c.bf16 %v6309_v39, %v6309_v39  ;;  %v10991_v30 = vld [vmem:[#allocation8 + $0x5b0] sm:$0xff]   ;;  %v10992_v39 = vld [vmem:[#allocation8 + $0x578] sm:$0xff]  }
 0x42e   :  { %10580 = vmatprep.subr.bf16.mxu1 %v10941_v61 }
 0x430   :  { %10559 = vmatpush3.bf16.msra.mxu0 %v10942_v25  ;;  %v12086_v25 = vld [vmem:[#allocation24_spill] sm:$0xff] }
 0x431   :  { %10581 = vmatpush3.bf16.msra.mxu1 %v10943_v12  ;;  %10560 = vmatprep.subr.bf16.mxu0 %v10944_v21  ;;  %v12087_v21 = vld [vmem:[#allocation25_spill] sm:$0xff] }
 0x432   :  { %10582 = vmatprep.subr.bf16.mxu1 %v10945_v19 }
 0x434   :  { %10561 = vmatpush3.bf16.msra.mxu0 %v10946_v14 }
 0x435   :  { %10583 = vmatpush3.bf16.msra.mxu1 %v10947_v55  ;;  %10562 = vmatprep.subr.bf16.mxu0 %v10948_v11  ;;  %v10974_v11 = vld [vmem:[#allocation8 + $0x510] sm:$0xff]  }
 0x436   :  { %10584 = vmatprep.subr.bf16.mxu1 %v10949_v17  ;;  %v12088_v17 = vld [vmem:[#allocation26_spill] sm:$0xff] }
 0x438   :  { %10563 = vmatpush3.bf16.msra.mxu0 %v10950_v22 }
 0x439   :  { %10585 = vmatpush3.bf16.msra.mxu1 %v10951_v41  ;;  %10564 = vmatprep.subr.bf16.mxu0 %v10952_v58 }
 0x43a   :  { %10586 = vmatprep.subr.bf16.mxu1 %v10953_v24  ;;  %v10975_v24 = vld [vmem:[#allocation8 + $0x590] sm:$0xff]  }
 0x43c   :  { %10565 = vmatpush3.bf16.msra.mxu0 %v10954_v2  ;;  %v10976_v2 = vld [vmem:[#allocation8 + $0x558] sm:$0xff]  }
 0x43d   :  { %10587 = vmatpush3.bf16.msra.mxu1 %v10955_v48  ;;  %10566 = vmatprep.subr.bf16.mxu0 %v10956_v36  ;;  %v10977_v36 = vld [vmem:[#allocation8 + $0x5d8] sm:$0xff]  }
 0x43e   :  { %10588 = vmatprep.subr.bf16.mxu1 %v10957_v15  ;;  %v10978_v15 = vld [vmem:[#allocation8 + $0x518] sm:$0xff]  }
 0x440   :  { %10567 = vmatpush3.bf16.msra.mxu0 %v10958_v18  ;;  %v10979_v18 = vld [vmem:[#allocation8 + $0x598] sm:$0xff]  }
 0x441   :  { %10589 = vmatpush3.bf16.msra.mxu1 %v10959_v37  ;;  %10568 = vmatprep.subr.bf16.mxu0 %v10960_v29  ;;  %v10981_v37 = vld [vmem:[#allocation8 + $0x5e0] sm:$0xff]  }
 0x442   :  { %10590 = vmatprep.subr.bf16.mxu1 %v10961_v7  ;;  %v10982_v29 = vld [vmem:[#allocation8 + $0x520] sm:$0xff]   ;;  %v10984_v7 = vld [vmem:[#allocation8 + $0x568] sm:$0xff]  }
 0x444   :  { %10569 = vmatpush3.bf16.msra.mxu0 %v10962_v9  ;;  %v10987_v9 = vld [vmem:[#allocation8 + $0x5a8] sm:$0xff]  }
 0x445   :  { %10591 = vmatpush3.bf16.msra.mxu1 %v10963_v3  ;;  %10598 = vmatprep.subr.bf16.mxu0 %v10964_v5  ;;  %v10989_v3 = vld [vmem:[#allocation8 + $0x5f0] sm:$0xff]   ;;  %v11969_v5 = vld [vmem:[#allocation7 + $0x18] sm:$0xff] }
 0x446   :  { %10620 = vmatprep.subr.bf16.mxu1 %v10965_v33  ;;  %v6209_v33 = vrot.slane %v11903_v8, %v11832_v52 }
 0x447   :  { %8751 = vmatmul.mubr.bf16.vlgmr.msra.gmra.mrb[80].mxu0 %v6334_v34  ;;  %v10993_v34 = vld [vmem:[#allocation8 + $0x5f8] sm:$0xff]  }
 0x448   :  { %8791 = vmatmul.mubr.bf16.vlgmr.msra.gmra.mrb[80].mxu1 %v6336_v32  ;;  %10599 = vmatpush3.bf16.msra.mxu0 %v10966_v28  ;;  %v6217_v28 = vrot.slane %v11903_v8, %v11835_v53  ;;  %v6237_v32 = vrot.slane %v11969_v5, %v11769_v45  ;;  %v10998_v45 = vld [vmem:[#allocation8 + $0x600] sm:$0xff]  }
 0x449   :  { %8830 = vmatprep.mubr.bf16.mxu0 %v6339_v40  ;;  %10621 = vmatpush3.bf16.msra.mxu1 %v10967_v51  ;;  %v6229_v51 = vrot.slane %v11969_v5, %v11764_v44  ;;  %v6306_v40 = vadd.f32 %v6209_v33, %v6106_v56 }
 0x44a   :  { %8870 = vmatprep.mubr.bf16.mxu1 %v6341_v35  ;;  %v11953_v10 = vpop.f32.mrb[56].mxu0  ;;  %10600 = vmatprep.subr.bf16.mxu0 %v10968_v43  ;;  %v11957_v62 = vpop.f32.mrb[56].mxu1  ;;  %v10994_v43 = vld [vmem:[#allocation8 + $0x538] sm:$0xff]   ;;  %v10996_v35 = vld [vmem:[#allocation8 + $0x640] sm:$0xff]   ;;  %v6308_v8 = vadd.f32 %v6217_v28, %v6108_v20  ;;  %v11004_v20 = vld [vmem:[#allocation8 + $0x650] sm:$0xff]  }
 0x44b   :  { %v6110_v13 = vmax.f32 %v11668_v31, %v11953_v10  ;;  %v11959_v61 = vpop.f32.mrb[57].mxu0  ;;  %10622 = vmatprep.subr.bf16.mxu1 %v10969_v50  ;;  %v6112_v12 = vmax.f32 %v12086_v25, %v11957_v62  ;;  %v11965_v14 = vpop.f32.mrb[57].mxu1  ;;  %v10995_v50 = vld [vmem:[#allocation8 + $0x5b8] sm:$0xff]   ;;  %v11022_v28 = vld [vmem:[#allocation8 + $0x630] sm:$0xff]   ;;  %v11032_v10 = vld [vmem:[#allocation8 + $0x748] sm:$0xff]  }
 0x44c   :  { %v6111_v19 = vmax.f32 %v12087_v21, %v11959_v61  ;;  %v5960_v55 = vpop.f32.mrb[58].mxu0  ;;  %10601 = vmatpush3.bf16.msra.mxu0 %v10970_v60  ;;  %v6113_v22 = vmax.f32 %v12088_v17, %v11965_v14  ;;  %v6001_v41 = vpop.f32.mrb[58].mxu1  ;;  %v10997_v60 = vld [vmem:[#allocation8 + $0x6c0] sm:$0xff]   ;;  %v6340_v54 = vpack.c.bf16 %v6308_v8, %v6308_v8  ;;  %v11001_v61 = vld [vmem:[#allocation8 + $0x6c8] sm:$0xff]   ;;  %v11006_v14 = vld [vmem:[#allocation8 + $0x610] sm:$0xff]   ;;  %v6233_v8 = vrot.slane %v11969_v5, %v11787_v46 }
 0x44d   :  { %10623 = vmatpush3.bf16.msra.mxu1 %v10971_v63  ;;  %v5961_v58 = vpop.f32.mrb[59].mxu0  ;;  %10602 = vmatprep.subr.bf16.mxu0 %v10972_v47  ;;  %v6002_v48 = vpop.f32.mrb[59].mxu1  ;;  %v6338_v47 = vpack.c.bf16 %v6306_v40, %v6306_v40  ;;  %v11007_v55 = vld [vmem:[#allocation8 + $0x690] sm:$0xff]   ;;  %v11009_v17 = vld [vmem:[#allocation8 + $0x6d8] sm:$0xff]   ;;  %v11034_v62 = vld [vmem:[#allocation8 + $0x708] sm:$0xff]  }
 0x44e   :  { %10624 = vmatprep.subr.bf16.mxu1 %v10973_v1  ;;  %v6311_v44 = vadd.f32 %v6229_v51, %v6111_v19  ;;  %v6313_v63 = vadd.f32 %v6237_v32, %v6113_v22  ;;  %v10999_v1 = vld [vmem:[#allocation8 + $0x680] sm:$0xff]   ;;  %v11005_v19 = vld [vmem:[#allocation8 + $0x6d0] sm:$0xff]   ;;  %v11010_v22 = vld [vmem:[#allocation8 + $0x618] sm:$0xff]   ;;  %v6312_v46 = vadd.f32 %v6233_v8, %v6112_v12 }
 0x44f   :  { %v11011_v41 = vld [vmem:[#allocation8 + $0x698] sm:$0xff]   ;;  %v11012_v58 = vld [vmem:[#allocation8 + $0x660] sm:$0xff]   ;;  %v11035_v25 = vld [vmem:[#allocation8 + $0x788] sm:$0xff]  }
 0x450   :  { %10603 = vmatpush3.bf16.msra.mxu0 %v10974_v11  ;;  %v6343_v56 = vpack.c.bf16 %v6311_v44, %v6311_v44  ;;  %v6345_v21 = vpack.c.bf16 %v6313_v63, %v6313_v63  ;;  %v11008_v11 = vld [vmem:[#allocation8 + $0x658] sm:$0xff]   ;;  %v11015_v48 = vld [vmem:[#allocation8 + $0x6a0] sm:$0xff]   ;;  %v6245_v63 = vrot.slane %v11969_v5, %v11792_v27  ;;  %v6344_v31 = vpack.c.bf16 %v6312_v46, %v6312_v46  ;;  %v11036_v12 = vld [vmem:[#allocation8 + $0x750] sm:$0xff]  }
 0x451   :  { %10625 = vmatpush3.bf16.msra.mxu1 %v10975_v24  ;;  %10604 = vmatprep.subr.bf16.mxu0 %v10976_v2  ;;  %v11013_v24 = vld [vmem:[#allocation8 + $0x6e0] sm:$0xff]   ;;  %v12092_v51 = vld [vmem:[#allocation30_spill] sm:$0xff] }
 0x452   :  { %10626 = vmatprep.subr.bf16.mxu1 %v10977_v36  ;;  %v11014_v2 = vld [vmem:[#allocation8 + $0x620] sm:$0xff]   ;;  %v11016_v36 = vld [vmem:[#allocation8 + $0x668] sm:$0xff]   ;;  %v11025_v44 = vld [vmem:[#allocation8 + $0x6f8] sm:$0xff]  }
 0x454   :  { %10605 = vmatpush3.bf16.msra.mxu0 %v10978_v15  ;;  %v11017_v15 = vld [vmem:[#allocation8 + $0x6e8] sm:$0xff]  }
 0x455   :  { %10627 = vmatpush3.bf16.msra.mxu1 %v10979_v18  ;;  %10606 = vmatprep.subr.bf16.mxu0 %v10980_v57  ;;  %v11018_v18 = vld [vmem:[#allocation8 + $0x628] sm:$0xff]  }
 0x456   :  { %10628 = vmatprep.subr.bf16.mxu1 %v10981_v37  ;;  %v11019_v57 = vld [vmem:[#allocation8 + $0x6a8] sm:$0xff]   ;;  %v11020_v37 = vld [vmem:[#allocation8 + $0x670] sm:$0xff]  }
 0x458   :  { %10607 = vmatpush3.bf16.msra.mxu0 %v10982_v29 }
 0x459   :  { %10629 = vmatpush3.bf16.msra.mxu1 %v10983_v26  ;;  %10608 = vmatprep.subr.bf16.mxu0 %v10984_v7  ;;  %v11021_v26 = vld [vmem:[#allocation8 + $0x6f0] sm:$0xff]   ;;  %v12089_v7 = vld [vmem:[#allocation27_spill] sm:$0xff] }
 0x45a   :  { %10630 = vmatprep.subr.bf16.mxu1 %v10985_v6 }
 0x45c   :  { %10609 = vmatpush3.bf16.msra.mxu0 %v10986_v0 }
 0x45d   :  { %10631 = vmatpush3.bf16.msra.mxu1 %v10987_v9  ;;  %10610 = vmatprep.subr.bf16.mxu0 %v10988_v49  ;;  %v12090_v49 = vld [vmem:[#allocation28_spill] sm:$0xff] }
 0x45e   :  { %10632 = vmatprep.subr.bf16.mxu1 %v10989_v3 }
 0x460   :  { %10611 = vmatpush3.bf16.msra.mxu0 %v10990_v16  ;;  %v12091_v16 = vld [vmem:[#allocation29_spill] sm:$0xff] }
 0x461   :  { %10633 = vmatpush3.bf16.msra.mxu1 %v10991_v30  ;;  %10612 = vmatprep.subr.bf16.mxu0 %v10992_v39 }
 0x462   :  { %10634 = vmatprep.subr.bf16.mxu1 %v10993_v34  ;;  %v6225_v34 = vrot.slane %v11969_v5, %v11784_v23  ;;  %v6253_v23 = vrot.slane %v11969_v5, %v11801_v42  ;;  %v11030_v42 = vld [vmem:[#allocation8 + $0x700] sm:$0xff]  }
 0x464   :  { %10613 = vmatpush3.bf16.msra.mxu0 %v10994_v43 }
 0x465   :  { %10635 = vmatpush3.bf16.msra.mxu1 %v10995_v50  ;;  %10642 = vmatprep.subr.bf16.mxu0 %v10996_v35  ;;  %v11023_v50 = vld [vmem:[#allocation8 + $0x6b0] sm:$0xff]   ;;  %v11024_v35 = vld [vmem:[#allocation8 + $0x678] sm:$0xff]  }
 0x466   :  { %10664 = vmatprep.subr.bf16.mxu1 %v10997_v60 }
 0x467   :  { %8831 = vmatmul.mubr.bf16.vlgmr.msra.gmra.mrb[84].mxu0 %v6338_v47  ;;  %v6310_v47 = vadd.f32 %v6225_v34, %v6110_v13  ;;  %v6241_v34 = vrot.slane %v11969_v5, %v11832_v52 }
 0x468   :  { %8871 = vmatmul.mubr.bf16.vlgmr.msra.gmra.mrb[84].mxu1 %v6340_v54  ;;  %10643 = vmatpush3.bf16.msra.mxu0 %v10998_v45  ;;  %v11026_v45 = vld [vmem:[#allocation8 + $0x638] sm:$0xff]   ;;  %v11028_v54 = vld [vmem:[#allocation8 + $0x740] sm:$0xff]  }
 0x469   :  { %8910 = vmatprep.mubr.bf16.mxu0 %v6343_v56  ;;  %10665 = vmatpush3.bf16.msra.mxu1 %v10999_v1  ;;  %v11027_v1 = vld [vmem:[#allocation8 + $0x6b8] sm:$0xff]  }
 0x46a   :  { %8950 = vmatprep.mubr.bf16.mxu1 %v6345_v21  ;;  %10644 = vmatprep.subr.bf16.mxu0 %v11000_v4  ;;  %v11029_v4 = vld [vmem:[#allocation8 + $0x7c0] sm:$0xff]  }
 0x46b   :  { %10666 = vmatprep.subr.bf16.mxu1 %v11001_v61  ;;  %v6342_v61 = vpack.c.bf16 %v6310_v47, %v6310_v47  ;;  %v11031_v21 = vld [vmem:[#allocation8 + $0x780] sm:$0xff]  }
 0x46c   :  { %10645 = vmatpush3.bf16.msra.mxu0 %v11002_v59  ;;  %v11033_v59 = vld [vmem:[#allocation8 + $0x7c8] sm:$0xff]  }
 0x46d   :  { %10667 = vmatpush3.bf16.msra.mxu1 %v11003_v38  ;;  %10646 = vmatprep.subr.bf16.mxu0 %v11004_v20  ;;  %v11037_v20 = vld [vmem:[#allocation8 + $0x7d0] sm:$0xff]  }
 0x46e   :  { %10668 = vmatprep.subr.bf16.mxu1 %v11005_v19  ;;  %v11038_v19 = vld [vmem:[#allocation8 + $0x710] sm:$0xff]  }
 0x470   :  { %10647 = vmatpush3.bf16.msra.mxu0 %v11006_v14  ;;  %v11039_v14 = vld [vmem:[#allocation8 + $0x790] sm:$0xff]  }
 0x471   :  { %10669 = vmatpush3.bf16.msra.mxu1 %v11007_v55  ;;  %10648 = vmatprep.subr.bf16.mxu0 %v11008_v11  ;;  %v11040_v55 = vld [vmem:[#allocation8 + $0x758] sm:$0xff]  }
 0x472   :  { %10670 = vmatprep.subr.bf16.mxu1 %v11009_v17  ;;  %v11041_v11 = vld [vmem:[#allocation8 + $0x7d8] sm:$0xff]  }
 0x473   :  { %v11042_v17 = vld [vmem:[#allocation8 + $0x718] sm:$0xff]  }
 0x474   :  { %10649 = vmatpush3.bf16.msra.mxu0 %v11010_v22  ;;  %v11043_v22 = vld [vmem:[#allocation8 + $0x798] sm:$0xff]  }
 0x475   :  { %10671 = vmatpush3.bf16.msra.mxu1 %v11011_v41  ;;  %10650 = vmatprep.subr.bf16.mxu0 %v11012_v58  ;;  %v11044_v41 = vld [vmem:[#allocation8 + $0x760] sm:$0xff]  }
 0x476   :  { %10672 = vmatprep.subr.bf16.mxu1 %v11013_v24  ;;  %v11045_v58 = vld [vmem:[#allocation8 + $0x7e0] sm:$0xff]  }
 0x477   :  { %v11046_v24 = vld [vmem:[#allocation8 + $0x720] sm:$0xff]  }
 0x478   :  { %10651 = vmatpush3.bf16.msra.mxu0 %v11014_v2  ;;  %v11047_v2 = vld [vmem:[#allocation8 + $0x7a0] sm:$0xff]  }
 0x479   :  { %10673 = vmatpush3.bf16.msra.mxu1 %v11015_v48  ;;  %10652 = vmatprep.subr.bf16.mxu0 %v11016_v36  ;;  %v11048_v48 = vld [vmem:[#allocation8 + $0x768] sm:$0xff]  }
 0x47a   :  { %v11985_v29 = vpop.f32.mrb[60].mxu0  ;;  %10674 = vmatprep.subr.bf16.mxu1 %v11017_v15  ;;  %v11989_v0 = vpop.f32.mrb[60].mxu1  ;;  %v11049_v36 = vld [vmem:[#allocation8 + $0x7e8] sm:$0xff]  }
 0x47b   :  { %v6114_v6 = vmax.f32 %v12089_v7, %v11985_v29  ;;  %v6040_v9 = vpop.f32.mrb[61].mxu0  ;;  %v6116_v3 = vmax.f32 %v12090_v49, %v11989_v0  ;;  %v6081_v30 = vpop.f32.mrb[61].mxu1  ;;  %v11050_v15 = vld [vmem:[#allocation8 + $0x728] sm:$0xff]  }
 0x47c   :  { %v6115_v33 = vmax.f32 %v12091_v16, %v6040_v9  ;;  %v6042_v39 = vpop.f32.mrb[62].mxu0  ;;  %10653 = vmatpush3.bf16.msra.mxu0 %v11018_v18  ;;  %v6117_v32 = vmax.f32 %v12092_v51, %v6081_v30  ;;  %v6083_v43 = vpop.f32.mrb[62].mxu1  ;;  %v11051_v18 = vld [vmem:[#allocation8 + $0x7a8] sm:$0xff]  }
 0x47d   :  { %10675 = vmatpush3.bf16.msra.mxu1 %v11019_v57  ;;  %v6043_v40 = vpop.f32.mrb[63].mxu0  ;;  %10654 = vmatprep.subr.bf16.mxu0 %v11020_v37  ;;  %v6084_v60 = vpop.f32.mrb[63].mxu1  ;;  %v11052_v57 = vld [vmem:[#allocation8 + $0x770] sm:$0xff]   ;;  %v6314_v52 = vadd.f32 %v6241_v34, %v6114_v6  ;;  %v11071_v34 = vld [vmem:[#allocation14 + $0x18] sm:$0xff]  }
 0x47e   :  { %10676 = vmatprep.subr.bf16.mxu1 %v11021_v26  ;;  %v6315_v27 = vadd.f32 %v6245_v63, %v6115_v33  ;;  %v6317_v56 = vadd.f32 %v6253_v23, %v6117_v32  ;;  %v11053_v26 = vld [vmem:[#allocation8 + $0x7f0] sm:$0xff]   ;;  %v11057_v60 = vld [vmem:[#allocation8 + $0x7f8] sm:$0xff]  }
 0x47f   :  { %v11055_v40 = vld [vmem:[#allocation8 + $0x7b0] sm:$0xff]   ;;  %v11058_v63 = vld [vmem:[#allocation8 + $0x738] sm:$0xff]  }
 0x480   :  { %10655 = vmatpush3.bf16.msra.mxu0 %v11022_v28  ;;  %v6347_v13 = vpack.c.bf16 %v6315_v27, %v6315_v27  ;;  %v6349_v38 = vpack.c.bf16 %v6317_v56, %v6317_v56  ;;  %v11054_v28 = vld [vmem:[#allocation8 + $0x730] sm:$0xff]   ;;  %v11059_v23 = vld [vmem:[#allocation8 + $0x7b8] sm:$0xff]  }
 0x481   :  { %10677 = vmatpush3.bf16.msra.mxu1 %v11023_v50  ;;  %10656 = vmatprep.subr.bf16.mxu0 %v11024_v35  ;;  %v11056_v50 = vld [vmem:[#allocation8 + $0x778] sm:$0xff]   ;;  %v6249_v35 = vrot.slane %v11969_v5, %v11835_v53  ;;  %v6346_v53 = vpack.c.bf16 %v6314_v52, %v6314_v52 }
 0x482   :  { %10678 = vmatprep.subr.bf16.mxu1 %v11025_v44 }
 0x484   :  { %10657 = vmatpush3.bf16.msra.mxu0 %v11026_v45  ;;  %v6316_v45 = vadd.f32 %v6249_v35, %v6116_v3 }
 0x485   :  { %10679 = vmatpush3.bf16.msra.mxu1 %v11027_v1  ;;  %10686 = vmatprep.subr.bf16.mxu0 %v11028_v54 }
 0x486   :  { %10708 = vmatprep.subr.bf16.mxu1 %v11029_v4  ;;  %v6348_v5 = vpack.c.bf16 %v6316_v45, %v6316_v45 }
 0x487   :  { %8911 = vmatmul.mubr.bf16.vlgmr.msra.gmra.mrb[88].mxu0 %v6342_v61 }
 0x488   :  { %8951 = vmatmul.mubr.bf16.vlgmr.msra.gmra.mrb[88].mxu1 %v6344_v31  ;;  %10687 = vmatpush3.bf16.msra.mxu0 %v11030_v42 }
 0x489   :  { %8990 = vmatprep.mubr.bf16.mxu0 %v6347_v13  ;;  %10709 = vmatpush3.bf16.msra.mxu1 %v11031_v21 }
 0x48a   :  { %9030 = vmatprep.mubr.bf16.mxu1 %v6349_v38  ;;  %10688 = vmatprep.subr.bf16.mxu0 %v11032_v10 }
 0x48b   :  { %10710 = vmatprep.subr.bf16.mxu1 %v11033_v59 }
 0x48c   :  { %10689 = vmatpush3.bf16.msra.mxu0 %v11034_v62 }
 0x48d   :  { %10711 = vmatpush3.bf16.msra.mxu1 %v11035_v25  ;;  %10690 = vmatprep.subr.bf16.mxu0 %v11036_v12 }
 0x48e   :  { %10712 = vmatprep.subr.bf16.mxu1 %v11037_v20  ;;  %v11060_v20 = vld [vmem:[#allocation11] sm:$0xff]  }
 0x490   :  { %10691 = vmatpush3.bf16.msra.mxu0 %v11038_v19  ;;  %v11331_v19 = vmov 0.0  }
 0x491   :  { %10713 = vmatpush3.bf16.msra.mxu1 %v11039_v14  ;;  %10692 = vmatprep.subr.bf16.mxu0 %v11040_v55  ;;  %v11061_v14 = vld [vmem:[#allocation11 + $0x8] sm:$0xff]   ;;  %v11062_v55 = vld [vmem:[#allocation11 + $0x10] sm:$0xff]  }
 0x492   :  { %10714 = vmatprep.subr.bf16.mxu1 %v11041_v11  ;;  %v11063_v11 = vld [vmem:[#allocation11 + $0x18] sm:$0xff]  }
 0x494   :  { %10693 = vmatpush3.bf16.msra.mxu0 %v11042_v17 }
 0x495   :  { %10715 = vmatpush3.bf16.msra.mxu1 %v11043_v22  ;;  %10694 = vmatprep.subr.bf16.mxu0 %v11044_v41 }
 0x496   :  { %10716 = vmatprep.subr.bf16.mxu1 %v11045_v58  ;;  %v11064_v58 = vld [vmem:[#allocation11 + $0x20] sm:$0xff]  }
 0x498   :  { %10695 = vmatpush3.bf16.msra.mxu0 %v11046_v24 }
 0x499   :  { %10717 = vmatpush3.bf16.msra.mxu1 %v11047_v2  ;;  %10696 = vmatprep.subr.bf16.mxu0 %v11048_v48 }
 0x49a   :  { %v10394_v37 = vpop.f32.mrb[64].mxu0  ;;  %10718 = vmatprep.subr.bf16.mxu1 %v11049_v36 }
 0x49b   :  { %v10416_v9 = vpop.f32.mrb[64].mxu1  ;;  %v10395_v16 = vpop.f32.mrb[65].mxu0 }
 0x49c   :  { %v10396_v33 = vadd.f32 %v10395_v16, %v10394_v37  ;;  %v10417_v30 = vpop.f32.mrb[65].mxu1  ;;  %v10397_v39 = vpop.f32.mrb[66].mxu0  ;;  %10697 = vmatpush3.bf16.msra.mxu0 %v11050_v15  ;;  %v11066_v16 = vld [vmem:[#allocation11 + $0x30] sm:$0xff]  }
 0x49d   :  { %v10418_v51 = vadd.f32 %v10417_v30, %v10416_v9  ;;  %v10419_v32 = vpop.f32.mrb[66].mxu1  ;;  %10719 = vmatpush3.bf16.msra.mxu1 %v11051_v18  ;;  %v10398_v43 = vpop.f32.mrb[67].mxu0  ;;  %10698 = vmatprep.subr.bf16.mxu0 %v11052_v57  ;;  %v11068_v30 = vld [vmem:[#allocation14] sm:$0xff]   ;;  %v11069_v39 = vld [vmem:[#allocation14 + $0x8] sm:$0xff]  }
 0x49e   :  { %v10420_v8 = vpop.f32.mrb[67].mxu1  ;;  %10720 = vmatprep.subr.bf16.mxu1 %v11053_v26  ;;  %v11065_v26 = vld [vmem:[#allocation11 + $0x28] sm:$0xff]  }
 0x49f   :  { %v8473_v44 = vadd.f32 %v10418_v51, %v10396_v33  ;;  %v11067_v33 = vld [vmem:[#allocation11 + $0x38] sm:$0xff]  }
 0x4a0   :  { %10699 = vmatpush3.bf16.msra.mxu0 %v11054_v28  ;;  %v11070_v28 = vld [vmem:[#allocation14 + $0x10] sm:$0xff]  }
 0x4a1   :  { %10721 = vmatpush3.bf16.msra.mxu1 %v11055_v40  ;;  %10700 = vmatprep.subr.bf16.mxu0 %v11056_v50 }
 0x4a2   :  { %10722 = vmatprep.subr.bf16.mxu1 %v11057_v60 }
 0x4a4   :  { %10701 = vmatpush3.bf16.msra.mxu0 %v11058_v63 }
 0x4a5   :  { %10723 = vmatpush3.bf16.msra.mxu1 %v11059_v23  ;;  %10748 = vmatprep.subr.bf16.mxu0 %v11331_v19 }
 0x4a6   :  { %10768 = vmatprep.subr.bf16.mxu1 %v11331_v19 }
 0x4a7   :  { %8991 = vmatmul.mubr.bf16.vlgmr.msra.gmra.mrb[92].mxu0 %v6346_v53 }
 0x4a8   :  { %9031 = vmatmul.mubr.bf16.vlgmr.msra.gmra.mrb[92].mxu1 %v6348_v5  ;;  %10749 = vmatpush3.bf16.msra.mxu0 %v11060_v20 }
 0x4a9   :  { %10750 = vmatprep.subr.bf16.mxu0 %v11331_v19  ;;  %10764 = vmatprep.mubr.msk.bf16.mxu0 %vm11332_vm1, %v11331_v19 }
 0x4aa   :  { %10784 = vmatprep.mubr.msk.bf16.mxu1 %vm11332_vm1, %v11331_v19  ;;  %10769 = vmatpush3.bf16.msra.mxu1 %v11068_v30 }
 0x4ab   :  { %10770 = vmatprep.subr.bf16.mxu1 %v11331_v19 }
 0x4ac   :  { %10751 = vmatpush3.bf16.msra.mxu0 %v11061_v14 }
 0x4ad   :  { %10752 = vmatprep.subr.bf16.mxu0 %v11331_v19 }
 0x4ae   :  { %10771 = vmatpush3.bf16.msra.mxu1 %v11069_v39 }
 0x4af   :  { %10772 = vmatprep.subr.bf16.mxu1 %v11331_v19 }
 0x4b0   :  { %10753 = vmatpush3.bf16.msra.mxu0 %v11062_v55 }
 0x4b1   :  { %10754 = vmatprep.subr.bf16.mxu0 %v11331_v19 }
 0x4b2   :  { %10773 = vmatpush3.bf16.msra.mxu1 %v11070_v28 }
 0x4b3   :  { %10774 = vmatprep.subr.bf16.mxu1 %v11331_v19 }
 0x4b4   :  { %10755 = vmatpush3.bf16.msra.mxu0 %v11063_v11 }
 0x4b5   :  { %10756 = vmatprep.subr.bf16.mxu0 %v11331_v19 }
 0x4b6   :  { %10775 = vmatpush3.bf16.msra.mxu1 %v11071_v34 }
 0x4b7   :  { %10776 = vmatprep.subr.bf16.mxu1 %v11331_v19 }
 0x4b8   :  { %10757 = vmatpush3.bf16.msra.mxu0 %v11064_v58 }
 0x4b9   :  { %10758 = vmatprep.subr.bf16.mxu0 %v11331_v19 }
 0x4ba   :  { %v10438_v47 = vpop.f32.mrb[68].mxu0 }
 0x4bb   :  { %v10460_v1 = vpop.f32.mrb[68].mxu1  ;;  %v10439_v54 = vpop.f32.mrb[69].mxu0 }
 0x4bc   :  { %v10440_v46 = vadd.f32 %v10439_v54, %v10438_v47  ;;  %v10461_v29 = vpop.f32.mrb[69].mxu1  ;;  %v10441_v7 = vpop.f32.mrb[70].mxu0  ;;  %10759 = vmatpush3.bf16.msra.mxu0 %v11065_v26  ;;  %v11074_v26 = vld [vmem:[#allocation14 + $0x30] sm:$0xff]  }
 0x4bd   :  { %v10462_v6 = vadd.f32 %v10461_v29, %v10460_v1  ;;  %v10463_v4 = vpop.f32.mrb[70].mxu1  ;;  %v10442_v27 = vpop.f32.mrb[71].mxu0  ;;  %10760 = vmatprep.subr.bf16.mxu0 %v11331_v19 }
 0x4be   :  { %v8513_v56 = vadd.f32 %v10440_v46, %v8473_v44  ;;  %v10464_v42 = vpop.f32.mrb[71].mxu1 }
 0x4c0   :  { %v8553_v0 = vadd.f32 %v10462_v6, %v8513_v56  ;;  %10761 = vmatpush3.bf16.msra.mxu0 %v11066_v16  ;;  %v10359_v16 = vld [vmem:[#allocation13] ss:$0 sm:$0xff] }
 0x4c1   :  { %10762 = vmatprep.subr.bf16.mxu0 %v11331_v19 }
 0x4c4   :  { %10763 = vmatpush3.bf16.msra.mxu0 %v11067_v33 }
 0x4da   :  { %v10482_v49 = vpop.f32.mrb[72].mxu0 }
 0x4db   :  { %v10504_v3 = vpop.f32.mrb[72].mxu1  ;;  %v10483_v61 = vpop.f32.mrb[73].mxu0 }
 0x4dc   :  { %v10484_v21 = vadd.f32 %v10483_v61, %v10482_v49  ;;  %v10505_v31 = vpop.f32.mrb[73].mxu1  ;;  %v10485_v10 = vpop.f32.mrb[74].mxu0 }
 0x4dd   :  { %v10506_v13 = vadd.f32 %v10505_v31, %v10504_v3  ;;  %v10507_v59 = vpop.f32.mrb[74].mxu1  ;;  %v10486_v38 = vpop.f32.mrb[75].mxu0 }
 0x4de   :  { %v8593_v62 = vadd.f32 %v10484_v21, %v8553_v0  ;;  %v10508_v25 = vpop.f32.mrb[75].mxu1 }
 0x4e0   :  { %v8633_v12 = vadd.f32 %v10506_v13, %v8593_v62 }
 0x4fa   :  { %v10526_v17 = vpop.f32.mrb[76].mxu0 }
 0x4fb   :  { %v10548_v22 = vpop.f32.mrb[76].mxu1  ;;  %v10527_v41 = vpop.f32.mrb[77].mxu0 }
 0x4fc   :  { %v10528_v24 = vadd.f32 %v10527_v41, %v10526_v17  ;;  %v10549_v2 = vpop.f32.mrb[77].mxu1  ;;  %v10529_v48 = vpop.f32.mrb[78].mxu0 }
 0x4fd   :  { %v10550_v36 = vadd.f32 %v10549_v2, %v10548_v22  ;;  %v10551_v15 = vpop.f32.mrb[78].mxu1  ;;  %v10530_v18 = vpop.f32.mrb[79].mxu0  ;;  %v10358_v48 = vld [vmem:[#allocation10] ss:$0 sm:$0xff] }
 0x4fe   :  { %v8673_v57 = vadd.f32 %v10528_v24, %v8633_v12  ;;  %v10552_v37 = vpop.f32.mrb[79].mxu1 }
 0x4ff   :  { %v11073_v37 = vld [vmem:[#allocation14 + $0x28] sm:$0xff]  }
 0x500   :  { %v8713_v9 = vadd.f32 %v10550_v36, %v8673_v57  ;;  %v11072_v57 = vld [vmem:[#allocation14 + $0x20] sm:$0xff]  }
 0x501   :  { %10777 = vmatpush3.bf16.msra.mxu1 %v11072_v57 }
 0x502   :  { %10778 = vmatprep.subr.bf16.mxu1 %v11331_v19 }
 0x505   :  { %10779 = vmatpush3.bf16.msra.mxu1 %v11073_v37 }
 0x506   :  { %10780 = vmatprep.subr.bf16.mxu1 %v11331_v19 }
 0x509   :  { %10781 = vmatpush3.bf16.msra.mxu1 %v11074_v26 }
 0x50a   :  { %10782 = vmatprep.subr.bf16.mxu1 %v11331_v19 }
 0x51a   :  { %v10570_v51 = vpop.f32.mrb[80].mxu0 }
 0x51b   :  { %v10592_v32 = vpop.f32.mrb[80].mxu1  ;;  %v10571_v43 = vpop.f32.mrb[81].mxu0 }
 0x51c   :  { %v10572_v40 = vadd.f32 %v10571_v43, %v10570_v51  ;;  %v10593_v50 = vpop.f32.mrb[81].mxu1  ;;  %v10573_v35 = vpop.f32.mrb[82].mxu0  ;;  %v10368_v43 = vld [vmem:[#allocation16] ss:$0 sm:$0xff] }
 0x51d   :  { %v10594_v8 = vadd.f32 %v10593_v50, %v10592_v32  ;;  %v10595_v60 = vpop.f32.mrb[82].mxu1  ;;  %v10574_v44 = vpop.f32.mrb[83].mxu0 }
 0x51e   :  { %v8753_v63 = vadd.f32 %v10572_v40, %v8713_v9  ;;  %v10596_v52 = vpop.f32.mrb[83].mxu1  ;;  %v11075_v9 = vld [vmem:[#allocation14 + $0x38] sm:$0xff]  }
 0x51f   :  { %10783 = vmatpush3.bf16.msra.mxu1 %v11075_v9 }
 0x520   :  { %v8793_v23 = vadd.f32 %v10594_v8, %v8753_v63 }
 0x53a   :  { %v10614_v45 = vpop.f32.mrb[84].mxu0 }
 0x53b   :  { %v10636_v53 = vpop.f32.mrb[84].mxu1  ;;  %v10615_v5 = vpop.f32.mrb[85].mxu0 }
 0x53c   :  { %v10616_v47 = vadd.f32 %v10615_v5, %v10614_v45  ;;  %v10637_v1 = vpop.f32.mrb[85].mxu1  ;;  %v10617_v54 = vpop.f32.mrb[86].mxu0 }
 0x53d   :  { %v10638_v46 = vadd.f32 %v10637_v1, %v10636_v53  ;;  %v10639_v29 = vpop.f32.mrb[86].mxu1  ;;  %v10618_v7 = vpop.f32.mrb[87].mxu0 }
 0x53e   :  { %v8833_v6 = vadd.f32 %v10616_v47, %v8793_v23  ;;  %v10640_v4 = vpop.f32.mrb[87].mxu1 }
 0x540   :  { %v8873_v27 = vadd.f32 %v10638_v46, %v8833_v6 }
 0x55a   :  { %v10658_v56 = vpop.f32.mrb[88].mxu0 }
 0x55b   :  { %v10680_v42 = vpop.f32.mrb[88].mxu1  ;;  %v10659_v0 = vpop.f32.mrb[89].mxu0 }
 0x55c   :  { %v10660_v49 = vadd.f32 %v10659_v0, %v10658_v56  ;;  %v10681_v3 = vpop.f32.mrb[89].mxu1  ;;  %v10661_v61 = vpop.f32.mrb[90].mxu0 }
 0x55d   :  { %v10682_v21 = vadd.f32 %v10681_v3, %v10680_v42  ;;  %v10683_v31 = vpop.f32.mrb[90].mxu1  ;;  %v10662_v10 = vpop.f32.mrb[91].mxu0 }
 0x55e   :  { %v8913_v13 = vadd.f32 %v10660_v49, %v8873_v27  ;;  %v10684_v59 = vpop.f32.mrb[91].mxu1 }
 0x560   :  { %v8953_v38 = vadd.f32 %v10682_v21, %v8913_v13 }
 0x57a   :  { %v10702_v62 = vpop.f32.mrb[92].mxu0 }
 0x57b   :  { %v10724_v25 = vpop.f32.mrb[92].mxu1  ;;  %v10703_v12 = vpop.f32.mrb[93].mxu0 }
 0x57c   :  { %v10704_v20 = vadd.f32 %v10703_v12, %v10702_v62  ;;  %v10725_v14 = vpop.f32.mrb[93].mxu1  ;;  %v10705_v55 = vpop.f32.mrb[94].mxu0 }
 0x57d   :  { %v10726_v11 = vadd.f32 %v10725_v14, %v10724_v25  ;;  %v10727_v17 = vpop.f32.mrb[94].mxu1  ;;  %v10706_v22 = vpop.f32.mrb[95].mxu0 }
 0x57e   :  { %v8993_v41 = vadd.f32 %v10704_v20, %v8953_v38  ;;  %v10728_v58 = vpop.f32.mrb[95].mxu1 }
 0x580   :  { %v9033_v24 = vadd.f32 %v10726_v11, %v8993_v41 }
 0x582   :  { %v9039_v2 = vrot.slane %v9033_v24, 2 }
 0x584   :  { %v9041_v36 = vmax.f32 %v9033_v24, %v9039_v2 }
 0x586   :  { %v9049_v15 = vadd.f32 %v10358_v48, %v9041_v36 }
 0x588   :  { %v9050_v18 = vpack.c.bf16 %v9049_v15, %v9049_v15 }
 0x58a   :  { %10765 = vmatmul.mubr.bf16.vlgmr.msra.gmra.mrb[96].mxu0 %v9050_v18 }
 0x65d   :  { %v9156_v33 = vpop.f32.mrb[96].mxu0 }
 0x65e   :  { %v9157_v30 = vadd.f32 %v10359_v16, %v9156_v33  ;;  %v10766_v39 = vpop.f32.mrb[97].mxu0 }
 0x65f   :  { %v9159_v28 = vpop.f32.mrb[98].mxu0 }
 0x660   :  { %11076 = vtanh.f32 %v9157_v30  ;;  %v10767_v34 = vpop.f32.mrb[99].mxu0 }
 0x66a   :  { %v11077_v51 = vpop.eup %11076 }
 0x66b   :  { %v9163_v32 = vpack.c.bf16 %v11077_v51, %v11077_v51 }
 0x66d   :  { %10785 = vmatmul.mubr.bf16.vlgmr.msra.gmra.mrb[96].mxu1 %v9163_v32 }
 0x740   :  { %v9269_v40 = vpop.f32.mrb[96].mxu1 }
 0x741   :  { %v9270_v50 = vadd.f32 %v10368_v43, %v9269_v40  ;;  %v10786_v35 = vpop.f32.mrb[97].mxu1 }
 0x742   :  { %v9272_v8 = vpop.f32.mrb[98].mxu1 }
 0x743   :  { %v10377_v60 = vmul.f32 -1.442695, %v9270_v50  ;;  %v10787_v44 = vpop.f32.mrb[99].mxu1 }
 0x745   :  { %11078 = vpow2.f32 %v10377_v60 }
 0x74f   :  { %v11079_v19 = vpop.eup %11078 }
 0x750   :  { %v9278_v63 = vadd.f32 1.0, %v11079_v19 }
 0x752   :  { %11080 = vrcp.f32 %v9278_v63 }
 0x75c   :  { %v11081_v52 = vpop.eup %11080 }
 0x75d   :  { %9281 = vst [vmem:[#allocation17] sm:$0x3] %v11081_v52 }
 0x75e   :  { %11295 = shalt.err (!%p11292_p6)
}
 0x75f   :  { %s11296_s5 = scalar_lea.hbm %s12059_s10, 32 }
 0x760   :  { %p11297_p7 = scmp.ne.s32.totalorder %s12059_s10, %s11296_s5  ;;  %p11300_p8 = scmp.lt.u32.totalorder %s11296_s5, %s12059_s10 }
 0x762   :  { %p11302_p9 = pnand %p11300_p8, %p11297_p7 }
 0x764   :  { %11305 = shalt.err (!%p11302_p9)
}
 0x765   :  { %9291 = dma.vmem_to_hbm [thread:$0]  %s9289_s27, 32, %s12059_s10, [#allocation4]  }
 0x766   :  { %11316 = dma.done.wait [#allocation4], 32  }
 0x767   :  { %11317 = vsyncadd [#allocation4], 4294967264 }
 0x768   :  { %9295 = vsyncpa [#allocation3], 1 }
 0x769   :  { %9296 = vsyncpa [#allocation6], 1 }
 0x76a   :  { %9297 = vsyncpa [#allocation9], 1 }
 0x76b   :  { %9298 = vsyncpa [#allocation12], 1 }
 0x76c   :  { %9299 = vsyncpa [#allocation15], 1 }
 0x76d   :  { %9300 = vsyncpa [#allocation4], 1 }

// kernel: _device_forward.1
= control target key start
LH: loop header
LB: loop body
LE: loop exit
PB: predicated region body
PF: predicated region fallthrough
CT: control target
= control target key end

     0   :  { %15 = vsyncpa [#allocation3], 0  ;;  %s12049_s0 = inlined_call_operand.vmem [shape: bf16[1,4,192], index: 0, kind: input, shape index: {}]   ;;  %s12050_s1 = inlined_call_operand.hbm [shape: bf16[192,4096], index: 1, kind: input, shape index: {}]   ;;  %s12051_s2 = inlined_call_operand.hbm [shape: bf16[192,4096], index: 2, kind: input, shape index: {}]   ;;  %s12052_s3 = inlined_call_operand.hbm [shape: f32[1,4096], index: 3, kind: input, shape index: {}]   ;;  %s12053_s4 = inlined_call_operand.hbm [shape: bf16[4096,128], index: 4, kind: input, shape index: {}]   ;;  %s12054_s5 = inlined_call_operand.hbm [shape: f32[1,128], index: 5, kind: input, shape index: {}]   ;;  %s12055_s6 = inlined_call_operand.hbm [shape: bf16[128,128], index: 6, kind: input, shape index: {}]   ;;  %s12056_s7 = inlined_call_operand.hbm [shape: f32[1,128], index: 7, kind: input, shape index: {}]   ;;  %s12057_s8 = inlined_call_operand.hbm [shape: bf16[128,128], index: 8, kind: input, shape index: {}]   ;;  %s12058_s9 = inlined_call_operand.hbm [shape: f32[1,128], index: 9, kind: input, shape index: {}]   ;;  %s12059_s10 = inlined_call_operand.hbm [shape: f32[1,2,128], index: 10, kind: output, shape index: {}]  }
   0x1   :  { %16 = vsyncpa [#allocation6], 0 }
   0x2   :  { %17 = vsyncpa [#allocation9], 0 }
   0x3   :  { %18 = vsyncpa [#allocation12], 0 }
   0x4   :  { %19 = vsyncpa [#allocation15], 0 }
   0x5   :  { %20 = vsyncpa [#allocation4], 0  ;;  %s11318_s13 = smov [#allocation5]   ;;  %s11319_s15 = smov [#allocation8]  }
   0x6   :  { %s40_s14 = sshll.u32 %s11318_s13, 4  ;;  %s62_s16 = sshll.u32 %s11319_s15, 4  ;;  %s41_s14 = int_to_ptr.vmem [resolvable:$true] %s40_s14  ;;  %s11389_s16 = int_to_ptr.vmem [resolvable:$true] %s62_s16 }
   0x7   :  { %s11086_s19 = scalar_lea.hbm %s12051_s2, 49152 }
   0x8   :  { %p11087_p0 = scmp.ne.s32.totalorder %s12051_s2, %s11086_s19  ;;  %p11090_p1 = scmp.lt.u32.totalorder %s11086_s19, %s12051_s2 }
   0xa   :  { %p11092_p2 = pnand %p11090_p1, %p11087_p0 }
   0xc   :  { %11095 = shalt.err (!%p11092_p2)
}
   0xd   :  { %s11096_s24 = scalar_lea.vmem %s41_s14, 49152  ;;  %p11101_p4 = scmp.lt.s32.totalorder %s41_s14, %s41_s14 }
   0xe   :  { %p11097_p3 = scmp.ne.s32.totalorder %s41_s14, %s11096_s24  ;;  %p11102_p5 = scmp.lt.s32.totalorder %s11096_s24, %s11096_s24 }
  0x10   :  { %p11103_p6 = por %p11102_p5, %p11101_p4 }
  0x12   :  { %p11104_p7 = pnand %p11103_p6, %p11097_p3 }
  0x14   :  { %11107 = shalt.err (!%p11104_p7)
}
  0x15   :  { %s11320_s25 = smov 2048   ;;  %s11321_s26 = smov 128  }
  0x16   :  { %46 = dma.hbm_to_vmem [thread:$0]  %s12051_s2, 49152, %s41_s14, [#allocation6], %s11320_s25, %s11320_s25, %s11321_s26  }
  0x17   :  { %s11108_s11 = scalar_lea.hbm %s12053_s4, 32768 }
  0x18   :  { %p11109_p8 = scmp.ne.s32.totalorder %s12053_s4, %s11108_s11  ;;  %p11112_p9 = scmp.lt.u32.totalorder %s11108_s11, %s12053_s4 }
  0x1a   :  { %p11114_p10 = pnand %p11112_p9, %p11109_p8 }
  0x1c   :  { %11117 = shalt.err (!%p11114_p10)
}
  0x1d   :  { %s11118_s18 = scalar_lea.vmem %s11389_s16, 32768  ;;  %p11123_p12 = scmp.lt.s32.totalorder %s11389_s16, %s11389_s16 }
  0x1e   :  { %p11119_p11 = scmp.ne.s32.totalorder %s11389_s16, %s11118_s18  ;;  %p11124_p13 = scmp.lt.s32.totalorder %s11118_s18, %s11118_s18 }
  0x20   :  { %p11125_p0 = por %p11124_p13, %p11123_p12 }
  0x22   :  { %p11126_p1 = pnand %p11125_p0, %p11119_p11 }
  0x24   :  { %11129 = shalt.err (!%p11126_p1)
}
  0x25   :  { %s11322_s2 = smov 64   ;;  %s11323_s14 = smov 4  }
  0x26   :  { %68 = dma.hbm_to_vmem [thread:$0]  %s12053_s4, 32768, %s11389_s16, [#allocation9], %s11322_s2, %s11322_s2, %s11323_s14  }
  0x27   :  { %s11324_s21 = smov [#allocation11]   ;;  %s11325_s23 = smov [#allocation14]  }
  0x28   :  { %s84_s22 = sshll.u32 %s11324_s21, 4  ;;  %s106_s24 = sshll.u32 %s11325_s23, 4  ;;  %s85_s22 = int_to_ptr.vmem [resolvable:$true] %s84_s22  ;;  %s11426_s24 = int_to_ptr.vmem [resolvable:$true] %s106_s24 }
  0x29   :  { %s11130_s29 = scalar_lea.hbm %s12055_s6, 1024 }
  0x2a   :  { %p11131_p2 = scmp.ne.s32.totalorder %s12055_s6, %s11130_s29  ;;  %p11134_p3 = scmp.lt.u32.totalorder %s11130_s29, %s12055_s6 }
  0x2c   :  { %p11136_p4 = pnand %p11134_p3, %p11131_p2 }
  0x2e   :  { %11139 = shalt.err (!%p11136_p4)
}
  0x2f   :  { %s11140_s4 = scalar_lea.vmem %s85_s22, 1024  ;;  %p11145_p6 = scmp.lt.s32.totalorder %s85_s22, %s85_s22 }
  0x30   :  { %p11141_p5 = scmp.ne.s32.totalorder %s85_s22, %s11140_s4  ;;  %p11146_p7 = scmp.lt.s32.totalorder %s11140_s4, %s11140_s4 }
  0x32   :  { %p11147_p8 = por %p11146_p7, %p11145_p6 }
  0x34   :  { %p11148_p9 = pnand %p11147_p8, %p11141_p5 }
  0x36   :  { %11151 = shalt.err (!%p11148_p9)
}
  0x37   :  { %90 = dma.hbm_to_vmem [thread:$0]  %s12055_s6, 1024, %s85_s22, [#allocation12], %s11322_s2, %s11322_s2, %s11323_s14  }
  0x38   :  { %s11152_s19 = scalar_lea.hbm %s12057_s8, 1024 }
  0x39   :  { %p11153_p10 = scmp.ne.s32.totalorder %s12057_s8, %s11152_s19  ;;  %p11156_p11 = scmp.lt.u32.totalorder %s11152_s19, %s12057_s8 }
  0x3b   :  { %p11158_p12 = pnand %p11156_p11, %p11153_p10 }
  0x3d   :  { %11161 = shalt.err (!%p11158_p12)
}
  0x3e   :  { %s11162_s28 = scalar_lea.vmem %s11426_s24, 1024  ;;  %p11167_p0 = scmp.lt.s32.totalorder %s11426_s24, %s11426_s24 }
  0x3f   :  { %p11163_p13 = scmp.ne.s32.totalorder %s11426_s24, %s11162_s28  ;;  %p11168_p1 = scmp.lt.s32.totalorder %s11162_s28, %s11162_s28 }
  0x41   :  { %p11169_p2 = por %p11168_p1, %p11167_p0 }
  0x43   :  { %p11170_p3 = pnand %p11169_p2, %p11163_p13 }
  0x45   :  { %11173 = shalt.err (!%p11170_p3)
}
  0x46   :  { %112 = dma.hbm_to_vmem [thread:$0]  %s12057_s8, 1024, %s11426_s24, [#allocation15], %s11322_s2, %s11322_s2, %s11323_s14  }
  0x47   :  { %s11326_s29 = smov [#allocation2]   ;;  %s11327_s11 = smov [#allocation7]  }
  0x48   :  { %s28_s30 = sshll.u32 %s11326_s29, 4  ;;  %s53_s12 = sshll.u32 %s11327_s11, 4  ;;  %s29_s30 = int_to_ptr.vmem [resolvable:$true] %s28_s30  ;;  %s54_s12 = int_to_ptr.vmem [resolvable:$true] %s53_s12 }
  0x49   :  { %s11174_s16 = scalar_lea.hbm %s12050_s1, 49152 }
  0x4a   :  { %p11175_p4 = scmp.ne.s32.totalorder %s12050_s1, %s11174_s16  ;;  %p11178_p5 = scmp.lt.u32.totalorder %s11174_s16, %s12050_s1 }
  0x4c   :  { %p11180_p6 = pnand %p11178_p5, %p11175_p4 }
  0x4e   :  { %11183 = shalt.err (!%p11180_p6)
}
  0x4f   :  { %s11184_s8 = scalar_lea.vmem %s29_s30, 49152  ;;  %p11189_p8 = scmp.lt.s32.totalorder %s29_s30, %s29_s30 }
  0x50   :  { %p11185_p7 = scmp.ne.s32.totalorder %s29_s30, %s11184_s8  ;;  %p11190_p9 = scmp.lt.s32.totalorder %s11184_s8, %s11184_s8 }
  0x52   :  { %p11191_p10 = por %p11190_p9, %p11189_p8 }
  0x54   :  { %p11192_p11 = pnand %p11191_p10, %p11185_p7 }
  0x56   :  { %11195 = shalt.err (!%p11192_p11)
}
  0x57   :  { %34 = dma.hbm_to_vmem [thread:$0]  %s12050_s1, 49152, %s29_s30, [#allocation3], %s11320_s25, %s11320_s25, %s11321_s26  }
  0x58   :  { %s11196_s21 = scalar_lea.hbm %s12052_s3, 512 }
  0x59   :  { %p11197_p12 = scmp.ne.s32.totalorder %s12052_s3, %s11196_s21  ;;  %p11200_p13 = scmp.lt.u32.totalorder %s11196_s21, %s12052_s3 }
  0x5b   :  { %p11202_p0 = pnand %p11200_p13, %p11197_p12 }
  0x5d   :  { %11205 = shalt.err (!%p11202_p0)
}
  0x5e   :  { %s11206_s22 = scalar_lea.vmem %s54_s12, 512  ;;  %p11211_p2 = scmp.lt.s32.totalorder %s54_s12, %s54_s12 }
  0x5f   :  { %p11207_p1 = scmp.ne.s32.totalorder %s54_s12, %s11206_s22  ;;  %p11212_p3 = scmp.lt.s32.totalorder %s11206_s22, %s11206_s22 }
  0x61   :  { %p11213_p4 = por %p11212_p3, %p11211_p2 }
  0x63   :  { %p11214_p5 = pnand %p11213_p4, %p11207_p1 }
  0x65   :  { %11217 = shalt.err (!%p11214_p5)
}
  0x66   :  { %56 = dma.hbm_to_vmem [thread:$0]  %s12052_s3, 512, %s54_s12, [#allocation6]  }
  0x67   :  { %s11328_s26 = smov [#allocation10]   ;;  %s11329_s30 = smov [#allocation13]  }
  0x68   :  { %s75_s29 = sshll.u32 %s11328_s26, 4  ;;  %s97_s11 = sshll.u32 %s11329_s30, 4  ;;  %s76_s29 = int_to_ptr.vmem [resolvable:$true] %s75_s29  ;;  %s98_s11 = int_to_ptr.vmem [resolvable:$true] %s97_s11 }
  0x69   :  { %s11218_s16 = scalar_lea.hbm %s12054_s5, 16 }
  0x6a   :  { %p11219_p6 = scmp.ne.s32.totalorder %s12054_s5, %s11218_s16  ;;  %p11222_p7 = scmp.lt.u32.totalorder %s11218_s16, %s12054_s5 }
  0x6c   :  { %p11224_p8 = pnand %p11222_p7, %p11219_p6 }
  0x6e   :  { %11227 = shalt.err (!%p11224_p8)
}
  0x6f   :  { %s11228_s3 = scalar_lea.vmem %s76_s29, 16  ;;  %s11232_s12 = scalar_lea.vmem %s76_s29, 32 }
  0x70   :  { %p11229_p9 = scmp.ne.s32.totalorder %s76_s29, %s11228_s3  ;;  %p11233_p10 = scmp.lt.s32.totalorder %s76_s29, %s76_s29 }
  0x71   :  { %p11234_p11 = scmp.lt.s32.totalorder %s11232_s12, %s11228_s3 }
  0x73   :  { %p11235_p12 = por %p11234_p11, %p11233_p10 }
  0x75   :  { %p11236_p13 = pnand %p11235_p12, %p11229_p9 }
  0x77   :  { %11239 = shalt.err (!%p11236_p13)
}
  0x78   :  { %78 = dma.hbm_to_vmem [thread:$0]  %s12054_s5, 16, %s76_s29, [#allocation9]  }
  0x79   :  { %s11240_s20 = scalar_lea.hbm %s12056_s7, 16 }
  0x7a   :  { %p11241_p0 = scmp.ne.s32.totalorder %s12056_s7, %s11240_s20  ;;  %p11244_p1 = scmp.lt.u32.totalorder %s11240_s20, %s12056_s7 }
  0x7c   :  { %p11246_p2 = pnand %p11244_p1, %p11241_p0 }
  0x7e   :  { %11249 = shalt.err (!%p11246_p2)
}
  0x7f   :  { %s11250_s6 = scalar_lea.vmem %s98_s11, 16  ;;  %s11254_s22 = scalar_lea.vmem %s98_s11, 32 }
  0x80   :  { %p11251_p3 = scmp.ne.s32.totalorder %s98_s11, %s11250_s6  ;;  %p11255_p4 = scmp.lt.s32.totalorder %s98_s11, %s98_s11 }
  0x81   :  { %p11256_p5 = scmp.lt.s32.totalorder %s11254_s22, %s11250_s6 }
  0x83   :  { %p11257_p6 = por %p11256_p5, %p11255_p4 }
  0x85   :  { %p11258_p7 = pnand %p11257_p6, %p11251_p3 }
  0x87   :  { %11261 = shalt.err (!%p11258_p7)
}
  0x88   :  { %100 = dma.hbm_to_vmem [thread:$0]  %s12056_s7, 16, %s98_s11, [#allocation12]  }
  0x89   :  { %s11330_s25 = smov [#allocation16]   ;;  %s11262_s13 = scalar_lea.hbm %s12058_s9, 16 }
  0x8a   :  { %s119_s26 = sshll.u32 %s11330_s25, 4  ;;  %p11263_p8 = scmp.ne.s32.totalorder %s12058_s9, %s11262_s13  ;;  %s120_s26 = int_to_ptr.vmem [resolvable:$true] %s119_s26 }
  0x8b   :  { %p11266_p9 = scmp.lt.u32.totalorder %s11262_s13, %s12058_s9 }
  0x8d   :  { %p11268_p10 = pnand %p11266_p9, %p11263_p8 }
  0x8f   :  { %11271 = shalt.err (!%p11268_p10)
}
  0x90   :  { %s11272_s18 = scalar_lea.vmem %s120_s26, 16  ;;  %s11276_s7 = scalar_lea.vmem %s120_s26, 32 }
  0x91   :  { %p11273_p11 = scmp.ne.s32.totalorder %s120_s26, %s11272_s18  ;;  %p11277_p12 = scmp.lt.s32.totalorder %s120_s26, %s120_s26 }
  0x92   :  { %p11278_p13 = scmp.lt.s32.totalorder %s11276_s7, %s11272_s18 }
  0x94   :  { %p11279_p0 = por %p11278_p13, %p11277_p12 }
  0x96   :  { %p11280_p1 = pnand %p11279_p0, %p11273_p11 }
  0x98   :  { %11283 = shalt.err (!%p11280_p1)
}
  0x99   :  { %122 = dma.hbm_to_vmem [thread:$0]  %s12058_s9, 16, %s120_s26, [#allocation15]  }
  0x9a   :  { %11306 = dma.done.wait [#allocation3], 49152  }
  0x9b   :  { %11307 = vsyncadd [#allocation3], 4294918144 }
  0x9c   :  { %11308 = dma.done.wait [#allocation6], 49664  }
  0x9d   :  { %11309 = vsyncadd [#allocation6], 4294917632 }
  0x9e   :  { %11310 = dma.done.wait [#allocation9], 32784  }
  0x9f   :  { %11311 = vsyncadd [#allocation9], 4294934512 }
  0xa0   :  { %11312 = dma.done.wait [#allocation12], 1040  }
  0xa1   :  { %11313 = vsyncadd [#allocation12], 4294966256 }
  0xa2   :  { %11314 = dma.done.wait [#allocation15], 1040  }
  0xa3   :  { %11315 = vsyncadd [#allocation15], 4294966256  ;;  %v152_v0 = vld [vmem:[#allocation2] sm:$0xff]  ;;  %v153_v2 = vld [vmem:[#allocation2 + $0x8] sm:$0xff]  ;;  %vm2466_vm0 = vcmask 523264   ;;  %vm11332_vm1 = vmmov 0  }
  0xa4   :  { %v168_v1 = vld [vmem:[#allocation2 + $0x80] sm:$0xff]  ;;  %v169_v4 = vld [vmem:[#allocation2 + $0x88] sm:$0xff]  ;;  %v11529_v43 = vld.sshfl [vmem:[%s12049_s0] sm:$0x33 pattern:$0x76325410] }
  0xa5   :  { %v9303_v3 = vcombine.high %v152_v0, %v168_v1  ;;  %v9302_v5 = vcombine.low %v152_v0, %v168_v1  ;;  %v184_v6 = vld [vmem:[#allocation2 + $0x100] sm:$0xff]  ;;  %v9305_v8 = vcombine.high %v153_v2, %v169_v4  ;;  %v9304_v9 = vcombine.low %v153_v2, %v169_v4  ;;  %v185_v11 = vld [vmem:[#allocation2 + $0x108] sm:$0xff] }
  0xa6   :  { %v200_v7 = vld [vmem:[#allocation2 + $0x180] sm:$0xff]  ;;  %v201_v12 = vld [vmem:[#allocation2 + $0x188] sm:$0xff]  ;;  %v11533_v46 = vcombine.high %v11529_v43, %v11529_v43 }
  0xa7   :  { %v9335_v10 = vcombine.high %v184_v6, %v200_v7  ;;  %v216_v13 = vld [vmem:[#allocation2 + $0x200] sm:$0xff]  ;;  %2470 = vmatprep.subr.bf16.mxu0 %v9303_v3  ;;  %v9337_v14 = vcombine.high %v185_v11, %v201_v12  ;;  %v217_v16 = vld [vmem:[#allocation2 + $0x208] sm:$0xff]  ;;  %2511 = vmatprep.subr.bf16.mxu1 %v9305_v8  ;;  %v9334_v18 = vcombine.low %v184_v6, %v200_v7 }
  0xa8   :  { %v232_v15 = vld [vmem:[#allocation2 + $0x280] sm:$0xff]  ;;  %v233_v17 = vld [vmem:[#allocation2 + $0x288] sm:$0xff]  ;;  %2471 = vmatpush1.bf16.msra.mxu0 %v9302_v5  ;;  %2512 = vmatpush1.bf16.msra.mxu1 %v9304_v9  ;;  %v9336_v19 = vcombine.low %v185_v11, %v201_v12 }
  0xa9   :  { %2472 = vmatprep.subr.bf16.mxu0 %v9335_v10  ;;  %v9367_v20 = vcombine.high %v216_v13, %v232_v15  ;;  %2513 = vmatprep.subr.bf16.mxu1 %v9337_v14  ;;  %v9369_v21 = vcombine.high %v217_v16, %v233_v17  ;;  %v248_v22 = vld [vmem:[#allocation2 + $0x300] sm:$0xff]  ;;  %v249_v24 = vld [vmem:[#allocation2 + $0x308] sm:$0xff]  ;;  %v9366_v26 = vcombine.low %v216_v13, %v232_v15 }
  0xaa   :  { %v264_v23 = vld [vmem:[#allocation2 + $0x380] sm:$0xff]  ;;  %v265_v25 = vld [vmem:[#allocation2 + $0x388] sm:$0xff]  ;;  %v9368_v27 = vcombine.low %v217_v16, %v233_v17  ;;  %9686 = vmatprep.mubr.msk.bf16.mxu0 %vm2466_vm0, %v11533_v46  ;;  %9687 = vmatprep.mubr.msk.bf16.mxu1 %vm2466_vm0, %v11533_v46 }
  0xab   :  { %v9399_v28 = vcombine.high %v248_v22, %v264_v23  ;;  %v9401_v29 = vcombine.high %v249_v24, %v265_v25  ;;  %v280_v30 = vld [vmem:[#allocation2 + $0x400] sm:$0xff]  ;;  %v281_v32 = vld [vmem:[#allocation2 + $0x408] sm:$0xff]  ;;  %v9398_v34 = vcombine.low %v248_v22, %v264_v23  ;;  %v9400_v35 = vcombine.low %v249_v24, %v265_v25 }
  0xac   :  { %2473 = vmatpush1.bf16.msra.mxu0 %v9334_v18  ;;  %2514 = vmatpush1.bf16.msra.mxu1 %v9336_v19  ;;  %v296_v31 = vld [vmem:[#allocation2 + $0x480] sm:$0xff]  ;;  %v297_v33 = vld [vmem:[#allocation2 + $0x488] sm:$0xff] }
  0xad   :  { %2474 = vmatprep.subr.bf16.mxu0 %v9367_v20  ;;  %2515 = vmatprep.subr.bf16.mxu1 %v9369_v21  ;;  %v9431_v36 = vcombine.high %v280_v30, %v296_v31  ;;  %v9433_v37 = vcombine.high %v281_v32, %v297_v33  ;;  %v312_v38 = vld [vmem:[#allocation2 + $0x500] sm:$0xff]  ;;  %v313_v40 = vld [vmem:[#allocation2 + $0x508] sm:$0xff]  ;;  %v9430_v42 = vcombine.low %v280_v30, %v296_v31 }
  0xae   :  { %v328_v39 = vld [vmem:[#allocation2 + $0x580] sm:$0xff]  ;;  %v329_v41 = vld [vmem:[#allocation2 + $0x588] sm:$0xff]  ;;  %v9432_v44 = vcombine.low %v281_v32, %v297_v33  ;;  %v154_v32 = vld [vmem:[#allocation2 + $0x10] sm:$0xff] }
  0xaf   :  { %v9463_v45 = vcombine.high %v312_v38, %v328_v39  ;;  %v9465_v47 = vcombine.high %v313_v40, %v329_v41  ;;  %v344_v48 = vld [vmem:[#allocation2 + $0x600] sm:$0xff]  ;;  %v345_v50 = vld [vmem:[#allocation2 + $0x608] sm:$0xff]  ;;  %v9462_v52 = vcombine.low %v312_v38, %v328_v39  ;;  %v9464_v53 = vcombine.low %v313_v40, %v329_v41  ;;  %v170_v33 = vld [vmem:[#allocation2 + $0x90] sm:$0xff] }
  0xb0   :  { %2475 = vmatpush1.bf16.msra.mxu0 %v9366_v26  ;;  %2516 = vmatpush1.bf16.msra.mxu1 %v9368_v27  ;;  %v360_v49 = vld [vmem:[#allocation2 + $0x680] sm:$0xff]  ;;  %v361_v51 = vld [vmem:[#allocation2 + $0x688] sm:$0xff]  ;;  %v9307_v38 = vcombine.high %v154_v32, %v170_v33  ;;  %v186_v40 = vld [vmem:[#allocation2 + $0x110] sm:$0xff] }
  0xb1   :  { %2476 = vmatprep.subr.bf16.mxu0 %v9399_v28  ;;  %2517 = vmatprep.subr.bf16.mxu1 %v9401_v29  ;;  %v9495_v54 = vcombine.high %v344_v48, %v360_v49  ;;  %v9497_v55 = vcombine.high %v345_v50, %v361_v51  ;;  %v376_v56 = vld [vmem:[#allocation2 + $0x700] sm:$0xff]  ;;  %v377_v58 = vld [vmem:[#allocation2 + $0x708] sm:$0xff]  ;;  %v9494_v60 = vcombine.low %v344_v48, %v360_v49  ;;  %v202_v41 = vld [vmem:[#allocation2 + $0x190] sm:$0xff] }
  0xb2   :  { %v392_v57 = vld [vmem:[#allocation2 + $0x780] sm:$0xff]  ;;  %v393_v59 = vld [vmem:[#allocation2 + $0x788] sm:$0xff]  ;;  %v9496_v61 = vcombine.low %v345_v50, %v361_v51  ;;  %v9339_v48 = vcombine.high %v186_v40, %v202_v41  ;;  %v218_v50 = vld [vmem:[#allocation2 + $0x210] sm:$0xff] }
  0xb3   :  { %v9527_v62 = vcombine.high %v376_v56, %v392_v57  ;;  %v9529_v63 = vcombine.high %v377_v58, %v393_v59  ;;  %v408_v0 = vld [vmem:[#allocation2 + $0x800] sm:$0xff]  ;;  %v409_v2 = vld [vmem:[#allocation2 + $0x808] sm:$0xff]  ;;  %v9526_v4 = vcombine.low %v376_v56, %v392_v57  ;;  %v9528_v5 = vcombine.low %v377_v58, %v393_v59  ;;  %v234_v51 = vld [vmem:[#allocation2 + $0x290] sm:$0xff] }
  0xb4   :  { %2477 = vmatpush1.bf16.msra.mxu0 %v9398_v34  ;;  %2518 = vmatpush1.bf16.msra.mxu1 %v9400_v35  ;;  %v424_v1 = vld [vmem:[#allocation2 + $0x880] sm:$0xff]  ;;  %v425_v3 = vld [vmem:[#allocation2 + $0x888] sm:$0xff]  ;;  %v155_v34 = vld [vmem:[#allocation2 + $0x18] sm:$0xff]  ;;  %v9371_v56 = vcombine.high %v218_v50, %v234_v51 }
  0xb5   :  { %2478 = vmatprep.subr.bf16.mxu0 %v9431_v36  ;;  %2519 = vmatprep.subr.bf16.mxu1 %v9433_v37  ;;  %v9559_v6 = vcombine.high %v408_v0, %v424_v1  ;;  %v9561_v7 = vcombine.high %v409_v2, %v425_v3  ;;  %v440_v8 = vld [vmem:[#allocation2 + $0x900] sm:$0xff]  ;;  %v441_v10 = vld [vmem:[#allocation2 + $0x908] sm:$0xff]  ;;  %v9558_v12 = vcombine.low %v408_v0, %v424_v1  ;;  %v171_v35 = vld [vmem:[#allocation2 + $0x98] sm:$0xff] }
  0xb6   :  { %v456_v9 = vld [vmem:[#allocation2 + $0x980] sm:$0xff]  ;;  %v457_v11 = vld [vmem:[#allocation2 + $0x988] sm:$0xff]  ;;  %v9560_v13 = vcombine.low %v409_v2, %v425_v3  ;;  %v9309_v39 = vcombine.high %v155_v34, %v171_v35  ;;  %v250_v58 = vld [vmem:[#allocation2 + $0x310] sm:$0xff] }
  0xb7   :  { %v9591_v14 = vcombine.high %v440_v8, %v456_v9  ;;  %v9593_v15 = vcombine.high %v441_v10, %v457_v11  ;;  %v472_v16 = vld [vmem:[#allocation2 + $0xa00] sm:$0xff]  ;;  %v473_v18 = vld [vmem:[#allocation2 + $0xa08] sm:$0xff]  ;;  %v9590_v20 = vcombine.low %v440_v8, %v456_v9  ;;  %v9592_v21 = vcombine.low %v441_v10, %v457_v11  ;;  %v266_v59 = vld [vmem:[#allocation2 + $0x390] sm:$0xff] }
  0xb8   :  { %2479 = vmatpush1.bf16.msra.mxu0 %v9430_v42  ;;  %2520 = vmatpush1.bf16.msra.mxu1 %v9432_v44  ;;  %v488_v17 = vld [vmem:[#allocation2 + $0xa80] sm:$0xff]  ;;  %v489_v19 = vld [vmem:[#allocation2 + $0xa88] sm:$0xff]  ;;  %v187_v42 = vld [vmem:[#allocation2 + $0x118] sm:$0xff]  ;;  %v9403_v0 = vcombine.high %v250_v58, %v266_v59 }
  0xb9   :  { %2480 = vmatprep.subr.bf16.mxu0 %v9463_v45  ;;  %2521 = vmatprep.subr.bf16.mxu1 %v9465_v47  ;;  %v9623_v22 = vcombine.high %v472_v16, %v488_v17  ;;  %v9625_v23 = vcombine.high %v473_v18, %v489_v19  ;;  %v504_v24 = vld [vmem:[#allocation2 + $0xb00] sm:$0xff]  ;;  %v505_v26 = vld [vmem:[#allocation2 + $0xb08] sm:$0xff]  ;;  %v9622_v28 = vcombine.low %v472_v16, %v488_v17  ;;  %v203_v44 = vld [vmem:[#allocation2 + $0x198] sm:$0xff] }
  0xba   :  { %v520_v25 = vld [vmem:[#allocation2 + $0xb80] sm:$0xff]  ;;  %v521_v27 = vld [vmem:[#allocation2 + $0xb88] sm:$0xff]  ;;  %v9624_v29 = vcombine.low %v473_v18, %v489_v19  ;;  %v9306_v45 = vcombine.low %v154_v32, %v170_v33  ;;  %v9308_v47 = vcombine.low %v155_v34, %v171_v35  ;;  %v9341_v49 = vcombine.high %v187_v42, %v203_v44  ;;  %v282_v2 = vld [vmem:[#allocation2 + $0x410] sm:$0xff] }
  0xbb   :  { %v9655_v30 = vcombine.high %v504_v24, %v520_v25  ;;  %v9657_v31 = vcombine.high %v505_v26, %v521_v27  ;;  %v9654_v36 = vcombine.low %v504_v24, %v520_v25  ;;  %v9656_v37 = vcombine.low %v505_v26, %v521_v27  ;;  %v298_v3 = vld [vmem:[#allocation2 + $0x490] sm:$0xff]  ;;  %v347_v19 = vld [vmem:[#allocation2 + $0x618] sm:$0xff] }
  0xbc   :  { %2481 = vmatpush1.bf16.msra.mxu0 %v9462_v52  ;;  %2522 = vmatpush1.bf16.msra.mxu1 %v9464_v53  ;;  %v219_v52 = vld [vmem:[#allocation2 + $0x218] sm:$0xff]  ;;  %v9435_v8 = vcombine.high %v282_v2, %v298_v3  ;;  %v314_v10 = vld [vmem:[#allocation2 + $0x510] sm:$0xff] }
  0xbd   :  { %2482 = vmatprep.subr.bf16.mxu0 %v9495_v54  ;;  %2523 = vmatprep.subr.bf16.mxu1 %v9497_v55  ;;  %v235_v53 = vld [vmem:[#allocation2 + $0x298] sm:$0xff]  ;;  %v9338_v54 = vcombine.low %v186_v40, %v202_v41  ;;  %v9340_v55 = vcombine.low %v187_v42, %v203_v44  ;;  %v330_v11 = vld [vmem:[#allocation2 + $0x590] sm:$0xff] }
  0xbe   :  { %v9373_v57 = vcombine.high %v219_v52, %v235_v53  ;;  %v9467_v16 = vcombine.high %v314_v10, %v330_v11  ;;  %v346_v17 = vld [vmem:[#allocation2 + $0x610] sm:$0xff]  ;;  %v379_v27 = vld [vmem:[#allocation2 + $0x718] sm:$0xff] }
  0xbf   :  { %v362_v18 = vld [vmem:[#allocation2 + $0x690] sm:$0xff]  ;;  %v411_v35 = vld [vmem:[#allocation2 + $0x818] sm:$0xff] }
  0xc0   :  { %2483 = vmatpush1.bf16.msra.mxu0 %v9494_v60  ;;  %2524 = vmatpush1.bf16.msra.mxu1 %v9496_v61  ;;  %v251_v60 = vld [vmem:[#allocation2 + $0x318] sm:$0xff]  ;;  %v9499_v24 = vcombine.high %v346_v17, %v362_v18  ;;  %v378_v25 = vld [vmem:[#allocation2 + $0x710] sm:$0xff] }
  0xc1   :  { %2484 = vmatprep.subr.bf16.mxu0 %v9527_v62  ;;  %2525 = vmatprep.subr.bf16.mxu1 %v9529_v63  ;;  %v267_v61 = vld [vmem:[#allocation2 + $0x398] sm:$0xff]  ;;  %v9370_v62 = vcombine.low %v218_v50, %v234_v51  ;;  %v9372_v63 = vcombine.low %v219_v52, %v235_v53  ;;  %v394_v26 = vld [vmem:[#allocation2 + $0x790] sm:$0xff] }
  0xc2   :  { %v9405_v1 = vcombine.high %v251_v60, %v267_v61  ;;  %v9531_v32 = vcombine.high %v378_v25, %v394_v26  ;;  %v410_v33 = vld [vmem:[#allocation2 + $0x810] sm:$0xff]  ;;  %v443_v44 = vld [vmem:[#allocation2 + $0x918] sm:$0xff] }
  0xc3   :  { %v426_v34 = vld [vmem:[#allocation2 + $0x890] sm:$0xff]  ;;  %v475_v53 = vld [vmem:[#allocation2 + $0xa18] sm:$0xff] }
  0xc4   :  { %2485 = vmatpush1.bf16.msra.mxu0 %v9526_v4  ;;  %2526 = vmatpush1.bf16.msra.mxu1 %v9528_v5  ;;  %v283_v4 = vld [vmem:[#allocation2 + $0x418] sm:$0xff]  ;;  %v9563_v40 = vcombine.high %v410_v33, %v426_v34  ;;  %v442_v41 = vld [vmem:[#allocation2 + $0x910] sm:$0xff] }
  0xc5   :  { %2486 = vmatprep.subr.bf16.mxu0 %v9559_v6  ;;  %2527 = vmatprep.subr.bf16.mxu1 %v9561_v7  ;;  %v299_v5 = vld [vmem:[#allocation2 + $0x498] sm:$0xff]  ;;  %v9402_v6 = vcombine.low %v250_v58, %v266_v59  ;;  %v9404_v7 = vcombine.low %v251_v60, %v267_v61  ;;  %v458_v42 = vld [vmem:[#allocation2 + $0x990] sm:$0xff] }
  0xc6   :  { %v9437_v9 = vcombine.high %v283_v4, %v299_v5  ;;  %v9595_v50 = vcombine.high %v442_v41, %v458_v42  ;;  %v474_v51 = vld [vmem:[#allocation2 + $0xa10] sm:$0xff]  ;;  %v507_v61 = vld [vmem:[#allocation2 + $0xb18] sm:$0xff] }
  0xc7   :  { %v490_v52 = vld [vmem:[#allocation2 + $0xa90] sm:$0xff] }
  0xc8   :  { %2487 = vmatpush1.bf16.msra.mxu0 %v9558_v12  ;;  %2528 = vmatpush1.bf16.msra.mxu1 %v9560_v13  ;;  %v315_v12 = vld [vmem:[#allocation2 + $0x518] sm:$0xff]  ;;  %v9627_v58 = vcombine.high %v474_v51, %v490_v52  ;;  %v506_v59 = vld [vmem:[#allocation2 + $0xb10] sm:$0xff] }
  0xc9   :  { %2488 = vmatprep.subr.bf16.mxu0 %v9591_v14  ;;  %2529 = vmatprep.subr.bf16.mxu1 %v9593_v15  ;;  %v331_v13 = vld [vmem:[#allocation2 + $0x598] sm:$0xff]  ;;  %v9434_v14 = vcombine.low %v282_v2, %v298_v3  ;;  %v9436_v15 = vcombine.low %v283_v4, %v299_v5  ;;  %v522_v60 = vld [vmem:[#allocation2 + $0xb90] sm:$0xff]  ;;  %v156_v3 = vld [vmem:[#allocation2 + $0x20] sm:$0xff] }
  0xca   :  { %v9659_v2 = vcombine.high %v506_v59, %v522_v60  ;;  %v172_v4 = vld [vmem:[#allocation2 + $0xa0] sm:$0xff]  ;;  %v157_v5 = vld [vmem:[#allocation2 + $0x28] sm:$0xff] }
  0xcc   :  { %2489 = vmatpush1.bf16.msra.mxu0 %v9590_v20  ;;  %2530 = vmatpush1.bf16.msra.mxu1 %v9592_v21  ;;  %v9469_v20 = vcombine.high %v315_v12, %v331_v13  ;;  %v363_v21 = vld [vmem:[#allocation2 + $0x698] sm:$0xff] }
  0xcd   :  { %2490 = vmatprep.subr.bf16.mxu0 %v9623_v22  ;;  %2531 = vmatprep.subr.bf16.mxu1 %v9625_v23  ;;  %v9466_v22 = vcombine.low %v314_v10, %v330_v11  ;;  %v9468_v23 = vcombine.low %v315_v12, %v331_v13  ;;  %v9311_v10 = vcombine.high %v156_v3, %v172_v4  ;;  %v188_v11 = vld [vmem:[#allocation2 + $0x120] sm:$0xff]  ;;  %v189_v13 = vld [vmem:[#allocation2 + $0x128] sm:$0xff] }
  0xce   :  { %v204_v12 = vld [vmem:[#allocation2 + $0x1a0] sm:$0xff] }
  0xd0   :  { %2491 = vmatpush1.bf16.msra.mxu0 %v9622_v28  ;;  %2532 = vmatpush1.bf16.msra.mxu1 %v9624_v29  ;;  %v9501_v28 = vcombine.high %v347_v19, %v363_v21  ;;  %v395_v29 = vld [vmem:[#allocation2 + $0x798] sm:$0xff] }
  0xd1   :  { %2492 = vmatprep.subr.bf16.mxu0 %v9655_v30  ;;  %2533 = vmatprep.subr.bf16.mxu1 %v9657_v31  ;;  %v9498_v30 = vcombine.low %v346_v17, %v362_v18  ;;  %v9500_v31 = vcombine.low %v347_v19, %v363_v21  ;;  %v9343_v18 = vcombine.high %v188_v11, %v204_v12  ;;  %v220_v19 = vld [vmem:[#allocation2 + $0x220] sm:$0xff]  ;;  %v221_v21 = vld [vmem:[#allocation2 + $0x228] sm:$0xff] }
  0xd4   :  { %2493 = vmatpush1.bf16.msra.mxu0 %v9654_v36  ;;  %2534 = vmatpush1.bf16.msra.mxu1 %v9656_v37  ;;  %v9533_v36 = vcombine.high %v379_v27, %v395_v29  ;;  %v427_v37 = vld [vmem:[#allocation2 + $0x898] sm:$0xff] }
  0xd5   :  { %2552 = vmatprep.subr.bf16.mxu0 %v9307_v38  ;;  %2593 = vmatprep.subr.bf16.mxu1 %v9309_v39  ;;  %v9530_v38 = vcombine.low %v378_v25, %v394_v26  ;;  %v9532_v39 = vcombine.low %v379_v27, %v395_v29  ;;  %v252_v27 = vld [vmem:[#allocation2 + $0x320] sm:$0xff]  ;;  %v253_v29 = vld [vmem:[#allocation2 + $0x328] sm:$0xff] }
  0xd7   :  { %2503 = vmatmul.mubr.bf16.vlgmr.msra.gmra.mrb[0].mxu0 %v11529_v43  ;;  %2544 = vmatmul.mubr.bf16.vlgmr.msra.gmra.mrb[0].mxu1 %v11529_v43 }
  0xd8   :  { %2553 = vmatpush1.bf16.msra.mxu0 %v9306_v45  ;;  %2594 = vmatpush1.bf16.msra.mxu1 %v9308_v47  ;;  %v9565_v45 = vcombine.high %v411_v35, %v427_v37  ;;  %v459_v47 = vld [vmem:[#allocation2 + $0x998] sm:$0xff] }
  0xd9   :  { %2554 = vmatprep.subr.bf16.mxu0 %v9339_v48  ;;  %2595 = vmatprep.subr.bf16.mxu1 %v9341_v49  ;;  %v9562_v48 = vcombine.low %v410_v33, %v426_v34  ;;  %v9564_v49 = vcombine.low %v411_v35, %v427_v37  ;;  %v284_v34 = vld [vmem:[#allocation2 + $0x420] sm:$0xff] }
  0xda   :  { %9688 = vmatprep.mubr.msk.bf16.mxu0 %vm2466_vm0, %v11533_v46  ;;  %9689 = vmatprep.mubr.msk.bf16.mxu1 %vm2466_vm0, %v11533_v46  ;;  %v300_v35 = vld [vmem:[#allocation2 + $0x4a0] sm:$0xff] }
  0xdc   :  { %2555 = vmatpush1.bf16.msra.mxu0 %v9338_v54  ;;  %2596 = vmatpush1.bf16.msra.mxu1 %v9340_v55  ;;  %v9597_v54 = vcombine.high %v443_v44, %v459_v47  ;;  %v491_v55 = vld [vmem:[#allocation2 + $0xa98] sm:$0xff] }
  0xdd   :  { %2556 = vmatprep.subr.bf16.mxu0 %v9371_v56  ;;  %2597 = vmatprep.subr.bf16.mxu1 %v9373_v57  ;;  %v9594_v56 = vcombine.low %v442_v41, %v458_v42  ;;  %v9596_v57 = vcombine.low %v443_v44, %v459_v47  ;;  %v9439_v41 = vcombine.high %v284_v34, %v300_v35  ;;  %v316_v42 = vld [vmem:[#allocation2 + $0x520] sm:$0xff] }
  0xde   :  { %v332_v44 = vld [vmem:[#allocation2 + $0x5a0] sm:$0xff] }
  0xe0   :  { %2557 = vmatpush1.bf16.msra.mxu0 %v9370_v62  ;;  %2598 = vmatpush1.bf16.msra.mxu1 %v9372_v63  ;;  %v9629_v62 = vcombine.high %v475_v53, %v491_v55  ;;  %v523_v63 = vld [vmem:[#allocation2 + $0xb98] sm:$0xff] }
  0xe1   :  { %2558 = vmatprep.subr.bf16.mxu0 %v9403_v0  ;;  %2599 = vmatprep.subr.bf16.mxu1 %v9405_v1  ;;  %v9626_v0 = vcombine.low %v474_v51, %v490_v52  ;;  %v9628_v1 = vcombine.low %v475_v53, %v491_v55  ;;  %v9471_v51 = vcombine.high %v316_v42, %v332_v44  ;;  %v348_v52 = vld [vmem:[#allocation2 + $0x620] sm:$0xff] }
  0xe2   :  { %v364_v53 = vld [vmem:[#allocation2 + $0x6a0] sm:$0xff] }
  0xe4   :  { %2559 = vmatpush1.bf16.msra.mxu0 %v9402_v6  ;;  %2600 = vmatpush1.bf16.msra.mxu1 %v9404_v7  ;;  %v9661_v6 = vcombine.high %v507_v61, %v523_v63  ;;  %v173_v7 = vld [vmem:[#allocation2 + $0xa8] sm:$0xff] }
  0xe5   :  { %2560 = vmatprep.subr.bf16.mxu0 %v9435_v8  ;;  %2601 = vmatprep.subr.bf16.mxu1 %v9437_v9  ;;  %v9658_v8 = vcombine.low %v506_v59, %v522_v60  ;;  %v9660_v9 = vcombine.low %v507_v61, %v523_v63  ;;  %v9312_v17 = vcombine.low %v157_v5, %v173_v7  ;;  %v380_v60 = vld [vmem:[#allocation2 + $0x720] sm:$0xff] }
  0xe6   :  { %v9503_v59 = vcombine.high %v348_v52, %v364_v53  ;;  %v396_v61 = vld [vmem:[#allocation2 + $0x7a0] sm:$0xff] }
  0xe8   :  { %2561 = vmatpush1.bf16.msra.mxu0 %v9434_v14  ;;  %2602 = vmatpush1.bf16.msra.mxu1 %v9436_v15  ;;  %v9313_v14 = vcombine.high %v157_v5, %v173_v7  ;;  %v205_v15 = vld [vmem:[#allocation2 + $0x1a8] sm:$0xff]  ;;  %v428_v5 = vld [vmem:[#allocation2 + $0x8a0] sm:$0xff] }
  0xe9   :  { %2562 = vmatprep.subr.bf16.mxu0 %v9467_v16  ;;  %2603 = vmatprep.subr.bf16.mxu1 %v9469_v20  ;;  %v9310_v16 = vcombine.low %v156_v3, %v172_v4  ;;  %v236_v20 = vld [vmem:[#allocation2 + $0x2a0] sm:$0xff]  ;;  %v9344_v25 = vcombine.low %v189_v13, %v205_v15  ;;  %v9535_v3 = vcombine.high %v380_v60, %v396_v61 }
  0xea   :  { %v9375_v26 = vcombine.high %v220_v19, %v236_v20  ;;  %v412_v4 = vld [vmem:[#allocation2 + $0x820] sm:$0xff] }
  0xec   :  { %2563 = vmatpush1.bf16.msra.mxu0 %v9466_v22  ;;  %2604 = vmatpush1.bf16.msra.mxu1 %v9468_v23  ;;  %v9345_v22 = vcombine.high %v189_v13, %v205_v15  ;;  %v237_v23 = vld [vmem:[#allocation2 + $0x2a8] sm:$0xff]  ;;  %v460_v13 = vld [vmem:[#allocation2 + $0x9a0] sm:$0xff] }
  0xed   :  { %2564 = vmatprep.subr.bf16.mxu0 %v9499_v24  ;;  %2605 = vmatprep.subr.bf16.mxu1 %v9501_v28  ;;  %v9342_v24 = vcombine.low %v188_v11, %v204_v12  ;;  %v268_v28 = vld [vmem:[#allocation2 + $0x3a0] sm:$0xff]  ;;  %v9567_v11 = vcombine.high %v412_v4, %v428_v5 }
  0xee   :  { %v9407_v33 = vcombine.high %v252_v27, %v268_v28  ;;  %v444_v12 = vld [vmem:[#allocation2 + $0x920] sm:$0xff] }
  0xf0   :  { %2565 = vmatpush1.bf16.msra.mxu0 %v9498_v30  ;;  %2606 = vmatpush1.bf16.msra.mxu1 %v9500_v31  ;;  %v9377_v30 = vcombine.high %v221_v21, %v237_v23  ;;  %v269_v31 = vld [vmem:[#allocation2 + $0x3a8] sm:$0xff] }
  0xf1   :  { %2566 = vmatprep.subr.bf16.mxu0 %v9531_v32  ;;  %2607 = vmatprep.subr.bf16.mxu1 %v9533_v36  ;;  %v9376_v32 = vcombine.low %v221_v21, %v237_v23  ;;  %v285_v36 = vld [vmem:[#allocation2 + $0x428] sm:$0xff]  ;;  %v9409_v37 = vcombine.high %v253_v29, %v269_v31  ;;  %v492_v21 = vld [vmem:[#allocation2 + $0xaa0] sm:$0xff] }
  0xf4   :  { %2567 = vmatpush1.bf16.msra.mxu0 %v9530_v38  ;;  %2608 = vmatpush1.bf16.msra.mxu1 %v9532_v39  ;;  %v301_v38 = vld [vmem:[#allocation2 + $0x4a8] sm:$0xff]  ;;  %v9406_v39 = vcombine.low %v252_v27, %v268_v28  ;;  %v508_v28 = vld [vmem:[#allocation2 + $0xb20] sm:$0xff] }
  0xf5   :  { %2568 = vmatprep.subr.bf16.mxu0 %v9563_v40  ;;  %2609 = vmatprep.subr.bf16.mxu1 %v9565_v45  ;;  %v9408_v40 = vcombine.low %v253_v29, %v269_v31  ;;  %v317_v45 = vld [vmem:[#allocation2 + $0x528] sm:$0xff]  ;;  %v9441_v47 = vcombine.high %v285_v36, %v301_v38  ;;  %v524_v29 = vld [vmem:[#allocation2 + $0xba0] sm:$0xff] }
  0xf8   :  { %2569 = vmatpush1.bf16.msra.mxu0 %v9562_v48  ;;  %2610 = vmatpush1.bf16.msra.mxu1 %v9564_v49  ;;  %v333_v48 = vld [vmem:[#allocation2 + $0x5a8] sm:$0xff]  ;;  %v9438_v49 = vcombine.low %v284_v34, %v300_v35  ;;  %v9663_v34 = vcombine.high %v508_v28, %v524_v29  ;;  %v158_v35 = vld [vmem:[#allocation2 + $0x30] sm:$0xff] }
  0xf9   :  { %2570 = vmatprep.subr.bf16.mxu0 %v9595_v50  ;;  %2611 = vmatprep.subr.bf16.mxu1 %v9597_v54  ;;  %v9440_v50 = vcombine.low %v285_v36, %v301_v38  ;;  %v349_v54 = vld [vmem:[#allocation2 + $0x628] sm:$0xff]  ;;  %v9473_v55 = vcombine.high %v317_v45, %v333_v48  ;;  %v174_v36 = vld [vmem:[#allocation2 + $0xb0] sm:$0xff] }
  0xfc   :  { %2571 = vmatpush1.bf16.msra.mxu0 %v9594_v56  ;;  %2612 = vmatpush1.bf16.msra.mxu1 %v9596_v57  ;;  %v365_v56 = vld [vmem:[#allocation2 + $0x6a8] sm:$0xff]  ;;  %v9470_v57 = vcombine.low %v316_v42, %v332_v44  ;;  %v9315_v42 = vcombine.high %v158_v35, %v174_v36  ;;  %v190_v44 = vld [vmem:[#allocation2 + $0x130] sm:$0xff] }
  0xfd   :  { %2572 = vmatprep.subr.bf16.mxu0 %v9627_v58  ;;  %2613 = vmatprep.subr.bf16.mxu1 %v9629_v62  ;;  %v9472_v58 = vcombine.low %v317_v45, %v333_v48  ;;  %v381_v62 = vld [vmem:[#allocation2 + $0x728] sm:$0xff]  ;;  %v9505_v63 = vcombine.high %v349_v54, %v365_v56  ;;  %v206_v45 = vld [vmem:[#allocation2 + $0x1b0] sm:$0xff] }
 0x100   :  { %2573 = vmatpush1.bf16.msra.mxu0 %v9626_v0  ;;  %2614 = vmatpush1.bf16.msra.mxu1 %v9628_v1  ;;  %v397_v0 = vld [vmem:[#allocation2 + $0x7a8] sm:$0xff]  ;;  %v9502_v1 = vcombine.low %v348_v52, %v364_v53  ;;  %v9347_v52 = vcombine.high %v190_v44, %v206_v45  ;;  %v222_v53 = vld [vmem:[#allocation2 + $0x230] sm:$0xff] }
 0x101   :  { %2574 = vmatprep.subr.bf16.mxu0 %v9659_v2  ;;  %2615 = vmatprep.subr.bf16.mxu1 %v9661_v6  ;;  %v9504_v2 = vcombine.low %v349_v54, %v365_v56  ;;  %v413_v6 = vld [vmem:[#allocation2 + $0x828] sm:$0xff]  ;;  %v9537_v7 = vcombine.high %v381_v62, %v397_v0  ;;  %v238_v54 = vld [vmem:[#allocation2 + $0x2b0] sm:$0xff] }
 0x104   :  { %2575 = vmatpush1.bf16.msra.mxu0 %v9658_v8  ;;  %2616 = vmatpush1.bf16.msra.mxu1 %v9660_v9  ;;  %v429_v8 = vld [vmem:[#allocation2 + $0x8a8] sm:$0xff]  ;;  %v9534_v9 = vcombine.low %v380_v60, %v396_v61  ;;  %v9379_v61 = vcombine.high %v222_v53, %v238_v54 }
 0x105   :  { %2634 = vmatprep.subr.bf16.mxu0 %v9311_v10  ;;  %2675 = vmatprep.subr.bf16.mxu1 %v9313_v14  ;;  %v9536_v10 = vcombine.low %v381_v62, %v397_v0  ;;  %v445_v14 = vld [vmem:[#allocation2 + $0x928] sm:$0xff]  ;;  %v9569_v15 = vcombine.high %v413_v6, %v429_v8  ;;  %v254_v62 = vld [vmem:[#allocation2 + $0x330] sm:$0xff]  ;;  %v255_v0 = vld [vmem:[#allocation2 + $0x338] sm:$0xff] }
 0x107   :  { %2585 = vmatmul.mubr.bf16.vlgmr.msra.gmra.mrb[4].mxu0 %v11529_v43  ;;  %2626 = vmatmul.mubr.bf16.vlgmr.msra.gmra.mrb[4].mxu1 %v11529_v43  ;;  %v9374_v43 = vcombine.low %v220_v19, %v236_v20  ;;  %v9599_v19 = vcombine.high %v444_v12, %v460_v13  ;;  %v476_v20 = vld [vmem:[#allocation2 + $0xa20] sm:$0xff] }
 0x108   :  { %2635 = vmatpush1.bf16.msra.mxu0 %v9310_v16  ;;  %2676 = vmatpush1.bf16.msra.mxu1 %v9312_v17  ;;  %v461_v16 = vld [vmem:[#allocation2 + $0x9a8] sm:$0xff]  ;;  %v9566_v17 = vcombine.low %v412_v4, %v428_v5  ;;  %v9631_v27 = vcombine.high %v476_v20, %v492_v21 }
 0x109   :  { %2636 = vmatprep.subr.bf16.mxu0 %v9343_v18  ;;  %2677 = vmatprep.subr.bf16.mxu1 %v9345_v22  ;;  %v9568_v18 = vcombine.low %v413_v6, %v429_v8  ;;  %v477_v22 = vld [vmem:[#allocation2 + $0xa28] sm:$0xff]  ;;  %v9601_v23 = vcombine.high %v445_v14, %v461_v16  ;;  %v286_v6 = vld [vmem:[#allocation2 + $0x430] sm:$0xff]  ;;  %v287_v8 = vld [vmem:[#allocation2 + $0x438] sm:$0xff] }
 0x10a   :  { %9690 = vmatprep.mubr.msk.bf16.mxu0 %vm2466_vm0, %v11533_v46  ;;  %9691 = vmatprep.mubr.msk.bf16.mxu1 %vm2466_vm0, %v11533_v46 }
 0x10c   :  { %2637 = vmatpush1.bf16.msra.mxu0 %v9342_v24  ;;  %2678 = vmatpush1.bf16.msra.mxu1 %v9344_v25  ;;  %v493_v24 = vld [vmem:[#allocation2 + $0xaa8] sm:$0xff]  ;;  %v9598_v25 = vcombine.low %v444_v12, %v460_v13 }
 0x10d   :  { %2638 = vmatprep.subr.bf16.mxu0 %v9375_v26  ;;  %2679 = vmatprep.subr.bf16.mxu1 %v9377_v30  ;;  %v9600_v26 = vcombine.low %v445_v14, %v461_v16  ;;  %v509_v30 = vld [vmem:[#allocation2 + $0xb28] sm:$0xff]  ;;  %v9633_v31 = vcombine.high %v477_v22, %v493_v24  ;;  %v318_v14 = vld [vmem:[#allocation2 + $0x530] sm:$0xff]  ;;  %v319_v16 = vld [vmem:[#allocation2 + $0x538] sm:$0xff] }
 0x110   :  { %2639 = vmatpush1.bf16.msra.mxu0 %v9374_v43  ;;  %2680 = vmatpush1.bf16.msra.mxu1 %v9376_v32  ;;  %v525_v43 = vld [vmem:[#allocation2 + $0xba8] sm:$0xff]  ;;  %v9630_v32 = vcombine.low %v476_v20, %v492_v21 }
 0x111   :  { %2640 = vmatprep.subr.bf16.mxu0 %v9407_v33  ;;  %2681 = vmatprep.subr.bf16.mxu1 %v9409_v37  ;;  %v9632_v33 = vcombine.low %v477_v22, %v493_v24  ;;  %v159_v37 = vld [vmem:[#allocation2 + $0x38] sm:$0xff]  ;;  %v9665_v38 = vcombine.high %v509_v30, %v525_v43  ;;  %v350_v22 = vld [vmem:[#allocation2 + $0x630] sm:$0xff] }
 0x112   :  { %v351_v24 = vld [vmem:[#allocation2 + $0x638] sm:$0xff] }
 0x114   :  { %2641 = vmatpush1.bf16.msra.mxu0 %v9406_v39  ;;  %2682 = vmatpush1.bf16.msra.mxu1 %v9408_v40  ;;  %v175_v39 = vld [vmem:[#allocation2 + $0xb8] sm:$0xff]  ;;  %v9662_v40 = vcombine.low %v508_v28, %v524_v29 }
 0x115   :  { %2642 = vmatprep.subr.bf16.mxu0 %v9439_v41  ;;  %2683 = vmatprep.subr.bf16.mxu1 %v9441_v47  ;;  %v9664_v41 = vcombine.low %v509_v30, %v525_v43  ;;  %v191_v47 = vld [vmem:[#allocation2 + $0x138] sm:$0xff]  ;;  %v9317_v48 = vcombine.high %v159_v37, %v175_v39  ;;  %v382_v30 = vld [vmem:[#allocation2 + $0x730] sm:$0xff] }
 0x116   :  { %v383_v43 = vld [vmem:[#allocation2 + $0x738] sm:$0xff] }
 0x118   :  { %2643 = vmatpush1.bf16.msra.mxu0 %v9438_v49  ;;  %2684 = vmatpush1.bf16.msra.mxu1 %v9440_v50  ;;  %v207_v49 = vld [vmem:[#allocation2 + $0x1b8] sm:$0xff]  ;;  %v9314_v50 = vcombine.low %v158_v35, %v174_v36 }
 0x119   :  { %2644 = vmatprep.subr.bf16.mxu0 %v9471_v51  ;;  %2685 = vmatprep.subr.bf16.mxu1 %v9473_v55  ;;  %v9316_v51 = vcombine.low %v159_v37, %v175_v39  ;;  %v223_v55 = vld [vmem:[#allocation2 + $0x238] sm:$0xff]  ;;  %v9349_v56 = vcombine.high %v191_v47, %v207_v49  ;;  %v9348_v60 = vcombine.low %v191_v47, %v207_v49  ;;  %v414_v37 = vld [vmem:[#allocation2 + $0x830] sm:$0xff] }
 0x11a   :  { %v415_v39 = vld [vmem:[#allocation2 + $0x838] sm:$0xff]  ;;  %v446_v47 = vld [vmem:[#allocation2 + $0x930] sm:$0xff] }
 0x11b   :  { %v447_v49 = vld [vmem:[#allocation2 + $0x938] sm:$0xff] }
 0x11c   :  { %2645 = vmatpush1.bf16.msra.mxu0 %v9470_v57  ;;  %2686 = vmatpush1.bf16.msra.mxu1 %v9472_v58  ;;  %v239_v57 = vld [vmem:[#allocation2 + $0x2b8] sm:$0xff]  ;;  %v11554_v58 = vld.sshfl [vmem:[%s12049_s0] sm:$0x33 pattern:$0x76325410] }
 0x11d   :  { %2646 = vmatprep.subr.bf16.mxu0 %v9503_v59  ;;  %2687 = vmatprep.subr.bf16.mxu1 %v9505_v63  ;;  %v9346_v59 = vcombine.low %v190_v44, %v206_v45  ;;  %v270_v63 = vld [vmem:[#allocation2 + $0x3b0] sm:$0xff]  ;;  %v9380_v4 = vcombine.low %v223_v55, %v239_v57 }
 0x11e   :  { %v9411_v5 = vcombine.high %v254_v62, %v270_v63 }
 0x120   :  { %2647 = vmatpush1.bf16.msra.mxu0 %v9502_v1  ;;  %2688 = vmatpush1.bf16.msra.mxu1 %v9504_v2  ;;  %v9381_v1 = vcombine.high %v223_v55, %v239_v57  ;;  %v271_v2 = vld [vmem:[#allocation2 + $0x3b8] sm:$0xff]  ;;  %v478_v55 = vld [vmem:[#allocation2 + $0xa30] sm:$0xff] }
 0x121   :  { %2648 = vmatprep.subr.bf16.mxu0 %v9535_v3  ;;  %2689 = vmatprep.subr.bf16.mxu1 %v9537_v7  ;;  %v9378_v3 = vcombine.low %v222_v53, %v238_v54  ;;  %v302_v7 = vld [vmem:[#allocation2 + $0x4b0] sm:$0xff]  ;;  %v9412_v12 = vcombine.low %v255_v0, %v271_v2  ;;  %v479_v57 = vld [vmem:[#allocation2 + $0xa38] sm:$0xff] }
 0x122   :  { %v9443_v13 = vcombine.high %v286_v6, %v302_v7 }
 0x124   :  { %2649 = vmatpush1.bf16.msra.mxu0 %v9534_v9  ;;  %2690 = vmatpush1.bf16.msra.mxu1 %v9536_v10  ;;  %v9413_v9 = vcombine.high %v255_v0, %v271_v2  ;;  %v303_v10 = vld [vmem:[#allocation2 + $0x4b8] sm:$0xff]  ;;  %v510_v0 = vld [vmem:[#allocation2 + $0xb30] sm:$0xff] }
 0x125   :  { %2650 = vmatprep.subr.bf16.mxu0 %v9567_v11  ;;  %2691 = vmatprep.subr.bf16.mxu1 %v9569_v15  ;;  %v9410_v11 = vcombine.low %v254_v62, %v270_v63  ;;  %v334_v15 = vld [vmem:[#allocation2 + $0x5b0] sm:$0xff]  ;;  %v9444_v20 = vcombine.low %v287_v8, %v303_v10  ;;  %v511_v2 = vld [vmem:[#allocation2 + $0xb38] sm:$0xff] }
 0x126   :  { %v9475_v21 = vcombine.high %v318_v14, %v334_v15 }
 0x128   :  { %2651 = vmatpush1.bf16.msra.mxu0 %v9566_v17  ;;  %2692 = vmatpush1.bf16.msra.mxu1 %v9568_v18  ;;  %v9445_v17 = vcombine.high %v287_v8, %v303_v10  ;;  %v335_v18 = vld [vmem:[#allocation2 + $0x5b8] sm:$0xff]  ;;  %v160_v8 = vld [vmem:[#allocation2 + $0x40] sm:$0xff]  ;;  %v161_v10 = vld [vmem:[#allocation2 + $0x48] sm:$0xff] }
 0x129   :  { %2652 = vmatprep.subr.bf16.mxu0 %v9599_v19  ;;  %2693 = vmatprep.subr.bf16.mxu1 %v9601_v23  ;;  %v9442_v19 = vcombine.low %v286_v6, %v302_v7  ;;  %v366_v23 = vld [vmem:[#allocation2 + $0x6b0] sm:$0xff]  ;;  %v9476_v28 = vcombine.low %v319_v16, %v335_v18 }
 0x12a   :  { %v9507_v29 = vcombine.high %v350_v22, %v366_v23 }
 0x12c   :  { %2653 = vmatpush1.bf16.msra.mxu0 %v9598_v25  ;;  %2694 = vmatpush1.bf16.msra.mxu1 %v9600_v26  ;;  %v9477_v25 = vcombine.high %v319_v16, %v335_v18  ;;  %v367_v26 = vld [vmem:[#allocation2 + $0x6b8] sm:$0xff]  ;;  %v192_v16 = vld [vmem:[#allocation2 + $0x140] sm:$0xff]  ;;  %v193_v18 = vld [vmem:[#allocation2 + $0x148] sm:$0xff] }
 0x12d   :  { %2654 = vmatprep.subr.bf16.mxu0 %v9631_v27  ;;  %2695 = vmatprep.subr.bf16.mxu1 %v9633_v31  ;;  %v9474_v27 = vcombine.low %v318_v14, %v334_v15  ;;  %v398_v31 = vld [vmem:[#allocation2 + $0x7b0] sm:$0xff]  ;;  %v9508_v35 = vcombine.low %v351_v24, %v367_v26 }
 0x12e   :  { %v9539_v36 = vcombine.high %v382_v30, %v398_v31 }
 0x130   :  { %2655 = vmatpush1.bf16.msra.mxu0 %v9630_v32  ;;  %2696 = vmatpush1.bf16.msra.mxu1 %v9632_v33  ;;  %v9509_v32 = vcombine.high %v351_v24, %v367_v26  ;;  %v399_v33 = vld [vmem:[#allocation2 + $0x7b8] sm:$0xff]  ;;  %v224_v24 = vld [vmem:[#allocation2 + $0x240] sm:$0xff]  ;;  %v225_v26 = vld [vmem:[#allocation2 + $0x248] sm:$0xff] }
 0x131   :  { %2656 = vmatprep.subr.bf16.mxu0 %v9663_v34  ;;  %2697 = vmatprep.subr.bf16.mxu1 %v9665_v38  ;;  %v9506_v34 = vcombine.low %v350_v22, %v366_v23  ;;  %v430_v38 = vld [vmem:[#allocation2 + $0x8b0] sm:$0xff]  ;;  %v9540_v44 = vcombine.low %v383_v43, %v399_v33 }
 0x132   :  { %v9571_v45 = vcombine.high %v414_v37, %v430_v38 }
 0x134   :  { %2657 = vmatpush1.bf16.msra.mxu0 %v9662_v40  ;;  %2698 = vmatpush1.bf16.msra.mxu1 %v9664_v41  ;;  %v9541_v40 = vcombine.high %v383_v43, %v399_v33  ;;  %v431_v41 = vld [vmem:[#allocation2 + $0x8b8] sm:$0xff]  ;;  %v256_v43 = vld [vmem:[#allocation2 + $0x340] sm:$0xff]  ;;  %v257_v33 = vld [vmem:[#allocation2 + $0x348] sm:$0xff] }
 0x135   :  { %2716 = vmatprep.subr.bf16.mxu0 %v9315_v42  ;;  %2757 = vmatprep.subr.bf16.mxu1 %v9317_v48  ;;  %v9538_v42 = vcombine.low %v382_v30, %v398_v31  ;;  %v462_v48 = vld [vmem:[#allocation2 + $0x9b0] sm:$0xff]  ;;  %v9572_v53 = vcombine.low %v415_v39, %v431_v41 }
 0x136   :  { %v9603_v54 = vcombine.high %v446_v47, %v462_v48 }
 0x137   :  { %2667 = vmatmul.mubr.bf16.vlgmr.msra.gmra.mrb[8].mxu0 %v11554_v58  ;;  %2708 = vmatmul.mubr.bf16.vlgmr.msra.gmra.mrb[8].mxu1 %v11554_v58 }
 0x138   :  { %2717 = vmatpush1.bf16.msra.mxu0 %v9314_v50  ;;  %2758 = vmatpush1.bf16.msra.mxu1 %v9316_v51  ;;  %v9573_v50 = vcombine.high %v415_v39, %v431_v41  ;;  %v463_v51 = vld [vmem:[#allocation2 + $0x9b8] sm:$0xff]  ;;  %v288_v39 = vld [vmem:[#allocation2 + $0x440] sm:$0xff]  ;;  %v289_v41 = vld [vmem:[#allocation2 + $0x448] sm:$0xff] }
 0x139   :  { %2718 = vmatprep.subr.bf16.mxu0 %v9347_v52  ;;  %2759 = vmatprep.subr.bf16.mxu1 %v9349_v56  ;;  %v9570_v52 = vcombine.low %v414_v37, %v430_v38  ;;  %v494_v56 = vld [vmem:[#allocation2 + $0xab0] sm:$0xff]  ;;  %v9604_v62 = vcombine.low %v447_v49, %v463_v51 }
 0x13a   :  { %9692 = vmatprep.mubr.msk.bf16.mxu0 %vm2466_vm0, %v11533_v46  ;;  %9693 = vmatprep.mubr.msk.bf16.mxu1 %vm2466_vm0, %v11533_v46  ;;  %v9635_v63 = vcombine.high %v478_v55, %v494_v56 }
 0x13c   :  { %2719 = vmatpush1.bf16.msra.mxu0 %v9346_v59  ;;  %2760 = vmatpush1.bf16.msra.mxu1 %v9348_v60  ;;  %v9605_v59 = vcombine.high %v447_v49, %v463_v51  ;;  %v495_v60 = vld [vmem:[#allocation2 + $0xab8] sm:$0xff]  ;;  %v320_v49 = vld [vmem:[#allocation2 + $0x540] sm:$0xff]  ;;  %v321_v51 = vld [vmem:[#allocation2 + $0x548] sm:$0xff] }
 0x13d   :  { %2720 = vmatprep.subr.bf16.mxu0 %v9379_v61  ;;  %2761 = vmatprep.subr.bf16.mxu1 %v9381_v1  ;;  %v9602_v61 = vcombine.low %v446_v47, %v462_v48  ;;  %v526_v1 = vld [vmem:[#allocation2 + $0xbb0] sm:$0xff]  ;;  %v9636_v6 = vcombine.low %v479_v57, %v495_v60 }
 0x13e   :  { %v9667_v7 = vcombine.high %v510_v0, %v526_v1 }
 0x140   :  { %2721 = vmatpush1.bf16.msra.mxu0 %v9378_v3  ;;  %2762 = vmatpush1.bf16.msra.mxu1 %v9380_v4  ;;  %v9637_v3 = vcombine.high %v479_v57, %v495_v60  ;;  %v527_v4 = vld [vmem:[#allocation2 + $0xbb8] sm:$0xff]  ;;  %v352_v57 = vld [vmem:[#allocation2 + $0x640] sm:$0xff]  ;;  %v353_v60 = vld [vmem:[#allocation2 + $0x648] sm:$0xff] }
 0x141   :  { %2722 = vmatprep.subr.bf16.mxu0 %v9411_v5  ;;  %2763 = vmatprep.subr.bf16.mxu1 %v9413_v9  ;;  %v9634_v5 = vcombine.low %v478_v55, %v494_v56  ;;  %v176_v9 = vld [vmem:[#allocation2 + $0xc0] sm:$0xff]  ;;  %v9668_v14 = vcombine.low %v511_v2, %v527_v4 }
 0x142   :  { %v9319_v15 = vcombine.high %v160_v8, %v176_v9 }
 0x144   :  { %2723 = vmatpush1.bf16.msra.mxu0 %v9410_v11  ;;  %2764 = vmatpush1.bf16.msra.mxu1 %v9412_v12  ;;  %v9669_v11 = vcombine.high %v511_v2, %v527_v4  ;;  %v177_v12 = vld [vmem:[#allocation2 + $0xc8] sm:$0xff]  ;;  %v384_v2 = vld [vmem:[#allocation2 + $0x740] sm:$0xff] }
 0x145   :  { %2724 = vmatprep.subr.bf16.mxu0 %v9443_v13  ;;  %2765 = vmatprep.subr.bf16.mxu1 %v9445_v17  ;;  %v9666_v13 = vcombine.low %v510_v0, %v526_v1  ;;  %v208_v17 = vld [vmem:[#allocation2 + $0x1c0] sm:$0xff]  ;;  %v9320_v22 = vcombine.low %v161_v10, %v177_v12  ;;  %v385_v4 = vld [vmem:[#allocation2 + $0x748] sm:$0xff] }
 0x146   :  { %v9351_v23 = vcombine.high %v192_v16, %v208_v17 }
 0x148   :  { %2725 = vmatpush1.bf16.msra.mxu0 %v9442_v19  ;;  %2766 = vmatpush1.bf16.msra.mxu1 %v9444_v20  ;;  %v9321_v19 = vcombine.high %v161_v10, %v177_v12  ;;  %v209_v20 = vld [vmem:[#allocation2 + $0x1c8] sm:$0xff]  ;;  %v416_v10 = vld [vmem:[#allocation2 + $0x840] sm:$0xff] }
 0x149   :  { %2726 = vmatprep.subr.bf16.mxu0 %v9475_v21  ;;  %2767 = vmatprep.subr.bf16.mxu1 %v9477_v25  ;;  %v9318_v21 = vcombine.low %v160_v8, %v176_v9  ;;  %v240_v25 = vld [vmem:[#allocation2 + $0x2c0] sm:$0xff]  ;;  %v9352_v30 = vcombine.low %v193_v18, %v209_v20  ;;  %v417_v12 = vld [vmem:[#allocation2 + $0x848] sm:$0xff] }
 0x14a   :  { %v9383_v31 = vcombine.high %v224_v24, %v240_v25 }
 0x14c   :  { %2727 = vmatpush1.bf16.msra.mxu0 %v9474_v27  ;;  %2768 = vmatpush1.bf16.msra.mxu1 %v9476_v28  ;;  %v9353_v27 = vcombine.high %v193_v18, %v209_v20  ;;  %v241_v28 = vld [vmem:[#allocation2 + $0x2c8] sm:$0xff]  ;;  %v448_v18 = vld [vmem:[#allocation2 + $0x940] sm:$0xff] }
 0x14d   :  { %2728 = vmatprep.subr.bf16.mxu0 %v9507_v29  ;;  %2769 = vmatprep.subr.bf16.mxu1 %v9509_v32  ;;  %v9350_v29 = vcombine.low %v192_v16, %v208_v17  ;;  %v272_v32 = vld [vmem:[#allocation2 + $0x3c0] sm:$0xff]  ;;  %v9384_v37 = vcombine.low %v225_v26, %v241_v28  ;;  %v449_v20 = vld [vmem:[#allocation2 + $0x948] sm:$0xff] }
 0x14e   :  { %v9415_v38 = vcombine.high %v256_v43, %v272_v32 }
 0x150   :  { %2729 = vmatpush1.bf16.msra.mxu0 %v9506_v34  ;;  %2770 = vmatpush1.bf16.msra.mxu1 %v9508_v35  ;;  %v9385_v34 = vcombine.high %v225_v26, %v241_v28  ;;  %v273_v35 = vld [vmem:[#allocation2 + $0x3c8] sm:$0xff]  ;;  %v480_v26 = vld [vmem:[#allocation2 + $0xa40] sm:$0xff] }
 0x151   :  { %2730 = vmatprep.subr.bf16.mxu0 %v9539_v36  ;;  %2771 = vmatprep.subr.bf16.mxu1 %v9541_v40  ;;  %v9382_v36 = vcombine.low %v224_v24, %v240_v25  ;;  %v304_v40 = vld [vmem:[#allocation2 + $0x4c0] sm:$0xff]  ;;  %v9416_v47 = vcombine.low %v257_v33, %v273_v35  ;;  %v481_v28 = vld [vmem:[#allocation2 + $0xa48] sm:$0xff] }
 0x152   :  { %v9447_v48 = vcombine.high %v288_v39, %v304_v40 }
 0x154   :  { %2731 = vmatpush1.bf16.msra.mxu0 %v9538_v42  ;;  %2772 = vmatpush1.bf16.msra.mxu1 %v9540_v44  ;;  %v9417_v42 = vcombine.high %v257_v33, %v273_v35  ;;  %v305_v44 = vld [vmem:[#allocation2 + $0x4c8] sm:$0xff]  ;;  %v512_v33 = vld [vmem:[#allocation2 + $0xb40] sm:$0xff] }
 0x155   :  { %2732 = vmatprep.subr.bf16.mxu0 %v9571_v45  ;;  %2773 = vmatprep.subr.bf16.mxu1 %v9573_v50  ;;  %v9414_v45 = vcombine.low %v256_v43, %v272_v32  ;;  %v336_v50 = vld [vmem:[#allocation2 + $0x5c0] sm:$0xff]  ;;  %v9448_v55 = vcombine.low %v289_v41, %v305_v44  ;;  %v513_v35 = vld [vmem:[#allocation2 + $0xb48] sm:$0xff] }
 0x156   :  { %v9479_v56 = vcombine.high %v320_v49, %v336_v50 }
 0x158   :  { %2733 = vmatpush1.bf16.msra.mxu0 %v9570_v52  ;;  %2774 = vmatpush1.bf16.msra.mxu1 %v9572_v53  ;;  %v9449_v52 = vcombine.high %v289_v41, %v305_v44  ;;  %v337_v53 = vld [vmem:[#allocation2 + $0x5c8] sm:$0xff]  ;;  %v162_v41 = vld [vmem:[#allocation2 + $0x50] sm:$0xff]  ;;  %v163_v44 = vld [vmem:[#allocation2 + $0x58] sm:$0xff] }
 0x159   :  { %2734 = vmatprep.subr.bf16.mxu0 %v9603_v54  ;;  %2775 = vmatprep.subr.bf16.mxu1 %v9605_v59  ;;  %v9446_v54 = vcombine.low %v288_v39, %v304_v40  ;;  %v368_v59 = vld [vmem:[#allocation2 + $0x6c0] sm:$0xff]  ;;  %v9480_v0 = vcombine.low %v321_v51, %v337_v53 }
 0x15a   :  { %v9511_v1 = vcombine.high %v352_v57, %v368_v59 }
 0x15c   :  { %2735 = vmatpush1.bf16.msra.mxu0 %v9602_v61  ;;  %2776 = vmatpush1.bf16.msra.mxu1 %v9604_v62  ;;  %v9481_v61 = vcombine.high %v321_v51, %v337_v53  ;;  %v369_v62 = vld [vmem:[#allocation2 + $0x6c8] sm:$0xff]  ;;  %v194_v51 = vld [vmem:[#allocation2 + $0x150] sm:$0xff]  ;;  %v195_v53 = vld [vmem:[#allocation2 + $0x158] sm:$0xff] }
 0x15d   :  { %2736 = vmatprep.subr.bf16.mxu0 %v9635_v63  ;;  %2777 = vmatprep.subr.bf16.mxu1 %v9637_v3  ;;  %v9478_v63 = vcombine.low %v320_v49, %v336_v50  ;;  %v400_v3 = vld [vmem:[#allocation2 + $0x7c0] sm:$0xff]  ;;  %v9512_v8 = vcombine.low %v353_v60, %v369_v62 }
 0x15e   :  { %v9543_v9 = vcombine.high %v384_v2, %v400_v3 }
 0x160   :  { %2737 = vmatpush1.bf16.msra.mxu0 %v9634_v5  ;;  %2778 = vmatpush1.bf16.msra.mxu1 %v9636_v6  ;;  %v9513_v5 = vcombine.high %v353_v60, %v369_v62  ;;  %v401_v6 = vld [vmem:[#allocation2 + $0x7c8] sm:$0xff]  ;;  %v226_v60 = vld [vmem:[#allocation2 + $0x250] sm:$0xff]  ;;  %v227_v62 = vld [vmem:[#allocation2 + $0x258] sm:$0xff] }
 0x161   :  { %2738 = vmatprep.subr.bf16.mxu0 %v9667_v7  ;;  %2779 = vmatprep.subr.bf16.mxu1 %v9669_v11  ;;  %v9510_v7 = vcombine.low %v352_v57, %v368_v59  ;;  %v432_v11 = vld [vmem:[#allocation2 + $0x8c0] sm:$0xff]  ;;  %v9544_v16 = vcombine.low %v385_v4, %v401_v6 }
 0x162   :  { %v9575_v17 = vcombine.high %v416_v10, %v432_v11 }
 0x164   :  { %2739 = vmatpush1.bf16.msra.mxu0 %v9666_v13  ;;  %2780 = vmatpush1.bf16.msra.mxu1 %v9668_v14  ;;  %v9545_v13 = vcombine.high %v385_v4, %v401_v6  ;;  %v433_v14 = vld [vmem:[#allocation2 + $0x8c8] sm:$0xff]  ;;  %v258_v4 = vld [vmem:[#allocation2 + $0x350] sm:$0xff]  ;;  %v259_v6 = vld [vmem:[#allocation2 + $0x358] sm:$0xff] }
 0x165   :  { %2798 = vmatprep.subr.bf16.mxu0 %v9319_v15  ;;  %2839 = vmatprep.subr.bf16.mxu1 %v9321_v19  ;;  %v9542_v15 = vcombine.low %v384_v2, %v400_v3  ;;  %v464_v19 = vld [vmem:[#allocation2 + $0x9c0] sm:$0xff]  ;;  %v9576_v24 = vcombine.low %v417_v12, %v433_v14 }
 0x166   :  { %v9607_v25 = vcombine.high %v448_v18, %v464_v19 }
 0x167   :  { %2749 = vmatmul.mubr.bf16.vlgmr.msra.gmra.mrb[12].mxu0 %v11554_v58  ;;  %2790 = vmatmul.mubr.bf16.vlgmr.msra.gmra.mrb[12].mxu1 %v11554_v58 }
 0x168   :  { %2799 = vmatpush1.bf16.msra.mxu0 %v9318_v21  ;;  %2840 = vmatpush1.bf16.msra.mxu1 %v9320_v22  ;;  %v9577_v21 = vcombine.high %v417_v12, %v433_v14  ;;  %v465_v22 = vld [vmem:[#allocation2 + $0x9c8] sm:$0xff]  ;;  %v306_v12 = vld [vmem:[#allocation2 + $0x4d0] sm:$0xff] }
 0x169   :  { %2800 = vmatprep.subr.bf16.mxu0 %v9351_v23  ;;  %2841 = vmatprep.subr.bf16.mxu1 %v9353_v27  ;;  %v9574_v23 = vcombine.low %v416_v10, %v432_v11  ;;  %v496_v27 = vld [vmem:[#allocation2 + $0xac0] sm:$0xff]  ;;  %v9608_v43 = vcombine.low %v449_v20, %v465_v22  ;;  %v290_v11 = vld [vmem:[#allocation2 + $0x450] sm:$0xff] }
 0x16a   :  { %9694 = vmatprep.mubr.msk.bf16.mxu0 %vm2466_vm0, %v11533_v46  ;;  %9695 = vmatprep.mubr.msk.bf16.mxu1 %vm2466_vm0, %v11533_v46  ;;  %v9639_v32 = vcombine.high %v480_v26, %v496_v27 }
 0x16c   :  { %2801 = vmatpush1.bf16.msra.mxu0 %v9350_v29  ;;  %2842 = vmatpush1.bf16.msra.mxu1 %v9352_v30  ;;  %v9609_v29 = vcombine.high %v449_v20, %v465_v22  ;;  %v497_v30 = vld [vmem:[#allocation2 + $0xac8] sm:$0xff]  ;;  %v338_v20 = vld [vmem:[#allocation2 + $0x5d0] sm:$0xff] }
 0x16d   :  { %2802 = vmatprep.subr.bf16.mxu0 %v9383_v31  ;;  %2843 = vmatprep.subr.bf16.mxu1 %v9385_v34  ;;  %v9606_v31 = vcombine.low %v448_v18, %v464_v19  ;;  %v528_v34 = vld [vmem:[#allocation2 + $0xbc0] sm:$0xff]  ;;  %v9640_v39 = vcombine.low %v481_v28, %v497_v30  ;;  %v9451_v18 = vcombine.high %v290_v11, %v306_v12  ;;  %v322_v19 = vld [vmem:[#allocation2 + $0x550] sm:$0xff] }
 0x16e   :  { %v9671_v40 = vcombine.high %v512_v33, %v528_v34 }
 0x170   :  { %2803 = vmatpush1.bf16.msra.mxu0 %v9382_v36  ;;  %2844 = vmatpush1.bf16.msra.mxu1 %v9384_v37  ;;  %v9641_v36 = vcombine.high %v481_v28, %v497_v30  ;;  %v529_v37 = vld [vmem:[#allocation2 + $0xbc8] sm:$0xff]  ;;  %v370_v28 = vld [vmem:[#allocation2 + $0x6d0] sm:$0xff] }
 0x171   :  { %2804 = vmatprep.subr.bf16.mxu0 %v9415_v38  ;;  %2845 = vmatprep.subr.bf16.mxu1 %v9417_v42  ;;  %v9638_v38 = vcombine.low %v480_v26, %v496_v27  ;;  %v178_v42 = vld [vmem:[#allocation2 + $0xd0] sm:$0xff]  ;;  %v9672_v49 = vcombine.low %v513_v35, %v529_v37  ;;  %v9483_v26 = vcombine.high %v322_v19, %v338_v20 }
 0x172   :  { %v9323_v50 = vcombine.high %v162_v41, %v178_v42  ;;  %v354_v27 = vld [vmem:[#allocation2 + $0x650] sm:$0xff] }
 0x174   :  { %2805 = vmatpush1.bf16.msra.mxu0 %v9414_v45  ;;  %2846 = vmatpush1.bf16.msra.mxu1 %v9416_v47  ;;  %v9673_v45 = vcombine.high %v513_v35, %v529_v37  ;;  %v179_v47 = vld [vmem:[#allocation2 + $0xd8] sm:$0xff]  ;;  %v402_v35 = vld [vmem:[#allocation2 + $0x7d0] sm:$0xff] }
 0x175   :  { %2806 = vmatprep.subr.bf16.mxu0 %v9447_v48  ;;  %2847 = vmatprep.subr.bf16.mxu1 %v9449_v52  ;;  %v9670_v48 = vcombine.low %v512_v33, %v528_v34  ;;  %v210_v52 = vld [vmem:[#allocation2 + $0x1d0] sm:$0xff]  ;;  %v9324_v57 = vcombine.low %v163_v44, %v179_v47  ;;  %v9515_v33 = vcombine.high %v354_v27, %v370_v28 }
 0x176   :  { %v9355_v59 = vcombine.high %v194_v51, %v210_v52  ;;  %v386_v34 = vld [vmem:[#allocation2 + $0x750] sm:$0xff] }
 0x178   :  { %2807 = vmatpush1.bf16.msra.mxu0 %v9446_v54  ;;  %2848 = vmatpush1.bf16.msra.mxu1 %v9448_v55  ;;  %v9325_v54 = vcombine.high %v163_v44, %v179_v47  ;;  %v211_v55 = vld [vmem:[#allocation2 + $0x1d8] sm:$0xff] }
 0x179   :  { %2808 = vmatprep.subr.bf16.mxu0 %v9479_v56  ;;  %2849 = vmatprep.subr.bf16.mxu1 %v9481_v61  ;;  %v9322_v56 = vcombine.low %v162_v41, %v178_v42  ;;  %v242_v61 = vld [vmem:[#allocation2 + $0x2d0] sm:$0xff]  ;;  %v9356_v2 = vcombine.low %v195_v53, %v211_v55 }
 0x17a   :  { %v9387_v3 = vcombine.high %v226_v60, %v242_v61 }
 0x17c   :  { %2809 = vmatpush1.bf16.msra.mxu0 %v9478_v63  ;;  %2850 = vmatpush1.bf16.msra.mxu1 %v9480_v0  ;;  %v9357_v63 = vcombine.high %v195_v53, %v211_v55  ;;  %v243_v0 = vld [vmem:[#allocation2 + $0x2d8] sm:$0xff] }
 0x17d   :  { %2810 = vmatprep.subr.bf16.mxu0 %v9511_v1  ;;  %2851 = vmatprep.subr.bf16.mxu1 %v9513_v5  ;;  %v9354_v1 = vcombine.low %v194_v51, %v210_v52  ;;  %v274_v5 = vld [vmem:[#allocation2 + $0x3d0] sm:$0xff]  ;;  %v419_v53 = vld [vmem:[#allocation2 + $0x858] sm:$0xff] }
 0x17e   :  { %v9419_v10 = vcombine.high %v258_v4, %v274_v5  ;;  %v418_v51 = vld [vmem:[#allocation2 + $0x850] sm:$0xff] }
 0x17f   :  { %v434_v52 = vld [vmem:[#allocation2 + $0x8d0] sm:$0xff] }
 0x180   :  { %2811 = vmatpush1.bf16.msra.mxu0 %v9510_v7  ;;  %2852 = vmatpush1.bf16.msra.mxu1 %v9512_v8  ;;  %v9389_v7 = vcombine.high %v227_v62, %v243_v0  ;;  %v275_v8 = vld [vmem:[#allocation2 + $0x3d8] sm:$0xff] }
 0x181   :  { %2812 = vmatprep.subr.bf16.mxu0 %v9543_v9  ;;  %2853 = vmatprep.subr.bf16.mxu1 %v9545_v13  ;;  %v9388_v9 = vcombine.low %v227_v62, %v243_v0  ;;  %v291_v13 = vld [vmem:[#allocation2 + $0x458] sm:$0xff]  ;;  %v9421_v14 = vcombine.high %v259_v6, %v275_v8  ;;  %v466_v62 = vld [vmem:[#allocation2 + $0x9d0] sm:$0xff] }
 0x184   :  { %2813 = vmatpush1.bf16.msra.mxu0 %v9542_v15  ;;  %2854 = vmatpush1.bf16.msra.mxu1 %v9544_v16  ;;  %v307_v15 = vld [vmem:[#allocation2 + $0x4d8] sm:$0xff]  ;;  %v9418_v16 = vcombine.low %v258_v4, %v274_v5  ;;  %v482_v5 = vld [vmem:[#allocation2 + $0xa50] sm:$0xff] }
 0x185   :  { %2814 = vmatprep.subr.bf16.mxu0 %v9575_v17  ;;  %2855 = vmatprep.subr.bf16.mxu1 %v9577_v21  ;;  %v9420_v17 = vcombine.low %v259_v6, %v275_v8  ;;  %v323_v21 = vld [vmem:[#allocation2 + $0x558] sm:$0xff]  ;;  %v9453_v22 = vcombine.high %v291_v13, %v307_v15  ;;  %v498_v6 = vld [vmem:[#allocation2 + $0xad0] sm:$0xff] }
 0x188   :  { %2815 = vmatpush1.bf16.msra.mxu0 %v9574_v23  ;;  %2856 = vmatpush1.bf16.msra.mxu1 %v9576_v24  ;;  %v339_v23 = vld [vmem:[#allocation2 + $0x5d8] sm:$0xff]  ;;  %v9450_v24 = vcombine.low %v290_v11, %v306_v12  ;;  %v9643_v11 = vcombine.high %v482_v5, %v498_v6  ;;  %v514_v12 = vld [vmem:[#allocation2 + $0xb50] sm:$0xff] }
 0x189   :  { %2816 = vmatprep.subr.bf16.mxu0 %v9607_v25  ;;  %2857 = vmatprep.subr.bf16.mxu1 %v9609_v29  ;;  %v9452_v25 = vcombine.low %v291_v13, %v307_v15  ;;  %v355_v29 = vld [vmem:[#allocation2 + $0x658] sm:$0xff]  ;;  %v9485_v30 = vcombine.high %v323_v21, %v339_v23  ;;  %v530_v13 = vld [vmem:[#allocation2 + $0xbd0] sm:$0xff] }
 0x18c   :  { %2817 = vmatpush1.bf16.msra.mxu0 %v9606_v31  ;;  %2858 = vmatpush1.bf16.msra.mxu1 %v9608_v43  ;;  %v371_v31 = vld [vmem:[#allocation2 + $0x6d8] sm:$0xff]  ;;  %v9482_v43 = vcombine.low %v322_v19, %v338_v20  ;;  %v9675_v19 = vcombine.high %v514_v12, %v530_v13  ;;  %v164_v20 = vld [vmem:[#allocation2 + $0x60] sm:$0xff] }
 0x18d   :  { %2818 = vmatprep.subr.bf16.mxu0 %v9639_v32  ;;  %2859 = vmatprep.subr.bf16.mxu1 %v9641_v36  ;;  %v9484_v32 = vcombine.low %v323_v21, %v339_v23  ;;  %v387_v36 = vld [vmem:[#allocation2 + $0x758] sm:$0xff]  ;;  %v180_v21 = vld [vmem:[#allocation2 + $0xe0] sm:$0xff] }
 0x190   :  { %2819 = vmatpush1.bf16.msra.mxu0 %v9638_v38  ;;  %2860 = vmatpush1.bf16.msra.mxu1 %v9640_v39  ;;  %v9517_v38 = vcombine.high %v355_v29, %v371_v31  ;;  %v403_v39 = vld [vmem:[#allocation2 + $0x7d8] sm:$0xff] }
 0x191   :  { %2820 = vmatprep.subr.bf16.mxu0 %v9671_v40  ;;  %2861 = vmatprep.subr.bf16.mxu1 %v9673_v45  ;;  %v9514_v45 = vcombine.low %v354_v27, %v370_v28  ;;  %v9549_v55 = vcombine.high %v387_v36, %v403_v39  ;;  %v9327_v27 = vcombine.high %v164_v20, %v180_v21  ;;  %v196_v28 = vld [vmem:[#allocation2 + $0x160] sm:$0xff] }
 0x194   :  { %2821 = vmatpush1.bf16.msra.mxu0 %v9670_v48  ;;  %2862 = vmatpush1.bf16.msra.mxu1 %v9672_v49  ;;  %v9516_v49 = vcombine.low %v355_v29, %v371_v31  ;;  %v212_v29 = vld [vmem:[#allocation2 + $0x1e0] sm:$0xff] }
 0x195   :  { %2880 = vmatprep.subr.bf16.mxu0 %v9323_v50  ;;  %2921 = vmatprep.subr.bf16.mxu1 %v9325_v54  ;;  %v9547_v50 = vcombine.high %v386_v34, %v402_v35 }
 0x197   :  { %2831 = vmatmul.mubr.bf16.vlgmr.msra.gmra.mrb[16].mxu0 %v11554_v58  ;;  %2872 = vmatmul.mubr.bf16.vlgmr.msra.gmra.mrb[16].mxu1 %v11554_v58  ;;  %v9386_v58 = vcombine.low %v226_v60, %v242_v61  ;;  %v9579_v60 = vcombine.high %v418_v51, %v434_v52  ;;  %v450_v61 = vld [vmem:[#allocation2 + $0x950] sm:$0xff] }
 0x198   :  { %2881 = vmatpush1.bf16.msra.mxu0 %v9322_v56  ;;  %2922 = vmatpush1.bf16.msra.mxu1 %v9324_v57  ;;  %v435_v56 = vld [vmem:[#allocation2 + $0x8d8] sm:$0xff]  ;;  %v9546_v57 = vcombine.low %v386_v34, %v402_v35  ;;  %v9611_v4 = vcombine.high %v450_v61, %v466_v62  ;;  %v9359_v34 = vcombine.high %v196_v28, %v212_v29  ;;  %v228_v35 = vld [vmem:[#allocation2 + $0x260] sm:$0xff] }
 0x199   :  { %2882 = vmatprep.subr.bf16.mxu0 %v9355_v59  ;;  %2923 = vmatprep.subr.bf16.mxu1 %v9357_v63  ;;  %v9548_v59 = vcombine.low %v387_v36, %v403_v39  ;;  %v451_v63 = vld [vmem:[#allocation2 + $0x958] sm:$0xff]  ;;  %v9581_v0 = vcombine.high %v419_v53, %v435_v56  ;;  %v244_v36 = vld [vmem:[#allocation2 + $0x2e0] sm:$0xff] }
 0x19a   :  { %9696 = vmatprep.mubr.msk.bf16.mxu0 %vm2466_vm0, %v11533_v46  ;;  %9697 = vmatprep.mubr.msk.bf16.mxu1 %vm2466_vm0, %v11533_v46 }
 0x19c   :  { %2883 = vmatpush1.bf16.msra.mxu0 %v9354_v1  ;;  %2924 = vmatpush1.bf16.msra.mxu1 %v9356_v2  ;;  %v467_v1 = vld [vmem:[#allocation2 + $0x9d8] sm:$0xff]  ;;  %v9578_v2 = vcombine.low %v418_v51, %v434_v52  ;;  %v276_v51 = vld [vmem:[#allocation2 + $0x3e0] sm:$0xff]  ;;  %v261_v52 = vld [vmem:[#allocation2 + $0x368] sm:$0xff] }
 0x19d   :  { %2884 = vmatprep.subr.bf16.mxu0 %v9387_v3  ;;  %2925 = vmatprep.subr.bf16.mxu1 %v9389_v7  ;;  %v9580_v3 = vcombine.low %v419_v53, %v435_v56  ;;  %v483_v7 = vld [vmem:[#allocation2 + $0xa58] sm:$0xff]  ;;  %v9613_v8 = vcombine.high %v451_v63, %v467_v1 }
 0x1a0   :  { %2885 = vmatpush1.bf16.msra.mxu0 %v9386_v58  ;;  %2926 = vmatpush1.bf16.msra.mxu1 %v9388_v9  ;;  %v499_v58 = vld [vmem:[#allocation2 + $0xad8] sm:$0xff]  ;;  %v9610_v9 = vcombine.low %v450_v61, %v466_v62  ;;  %v293_v61 = vld [vmem:[#allocation2 + $0x468] sm:$0xff] }
 0x1a1   :  { %2886 = vmatprep.subr.bf16.mxu0 %v9419_v10  ;;  %2927 = vmatprep.subr.bf16.mxu1 %v9421_v14  ;;  %v9612_v10 = vcombine.low %v451_v63, %v467_v1  ;;  %v515_v14 = vld [vmem:[#allocation2 + $0xb58] sm:$0xff]  ;;  %v9645_v15 = vcombine.high %v483_v7, %v499_v58  ;;  %v309_v63 = vld [vmem:[#allocation2 + $0x4e8] sm:$0xff] }
 0x1a4   :  { %2887 = vmatpush1.bf16.msra.mxu0 %v9418_v16  ;;  %2928 = vmatpush1.bf16.msra.mxu1 %v9420_v17  ;;  %v531_v16 = vld [vmem:[#allocation2 + $0xbd8] sm:$0xff]  ;;  %v9642_v17 = vcombine.low %v482_v5, %v498_v6  ;;  %v325_v5 = vld [vmem:[#allocation2 + $0x568] sm:$0xff]  ;;  %v9457_v6 = vcombine.high %v293_v61, %v309_v63 }
 0x1a5   :  { %2888 = vmatprep.subr.bf16.mxu0 %v9451_v18  ;;  %2929 = vmatprep.subr.bf16.mxu1 %v9453_v22  ;;  %v9644_v18 = vcombine.low %v483_v7, %v499_v58  ;;  %v165_v22 = vld [vmem:[#allocation2 + $0x68] sm:$0xff]  ;;  %v9677_v23 = vcombine.high %v515_v14, %v531_v16  ;;  %v9456_v58 = vcombine.low %v293_v61, %v309_v63 }
 0x1a6   :  { %v341_v7 = vld [vmem:[#allocation2 + $0x5e8] sm:$0xff] }
 0x1a7   :  { %v501_v61 = vld [vmem:[#allocation2 + $0xae8] sm:$0xff] }
 0x1a8   :  { %2889 = vmatpush1.bf16.msra.mxu0 %v9450_v24  ;;  %2930 = vmatpush1.bf16.msra.mxu1 %v9452_v25  ;;  %v181_v24 = vld [vmem:[#allocation2 + $0xe8] sm:$0xff]  ;;  %v9674_v25 = vcombine.low %v514_v12, %v530_v13  ;;  %v9489_v13 = vcombine.high %v325_v5, %v341_v7 }
 0x1a9   :  { %2890 = vmatprep.subr.bf16.mxu0 %v9483_v26  ;;  %2931 = vmatprep.subr.bf16.mxu1 %v9485_v30  ;;  %v9676_v26 = vcombine.low %v515_v14, %v531_v16  ;;  %v197_v30 = vld [vmem:[#allocation2 + $0x168] sm:$0xff]  ;;  %v9329_v31 = vcombine.high %v165_v22, %v181_v24  ;;  %v9488_v16 = vcombine.low %v325_v5, %v341_v7 }
 0x1aa   :  { %v11574_v37 = vpop.f32.mrb[0].mxu0  ;;  %v11576_v40 = vpop.f32.mrb[0].mxu1  ;;  %v357_v12 = vld [vmem:[#allocation2 + $0x668] sm:$0xff] }
 0x1ab   :  { %v11578_v41 = vpop.f32.mrb[1].mxu0  ;;  %v11580_v42 = vpop.f32.mrb[1].mxu1  ;;  %v373_v14 = vld [vmem:[#allocation2 + $0x6e8] sm:$0xff] }
 0x1ac   :  { %v2508_v44 = vpop.f32.mrb[2].mxu0  ;;  %2891 = vmatpush1.bf16.msra.mxu0 %v9482_v43  ;;  %v2549_v47 = vpop.f32.mrb[2].mxu1  ;;  %2932 = vmatpush1.bf16.msra.mxu1 %v9484_v32  ;;  %v213_v43 = vld [vmem:[#allocation2 + $0x1e8] sm:$0xff]  ;;  %v9326_v32 = vcombine.low %v164_v20, %v180_v21 }
 0x1ad   :  { %v2509_v48 = vpop.f32.mrb[3].mxu0  ;;  %2892 = vmatprep.subr.bf16.mxu0 %v9515_v33  ;;  %v2550_v54 = vpop.f32.mrb[3].mxu1  ;;  %2933 = vmatprep.subr.bf16.mxu1 %v9517_v38  ;;  %v9328_v33 = vcombine.low %v165_v22, %v181_v24  ;;  %v229_v38 = vld [vmem:[#allocation2 + $0x268] sm:$0xff]  ;;  %v9361_v39 = vcombine.high %v197_v30, %v213_v43  ;;  %v9358_v47 = vcombine.low %v196_v28, %v212_v29 }
 0x1ae   :  { %v245_v44 = vld [vmem:[#allocation2 + $0x2e8] sm:$0xff]  ;;  %v9360_v48 = vcombine.low %v197_v30, %v213_v43  ;;  %v9521_v22 = vcombine.high %v357_v12, %v373_v14 }
 0x1af   :  { %v9393_v53 = vcombine.high %v229_v38, %v245_v44  ;;  %v277_v54 = vld [vmem:[#allocation2 + $0x3e8] sm:$0xff]  ;;  %v9392_v56 = vcombine.low %v229_v38, %v245_v44 }
 0x1b0   :  { %2893 = vmatpush1.bf16.msra.mxu0 %v9514_v45  ;;  %2934 = vmatpush1.bf16.msra.mxu1 %v9516_v49  ;;  %v11585_v45 = vld.sshfl [vmem:[%s12049_s0] sm:$0x33 pattern:$0x76325410]  ;;  %v9391_v49 = vcombine.high %v228_v35, %v244_v36  ;;  %v9425_v62 = vcombine.high %v261_v52, %v277_v54  ;;  %v9424_v1 = vcombine.low %v261_v52, %v277_v54  ;;  %v389_v20 = vld [vmem:[#allocation2 + $0x768] sm:$0xff] }
 0x1b1   :  { %2894 = vmatprep.subr.bf16.mxu0 %v9547_v50  ;;  %2935 = vmatprep.subr.bf16.mxu1 %v9549_v55  ;;  %v260_v50 = vld [vmem:[#allocation2 + $0x360] sm:$0xff]  ;;  %v9390_v55 = vcombine.low %v228_v35, %v244_v36  ;;  %v437_v38 = vld [vmem:[#allocation2 + $0x8e8] sm:$0xff] }
 0x1b2   :  { %v469_v52 = vld [vmem:[#allocation2 + $0x9e8] sm:$0xff] }
 0x1b3   :  { %v533_v5 = vld [vmem:[#allocation2 + $0xbe8] sm:$0xff] }
 0x1b4   :  { %2895 = vmatpush1.bf16.msra.mxu0 %v9546_v57  ;;  %2936 = vmatpush1.bf16.msra.mxu1 %v9548_v59  ;;  %v9423_v57 = vcombine.high %v260_v50, %v276_v51  ;;  %v292_v59 = vld [vmem:[#allocation2 + $0x460] sm:$0xff] }
 0x1b5   :  { %2896 = vmatprep.subr.bf16.mxu0 %v9579_v60  ;;  %2937 = vmatprep.subr.bf16.mxu1 %v9581_v0  ;;  %v308_v60 = vld [vmem:[#allocation2 + $0x4e0] sm:$0xff]  ;;  %v9422_v0 = vcombine.low %v260_v50, %v276_v51  ;;  %v453_v50 = vld [vmem:[#allocation2 + $0x968] sm:$0xff] }
 0x1b6   :  { %v9616_v63 = vcombine.low %v453_v50, %v469_v52 }
 0x1b8   :  { %2897 = vmatpush1.bf16.msra.mxu0 %v9578_v2  ;;  %2938 = vmatpush1.bf16.msra.mxu1 %v9580_v3  ;;  %v9455_v2 = vcombine.high %v292_v59, %v308_v60  ;;  %v324_v3 = vld [vmem:[#allocation2 + $0x560] sm:$0xff] }
 0x1b9   :  { %2898 = vmatprep.subr.bf16.mxu0 %v9611_v4  ;;  %2939 = vmatprep.subr.bf16.mxu1 %v9613_v8  ;;  %v340_v4 = vld [vmem:[#allocation2 + $0x5e0] sm:$0xff]  ;;  %v9454_v8 = vcombine.low %v292_v59, %v308_v60  ;;  %v485_v59 = vld [vmem:[#allocation2 + $0xa68] sm:$0xff]  ;;  %v9617_v60 = vcombine.high %v453_v50, %v469_v52  ;;  %v310_v52 = vld [vmem:[#allocation2 + $0x4f0] sm:$0xff] }
 0x1ba   :  { %v9648_v7 = vcombine.low %v485_v59, %v501_v61 }
 0x1bc   :  { %2899 = vmatpush1.bf16.msra.mxu0 %v9610_v9  ;;  %2940 = vmatpush1.bf16.msra.mxu1 %v9612_v10  ;;  %v9487_v9 = vcombine.high %v324_v3, %v340_v4  ;;  %v356_v10 = vld [vmem:[#allocation2 + $0x660] sm:$0xff] }
 0x1bd   :  { %2900 = vmatprep.subr.bf16.mxu0 %v9643_v11  ;;  %2941 = vmatprep.subr.bf16.mxu1 %v9645_v15  ;;  %v372_v11 = vld [vmem:[#allocation2 + $0x6e0] sm:$0xff]  ;;  %v9486_v15 = vcombine.low %v324_v3, %v340_v4  ;;  %v517_v3 = vld [vmem:[#allocation2 + $0xb68] sm:$0xff]  ;;  %v9649_v4 = vcombine.high %v485_v59, %v501_v61  ;;  %v342_v61 = vld [vmem:[#allocation2 + $0x5f0] sm:$0xff] }
 0x1be   :  { %v9518_v28 = vcombine.low %v356_v10, %v372_v11 }
 0x1c0   :  { %2901 = vmatpush1.bf16.msra.mxu0 %v9642_v17  ;;  %2942 = vmatpush1.bf16.msra.mxu1 %v9644_v18  ;;  %v9519_v17 = vcombine.high %v356_v10, %v372_v11  ;;  %v388_v18 = vld [vmem:[#allocation2 + $0x760] sm:$0xff]  ;;  %v167_v10 = vld [vmem:[#allocation2 + $0x78] sm:$0xff]  ;;  %v9681_v11 = vcombine.high %v517_v3, %v533_v5 }
 0x1c1   :  { %2902 = vmatprep.subr.bf16.mxu0 %v9675_v19  ;;  %2943 = vmatprep.subr.bf16.mxu1 %v9677_v23  ;;  %v404_v19 = vld [vmem:[#allocation2 + $0x7e0] sm:$0xff]  ;;  %v405_v23 = vld [vmem:[#allocation2 + $0x7e8] sm:$0xff] }
 0x1c2   :  { %v9551_v43 = vcombine.high %v388_v18, %v404_v19  ;;  %v9553_v36 = vcombine.high %v389_v20, %v405_v23  ;;  %v9552_v44 = vcombine.low %v389_v20, %v405_v23  ;;  %v215_v20 = vld [vmem:[#allocation2 + $0x1f8] sm:$0xff] }
 0x1c4   :  { %2903 = vmatpush1.bf16.msra.mxu0 %v9674_v25  ;;  %2944 = vmatpush1.bf16.msra.mxu1 %v9676_v26 }
 0x1c5   :  { %2962 = vmatprep.subr.bf16.mxu0 %v9327_v27  ;;  %3003 = vmatprep.subr.bf16.mxu1 %v9329_v31  ;;  %v9520_v31 = vcombine.low %v357_v12, %v373_v14  ;;  %v183_v12 = vld [vmem:[#allocation2 + $0xf8] sm:$0xff]  ;;  %v9680_v14 = vcombine.low %v517_v3, %v533_v5  ;;  %v374_v5 = vld [vmem:[#allocation2 + $0x6f0] sm:$0xff] }
 0x1c6   :  { %v9332_v23 = vcombine.low %v167_v10, %v183_v12 }
 0x1c7   :  { %2913 = vmatmul.mubr.bf16.vlgmr.msra.gmra.mrb[20].mxu0 %v11585_v45  ;;  %2954 = vmatmul.mubr.bf16.vlgmr.msra.gmra.mrb[20].mxu1 %v11585_v45 }
 0x1c8   :  { %2963 = vmatpush1.bf16.msra.mxu0 %v9326_v32  ;;  %3004 = vmatpush1.bf16.msra.mxu1 %v9328_v33  ;;  %v420_v32 = vld [vmem:[#allocation2 + $0x860] sm:$0xff] }
 0x1c9   :  { %2964 = vmatprep.subr.bf16.mxu0 %v9359_v34  ;;  %3005 = vmatprep.subr.bf16.mxu1 %v9361_v39  ;;  %v436_v33 = vld [vmem:[#allocation2 + $0x8e0] sm:$0xff]  ;;  %v421_v34 = vld [vmem:[#allocation2 + $0x868] sm:$0xff]  ;;  %v9550_v39 = vcombine.low %v388_v18, %v404_v19  ;;  %v199_v18 = vld [vmem:[#allocation2 + $0x178] sm:$0xff]  ;;  %v9333_v19 = vcombine.high %v167_v10, %v183_v12 }
 0x1ca   :  { %9698 = vmatprep.mubr.msk.bf16.mxu0 %vm2466_vm0, %v11533_v46  ;;  %9699 = vmatprep.mubr.msk.bf16.mxu1 %vm2466_vm0, %v11533_v46  ;;  %v9585_v51 = vcombine.high %v421_v34, %v437_v38  ;;  %v9584_v54 = vcombine.low %v421_v34, %v437_v38  ;;  %v278_v38 = vld [vmem:[#allocation2 + $0x3f0] sm:$0xff] }
 0x1cb   :  { %v390_v12 = vld [vmem:[#allocation2 + $0x770] sm:$0xff] }
 0x1cc   :  { %2965 = vmatpush1.bf16.msra.mxu0 %v9358_v47  ;;  %3006 = vmatpush1.bf16.msra.mxu1 %v9360_v48  ;;  %v9583_v47 = vcombine.high %v420_v32, %v436_v33  ;;  %v452_v48 = vld [vmem:[#allocation2 + $0x960] sm:$0xff] }
 0x1cd   :  { %2966 = vmatprep.subr.bf16.mxu0 %v9391_v49  ;;  %3007 = vmatprep.subr.bf16.mxu1 %v9393_v53  ;;  %v468_v49 = vld [vmem:[#allocation2 + $0x9e0] sm:$0xff]  ;;  %v9582_v53 = vcombine.low %v420_v32, %v436_v33  ;;  %v9364_v33 = vcombine.low %v199_v18, %v215_v20 }
 0x1d0   :  { %2967 = vmatpush1.bf16.msra.mxu0 %v9390_v55  ;;  %3008 = vmatpush1.bf16.msra.mxu1 %v9392_v56  ;;  %v9615_v55 = vcombine.high %v452_v48, %v468_v49  ;;  %v484_v56 = vld [vmem:[#allocation2 + $0xa60] sm:$0xff] }
 0x1d1   :  { %2968 = vmatprep.subr.bf16.mxu0 %v9423_v57  ;;  %3009 = vmatprep.subr.bf16.mxu1 %v9425_v62  ;;  %v500_v57 = vld [vmem:[#allocation2 + $0xae0] sm:$0xff]  ;;  %v9614_v62 = vcombine.low %v452_v48, %v468_v49 }
 0x1d4   :  { %2969 = vmatpush1.bf16.msra.mxu0 %v9422_v0  ;;  %3010 = vmatpush1.bf16.msra.mxu1 %v9424_v1  ;;  %v9647_v0 = vcombine.high %v484_v56, %v500_v57  ;;  %v516_v1 = vld [vmem:[#allocation2 + $0xb60] sm:$0xff] }
 0x1d5   :  { %2970 = vmatprep.subr.bf16.mxu0 %v9455_v2  ;;  %3011 = vmatprep.subr.bf16.mxu1 %v9457_v6  ;;  %v532_v2 = vld [vmem:[#allocation2 + $0xbe0] sm:$0xff]  ;;  %v9646_v6 = vcombine.low %v484_v56, %v500_v57 }
 0x1d8   :  { %2971 = vmatpush1.bf16.msra.mxu0 %v9454_v8  ;;  %3012 = vmatpush1.bf16.msra.mxu1 %v9456_v58  ;;  %v9679_v8 = vcombine.high %v516_v1, %v532_v2  ;;  %v166_v58 = vld [vmem:[#allocation2 + $0x70] sm:$0xff] }
 0x1d9   :  { %2972 = vmatprep.subr.bf16.mxu0 %v9487_v9  ;;  %3013 = vmatprep.subr.bf16.mxu1 %v9489_v13  ;;  %v182_v9 = vld [vmem:[#allocation2 + $0xf0] sm:$0xff]  ;;  %v9678_v13 = vcombine.low %v516_v1, %v532_v2 }
 0x1da   :  { %v11593_v21 = vpop.f32.mrb[4].mxu0  ;;  %v11595_v24 = vpop.f32.mrb[4].mxu1 }
 0x1db   :  { %v11597_v25 = vpop.f32.mrb[5].mxu0  ;;  %v11599_v26 = vpop.f32.mrb[5].mxu1 }
 0x1dc   :  { %v2590_v27 = vpop.f32.mrb[6].mxu0  ;;  %2973 = vmatpush1.bf16.msra.mxu0 %v9486_v15  ;;  %v2631_v29 = vpop.f32.mrb[6].mxu1  ;;  %3014 = vmatpush1.bf16.msra.mxu1 %v9488_v16  ;;  %v9331_v15 = vcombine.high %v166_v58, %v182_v9  ;;  %v198_v16 = vld [vmem:[#allocation2 + $0x170] sm:$0xff] }
 0x1dd   :  { %v2591_v30 = vpop.f32.mrb[7].mxu0  ;;  %2974 = vmatprep.subr.bf16.mxu0 %v9519_v17  ;;  %v2632_v35 = vpop.f32.mrb[7].mxu1  ;;  %3015 = vmatprep.subr.bf16.mxu1 %v9521_v22  ;;  %v214_v17 = vld [vmem:[#allocation2 + $0x1f0] sm:$0xff]  ;;  %v9330_v22 = vcombine.low %v166_v58, %v182_v9  ;;  %v9365_v29 = vcombine.high %v199_v18, %v215_v20 }
 0x1de   :  { %v9363_v27 = vcombine.high %v198_v16, %v214_v17  ;;  %v246_v30 = vld [vmem:[#allocation2 + $0x2f0] sm:$0xff]  ;;  %v9362_v32 = vcombine.low %v198_v16, %v214_v17  ;;  %v391_v16 = vld [vmem:[#allocation2 + $0x778] sm:$0xff] }
 0x1df   :  { %v407_v17 = vld [vmem:[#allocation2 + $0x7f8] sm:$0xff] }
 0x1e0   :  { %2975 = vmatpush1.bf16.msra.mxu0 %v9518_v28  ;;  %3016 = vmatpush1.bf16.msra.mxu1 %v9520_v31  ;;  %v230_v28 = vld [vmem:[#allocation2 + $0x270] sm:$0xff]  ;;  %v231_v31 = vld [vmem:[#allocation2 + $0x278] sm:$0xff] }
 0x1e1   :  { %2976 = vmatprep.subr.bf16.mxu0 %v9551_v43  ;;  %3017 = vmatprep.subr.bf16.mxu1 %v9553_v36  ;;  %v247_v43 = vld [vmem:[#allocation2 + $0x2f8] sm:$0xff]  ;;  %v9395_v34 = vcombine.high %v230_v28, %v246_v30  ;;  %v262_v36 = vld [vmem:[#allocation2 + $0x370] sm:$0xff] }
 0x1e2   :  { %v9397_v35 = vcombine.high %v231_v31, %v247_v43  ;;  %v9396_v48 = vcombine.low %v231_v31, %v247_v43  ;;  %v9427_v49 = vcombine.high %v262_v36, %v278_v38  ;;  %v422_v31 = vld [vmem:[#allocation2 + $0x870] sm:$0xff] }
 0x1e3   :  { %v438_v43 = vld [vmem:[#allocation2 + $0x8f0] sm:$0xff] }
 0x1e4   :  { %2977 = vmatpush1.bf16.msra.mxu0 %v9550_v39  ;;  %3018 = vmatpush1.bf16.msra.mxu1 %v9552_v44  ;;  %v263_v39 = vld [vmem:[#allocation2 + $0x378] sm:$0xff] }
 0x1e5   :  { %2978 = vmatprep.subr.bf16.mxu0 %v9583_v47  ;;  %3019 = vmatprep.subr.bf16.mxu1 %v9585_v51  ;;  %v279_v44 = vld [vmem:[#allocation2 + $0x3f8] sm:$0xff]  ;;  %v9394_v47 = vcombine.low %v230_v28, %v246_v30  ;;  %v294_v51 = vld [vmem:[#allocation2 + $0x470] sm:$0xff]  ;;  %v9557_v30 = vcombine.high %v391_v16, %v407_v17 }
 0x1e6   :  { %v9429_v50 = vcombine.high %v263_v39, %v279_v44  ;;  %v9428_v56 = vcombine.low %v263_v39, %v279_v44  ;;  %v9459_v57 = vcombine.high %v294_v51, %v310_v52  ;;  %v454_v39 = vld [vmem:[#allocation2 + $0x970] sm:$0xff] }
 0x1e7   :  { %v470_v44 = vld [vmem:[#allocation2 + $0x9f0] sm:$0xff] }
 0x1e8   :  { %2979 = vmatpush1.bf16.msra.mxu0 %v9582_v53  ;;  %3020 = vmatpush1.bf16.msra.mxu1 %v9584_v54  ;;  %v295_v53 = vld [vmem:[#allocation2 + $0x478] sm:$0xff] }
 0x1e9   :  { %2980 = vmatprep.subr.bf16.mxu0 %v9615_v55  ;;  %3021 = vmatprep.subr.bf16.mxu1 %v9617_v60  ;;  %v311_v54 = vld [vmem:[#allocation2 + $0x4f8] sm:$0xff]  ;;  %v9426_v55 = vcombine.low %v262_v36, %v278_v38  ;;  %v326_v60 = vld [vmem:[#allocation2 + $0x570] sm:$0xff]  ;;  %v9587_v36 = vcombine.high %v422_v31, %v438_v43 }
 0x1ea   :  { %v9461_v59 = vcombine.high %v295_v53, %v311_v54  ;;  %v9460_v1 = vcombine.low %v295_v53, %v311_v54  ;;  %v9491_v2 = vcombine.high %v326_v60, %v342_v61  ;;  %v486_v53 = vld [vmem:[#allocation2 + $0xa70] sm:$0xff] }
 0x1eb   :  { %v502_v54 = vld [vmem:[#allocation2 + $0xaf0] sm:$0xff] }
 0x1ec   :  { %2981 = vmatpush1.bf16.msra.mxu0 %v9614_v62  ;;  %3022 = vmatpush1.bf16.msra.mxu1 %v9616_v63  ;;  %v327_v62 = vld [vmem:[#allocation2 + $0x578] sm:$0xff] }
 0x1ed   :  { %2982 = vmatprep.subr.bf16.mxu0 %v9647_v0  ;;  %3023 = vmatprep.subr.bf16.mxu1 %v9649_v4  ;;  %v343_v63 = vld [vmem:[#allocation2 + $0x5f8] sm:$0xff]  ;;  %v9458_v0 = vcombine.low %v294_v51, %v310_v52  ;;  %v358_v4 = vld [vmem:[#allocation2 + $0x670] sm:$0xff]  ;;  %v9619_v51 = vcombine.high %v454_v39, %v470_v44 }
 0x1ee   :  { %v9493_v3 = vcombine.high %v327_v62, %v343_v63  ;;  %v9492_v58 = vcombine.low %v327_v62, %v343_v63  ;;  %v9523_v9 = vcombine.high %v358_v4, %v374_v5  ;;  %v9522_v20 = vcombine.low %v358_v4, %v374_v5  ;;  %v518_v62 = vld [vmem:[#allocation2 + $0xb70] sm:$0xff] }
 0x1ef   :  { %v534_v63 = vld [vmem:[#allocation2 + $0xbf0] sm:$0xff] }
 0x1f0   :  { %2983 = vmatpush1.bf16.msra.mxu0 %v9646_v6  ;;  %3024 = vmatpush1.bf16.msra.mxu1 %v9648_v7  ;;  %v359_v6 = vld [vmem:[#allocation2 + $0x678] sm:$0xff]  ;;  %v9683_v4 = vcombine.high %v518_v62, %v534_v63 }
 0x1f1   :  { %2984 = vmatprep.subr.bf16.mxu0 %v9679_v8  ;;  %3025 = vmatprep.subr.bf16.mxu1 %v9681_v11  ;;  %v375_v7 = vld [vmem:[#allocation2 + $0x6f8] sm:$0xff]  ;;  %v9490_v8 = vcombine.low %v326_v60, %v342_v61  ;;  %v9651_v60 = vcombine.high %v486_v53, %v502_v54 }
 0x1f2   :  { %v9525_v11 = vcombine.high %v359_v6, %v375_v7 }
 0x1f4   :  { %2985 = vmatpush1.bf16.msra.mxu0 %v9678_v13  ;;  %3026 = vmatpush1.bf16.msra.mxu1 %v9680_v14  ;;  %v406_v13 = vld [vmem:[#allocation2 + $0x7f0] sm:$0xff] }
 0x1f5   :  { %3044 = vmatprep.subr.bf16.mxu0 %v9331_v15  ;;  %3085 = vmatprep.subr.bf16.mxu1 %v9333_v19  ;;  %v9555_v28 = vcombine.high %v390_v12, %v406_v13 }
 0x1f7   :  { %2995 = vmatmul.mubr.bf16.vlgmr.msra.gmra.mrb[24].mxu0 %v11585_v45  ;;  %3036 = vmatmul.mubr.bf16.vlgmr.msra.gmra.mrb[24].mxu1 %v11585_v45 }
 0x1f8   :  { %3045 = vmatpush1.bf16.msra.mxu0 %v9330_v22  ;;  %3086 = vmatpush1.bf16.msra.mxu1 %v9332_v23 }
 0x1f9   :  { %3046 = vmatprep.subr.bf16.mxu0 %v9363_v27  ;;  %3087 = vmatprep.subr.bf16.mxu1 %v9365_v29  ;;  %v9524_v27 = vcombine.low %v359_v6, %v375_v7  ;;  %v3126_v6 = vld [vmem:[#allocation5] sm:$0xff] }
 0x1fa   :  { %9700 = vmatprep.mubr.msk.bf16.mxu0 %vm2466_vm0, %v11533_v46  ;;  %9701 = vmatprep.mubr.msk.bf16.mxu1 %vm2466_vm0, %v11533_v46  ;;  %v3142_v7 = vld [vmem:[#allocation5 + $0x80] sm:$0xff] }
 0x1fc   :  { %3047 = vmatpush1.bf16.msra.mxu0 %v9362_v32  ;;  %3088 = vmatpush1.bf16.msra.mxu1 %v9364_v33  ;;  %v423_v32 = vld [vmem:[#allocation2 + $0x878] sm:$0xff] }
 0x1fd   :  { %3048 = vmatprep.subr.bf16.mxu0 %v9395_v34  ;;  %3089 = vmatprep.subr.bf16.mxu1 %v9397_v35  ;;  %v439_v33 = vld [vmem:[#allocation2 + $0x8f8] sm:$0xff]  ;;  %v9554_v34 = vcombine.low %v390_v12, %v406_v13  ;;  %v9556_v35 = vcombine.low %v391_v16, %v407_v17  ;;  %v9703_v12 = vcombine.high %v3126_v6, %v3142_v7  ;;  %v3158_v16 = vld [vmem:[#allocation5 + $0x100] sm:$0xff] }
 0x1fe   :  { %v9589_v38 = vcombine.high %v423_v32, %v439_v33  ;;  %v3174_v17 = vld [vmem:[#allocation5 + $0x180] sm:$0xff] }
 0x200   :  { %3049 = vmatpush1.bf16.msra.mxu0 %v9394_v47  ;;  %3090 = vmatpush1.bf16.msra.mxu1 %v9396_v48  ;;  %v455_v47 = vld [vmem:[#allocation2 + $0x978] sm:$0xff] }
 0x201   :  { %3050 = vmatprep.subr.bf16.mxu0 %v9427_v49  ;;  %3091 = vmatprep.subr.bf16.mxu1 %v9429_v50  ;;  %v471_v48 = vld [vmem:[#allocation2 + $0x9f8] sm:$0xff]  ;;  %v9586_v49 = vcombine.low %v422_v31, %v438_v43  ;;  %v9588_v50 = vcombine.low %v423_v32, %v439_v33  ;;  %v3191_v31 = vld [vmem:[#allocation5 + $0x208] sm:$0xff]  ;;  %v9734_v32 = vcombine.low %v3158_v16, %v3174_v17 }
 0x202   :  { %v9621_v52 = vcombine.high %v455_v47, %v471_v48  ;;  %v3207_v43 = vld [vmem:[#allocation5 + $0x288] sm:$0xff] }
 0x204   :  { %3051 = vmatpush1.bf16.msra.mxu0 %v9426_v55  ;;  %3092 = vmatpush1.bf16.msra.mxu1 %v9428_v56  ;;  %v487_v55 = vld [vmem:[#allocation2 + $0xa78] sm:$0xff] }
 0x205   :  { %3052 = vmatprep.subr.bf16.mxu0 %v9459_v57  ;;  %3093 = vmatprep.subr.bf16.mxu1 %v9461_v59  ;;  %v503_v56 = vld [vmem:[#allocation2 + $0xaf8] sm:$0xff]  ;;  %v9618_v57 = vcombine.low %v454_v39, %v470_v44  ;;  %v9620_v59 = vcombine.low %v455_v47, %v471_v48  ;;  %v3223_v39 = vld [vmem:[#allocation5 + $0x308] sm:$0xff]  ;;  %v9768_v47 = vcombine.low %v3191_v31, %v3207_v43 }
 0x206   :  { %v9653_v61 = vcombine.high %v487_v55, %v503_v56  ;;  %v3239_v44 = vld [vmem:[#allocation5 + $0x388] sm:$0xff] }
 0x208   :  { %3053 = vmatpush1.bf16.msra.mxu0 %v9458_v0  ;;  %3094 = vmatpush1.bf16.msra.mxu1 %v9460_v1  ;;  %v519_v0 = vld [vmem:[#allocation2 + $0xb78] sm:$0xff] }
 0x209   :  { %3054 = vmatprep.subr.bf16.mxu0 %v9491_v2  ;;  %3095 = vmatprep.subr.bf16.mxu1 %v9493_v3  ;;  %v535_v1 = vld [vmem:[#allocation2 + $0xbf8] sm:$0xff]  ;;  %v9650_v2 = vcombine.low %v486_v53, %v502_v54  ;;  %v9652_v3 = vcombine.low %v487_v55, %v503_v56  ;;  %v3271_v53 = vld [vmem:[#allocation5 + $0x488] sm:$0xff]  ;;  %v9800_v55 = vcombine.low %v3223_v39, %v3239_v44 }
 0x20a   :  { %v11607_v10 = vpop.f32.mrb[8].mxu0  ;;  %v11609_v14 = vpop.f32.mrb[8].mxu1  ;;  %v9685_v5 = vcombine.high %v519_v0, %v535_v1 }
 0x20b   :  { %v11611_v15 = vpop.f32.mrb[9].mxu0  ;;  %v11613_v18 = vpop.f32.mrb[9].mxu1 }
 0x20c   :  { %v2672_v19 = vpop.f32.mrb[10].mxu0  ;;  %3055 = vmatpush1.bf16.msra.mxu0 %v9490_v8  ;;  %v2713_v22 = vpop.f32.mrb[10].mxu1  ;;  %3096 = vmatpush1.bf16.msra.mxu1 %v9492_v58  ;;  %v3127_v8 = vld [vmem:[#allocation5 + $0x8] sm:$0xff] }
 0x20d   :  { %v2673_v23 = vpop.f32.mrb[11].mxu0  ;;  %3056 = vmatprep.subr.bf16.mxu0 %v9523_v9  ;;  %v2714_v29 = vpop.f32.mrb[11].mxu1  ;;  %3097 = vmatprep.subr.bf16.mxu1 %v9525_v11  ;;  %v3143_v58 = vld [vmem:[#allocation5 + $0x88] sm:$0xff]  ;;  %v9682_v9 = vcombine.low %v518_v62, %v534_v63  ;;  %v9684_v11 = vcombine.low %v519_v0, %v535_v1  ;;  %v9702_v22 = vcombine.low %v3126_v6, %v3142_v7 }
 0x20e   :  { %v9705_v13 = vcombine.high %v3127_v8, %v3143_v58  ;;  %v3159_v19 = vld [vmem:[#allocation5 + $0x108] sm:$0xff]  ;;  %v9704_v23 = vcombine.low %v3127_v8, %v3143_v58  ;;  %v3190_v29 = vld [vmem:[#allocation5 + $0x200] sm:$0xff] }
 0x20f   :  { %v3303_v62 = vld [vmem:[#allocation5 + $0x588] sm:$0xff] }
 0x210   :  { %3057 = vmatpush1.bf16.msra.mxu0 %v9522_v20  ;;  %3098 = vmatpush1.bf16.msra.mxu1 %v9524_v27  ;;  %v3175_v20 = vld [vmem:[#allocation5 + $0x188] sm:$0xff]  ;;  %v9735_v27 = vcombine.high %v3158_v16, %v3174_v17 }
 0x211   :  { %3058 = vmatprep.subr.bf16.mxu0 %v9555_v28  ;;  %3099 = vmatprep.subr.bf16.mxu1 %v9557_v30  ;;  %v9737_v28 = vcombine.high %v3159_v19, %v3175_v20  ;;  %v3206_v30 = vld [vmem:[#allocation5 + $0x280] sm:$0xff]  ;;  %v9736_v33 = vcombine.low %v3159_v19, %v3175_v20  ;;  %v3335_v6 = vld [vmem:[#allocation5 + $0x688] sm:$0xff] }
 0x212   :  { %v3351_v19 = vld [vmem:[#allocation5 + $0x708] sm:$0xff] }
 0x213   :  { %v3367_v20 = vld [vmem:[#allocation5 + $0x788] sm:$0xff] }
 0x214   :  { %3059 = vmatpush1.bf16.msra.mxu0 %v9554_v34  ;;  %3100 = vmatpush1.bf16.msra.mxu1 %v9556_v35  ;;  %v9767_v34 = vcombine.high %v3190_v29, %v3206_v30  ;;  %v9769_v35 = vcombine.high %v3191_v31, %v3207_v43 }
 0x215   :  { %3060 = vmatprep.subr.bf16.mxu0 %v9587_v36  ;;  %3101 = vmatprep.subr.bf16.mxu1 %v9589_v38  ;;  %v3222_v36 = vld [vmem:[#allocation5 + $0x300] sm:$0xff] }
 0x216   :  { %v3238_v38 = vld [vmem:[#allocation5 + $0x380] sm:$0xff] }
 0x217   :  { %v9799_v48 = vcombine.high %v3222_v36, %v3238_v38  ;;  %v9798_v54 = vcombine.low %v3222_v36, %v3238_v38  ;;  %v3399_v36 = vld [vmem:[#allocation5 + $0x888] sm:$0xff] }
 0x218   :  { %3061 = vmatpush1.bf16.msra.mxu0 %v9586_v49  ;;  %3102 = vmatpush1.bf16.msra.mxu1 %v9588_v50  ;;  %v9801_v49 = vcombine.high %v3223_v39, %v3239_v44  ;;  %v3254_v50 = vld [vmem:[#allocation5 + $0x400] sm:$0xff]  ;;  %v9928_v39 = vcombine.low %v3351_v19, %v3367_v20 }
 0x219   :  { %3062 = vmatprep.subr.bf16.mxu0 %v9619_v51  ;;  %3103 = vmatprep.subr.bf16.mxu1 %v9621_v52  ;;  %v3270_v51 = vld [vmem:[#allocation5 + $0x480] sm:$0xff]  ;;  %v3255_v52 = vld [vmem:[#allocation5 + $0x408] sm:$0xff] }
 0x21a   :  { %v9831_v56 = vcombine.high %v3254_v50, %v3270_v51  ;;  %v9830_v63 = vcombine.low %v3254_v50, %v3270_v51  ;;  %v9832_v0 = vcombine.low %v3255_v52, %v3271_v53  ;;  %v3431_v50 = vld [vmem:[#allocation5 + $0x988] sm:$0xff] }
 0x21c   :  { %3063 = vmatpush1.bf16.msra.mxu0 %v9618_v57  ;;  %3104 = vmatpush1.bf16.msra.mxu1 %v9620_v59  ;;  %v9833_v57 = vcombine.high %v3255_v52, %v3271_v53  ;;  %v3286_v59 = vld [vmem:[#allocation5 + $0x500] sm:$0xff] }
 0x21d   :  { %3064 = vmatprep.subr.bf16.mxu0 %v9651_v60  ;;  %3105 = vmatprep.subr.bf16.mxu1 %v9653_v61  ;;  %v3302_v60 = vld [vmem:[#allocation5 + $0x580] sm:$0xff]  ;;  %v3287_v61 = vld [vmem:[#allocation5 + $0x508] sm:$0xff] }
 0x21e   :  { %v9863_v1 = vcombine.high %v3286_v59, %v3302_v60  ;;  %v9862_v7 = vcombine.low %v3286_v59, %v3302_v60  ;;  %v9864_v8 = vcombine.low %v3287_v61, %v3303_v62  ;;  %v3463_v59 = vld [vmem:[#allocation5 + $0xa88] sm:$0xff] }
 0x220   :  { %3065 = vmatpush1.bf16.msra.mxu0 %v9650_v2  ;;  %3106 = vmatpush1.bf16.msra.mxu1 %v9652_v3  ;;  %v9865_v2 = vcombine.high %v3287_v61, %v3303_v62  ;;  %v3318_v3 = vld [vmem:[#allocation5 + $0x600] sm:$0xff] }
 0x221   :  { %3066 = vmatprep.subr.bf16.mxu0 %v9683_v4  ;;  %3107 = vmatprep.subr.bf16.mxu1 %v9685_v5  ;;  %v3334_v4 = vld [vmem:[#allocation5 + $0x680] sm:$0xff]  ;;  %v3319_v5 = vld [vmem:[#allocation5 + $0x608] sm:$0xff] }
 0x222   :  { %v9895_v58 = vcombine.high %v3318_v3, %v3334_v4 }
 0x224   :  { %3067 = vmatpush1.bf16.msra.mxu0 %v9682_v9  ;;  %3108 = vmatpush1.bf16.msra.mxu1 %v9684_v11  ;;  %v9897_v11 = vcombine.high %v3319_v5, %v3335_v6 }
 0x225   :  { %5430 = vmatprep.subr.bf16.mxu0 %v9703_v12  ;;  %5471 = vmatprep.subr.bf16.mxu1 %v9705_v13  ;;  %v3350_v12 = vld [vmem:[#allocation5 + $0x700] sm:$0xff] }
 0x226   :  { %v3366_v13 = vld [vmem:[#allocation5 + $0x780] sm:$0xff] }
 0x227   :  { %3077 = vmatmul.mubr.bf16.vlgmr.msra.gmra.mrb[28].mxu0 %v11585_v45  ;;  %3118 = vmatmul.mubr.bf16.vlgmr.msra.gmra.mrb[28].mxu1 %v11585_v45  ;;  %v9766_v45 = vcombine.low %v3190_v29, %v3206_v30  ;;  %v9896_v30 = vcombine.low %v3319_v5, %v3335_v6  ;;  %v9927_v31 = vcombine.high %v3350_v12, %v3366_v13 }
 0x228   :  { %5431 = vmatpush1.bf16.msra.mxu0 %v9702_v22  ;;  %5472 = vmatpush1.bf16.msra.mxu1 %v9704_v23  ;;  %v9926_v38 = vcombine.low %v3350_v12, %v3366_v13  ;;  %v3145_v12 = vld [vmem:[#allocation5 + $0x98] sm:$0xff] }
 0x229   :  { %5432 = vmatprep.subr.bf16.mxu0 %v9735_v27  ;;  %5473 = vmatprep.subr.bf16.mxu1 %v9737_v28  ;;  %v9894_v27 = vcombine.low %v3318_v3, %v3334_v4  ;;  %v3495_v3 = vld [vmem:[#allocation5 + $0xb88] sm:$0xff] }
 0x22a   :  { %10086 = vmatprep.mubr.msk.bf16.mxu0 %vm2466_vm0, %v11533_v46  ;;  %10087 = vmatprep.mubr.msk.bf16.mxu1 %vm2466_vm0, %v11533_v46 }
 0x22c   :  { %5433 = vmatpush1.bf16.msra.mxu0 %v9734_v32  ;;  %5474 = vmatpush1.bf16.msra.mxu1 %v9736_v33  ;;  %v9929_v32 = vcombine.high %v3351_v19, %v3367_v20  ;;  %v3382_v33 = vld [vmem:[#allocation5 + $0x800] sm:$0xff] }
 0x22d   :  { %5434 = vmatprep.subr.bf16.mxu0 %v9767_v34  ;;  %5475 = vmatprep.subr.bf16.mxu1 %v9769_v35  ;;  %v3398_v34 = vld [vmem:[#allocation5 + $0x880] sm:$0xff]  ;;  %v3383_v35 = vld [vmem:[#allocation5 + $0x808] sm:$0xff] }
 0x22e   :  { %v9959_v44 = vcombine.high %v3382_v33, %v3398_v34  ;;  %v9958_v51 = vcombine.low %v3382_v33, %v3398_v34  ;;  %v9960_v52 = vcombine.low %v3383_v35, %v3399_v36  ;;  %v3192_v34 = vld [vmem:[#allocation5 + $0x210] sm:$0xff] }
 0x230   :  { %5435 = vmatpush1.bf16.msra.mxu0 %v9766_v45  ;;  %5476 = vmatpush1.bf16.msra.mxu1 %v9768_v47  ;;  %v9961_v45 = vcombine.high %v3383_v35, %v3399_v36  ;;  %v3414_v47 = vld [vmem:[#allocation5 + $0x900] sm:$0xff]  ;;  %v3208_v35 = vld [vmem:[#allocation5 + $0x290] sm:$0xff] }
 0x231   :  { %5436 = vmatprep.subr.bf16.mxu0 %v9799_v48  ;;  %5477 = vmatprep.subr.bf16.mxu1 %v9801_v49  ;;  %v3430_v48 = vld [vmem:[#allocation5 + $0x980] sm:$0xff]  ;;  %v3415_v49 = vld [vmem:[#allocation5 + $0x908] sm:$0xff]  ;;  %v11632_v36 = vld.sshfl [vmem:[%s12049_s0] sm:$0x33 pattern:$0x76325410] }
 0x232   :  { %v9991_v53 = vcombine.high %v3414_v47, %v3430_v48  ;;  %v9990_v60 = vcombine.low %v3414_v47, %v3430_v48  ;;  %v9992_v61 = vcombine.low %v3415_v49, %v3431_v50  ;;  %v9771_v47 = vcombine.high %v3192_v34, %v3208_v35 }
 0x234   :  { %5437 = vmatpush1.bf16.msra.mxu0 %v9798_v54  ;;  %5478 = vmatpush1.bf16.msra.mxu1 %v9800_v55  ;;  %v9993_v54 = vcombine.high %v3415_v49, %v3431_v50  ;;  %v3446_v55 = vld [vmem:[#allocation5 + $0xa00] sm:$0xff]  ;;  %v3224_v49 = vld [vmem:[#allocation5 + $0x310] sm:$0xff] }
 0x235   :  { %5438 = vmatprep.subr.bf16.mxu0 %v9831_v56  ;;  %5479 = vmatprep.subr.bf16.mxu1 %v9833_v57  ;;  %v3462_v56 = vld [vmem:[#allocation5 + $0xa80] sm:$0xff]  ;;  %v3447_v57 = vld [vmem:[#allocation5 + $0xa08] sm:$0xff]  ;;  %v3240_v50 = vld [vmem:[#allocation5 + $0x390] sm:$0xff] }
 0x236   :  { %v10023_v62 = vcombine.high %v3446_v55, %v3462_v56  ;;  %v10022_v4 = vcombine.low %v3446_v55, %v3462_v56  ;;  %v10024_v5 = vcombine.low %v3447_v57, %v3463_v59  ;;  %v9803_v55 = vcombine.high %v3224_v49, %v3240_v50 }
 0x238   :  { %5439 = vmatpush1.bf16.msra.mxu0 %v9830_v63  ;;  %5480 = vmatpush1.bf16.msra.mxu1 %v9832_v0  ;;  %v10025_v63 = vcombine.high %v3447_v57, %v3463_v59  ;;  %v3478_v0 = vld [vmem:[#allocation5 + $0xb00] sm:$0xff]  ;;  %v3256_v57 = vld [vmem:[#allocation5 + $0x410] sm:$0xff] }
 0x239   :  { %5440 = vmatprep.subr.bf16.mxu0 %v9863_v1  ;;  %5481 = vmatprep.subr.bf16.mxu1 %v9865_v2  ;;  %v3494_v1 = vld [vmem:[#allocation5 + $0xb80] sm:$0xff]  ;;  %v3479_v2 = vld [vmem:[#allocation5 + $0xb08] sm:$0xff]  ;;  %v3272_v59 = vld [vmem:[#allocation5 + $0x490] sm:$0xff] }
 0x23a   :  { %v11621_v9 = vpop.f32.mrb[12].mxu0  ;;  %v11623_v16 = vpop.f32.mrb[12].mxu1  ;;  %v10055_v6 = vcombine.high %v3478_v0, %v3494_v1  ;;  %v10054_v13 = vcombine.low %v3478_v0, %v3494_v1  ;;  %v10056_v19 = vcombine.low %v3479_v2, %v3495_v3  ;;  %v9835_v0 = vcombine.high %v3256_v57, %v3272_v59 }
 0x23b   :  { %v11625_v17 = vpop.f32.mrb[13].mxu0  ;;  %v11627_v22 = vpop.f32.mrb[13].mxu1 }
 0x23c   :  { %v2754_v23 = vpop.f32.mrb[14].mxu0  ;;  %5441 = vmatpush1.bf16.msra.mxu0 %v9862_v7  ;;  %v2795_v28 = vpop.f32.mrb[14].mxu1  ;;  %5482 = vmatpush1.bf16.msra.mxu1 %v9864_v8  ;;  %v10057_v7 = vcombine.high %v3479_v2, %v3495_v3  ;;  %v3128_v8 = vld [vmem:[#allocation5 + $0x10] sm:$0xff] }
 0x23d   :  { %v2755_v29 = vpop.f32.mrb[15].mxu0  ;;  %5442 = vmatprep.subr.bf16.mxu0 %v9895_v58  ;;  %v2796_v43 = vpop.f32.mrb[15].mxu1  ;;  %5483 = vmatprep.subr.bf16.mxu1 %v9897_v11  ;;  %v3144_v58 = vld [vmem:[#allocation5 + $0x90] sm:$0xff]  ;;  %v3129_v11 = vld [vmem:[#allocation5 + $0x18] sm:$0xff] }
 0x23e   :  { %v9707_v20 = vcombine.high %v3128_v8, %v3144_v58  ;;  %v9709_v23 = vcombine.high %v3129_v11, %v3145_v12  ;;  %v3176_v28 = vld [vmem:[#allocation5 + $0x190] sm:$0xff]  ;;  %v3161_v29 = vld [vmem:[#allocation5 + $0x118] sm:$0xff]  ;;  %v9708_v43 = vcombine.low %v3129_v11, %v3145_v12 }
 0x23f   :  { %v3288_v2 = vld [vmem:[#allocation5 + $0x510] sm:$0xff] }
 0x240   :  { %5443 = vmatpush1.bf16.msra.mxu0 %v9894_v27  ;;  %5484 = vmatpush1.bf16.msra.mxu1 %v9896_v30  ;;  %v3160_v27 = vld [vmem:[#allocation5 + $0x110] sm:$0xff]  ;;  %v3177_v30 = vld [vmem:[#allocation5 + $0x198] sm:$0xff] }
 0x241   :  { %5444 = vmatprep.subr.bf16.mxu0 %v9927_v31  ;;  %5485 = vmatprep.subr.bf16.mxu1 %v9929_v32  ;;  %v9706_v31 = vcombine.low %v3128_v8, %v3144_v58  ;;  %v9739_v32 = vcombine.high %v3160_v27, %v3176_v28  ;;  %v9741_v33 = vcombine.high %v3161_v29, %v3177_v30  ;;  %v3304_v3 = vld [vmem:[#allocation5 + $0x590] sm:$0xff] }
 0x242   :  { %v9867_v8 = vcombine.high %v3288_v2, %v3304_v3  ;;  %v3320_v11 = vld [vmem:[#allocation5 + $0x610] sm:$0xff] }
 0x243   :  { %v3336_v12 = vld [vmem:[#allocation5 + $0x690] sm:$0xff] }
 0x244   :  { %5445 = vmatpush1.bf16.msra.mxu0 %v9926_v38  ;;  %5486 = vmatpush1.bf16.msra.mxu1 %v9928_v39  ;;  %v3193_v38 = vld [vmem:[#allocation5 + $0x218] sm:$0xff] }
 0x245   :  { %5446 = vmatprep.subr.bf16.mxu0 %v9959_v44  ;;  %5487 = vmatprep.subr.bf16.mxu1 %v9961_v45  ;;  %v3209_v39 = vld [vmem:[#allocation5 + $0x298] sm:$0xff]  ;;  %v9738_v44 = vcombine.low %v3160_v27, %v3176_v28  ;;  %v9740_v45 = vcombine.low %v3161_v29, %v3177_v30  ;;  %v9899_v27 = vcombine.high %v3320_v11, %v3336_v12  ;;  %v3352_v30 = vld [vmem:[#allocation5 + $0x710] sm:$0xff] }
 0x246   :  { %v9773_v48 = vcombine.high %v3193_v38, %v3209_v39 }
 0x248   :  { %5447 = vmatpush1.bf16.msra.mxu0 %v9958_v51  ;;  %5488 = vmatpush1.bf16.msra.mxu1 %v9960_v52  ;;  %v3225_v51 = vld [vmem:[#allocation5 + $0x318] sm:$0xff] }
 0x249   :  { %5448 = vmatprep.subr.bf16.mxu0 %v9991_v53  ;;  %5489 = vmatprep.subr.bf16.mxu1 %v9993_v54  ;;  %v3241_v52 = vld [vmem:[#allocation5 + $0x398] sm:$0xff]  ;;  %v9770_v53 = vcombine.low %v3192_v34, %v3208_v35  ;;  %v9772_v54 = vcombine.low %v3193_v38, %v3209_v39  ;;  %v9898_v39 = vcombine.low %v3320_v11, %v3336_v12 }
 0x24a   :  { %v9805_v56 = vcombine.high %v3225_v51, %v3241_v52  ;;  %v3369_v34 = vld [vmem:[#allocation5 + $0x798] sm:$0xff] }
 0x24c   :  { %5449 = vmatpush1.bf16.msra.mxu0 %v9990_v60  ;;  %5490 = vmatpush1.bf16.msra.mxu1 %v9992_v61  ;;  %v3257_v60 = vld [vmem:[#allocation5 + $0x418] sm:$0xff] }
 0x24d   :  { %5450 = vmatprep.subr.bf16.mxu0 %v10023_v62  ;;  %5491 = vmatprep.subr.bf16.mxu1 %v10025_v63  ;;  %v3273_v61 = vld [vmem:[#allocation5 + $0x498] sm:$0xff]  ;;  %v9802_v62 = vcombine.low %v3224_v49, %v3240_v50  ;;  %v9804_v63 = vcombine.low %v3225_v51, %v3241_v52  ;;  %v3384_v51 = vld [vmem:[#allocation5 + $0x810] sm:$0xff] }
 0x24e   :  { %v9837_v1 = vcombine.high %v3257_v60, %v3273_v61  ;;  %v3400_v52 = vld [vmem:[#allocation5 + $0x890] sm:$0xff] }
 0x250   :  { %5451 = vmatpush1.bf16.msra.mxu0 %v10022_v4  ;;  %5492 = vmatpush1.bf16.msra.mxu1 %v10024_v5  ;;  %v3289_v4 = vld [vmem:[#allocation5 + $0x518] sm:$0xff] }
 0x251   :  { %5452 = vmatprep.subr.bf16.mxu0 %v10055_v6  ;;  %5493 = vmatprep.subr.bf16.mxu1 %v10057_v7  ;;  %v3305_v5 = vld [vmem:[#allocation5 + $0x598] sm:$0xff]  ;;  %v9834_v6 = vcombine.low %v3256_v57, %v3272_v59  ;;  %v9836_v7 = vcombine.low %v3257_v60, %v3273_v61  ;;  %v9963_v57 = vcombine.high %v3384_v51, %v3400_v52  ;;  %v3416_v60 = vld [vmem:[#allocation5 + $0x910] sm:$0xff] }
 0x252   :  { %v9869_v58 = vcombine.high %v3289_v4, %v3305_v5  ;;  %v3432_v61 = vld [vmem:[#allocation5 + $0x990] sm:$0xff] }
 0x254   :  { %5453 = vmatpush1.bf16.msra.mxu0 %v10054_v13  ;;  %5494 = vmatpush1.bf16.msra.mxu1 %v10056_v19  ;;  %v3321_v13 = vld [vmem:[#allocation5 + $0x618] sm:$0xff] }
 0x255   :  { %5512 = vmatprep.subr.bf16.mxu0 %v9707_v20  ;;  %5553 = vmatprep.subr.bf16.mxu1 %v9709_v23  ;;  %v3337_v19 = vld [vmem:[#allocation5 + $0x698] sm:$0xff]  ;;  %v9866_v20 = vcombine.low %v3288_v2, %v3304_v3  ;;  %v9868_v23 = vcombine.low %v3289_v4, %v3305_v5  ;;  %v9995_v2 = vcombine.high %v3416_v60, %v3432_v61  ;;  %v3448_v4 = vld [vmem:[#allocation5 + $0xa10] sm:$0xff] }
 0x256   :  { %v9901_v29 = vcombine.high %v3321_v13, %v3337_v19  ;;  %v3464_v5 = vld [vmem:[#allocation5 + $0xa90] sm:$0xff] }
 0x257   :  { %5463 = vmatmul.mubr.bf16.vlgmr.msra.gmra.mrb[32].mxu0 %v11632_v36  ;;  %5504 = vmatmul.mubr.bf16.vlgmr.msra.gmra.mrb[32].mxu1 %v11632_v36  ;;  %v10027_v11 = vcombine.high %v3448_v4, %v3464_v5 }
 0x258   :  { %5513 = vmatpush1.bf16.msra.mxu0 %v9706_v31  ;;  %5554 = vmatpush1.bf16.msra.mxu1 %v9708_v43  ;;  %v3368_v31 = vld [vmem:[#allocation5 + $0x790] sm:$0xff] }
 0x259   :  { %5514 = vmatprep.subr.bf16.mxu0 %v9739_v32  ;;  %5555 = vmatprep.subr.bf16.mxu1 %v9741_v33  ;;  %v3353_v33 = vld [vmem:[#allocation5 + $0x718] sm:$0xff] }
 0x25a   :  { %10088 = vmatprep.mubr.msk.bf16.mxu0 %vm2466_vm0, %v11533_v46  ;;  %10089 = vmatprep.mubr.msk.bf16.mxu1 %vm2466_vm0, %v11533_v46  ;;  %v9933_v50 = vcombine.high %v3353_v33, %v3369_v34 }
 0x25c   :  { %5515 = vmatpush1.bf16.msra.mxu0 %v9738_v44  ;;  %5556 = vmatpush1.bf16.msra.mxu1 %v9740_v45 }
 0x25d   :  { %5516 = vmatprep.subr.bf16.mxu0 %v9771_v47  ;;  %5557 = vmatprep.subr.bf16.mxu1 %v9773_v48  ;;  %v9900_v47 = vcombine.low %v3321_v13, %v3337_v19  ;;  %v9931_v48 = vcombine.high %v3352_v30, %v3368_v31  ;;  %v3480_v13 = vld [vmem:[#allocation5 + $0xb10] sm:$0xff] }
 0x25e   :  { %v3496_v19 = vld [vmem:[#allocation5 + $0xb90] sm:$0xff] }
 0x260   :  { %5517 = vmatpush1.bf16.msra.mxu0 %v9770_v53  ;;  %5558 = vmatpush1.bf16.msra.mxu1 %v9772_v54  ;;  %v3385_v53 = vld [vmem:[#allocation5 + $0x818] sm:$0xff] }
 0x261   :  { %5518 = vmatprep.subr.bf16.mxu0 %v9803_v55  ;;  %5559 = vmatprep.subr.bf16.mxu1 %v9805_v56  ;;  %v3401_v54 = vld [vmem:[#allocation5 + $0x898] sm:$0xff]  ;;  %v9930_v55 = vcombine.low %v3352_v30, %v3368_v31  ;;  %v9932_v56 = vcombine.low %v3353_v33, %v3369_v34  ;;  %v10059_v30 = vcombine.high %v3480_v13, %v3496_v19  ;;  %v3130_v33 = vld [vmem:[#allocation5 + $0x20] sm:$0xff] }
 0x262   :  { %v9965_v59 = vcombine.high %v3385_v53, %v3401_v54  ;;  %v3146_v34 = vld [vmem:[#allocation5 + $0xa0] sm:$0xff] }
 0x264   :  { %5519 = vmatpush1.bf16.msra.mxu0 %v9802_v62  ;;  %5560 = vmatpush1.bf16.msra.mxu1 %v9804_v63  ;;  %v3417_v62 = vld [vmem:[#allocation5 + $0x918] sm:$0xff] }
 0x265   :  { %5520 = vmatprep.subr.bf16.mxu0 %v9835_v0  ;;  %5561 = vmatprep.subr.bf16.mxu1 %v9837_v1  ;;  %v3433_v63 = vld [vmem:[#allocation5 + $0x998] sm:$0xff]  ;;  %v9962_v0 = vcombine.low %v3384_v51, %v3400_v52  ;;  %v9964_v1 = vcombine.low %v3385_v53, %v3401_v54  ;;  %v3163_v51 = vld [vmem:[#allocation5 + $0x128] sm:$0xff]  ;;  %v9710_v53 = vcombine.low %v3130_v33, %v3146_v34 }
 0x266   :  { %v9997_v3 = vcombine.high %v3417_v62, %v3433_v63  ;;  %v3179_v52 = vld [vmem:[#allocation5 + $0x1a8] sm:$0xff] }
 0x268   :  { %5521 = vmatpush1.bf16.msra.mxu0 %v9834_v6  ;;  %5562 = vmatpush1.bf16.msra.mxu1 %v9836_v7  ;;  %v3449_v6 = vld [vmem:[#allocation5 + $0xa18] sm:$0xff] }
 0x269   :  { %5522 = vmatprep.subr.bf16.mxu0 %v9867_v8  ;;  %5563 = vmatprep.subr.bf16.mxu1 %v9869_v58  ;;  %v3465_v7 = vld [vmem:[#allocation5 + $0xa98] sm:$0xff]  ;;  %v9994_v8 = vcombine.low %v3416_v60, %v3432_v61  ;;  %v9996_v58 = vcombine.low %v3417_v62, %v3433_v63  ;;  %v3195_v60 = vld [vmem:[#allocation5 + $0x228] sm:$0xff]  ;;  %v9744_v63 = vcombine.low %v3163_v51, %v3179_v52 }
 0x26a   :  { %v11640_v28 = vpop.f32.mrb[16].mxu0  ;;  %v11642_v43 = vpop.f32.mrb[16].mxu1  ;;  %v10029_v12 = vcombine.high %v3449_v6, %v3465_v7  ;;  %v3211_v61 = vld [vmem:[#allocation5 + $0x2a8] sm:$0xff] }
 0x26b   :  { %v11644_v32 = vpop.f32.mrb[17].mxu0  ;;  %v11646_v35 = vpop.f32.mrb[17].mxu1 }
 0x26c   :  { %v2836_v38 = vpop.f32.mrb[18].mxu0  ;;  %5523 = vmatpush1.bf16.msra.mxu0 %v9866_v20  ;;  %v2877_v44 = vpop.f32.mrb[18].mxu1  ;;  %5564 = vmatpush1.bf16.msra.mxu1 %v9868_v23  ;;  %v3481_v20 = vld [vmem:[#allocation5 + $0xb18] sm:$0xff] }
 0x26d   :  { %v2837_v45 = vpop.f32.mrb[19].mxu0  ;;  %5524 = vmatprep.subr.bf16.mxu0 %v9899_v27  ;;  %v2878_v49 = vpop.f32.mrb[19].mxu1  ;;  %5565 = vmatprep.subr.bf16.mxu1 %v9901_v29  ;;  %v3497_v23 = vld [vmem:[#allocation5 + $0xb98] sm:$0xff]  ;;  %v10026_v27 = vcombine.low %v3448_v4, %v3464_v5  ;;  %v10028_v29 = vcombine.low %v3449_v6, %v3465_v7  ;;  %v3131_v38 = vld [vmem:[#allocation5 + $0x28] sm:$0xff]  ;;  %v10058_v44 = vcombine.low %v3480_v13, %v3496_v19 }
 0x26e   :  { %v10061_v31 = vcombine.high %v3481_v20, %v3497_v23  ;;  %v10060_v45 = vcombine.low %v3481_v20, %v3497_v23  ;;  %v3162_v49 = vld [vmem:[#allocation5 + $0x120] sm:$0xff]  ;;  %v3227_v4 = vld [vmem:[#allocation5 + $0x328] sm:$0xff]  ;;  %v9776_v7 = vcombine.low %v3195_v60, %v3211_v61 }
 0x26f   :  { %v3243_v5 = vld [vmem:[#allocation5 + $0x3a8] sm:$0xff] }
 0x270   :  { %5525 = vmatpush1.bf16.msra.mxu0 %v9898_v39  ;;  %5566 = vmatpush1.bf16.msra.mxu1 %v9900_v47  ;;  %v3147_v39 = vld [vmem:[#allocation5 + $0xa8] sm:$0xff]  ;;  %v9711_v47 = vcombine.high %v3130_v33, %v3146_v34  ;;  %v9808_v23 = vcombine.low %v3227_v4, %v3243_v5 }
 0x271   :  { %5526 = vmatprep.subr.bf16.mxu0 %v9931_v48  ;;  %5567 = vmatprep.subr.bf16.mxu1 %v9933_v50  ;;  %v9713_v48 = vcombine.high %v3131_v38, %v3147_v39  ;;  %v3178_v50 = vld [vmem:[#allocation5 + $0x1a0] sm:$0xff]  ;;  %v9712_v54 = vcombine.low %v3131_v38, %v3147_v39  ;;  %v3259_v13 = vld [vmem:[#allocation5 + $0x428] sm:$0xff] }
 0x272   :  { %v9742_v62 = vcombine.low %v3162_v49, %v3178_v50  ;;  %v3275_v19 = vld [vmem:[#allocation5 + $0x4a8] sm:$0xff] }
 0x273   :  { %v3291_v33 = vld [vmem:[#allocation5 + $0x528] sm:$0xff]  ;;  %v9840_v39 = vcombine.low %v3259_v13, %v3275_v19 }
 0x274   :  { %5527 = vmatpush1.bf16.msra.mxu0 %v9930_v55  ;;  %5568 = vmatpush1.bf16.msra.mxu1 %v9932_v56  ;;  %v9743_v55 = vcombine.high %v3162_v49, %v3178_v50  ;;  %v9745_v56 = vcombine.high %v3163_v51, %v3179_v52  ;;  %v3307_v34 = vld [vmem:[#allocation5 + $0x5a8] sm:$0xff] }
 0x275   :  { %5528 = vmatprep.subr.bf16.mxu0 %v9963_v57  ;;  %5569 = vmatprep.subr.bf16.mxu1 %v9965_v59  ;;  %v3194_v57 = vld [vmem:[#allocation5 + $0x220] sm:$0xff]  ;;  %v3323_v49 = vld [vmem:[#allocation5 + $0x628] sm:$0xff]  ;;  %v9872_v52 = vcombine.low %v3291_v33, %v3307_v34 }
 0x276   :  { %v3210_v59 = vld [vmem:[#allocation5 + $0x2a0] sm:$0xff]  ;;  %v3339_v50 = vld [vmem:[#allocation5 + $0x6a8] sm:$0xff] }
 0x277   :  { %v9774_v6 = vcombine.low %v3194_v57, %v3210_v59 }
 0x278   :  { %5529 = vmatpush1.bf16.msra.mxu0 %v9962_v0  ;;  %5570 = vmatpush1.bf16.msra.mxu1 %v9964_v1  ;;  %v9775_v0 = vcombine.high %v3194_v57, %v3210_v59  ;;  %v9777_v1 = vcombine.high %v3195_v60, %v3211_v61  ;;  %v3370_v57 = vld [vmem:[#allocation5 + $0x7a0] sm:$0xff]  ;;  %v3355_v61 = vld [vmem:[#allocation5 + $0x728] sm:$0xff] }
 0x279   :  { %5530 = vmatprep.subr.bf16.mxu0 %v9995_v2  ;;  %5571 = vmatprep.subr.bf16.mxu1 %v9997_v3  ;;  %v3226_v2 = vld [vmem:[#allocation5 + $0x320] sm:$0xff] }
 0x27a   :  { %v3242_v3 = vld [vmem:[#allocation5 + $0x3a0] sm:$0xff] }
 0x27b   :  { %v9806_v20 = vcombine.low %v3226_v2, %v3242_v3 }
 0x27c   :  { %5531 = vmatpush1.bf16.msra.mxu0 %v9994_v8  ;;  %5572 = vmatpush1.bf16.msra.mxu1 %v9996_v58  ;;  %v9807_v8 = vcombine.high %v3226_v2, %v3242_v3  ;;  %v9809_v58 = vcombine.high %v3227_v4, %v3243_v5  ;;  %v9904_v4 = vcombine.low %v3323_v49, %v3339_v50 }
 0x27d   :  { %5532 = vmatprep.subr.bf16.mxu0 %v10027_v11  ;;  %5573 = vmatprep.subr.bf16.mxu1 %v10029_v12  ;;  %v3258_v11 = vld [vmem:[#allocation5 + $0x420] sm:$0xff] }
 0x27e   :  { %v3274_v12 = vld [vmem:[#allocation5 + $0x4a0] sm:$0xff] }
 0x27f   :  { %v9838_v38 = vcombine.low %v3258_v11, %v3274_v12 }
 0x280   :  { %5533 = vmatpush1.bf16.msra.mxu0 %v10026_v27  ;;  %5574 = vmatpush1.bf16.msra.mxu1 %v10028_v29  ;;  %v9839_v27 = vcombine.high %v3258_v11, %v3274_v12  ;;  %v9841_v29 = vcombine.high %v3259_v13, %v3275_v19  ;;  %v3387_v11 = vld [vmem:[#allocation5 + $0x828] sm:$0xff] }
 0x281   :  { %5534 = vmatprep.subr.bf16.mxu0 %v10059_v30  ;;  %5575 = vmatprep.subr.bf16.mxu1 %v10061_v31  ;;  %v3290_v30 = vld [vmem:[#allocation5 + $0x520] sm:$0xff]  ;;  %v3403_v12 = vld [vmem:[#allocation5 + $0x8a8] sm:$0xff] }
 0x282   :  { %v3306_v31 = vld [vmem:[#allocation5 + $0x5a0] sm:$0xff] }
 0x283   :  { %v9870_v51 = vcombine.low %v3290_v30, %v3306_v31 }
 0x284   :  { %5535 = vmatpush1.bf16.msra.mxu0 %v10058_v44  ;;  %5576 = vmatpush1.bf16.msra.mxu1 %v10060_v45  ;;  %v9871_v44 = vcombine.high %v3290_v30, %v3306_v31  ;;  %v9873_v45 = vcombine.high %v3291_v33, %v3307_v34  ;;  %v3419_v30 = vld [vmem:[#allocation5 + $0x928] sm:$0xff]  ;;  %v9968_v34 = vcombine.low %v3387_v11, %v3403_v12 }
 0x285   :  { %5594 = vmatprep.subr.bf16.mxu0 %v9711_v47  ;;  %5635 = vmatprep.subr.bf16.mxu1 %v9713_v48  ;;  %v3322_v47 = vld [vmem:[#allocation5 + $0x620] sm:$0xff]  ;;  %v3435_v31 = vld [vmem:[#allocation5 + $0x9a8] sm:$0xff] }
 0x286   :  { %v3338_v48 = vld [vmem:[#allocation5 + $0x6a0] sm:$0xff] }
 0x287   :  { %5545 = vmatmul.mubr.bf16.vlgmr.msra.gmra.mrb[36].mxu0 %v11632_v36  ;;  %5586 = vmatmul.mubr.bf16.vlgmr.msra.gmra.mrb[36].mxu1 %v11632_v36 }
 0x288   :  { %5595 = vmatpush1.bf16.msra.mxu0 %v9710_v53  ;;  %5636 = vmatpush1.bf16.msra.mxu1 %v9712_v54  ;;  %v9903_v53 = vcombine.high %v3322_v47, %v3338_v48 }
 0x289   :  { %5596 = vmatprep.subr.bf16.mxu0 %v9743_v55  ;;  %5637 = vmatprep.subr.bf16.mxu1 %v9745_v56  ;;  %v9905_v55 = vcombine.high %v3323_v49, %v3339_v50  ;;  %v3354_v56 = vld [vmem:[#allocation5 + $0x720] sm:$0xff]  ;;  %v10000_v50 = vcombine.low %v3419_v30, %v3435_v31 }
 0x28a   :  { %10090 = vmatprep.mubr.msk.bf16.mxu0 %vm2466_vm0, %v11533_v46  ;;  %10091 = vmatprep.mubr.msk.bf16.mxu1 %vm2466_vm0, %v11533_v46  ;;  %v9935_v5 = vcombine.high %v3354_v56, %v3370_v57  ;;  %v9934_v13 = vcombine.low %v3354_v56, %v3370_v57  ;;  %v3483_v56 = vld [vmem:[#allocation5 + $0xb28] sm:$0xff] }
 0x28b   :  { %v3499_v57 = vld [vmem:[#allocation5 + $0xba8] sm:$0xff] }
 0x28c   :  { %5597 = vmatpush1.bf16.msra.mxu0 %v9742_v62  ;;  %5638 = vmatpush1.bf16.msra.mxu1 %v9744_v63  ;;  %v3371_v62 = vld [vmem:[#allocation5 + $0x7a8] sm:$0xff] }
 0x28d   :  { %5598 = vmatprep.subr.bf16.mxu0 %v9775_v0  ;;  %5639 = vmatprep.subr.bf16.mxu1 %v9777_v1  ;;  %v9902_v1 = vcombine.low %v3322_v47, %v3338_v48  ;;  %v9936_v19 = vcombine.low %v3355_v61, %v3371_v62  ;;  %v3451_v47 = vld [vmem:[#allocation5 + $0xa28] sm:$0xff] }
 0x28e   :  { %v3467_v48 = vld [vmem:[#allocation5 + $0xaa8] sm:$0xff] }
 0x290   :  { %5599 = vmatpush1.bf16.msra.mxu0 %v9774_v6  ;;  %5640 = vmatpush1.bf16.msra.mxu1 %v9776_v7  ;;  %v9937_v7 = vcombine.high %v3355_v61, %v3371_v62  ;;  %v10032_v62 = vcombine.low %v3451_v47, %v3467_v48 }
 0x291   :  { %5600 = vmatprep.subr.bf16.mxu0 %v9807_v8  ;;  %5641 = vmatprep.subr.bf16.mxu1 %v9809_v58  ;;  %v3386_v8 = vld [vmem:[#allocation5 + $0x820] sm:$0xff] }
 0x292   :  { %v3402_v58 = vld [vmem:[#allocation5 + $0x8a0] sm:$0xff] }
 0x293   :  { %v9966_v33 = vcombine.low %v3386_v8, %v3402_v58 }
 0x294   :  { %5601 = vmatpush1.bf16.msra.mxu0 %v9806_v20  ;;  %5642 = vmatpush1.bf16.msra.mxu1 %v9808_v23  ;;  %v9967_v20 = vcombine.high %v3386_v8, %v3402_v58  ;;  %v9969_v23 = vcombine.high %v3387_v11, %v3403_v12  ;;  %v3164_v11 = vld [vmem:[#allocation5 + $0x130] sm:$0xff] }
 0x295   :  { %5602 = vmatprep.subr.bf16.mxu0 %v9839_v27  ;;  %5643 = vmatprep.subr.bf16.mxu1 %v9841_v29  ;;  %v3418_v27 = vld [vmem:[#allocation5 + $0x920] sm:$0xff]  ;;  %v3180_v12 = vld [vmem:[#allocation5 + $0x1b0] sm:$0xff] }
 0x296   :  { %v3434_v29 = vld [vmem:[#allocation5 + $0x9a0] sm:$0xff] }
 0x297   :  { %v9998_v49 = vcombine.low %v3418_v27, %v3434_v29 }
 0x298   :  { %5603 = vmatpush1.bf16.msra.mxu0 %v9838_v38  ;;  %5644 = vmatpush1.bf16.msra.mxu1 %v9840_v39  ;;  %v9999_v38 = vcombine.high %v3418_v27, %v3434_v29  ;;  %v10001_v39 = vcombine.high %v3419_v30, %v3435_v31  ;;  %v9747_v27 = vcombine.high %v3164_v11, %v3180_v12  ;;  %v3196_v30 = vld [vmem:[#allocation5 + $0x230] sm:$0xff] }
 0x299   :  { %5604 = vmatprep.subr.bf16.mxu0 %v9871_v44  ;;  %5645 = vmatprep.subr.bf16.mxu1 %v9873_v45  ;;  %v3450_v44 = vld [vmem:[#allocation5 + $0xa20] sm:$0xff]  ;;  %v3212_v31 = vld [vmem:[#allocation5 + $0x2b0] sm:$0xff] }
 0x29a   :  { %v11654_v54 = vpop.f32.mrb[20].mxu0  ;;  %v11656_v59 = vpop.f32.mrb[20].mxu1  ;;  %v3466_v45 = vld [vmem:[#allocation5 + $0xaa0] sm:$0xff] }
 0x29b   :  { %v11658_v60 = vpop.f32.mrb[21].mxu0  ;;  %v11660_v63 = vpop.f32.mrb[21].mxu1  ;;  %v10030_v61 = vcombine.low %v3450_v44, %v3466_v45 }
 0x29c   :  { %v2918_v0 = vpop.f32.mrb[22].mxu0  ;;  %5605 = vmatpush1.bf16.msra.mxu0 %v9870_v51  ;;  %v2959_v2 = vpop.f32.mrb[22].mxu1  ;;  %5646 = vmatpush1.bf16.msra.mxu1 %v9872_v52  ;;  %v10031_v51 = vcombine.high %v3450_v44, %v3466_v45  ;;  %v10033_v52 = vcombine.high %v3451_v47, %v3467_v48  ;;  %v9779_v44 = vcombine.high %v3196_v30, %v3212_v31  ;;  %v3228_v47 = vld [vmem:[#allocation5 + $0x330] sm:$0xff] }
 0x29d   :  { %v2919_v3 = vpop.f32.mrb[23].mxu0  ;;  %5606 = vmatprep.subr.bf16.mxu0 %v9903_v53  ;;  %v2960_v6 = vpop.f32.mrb[23].mxu1  ;;  %5647 = vmatprep.subr.bf16.mxu1 %v9905_v55  ;;  %v3482_v53 = vld [vmem:[#allocation5 + $0xb20] sm:$0xff]  ;;  %v3132_v2 = vld [vmem:[#allocation5 + $0x30] sm:$0xff] }
 0x29e   :  { %v3498_v55 = vld [vmem:[#allocation5 + $0xba0] sm:$0xff]  ;;  %v3148_v3 = vld [vmem:[#allocation5 + $0xb0] sm:$0xff] }
 0x29f   :  { %v10063_v0 = vcombine.high %v3482_v53, %v3498_v55  ;;  %v10062_v6 = vcombine.low %v3482_v53, %v3498_v55  ;;  %v9715_v8 = vcombine.high %v3132_v2, %v3148_v3  ;;  %v3244_v48 = vld [vmem:[#allocation5 + $0x3b0] sm:$0xff] }
 0x2a0   :  { %5607 = vmatpush1.bf16.msra.mxu0 %v9902_v1  ;;  %5648 = vmatpush1.bf16.msra.mxu1 %v9904_v4  ;;  %v10065_v1 = vcombine.high %v3483_v56, %v3499_v57  ;;  %v3133_v4 = vld [vmem:[#allocation5 + $0x38] sm:$0xff]  ;;  %v9811_v53 = vcombine.high %v3228_v47, %v3244_v48 }
 0x2a1   :  { %5608 = vmatprep.subr.bf16.mxu0 %v9935_v5  ;;  %5649 = vmatprep.subr.bf16.mxu1 %v9937_v7  ;;  %v3149_v5 = vld [vmem:[#allocation5 + $0xb8] sm:$0xff]  ;;  %v10064_v7 = vcombine.low %v3483_v56, %v3499_v57  ;;  %v3260_v56 = vld [vmem:[#allocation5 + $0x430] sm:$0xff] }
 0x2a2   :  { %v9717_v58 = vcombine.high %v3133_v4, %v3149_v5  ;;  %v3276_v57 = vld [vmem:[#allocation5 + $0x4b0] sm:$0xff] }
 0x2a4   :  { %5609 = vmatpush1.bf16.msra.mxu0 %v9934_v13  ;;  %5650 = vmatpush1.bf16.msra.mxu1 %v9936_v19  ;;  %v3165_v13 = vld [vmem:[#allocation5 + $0x138] sm:$0xff] }
 0x2a5   :  { %5610 = vmatprep.subr.bf16.mxu0 %v9967_v20  ;;  %5651 = vmatprep.subr.bf16.mxu1 %v9969_v23  ;;  %v3181_v19 = vld [vmem:[#allocation5 + $0x1b8] sm:$0xff]  ;;  %v9714_v20 = vcombine.low %v3132_v2, %v3148_v3  ;;  %v9716_v23 = vcombine.low %v3133_v4, %v3149_v5  ;;  %v9843_v2 = vcombine.high %v3260_v56, %v3276_v57  ;;  %v3292_v4 = vld [vmem:[#allocation5 + $0x530] sm:$0xff] }
 0x2a6   :  { %v9749_v29 = vcombine.high %v3165_v13, %v3181_v19  ;;  %v3308_v5 = vld [vmem:[#allocation5 + $0x5b0] sm:$0xff] }
 0x2a8   :  { %5611 = vmatpush1.bf16.msra.mxu0 %v9966_v33  ;;  %5652 = vmatpush1.bf16.msra.mxu1 %v9968_v34  ;;  %v3197_v33 = vld [vmem:[#allocation5 + $0x238] sm:$0xff] }
 0x2a9   :  { %5612 = vmatprep.subr.bf16.mxu0 %v9999_v38  ;;  %5653 = vmatprep.subr.bf16.mxu1 %v10001_v39  ;;  %v3213_v34 = vld [vmem:[#allocation5 + $0x2b8] sm:$0xff]  ;;  %v9746_v38 = vcombine.low %v3164_v11, %v3180_v12  ;;  %v9748_v39 = vcombine.low %v3165_v13, %v3181_v19  ;;  %v9875_v11 = vcombine.high %v3292_v4, %v3308_v5  ;;  %v3324_v13 = vld [vmem:[#allocation5 + $0x630] sm:$0xff] }
 0x2aa   :  { %v9781_v45 = vcombine.high %v3197_v33, %v3213_v34  ;;  %v3340_v19 = vld [vmem:[#allocation5 + $0x6b0] sm:$0xff] }
 0x2ac   :  { %5613 = vmatpush1.bf16.msra.mxu0 %v9998_v49  ;;  %5654 = vmatpush1.bf16.msra.mxu1 %v10000_v50  ;;  %v3229_v49 = vld [vmem:[#allocation5 + $0x338] sm:$0xff] }
 0x2ad   :  { %5614 = vmatprep.subr.bf16.mxu0 %v10031_v51  ;;  %5655 = vmatprep.subr.bf16.mxu1 %v10033_v52  ;;  %v3245_v50 = vld [vmem:[#allocation5 + $0x3b8] sm:$0xff]  ;;  %v9778_v51 = vcombine.low %v3196_v30, %v3212_v31  ;;  %v9780_v52 = vcombine.low %v3197_v33, %v3213_v34  ;;  %v9907_v30 = vcombine.high %v3324_v13, %v3340_v19  ;;  %v3356_v34 = vld [vmem:[#allocation5 + $0x730] sm:$0xff] }
 0x2ae   :  { %v9813_v55 = vcombine.high %v3229_v49, %v3245_v50 }
 0x2b0   :  { %5615 = vmatpush1.bf16.msra.mxu0 %v10030_v61  ;;  %5656 = vmatpush1.bf16.msra.mxu1 %v10032_v62  ;;  %v3261_v61 = vld [vmem:[#allocation5 + $0x438] sm:$0xff] }
 0x2b1   :  { %5616 = vmatprep.subr.bf16.mxu0 %v10063_v0  ;;  %5657 = vmatprep.subr.bf16.mxu1 %v10065_v1  ;;  %v3277_v62 = vld [vmem:[#allocation5 + $0x4b8] sm:$0xff]  ;;  %v9810_v0 = vcombine.low %v3228_v47, %v3244_v48  ;;  %v9812_v1 = vcombine.low %v3229_v49, %v3245_v50  ;;  %v9906_v50 = vcombine.low %v3324_v13, %v3340_v19 }
 0x2b2   :  { %v9845_v3 = vcombine.high %v3261_v61, %v3277_v62  ;;  %v3373_v47 = vld [vmem:[#allocation5 + $0x7b8] sm:$0xff] }
 0x2b4   :  { %5617 = vmatpush1.bf16.msra.mxu0 %v10062_v6  ;;  %5658 = vmatpush1.bf16.msra.mxu1 %v10064_v7  ;;  %v3293_v6 = vld [vmem:[#allocation5 + $0x538] sm:$0xff] }
 0x2b5   :  { %5676 = vmatprep.subr.bf16.mxu0 %v9715_v8  ;;  %5717 = vmatprep.subr.bf16.mxu1 %v9717_v58  ;;  %v3309_v7 = vld [vmem:[#allocation5 + $0x5b8] sm:$0xff]  ;;  %v9842_v8 = vcombine.low %v3260_v56, %v3276_v57  ;;  %v9844_v58 = vcombine.low %v3261_v61, %v3277_v62  ;;  %v3388_v61 = vld [vmem:[#allocation5 + $0x830] sm:$0xff] }
 0x2b6   :  { %v9877_v12 = vcombine.high %v3293_v6, %v3309_v7  ;;  %v3404_v62 = vld [vmem:[#allocation5 + $0x8b0] sm:$0xff] }
 0x2b7   :  { %5627 = vmatmul.mubr.bf16.vlgmr.msra.gmra.mrb[40].mxu0 %v11632_v36  ;;  %5668 = vmatmul.mubr.bf16.vlgmr.msra.gmra.mrb[40].mxu1 %v11632_v36 }
 0x2b8   :  { %5677 = vmatpush1.bf16.msra.mxu0 %v9714_v20  ;;  %5718 = vmatpush1.bf16.msra.mxu1 %v9716_v23  ;;  %v3325_v20 = vld [vmem:[#allocation5 + $0x638] sm:$0xff] }
 0x2b9   :  { %5678 = vmatprep.subr.bf16.mxu0 %v9747_v27  ;;  %5719 = vmatprep.subr.bf16.mxu1 %v9749_v29  ;;  %v3341_v23 = vld [vmem:[#allocation5 + $0x6b8] sm:$0xff]  ;;  %v9874_v27 = vcombine.low %v3292_v4, %v3308_v5  ;;  %v9876_v29 = vcombine.low %v3293_v6, %v3309_v7  ;;  %v9971_v4 = vcombine.high %v3388_v61, %v3404_v62  ;;  %v3420_v6 = vld [vmem:[#allocation5 + $0x930] sm:$0xff] }
 0x2ba   :  { %10092 = vmatprep.mubr.msk.bf16.mxu0 %vm2466_vm0, %v11533_v46  ;;  %10093 = vmatprep.mubr.msk.bf16.mxu1 %vm2466_vm0, %v11533_v46  ;;  %v9909_v33 = vcombine.high %v3325_v20, %v3341_v23  ;;  %v3436_v7 = vld [vmem:[#allocation5 + $0x9b0] sm:$0xff] }
 0x2bb   :  { %v10003_v13 = vcombine.high %v3420_v6, %v3436_v7 }
 0x2bc   :  { %5679 = vmatpush1.bf16.msra.mxu0 %v9746_v38  ;;  %5720 = vmatpush1.bf16.msra.mxu1 %v9748_v39  ;;  %v3372_v38 = vld [vmem:[#allocation5 + $0x7b0] sm:$0xff] }
 0x2bd   :  { %5680 = vmatprep.subr.bf16.mxu0 %v9779_v44  ;;  %5721 = vmatprep.subr.bf16.mxu1 %v9781_v45  ;;  %v3357_v45 = vld [vmem:[#allocation5 + $0x738] sm:$0xff] }
 0x2be   :  { %v9941_v57 = vcombine.high %v3357_v45, %v3373_v47 }
 0x2c0   :  { %5681 = vmatpush1.bf16.msra.mxu0 %v9778_v51  ;;  %5722 = vmatpush1.bf16.msra.mxu1 %v9780_v52 }
 0x2c1   :  { %5682 = vmatprep.subr.bf16.mxu0 %v9811_v53  ;;  %5723 = vmatprep.subr.bf16.mxu1 %v9813_v55  ;;  %v9908_v53 = vcombine.low %v3325_v20, %v3341_v23  ;;  %v9939_v55 = vcombine.high %v3356_v34, %v3372_v38  ;;  %v3452_v20 = vld [vmem:[#allocation5 + $0xa30] sm:$0xff] }
 0x2c2   :  { %v3468_v23 = vld [vmem:[#allocation5 + $0xab0] sm:$0xff] }
 0x2c4   :  { %5683 = vmatpush1.bf16.msra.mxu0 %v9810_v0  ;;  %5724 = vmatpush1.bf16.msra.mxu1 %v9812_v1  ;;  %v3389_v0 = vld [vmem:[#allocation5 + $0x838] sm:$0xff] }
 0x2c5   :  { %5684 = vmatprep.subr.bf16.mxu0 %v9843_v2  ;;  %5725 = vmatprep.subr.bf16.mxu1 %v9845_v3  ;;  %v3405_v1 = vld [vmem:[#allocation5 + $0x8b8] sm:$0xff]  ;;  %v9938_v2 = vcombine.low %v3356_v34, %v3372_v38  ;;  %v9940_v3 = vcombine.low %v3357_v45, %v3373_v47  ;;  %v10035_v34 = vcombine.high %v3452_v20, %v3468_v23  ;;  %v3484_v45 = vld [vmem:[#allocation5 + $0xb30] sm:$0xff] }
 0x2c6   :  { %v9973_v5 = vcombine.high %v3389_v0, %v3405_v1  ;;  %v3500_v47 = vld [vmem:[#allocation5 + $0xbb0] sm:$0xff] }
 0x2c8   :  { %5685 = vmatpush1.bf16.msra.mxu0 %v9842_v8  ;;  %5726 = vmatpush1.bf16.msra.mxu1 %v9844_v58  ;;  %v3421_v8 = vld [vmem:[#allocation5 + $0x938] sm:$0xff] }
 0x2c9   :  { %5686 = vmatprep.subr.bf16.mxu0 %v9875_v11  ;;  %5727 = vmatprep.subr.bf16.mxu1 %v9877_v12  ;;  %v3437_v58 = vld [vmem:[#allocation5 + $0x9b8] sm:$0xff]  ;;  %v9970_v11 = vcombine.low %v3388_v61, %v3404_v62  ;;  %v9972_v12 = vcombine.low %v3389_v0, %v3405_v1  ;;  %v3135_v61 = vld [vmem:[#allocation5 + $0x48] sm:$0xff]  ;;  %v10066_v0 = vcombine.low %v3484_v45, %v3500_v47 }
 0x2ca   :  { %v11668_v31 = vpop.f32.mrb[24].mxu0  ;;  %v11670_v39 = vpop.f32.mrb[24].mxu1  ;;  %v10005_v19 = vcombine.high %v3421_v8, %v3437_v58  ;;  %v3151_v62 = vld [vmem:[#allocation5 + $0xc8] sm:$0xff] }
 0x2cb   :  { %12063 = vst [vmem:[#allocation24_spill] sm:$0xff] %v11670_v39  ;;  %v11672_v44 = vpop.f32.mrb[25].mxu0  ;;  %v11674_v48 = vpop.f32.mrb[25].mxu1 }
 0x2cc   :  { %12064 = vst [vmem:[#allocation25_spill] sm:$0xff] %v11672_v44  ;;  %12065 = vst [vmem:[#allocation26_spill] sm:$0xff] %v11674_v48  ;;  %v3000_v49 = vpop.f32.mrb[26].mxu0  ;;  %5687 = vmatpush1.bf16.msra.mxu0 %v9874_v27  ;;  %v3041_v51 = vpop.f32.mrb[26].mxu1  ;;  %5728 = vmatpush1.bf16.msra.mxu1 %v9876_v29  ;;  %v3453_v27 = vld [vmem:[#allocation5 + $0xa38] sm:$0xff]  ;;  %v3412_v48 = vld [vmem:[#allocation5 + $0x8f0] sm:$0xff] }
 0x2cd   :  { %v3001_v52 = vpop.f32.mrb[27].mxu0  ;;  %5688 = vmatprep.subr.bf16.mxu0 %v9907_v30  ;;  %v3042_v56 = vpop.f32.mrb[27].mxu1  ;;  %5729 = vmatprep.subr.bf16.mxu1 %v9909_v33  ;;  %v3469_v29 = vld [vmem:[#allocation5 + $0xab8] sm:$0xff]  ;;  %v10002_v30 = vcombine.low %v3420_v6, %v3436_v7  ;;  %v10004_v33 = vcombine.low %v3421_v8, %v3437_v58  ;;  %v10034_v51 = vcombine.low %v3452_v20, %v3468_v23  ;;  %v3167_v6 = vld [vmem:[#allocation5 + $0x148] sm:$0xff] }
 0x2ce   :  { %v10037_v38 = vcombine.high %v3453_v27, %v3469_v29  ;;  %v3485_v49 = vld [vmem:[#allocation5 + $0xb38] sm:$0xff]  ;;  %v10036_v52 = vcombine.low %v3453_v27, %v3469_v29  ;;  %v3134_v56 = vld [vmem:[#allocation5 + $0x40] sm:$0xff]  ;;  %v3183_v7 = vld [vmem:[#allocation5 + $0x1c8] sm:$0xff]  ;;  %v9720_v58 = vcombine.low %v3135_v61, %v3151_v62 }
 0x2cf   :  { %v3199_v20 = vld [vmem:[#allocation5 + $0x248] sm:$0xff]  ;;  %v9752_v29 = vcombine.low %v3167_v6, %v3183_v7  ;;  %v3413_v44 = vld [vmem:[#allocation5 + $0x8f8] sm:$0xff] }
 0x2d0   :  { %5689 = vmatpush1.bf16.msra.mxu0 %v9906_v50  ;;  %5730 = vmatpush1.bf16.msra.mxu1 %v9908_v53  ;;  %v3501_v50 = vld [vmem:[#allocation5 + $0xbb8] sm:$0xff]  ;;  %v10067_v53 = vcombine.high %v3484_v45, %v3500_v47  ;;  %v3215_v23 = vld [vmem:[#allocation5 + $0x2c8] sm:$0xff] }
 0x2d1   :  { %5690 = vmatprep.subr.bf16.mxu0 %v9939_v55  ;;  %5731 = vmatprep.subr.bf16.mxu1 %v9941_v57  ;;  %v10069_v55 = vcombine.high %v3485_v49, %v3501_v50  ;;  %v3150_v57 = vld [vmem:[#allocation5 + $0xc0] sm:$0xff]  ;;  %v10068_v1 = vcombine.low %v3485_v49, %v3501_v50  ;;  %v3231_v45 = vld [vmem:[#allocation5 + $0x348] sm:$0xff]  ;;  %v9784_v49 = vcombine.low %v3199_v20, %v3215_v23 }
 0x2d2   :  { %v9718_v8 = vcombine.low %v3134_v56, %v3150_v57  ;;  %v3247_v47 = vld [vmem:[#allocation5 + $0x3c8] sm:$0xff] }
 0x2d4   :  { %5691 = vmatpush1.bf16.msra.mxu0 %v9938_v2  ;;  %5732 = vmatpush1.bf16.msra.mxu1 %v9940_v3  ;;  %v9719_v2 = vcombine.high %v3134_v56, %v3150_v57  ;;  %v9721_v3 = vcombine.high %v3135_v61, %v3151_v62  ;;  %v3279_v56 = vld [vmem:[#allocation5 + $0x4c8] sm:$0xff]  ;;  %v9816_v61 = vcombine.low %v3231_v45, %v3247_v47 }
 0x2d5   :  { %5692 = vmatprep.subr.bf16.mxu0 %v9971_v4  ;;  %5733 = vmatprep.subr.bf16.mxu1 %v9973_v5  ;;  %v3166_v4 = vld [vmem:[#allocation5 + $0x140] sm:$0xff] }
 0x2d6   :  { %v3182_v5 = vld [vmem:[#allocation5 + $0x1c0] sm:$0xff] }
 0x2d7   :  { %v9750_v27 = vcombine.low %v3166_v4, %v3182_v5 }
 0x2d8   :  { %5693 = vmatpush1.bf16.msra.mxu0 %v9970_v11  ;;  %5734 = vmatpush1.bf16.msra.mxu1 %v9972_v12  ;;  %v9751_v11 = vcombine.high %v3166_v4, %v3182_v5  ;;  %v9753_v12 = vcombine.high %v3167_v6, %v3183_v7  ;;  %v3311_v4 = vld [vmem:[#allocation5 + $0x5c8] sm:$0xff] }
 0x2d9   :  { %5694 = vmatprep.subr.bf16.mxu0 %v10003_v13  ;;  %5735 = vmatprep.subr.bf16.mxu1 %v10005_v19  ;;  %v3198_v13 = vld [vmem:[#allocation5 + $0x240] sm:$0xff] }
 0x2da   :  { %v3214_v19 = vld [vmem:[#allocation5 + $0x2c0] sm:$0xff] }
 0x2dc   :  { %5695 = vmatpush1.bf16.msra.mxu0 %v10002_v30  ;;  %5736 = vmatpush1.bf16.msra.mxu1 %v10004_v33  ;;  %v9783_v30 = vcombine.high %v3198_v13, %v3214_v19  ;;  %v9785_v33 = vcombine.high %v3199_v20, %v3215_v23 }
 0x2dd   :  { %5696 = vmatprep.subr.bf16.mxu0 %v10035_v34  ;;  %5737 = vmatprep.subr.bf16.mxu1 %v10037_v38  ;;  %v3230_v34 = vld [vmem:[#allocation5 + $0x340] sm:$0xff] }
 0x2de   :  { %v3246_v38 = vld [vmem:[#allocation5 + $0x3c0] sm:$0xff] }
 0x2df   :  { %v9815_v50 = vcombine.high %v3230_v34, %v3246_v38  ;;  %v9814_v57 = vcombine.low %v3230_v34, %v3246_v38 }
 0x2e0   :  { %5697 = vmatpush1.bf16.msra.mxu0 %v10034_v51  ;;  %5738 = vmatpush1.bf16.msra.mxu1 %v10036_v52  ;;  %v9817_v51 = vcombine.high %v3231_v45, %v3247_v47  ;;  %v3262_v52 = vld [vmem:[#allocation5 + $0x440] sm:$0xff]  ;;  %v3359_v45 = vld [vmem:[#allocation5 + $0x748] sm:$0xff] }
 0x2e1   :  { %5698 = vmatprep.subr.bf16.mxu0 %v10067_v53  ;;  %5739 = vmatprep.subr.bf16.mxu1 %v10069_v55  ;;  %v3278_v53 = vld [vmem:[#allocation5 + $0x4c0] sm:$0xff]  ;;  %v3263_v55 = vld [vmem:[#allocation5 + $0x448] sm:$0xff] }
 0x2e2   :  { %v9847_v62 = vcombine.high %v3262_v52, %v3278_v53  ;;  %v9846_v5 = vcombine.low %v3262_v52, %v3278_v53  ;;  %v9848_v6 = vcombine.low %v3263_v55, %v3279_v56  ;;  %v3375_v47 = vld [vmem:[#allocation5 + $0x7c8] sm:$0xff] }
 0x2e4   :  { %5699 = vmatpush1.bf16.msra.mxu0 %v10066_v0  ;;  %5740 = vmatpush1.bf16.msra.mxu1 %v10068_v1  ;;  %v9849_v0 = vcombine.high %v3263_v55, %v3279_v56  ;;  %v3294_v1 = vld [vmem:[#allocation5 + $0x540] sm:$0xff] }
 0x2e5   :  { %5758 = vmatprep.subr.bf16.mxu0 %v9719_v2  ;;  %5799 = vmatprep.subr.bf16.mxu1 %v9721_v3  ;;  %v3310_v2 = vld [vmem:[#allocation5 + $0x5c0] sm:$0xff]  ;;  %v3295_v3 = vld [vmem:[#allocation5 + $0x548] sm:$0xff] }
 0x2e6   :  { %v9879_v7 = vcombine.high %v3294_v1, %v3310_v2  ;;  %v9880_v20 = vcombine.low %v3295_v3, %v3311_v4 }
 0x2e7   :  { %5709 = vmatmul.mubr.bf16.vlgmr.msra.gmra.mrb[44].mxu0 %v11632_v36  ;;  %5750 = vmatmul.mubr.bf16.vlgmr.msra.gmra.mrb[44].mxu1 %v11632_v36  ;;  %v9782_v36 = vcombine.low %v3198_v13, %v3214_v19  ;;  %v3343_v13 = vld [vmem:[#allocation5 + $0x6c8] sm:$0xff]  ;;  %v9878_v19 = vcombine.low %v3294_v1, %v3310_v2 }
 0x2e8   :  { %5759 = vmatpush1.bf16.msra.mxu0 %v9718_v8  ;;  %5800 = vmatpush1.bf16.msra.mxu1 %v9720_v58  ;;  %v9881_v8 = vcombine.high %v3295_v3, %v3311_v4  ;;  %v3326_v58 = vld [vmem:[#allocation5 + $0x640] sm:$0xff]  ;;  %v3407_v1 = vld [vmem:[#allocation5 + $0x8c8] sm:$0xff]  ;;  %v9944_v3 = vcombine.low %v3359_v45, %v3375_v47 }
 0x2e9   :  { %5760 = vmatprep.subr.bf16.mxu0 %v9751_v11  ;;  %5801 = vmatprep.subr.bf16.mxu1 %v9753_v12  ;;  %v3342_v11 = vld [vmem:[#allocation5 + $0x6c0] sm:$0xff]  ;;  %v3327_v12 = vld [vmem:[#allocation5 + $0x648] sm:$0xff] }
 0x2ea   :  { %10094 = vmatprep.mubr.msk.bf16.mxu0 %vm2466_vm0, %v11533_v46  ;;  %10095 = vmatprep.mubr.msk.bf16.mxu1 %vm2466_vm0, %v11533_v46  ;;  %v9911_v23 = vcombine.high %v3326_v58, %v3342_v11  ;;  %v9912_v53 = vcombine.low %v3327_v12, %v3343_v13 }
 0x2ec   :  { %5761 = vmatpush1.bf16.msra.mxu0 %v9750_v27  ;;  %5802 = vmatpush1.bf16.msra.mxu1 %v9752_v29  ;;  %v9913_v29 = vcombine.high %v3327_v12, %v3343_v13 }
 0x2ed   :  { %5762 = vmatprep.subr.bf16.mxu0 %v9783_v30  ;;  %5803 = vmatprep.subr.bf16.mxu1 %v9785_v33  ;;  %v3358_v30 = vld [vmem:[#allocation5 + $0x740] sm:$0xff] }
 0x2ee   :  { %v3374_v33 = vld [vmem:[#allocation5 + $0x7c0] sm:$0xff] }
 0x2ef   :  { %v9943_v55 = vcombine.high %v3358_v30, %v3374_v33  ;;  %v9942_v2 = vcombine.low %v3358_v30, %v3374_v33  ;;  %v3471_v30 = vld [vmem:[#allocation5 + $0xac8] sm:$0xff] }
 0x2f0   :  { %5763 = vmatpush1.bf16.msra.mxu0 %v9782_v36  ;;  %5804 = vmatpush1.bf16.msra.mxu1 %v9784_v49 }
 0x2f1   :  { %5764 = vmatprep.subr.bf16.mxu0 %v9815_v50  ;;  %5805 = vmatprep.subr.bf16.mxu1 %v9817_v51  ;;  %v9910_v50 = vcombine.low %v3326_v58, %v3342_v11  ;;  %v3439_v58 = vld [vmem:[#allocation5 + $0x9c8] sm:$0xff] }
 0x2f4   :  { %5765 = vmatpush1.bf16.msra.mxu0 %v9814_v57  ;;  %5806 = vmatpush1.bf16.msra.mxu1 %v9816_v61  ;;  %v9945_v57 = vcombine.high %v3359_v45, %v3375_v47  ;;  %v3390_v61 = vld [vmem:[#allocation5 + $0x840] sm:$0xff] }
 0x2f5   :  { %5766 = vmatprep.subr.bf16.mxu0 %v9847_v62  ;;  %5807 = vmatprep.subr.bf16.mxu1 %v9849_v0  ;;  %v3406_v62 = vld [vmem:[#allocation5 + $0x8c0] sm:$0xff]  ;;  %v3391_v0 = vld [vmem:[#allocation5 + $0x848] sm:$0xff] }
 0x2f6   :  { %v9975_v4 = vcombine.high %v3390_v61, %v3406_v62  ;;  %v9974_v11 = vcombine.low %v3390_v61, %v3406_v62  ;;  %v9976_v12 = vcombine.low %v3391_v0, %v3407_v1  ;;  %v3136_v62 = vld [vmem:[#allocation5 + $0x50] sm:$0xff] }
 0x2f8   :  { %5767 = vmatpush1.bf16.msra.mxu0 %v9846_v5  ;;  %5808 = vmatpush1.bf16.msra.mxu1 %v9848_v6  ;;  %v9977_v5 = vcombine.high %v3391_v0, %v3407_v1  ;;  %v3422_v6 = vld [vmem:[#allocation5 + $0x940] sm:$0xff]  ;;  %v3152_v0 = vld [vmem:[#allocation5 + $0xd0] sm:$0xff]  ;;  %v3137_v1 = vld [vmem:[#allocation5 + $0x58] sm:$0xff] }
 0x2f9   :  { %5768 = vmatprep.subr.bf16.mxu0 %v9879_v7  ;;  %5809 = vmatprep.subr.bf16.mxu1 %v9881_v8  ;;  %v3438_v7 = vld [vmem:[#allocation5 + $0x9c0] sm:$0xff]  ;;  %v3423_v8 = vld [vmem:[#allocation5 + $0x948] sm:$0xff] }
 0x2fa   :  { %v11682_v27 = vpop.f32.mrb[28].mxu0  ;;  %v11684_v34 = vpop.f32.mrb[28].mxu1  ;;  %v10007_v13 = vcombine.high %v3422_v6, %v3438_v7  ;;  %v10006_v33 = vcombine.low %v3422_v6, %v3438_v7  ;;  %v10008_v45 = vcombine.low %v3423_v8, %v3439_v58  ;;  %v3168_v7 = vld [vmem:[#allocation5 + $0x150] sm:$0xff] }
 0x2fb   :  { %12066 = vst [vmem:[#allocation27_spill] sm:$0xff] %v11682_v27  ;;  %12067 = vst [vmem:[#allocation28_spill] sm:$0xff] %v11684_v34  ;;  %v11686_v38 = vpop.f32.mrb[29].mxu0  ;;  %v11688_v36 = vpop.f32.mrb[29].mxu1  ;;  %v3411_v34 = vld [vmem:[#allocation5 + $0x8e8] sm:$0xff]  ;;  %v3396_v27 = vld [vmem:[#allocation5 + $0x870] sm:$0xff] }
 0x2fc   :  { %12068 = vst [vmem:[#allocation29_spill] sm:$0xff] %v11686_v38  ;;  %12069 = vst [vmem:[#allocation30_spill] sm:$0xff] %v11688_v36  ;;  %v3082_v49 = vpop.f32.mrb[30].mxu0  ;;  %5769 = vmatpush1.bf16.msra.mxu0 %v9878_v19  ;;  %v3123_v51 = vpop.f32.mrb[30].mxu1  ;;  %5810 = vmatpush1.bf16.msra.mxu1 %v9880_v20  ;;  %v10009_v19 = vcombine.high %v3423_v8, %v3439_v58  ;;  %v3454_v20 = vld [vmem:[#allocation5 + $0xa40] sm:$0xff]  ;;  %v3184_v8 = vld [vmem:[#allocation5 + $0x1d0] sm:$0xff] }
 0x2fd   :  { %v3083_v52 = vpop.f32.mrb[31].mxu0  ;;  %5770 = vmatprep.subr.bf16.mxu0 %v9911_v23  ;;  %v3124_v56 = vpop.f32.mrb[31].mxu1  ;;  %5811 = vmatprep.subr.bf16.mxu1 %v9913_v29  ;;  %v3470_v23 = vld [vmem:[#allocation5 + $0xac0] sm:$0xff]  ;;  %v3455_v29 = vld [vmem:[#allocation5 + $0xa48] sm:$0xff]  ;;  %v3169_v58 = vld [vmem:[#allocation5 + $0x158] sm:$0xff] }
 0x2fe   :  { %v10039_v47 = vcombine.high %v3454_v20, %v3470_v23  ;;  %v10041_v49 = vcombine.high %v3455_v29, %v3471_v30  ;;  %v3502_v51 = vld [vmem:[#allocation5 + $0xbc0] sm:$0xff]  ;;  %v3487_v52 = vld [vmem:[#allocation5 + $0xb48] sm:$0xff]  ;;  %v10040_v56 = vcombine.low %v3455_v29, %v3471_v30  ;;  %v3216_v29 = vld [vmem:[#allocation5 + $0x2d0] sm:$0xff] }
 0x2ff   :  { %v11693_v30 = vld.sshfl [vmem:[%s12049_s0] sm:$0x33 pattern:$0x76325410]  ;;  %v3394_v36 = vld [vmem:[#allocation5 + $0x860] sm:$0xff]  ;;  %s11333_s0 = smov [#allocation17]  }
 0x300   :  { %5771 = vmatpush1.bf16.msra.mxu0 %v9910_v50  ;;  %5812 = vmatpush1.bf16.msra.mxu1 %v9912_v53  ;;  %v3486_v50 = vld [vmem:[#allocation5 + $0xb40] sm:$0xff]  ;;  %v3503_v53 = vld [vmem:[#allocation5 + $0xbc8] sm:$0xff]  ;;  %s9288_s27 = sshll.u32 %s11333_s0, 4  ;;  %s9289_s27 = int_to_ptr.vmem [resolvable:$true] %s9288_s27 }
 0x301   :  { %5772 = vmatprep.subr.bf16.mxu0 %v9943_v55  ;;  %5813 = vmatprep.subr.bf16.mxu1 %v9945_v57  ;;  %v10038_v55 = vcombine.low %v3454_v20, %v3470_v23  ;;  %v10071_v57 = vcombine.high %v3486_v50, %v3502_v51  ;;  %v10073_v61 = vcombine.high %v3487_v52, %v3503_v53  ;;  %v3200_v23 = vld [vmem:[#allocation5 + $0x250] sm:$0xff]  ;;  %v3410_v38 = vld [vmem:[#allocation5 + $0x8e0] sm:$0xff]  ;;  %s11284_s28 = scalar_lea.vmem %s9289_s27, 32  ;;  %p11289_p3 = scmp.lt.s32.totalorder %s9289_s27, %s9289_s27 }
 0x302   :  { %p11285_p2 = scmp.ne.s32.totalorder %s9289_s27, %s11284_s28  ;;  %p11290_p4 = scmp.lt.s32.totalorder %s11284_s28, %s11284_s28 }
 0x304   :  { %5773 = vmatpush1.bf16.msra.mxu0 %v9942_v2  ;;  %5814 = vmatpush1.bf16.msra.mxu1 %v9944_v3  ;;  %v3153_v2 = vld [vmem:[#allocation5 + $0xd8] sm:$0xff]  ;;  %v10070_v3 = vcombine.low %v3486_v50, %v3502_v51  ;;  %v9787_v50 = vcombine.high %v3200_v23, %v3216_v29  ;;  %p11291_p5 = por %p11290_p4, %p11289_p3 }
 0x305   :  { %5774 = vmatprep.subr.bf16.mxu0 %v9975_v4  ;;  %5815 = vmatprep.subr.bf16.mxu1 %v9977_v5  ;;  %v10072_v4 = vcombine.low %v3487_v52, %v3503_v53  ;;  %v9723_v5 = vcombine.high %v3136_v62, %v3152_v0  ;;  %v9725_v6 = vcombine.high %v3137_v1, %v3153_v2  ;;  %v3232_v52 = vld [vmem:[#allocation5 + $0x350] sm:$0xff] }
 0x306   :  { %v3248_v53 = vld [vmem:[#allocation5 + $0x3d0] sm:$0xff]  ;;  %p11292_p6 = pnand %p11291_p5, %p11285_p2 }
 0x308   :  { %5775 = vmatpush1.bf16.msra.mxu0 %v9974_v11  ;;  %5816 = vmatpush1.bf16.msra.mxu1 %v9976_v12  ;;  %v3185_v11 = vld [vmem:[#allocation5 + $0x1d8] sm:$0xff]  ;;  %v9722_v12 = vcombine.low %v3136_v62, %v3152_v0  ;;  %v9819_v62 = vcombine.high %v3232_v52, %v3248_v53 }
 0x309   :  { %5776 = vmatprep.subr.bf16.mxu0 %v10007_v13  ;;  %5817 = vmatprep.subr.bf16.mxu1 %v10009_v19  ;;  %v9724_v13 = vcombine.low %v3137_v1, %v3153_v2  ;;  %v9755_v19 = vcombine.high %v3168_v7, %v3184_v8  ;;  %v9757_v20 = vcombine.high %v3169_v58, %v3185_v11  ;;  %v3264_v1 = vld [vmem:[#allocation5 + $0x450] sm:$0xff] }
 0x30a   :  { %v3280_v2 = vld [vmem:[#allocation5 + $0x4d0] sm:$0xff] }
 0x30c   :  { %5777 = vmatpush1.bf16.msra.mxu0 %v10006_v33  ;;  %5818 = vmatpush1.bf16.msra.mxu1 %v10008_v45  ;;  %v3201_v33 = vld [vmem:[#allocation5 + $0x258] sm:$0xff] }
 0x30d   :  { %5778 = vmatprep.subr.bf16.mxu0 %v10039_v47  ;;  %5819 = vmatprep.subr.bf16.mxu1 %v10041_v49  ;;  %v3217_v45 = vld [vmem:[#allocation5 + $0x2d8] sm:$0xff]  ;;  %v9754_v47 = vcombine.low %v3168_v7, %v3184_v8  ;;  %v9756_v49 = vcombine.low %v3169_v58, %v3185_v11  ;;  %v9851_v7 = vcombine.high %v3264_v1, %v3280_v2  ;;  %v3296_v58 = vld [vmem:[#allocation5 + $0x550] sm:$0xff] }
 0x30e   :  { %v9789_v51 = vcombine.high %v3201_v33, %v3217_v45  ;;  %v3312_v11 = vld [vmem:[#allocation5 + $0x5d0] sm:$0xff] }
 0x310   :  { %5779 = vmatpush1.bf16.msra.mxu0 %v10038_v55  ;;  %5820 = vmatpush1.bf16.msra.mxu1 %v10040_v56  ;;  %v3233_v55 = vld [vmem:[#allocation5 + $0x358] sm:$0xff] }
 0x311   :  { %5780 = vmatprep.subr.bf16.mxu0 %v10071_v57  ;;  %5821 = vmatprep.subr.bf16.mxu1 %v10073_v61  ;;  %v3249_v56 = vld [vmem:[#allocation5 + $0x3d8] sm:$0xff]  ;;  %v9786_v57 = vcombine.low %v3200_v23, %v3216_v29  ;;  %v9788_v61 = vcombine.low %v3201_v33, %v3217_v45  ;;  %v9883_v23 = vcombine.high %v3296_v58, %v3312_v11  ;;  %v3328_v33 = vld [vmem:[#allocation5 + $0x650] sm:$0xff] }
 0x312   :  { %v9821_v0 = vcombine.high %v3233_v55, %v3249_v56  ;;  %v3344_v45 = vld [vmem:[#allocation5 + $0x6d0] sm:$0xff] }
 0x314   :  { %5781 = vmatpush1.bf16.msra.mxu0 %v10070_v3  ;;  %5822 = vmatpush1.bf16.msra.mxu1 %v10072_v4  ;;  %v3265_v3 = vld [vmem:[#allocation5 + $0x458] sm:$0xff] }
 0x315   :  { %5840 = vmatprep.subr.bf16.mxu0 %v9723_v5  ;;  %5881 = vmatprep.subr.bf16.mxu1 %v9725_v6  ;;  %v3281_v4 = vld [vmem:[#allocation5 + $0x4d8] sm:$0xff]  ;;  %v9818_v5 = vcombine.low %v3232_v52, %v3248_v53  ;;  %v9820_v6 = vcombine.low %v3233_v55, %v3249_v56  ;;  %v9915_v52 = vcombine.high %v3328_v33, %v3344_v45  ;;  %v3360_v56 = vld [vmem:[#allocation5 + $0x750] sm:$0xff] }
 0x316   :  { %v9853_v8 = vcombine.high %v3265_v3, %v3281_v4 }
 0x317   :  { %5791 = vmatmul.mubr.bf16.vlgmr.msra.gmra.mrb[48].mxu0 %v11693_v30  ;;  %5832 = vmatmul.mubr.bf16.vlgmr.msra.gmra.mrb[48].mxu1 %v11693_v30 }
 0x318   :  { %5841 = vmatpush1.bf16.msra.mxu0 %v9722_v12  ;;  %5882 = vmatpush1.bf16.msra.mxu1 %v9724_v13  ;;  %v3297_v12 = vld [vmem:[#allocation5 + $0x558] sm:$0xff] }
 0x319   :  { %5842 = vmatprep.subr.bf16.mxu0 %v9755_v19  ;;  %5883 = vmatprep.subr.bf16.mxu1 %v9757_v20  ;;  %v3313_v13 = vld [vmem:[#allocation5 + $0x5d8] sm:$0xff]  ;;  %v9850_v19 = vcombine.low %v3264_v1, %v3280_v2  ;;  %v9852_v20 = vcombine.low %v3265_v3, %v3281_v4 }
 0x31a   :  { %10096 = vmatprep.mubr.msk.bf16.mxu0 %vm2466_vm0, %v11533_v46  ;;  %10097 = vmatprep.mubr.msk.bf16.mxu1 %vm2466_vm0, %v11533_v46  ;;  %v9885_v29 = vcombine.high %v3297_v12, %v3313_v13  ;;  %v3361_v1 = vld [vmem:[#allocation5 + $0x758] sm:$0xff] }
 0x31b   :  { %v3377_v2 = vld [vmem:[#allocation5 + $0x7d8] sm:$0xff] }
 0x31c   :  { %5843 = vmatpush1.bf16.msra.mxu0 %v9754_v47  ;;  %5884 = vmatpush1.bf16.msra.mxu1 %v9756_v49  ;;  %v3329_v47 = vld [vmem:[#allocation5 + $0x658] sm:$0xff] }
 0x31d   :  { %5844 = vmatprep.subr.bf16.mxu0 %v9787_v50  ;;  %5885 = vmatprep.subr.bf16.mxu1 %v9789_v51  ;;  %v3345_v49 = vld [vmem:[#allocation5 + $0x6d8] sm:$0xff]  ;;  %v9882_v50 = vcombine.low %v3296_v58, %v3312_v11  ;;  %v9884_v51 = vcombine.low %v3297_v12, %v3313_v13 }
 0x31e   :  { %v9917_v55 = vcombine.high %v3329_v47, %v3345_v49  ;;  %v9916_v12 = vcombine.low %v3329_v47, %v3345_v49  ;;  %v3393_v3 = vld [vmem:[#allocation5 + $0x858] sm:$0xff] }
 0x31f   :  { %v3441_v47 = vld [vmem:[#allocation5 + $0x9d8] sm:$0xff] }
 0x320   :  { %5845 = vmatpush1.bf16.msra.mxu0 %v9786_v57  ;;  %5886 = vmatpush1.bf16.msra.mxu1 %v9788_v61  ;;  %v3376_v57 = vld [vmem:[#allocation5 + $0x7d0] sm:$0xff]  ;;  %v3409_v61 = vld [vmem:[#allocation5 + $0x8d8] sm:$0xff] }
 0x321   :  { %5846 = vmatprep.subr.bf16.mxu0 %v9819_v62  ;;  %5887 = vmatprep.subr.bf16.mxu1 %v9821_v0  ;;  %v9947_v13 = vcombine.high %v3360_v56, %v3376_v57 }
 0x324   :  { %5847 = vmatpush1.bf16.msra.mxu0 %v9818_v5  ;;  %5888 = vmatpush1.bf16.msra.mxu1 %v9820_v6 }
 0x325   :  { %5848 = vmatprep.subr.bf16.mxu0 %v9851_v7  ;;  %5889 = vmatprep.subr.bf16.mxu1 %v9853_v8  ;;  %v9914_v7 = vcombine.low %v3328_v33, %v3344_v45  ;;  %v9948_v33 = vcombine.low %v3361_v1, %v3377_v2 }
 0x328   :  { %5849 = vmatpush1.bf16.msra.mxu0 %v9850_v19  ;;  %5890 = vmatpush1.bf16.msra.mxu1 %v9852_v20  ;;  %v9949_v20 = vcombine.high %v3361_v1, %v3377_v2 }
 0x329   :  { %5850 = vmatprep.subr.bf16.mxu0 %v9883_v23  ;;  %5891 = vmatprep.subr.bf16.mxu1 %v9885_v29  ;;  %v3392_v23 = vld [vmem:[#allocation5 + $0x850] sm:$0xff] }
 0x32a   :  { %v11701_v53 = vpop.f32.mrb[32].mxu0  ;;  %v11705_v62 = vpop.f32.mrb[32].mxu1  ;;  %v3408_v29 = vld [vmem:[#allocation5 + $0x8d0] sm:$0xff] }
 0x32b   :  { %v11707_v0 = vpop.f32.mrb[33].mxu0  ;;  %v11713_v5 = vpop.f32.mrb[33].mxu1  ;;  %v9979_v45 = vcombine.high %v3392_v23, %v3408_v29  ;;  %v9978_v49 = vcombine.low %v3392_v23, %v3408_v29  ;;  %v3504_v23 = vld [vmem:[#allocation5 + $0xbd0] sm:$0xff]  ;;  %v3489_v29 = vld [vmem:[#allocation5 + $0xb58] sm:$0xff] }
 0x32c   :  { %v5468_v6 = vpop.f32.mrb[34].mxu0  ;;  %5851 = vmatpush1.bf16.msra.mxu0 %v9882_v50  ;;  %v5509_v58 = vpop.f32.mrb[34].mxu1  ;;  %5892 = vmatpush1.bf16.msra.mxu1 %v9884_v51  ;;  %v9981_v50 = vcombine.high %v3393_v3, %v3409_v61  ;;  %v3424_v51 = vld [vmem:[#allocation5 + $0x950] sm:$0xff] }
 0x32d   :  { %v5469_v11 = vpop.f32.mrb[35].mxu0  ;;  %5852 = vmatprep.subr.bf16.mxu0 %v9915_v52  ;;  %v5510_v19 = vpop.f32.mrb[35].mxu1  ;;  %5893 = vmatprep.subr.bf16.mxu1 %v9917_v55  ;;  %v9946_v6 = vcombine.low %v3360_v56, %v3376_v57  ;;  %v3440_v58 = vld [vmem:[#allocation5 + $0x9d0] sm:$0xff]  ;;  %v3425_v52 = vld [vmem:[#allocation5 + $0x958] sm:$0xff]  ;;  %v9980_v55 = vcombine.low %v3393_v3, %v3409_v61 }
 0x32e   :  { %v10011_v11 = vcombine.high %v3424_v51, %v3440_v58  ;;  %v10013_v19 = vcombine.high %v3425_v52, %v3441_v47  ;;  %v3472_v56 = vld [vmem:[#allocation5 + $0xad0] sm:$0xff]  ;;  %v3457_v57 = vld [vmem:[#allocation5 + $0xa58] sm:$0xff]  ;;  %v10010_v1 = vcombine.low %v3424_v51, %v3440_v58  ;;  %v10012_v2 = vcombine.low %v3425_v52, %v3441_v47  ;;  %v3154_v51 = vld [vmem:[#allocation5 + $0xe0] sm:$0xff] }
 0x32f   :  { %v3139_v58 = vld [vmem:[#allocation5 + $0x68] sm:$0xff] }
 0x330   :  { %5853 = vmatpush1.bf16.msra.mxu0 %v9914_v7  ;;  %5894 = vmatpush1.bf16.msra.mxu1 %v9916_v12  ;;  %v3456_v7 = vld [vmem:[#allocation5 + $0xa50] sm:$0xff]  ;;  %v3473_v12 = vld [vmem:[#allocation5 + $0xad8] sm:$0xff] }
 0x331   :  { %5854 = vmatprep.subr.bf16.mxu0 %v9947_v13  ;;  %5895 = vmatprep.subr.bf16.mxu1 %v9949_v20  ;;  %v10043_v13 = vcombine.high %v3456_v7, %v3472_v56  ;;  %v10045_v20 = vcombine.high %v3457_v57, %v3473_v12  ;;  %v10042_v61 = vcombine.low %v3456_v7, %v3472_v56  ;;  %v3186_v7 = vld [vmem:[#allocation5 + $0x1e0] sm:$0xff]  ;;  %v3171_v56 = vld [vmem:[#allocation5 + $0x168] sm:$0xff] }
 0x332   :  { %v10044_v3 = vcombine.low %v3457_v57, %v3473_v12 }
 0x334   :  { %5855 = vmatpush1.bf16.msra.mxu0 %v9946_v6  ;;  %5896 = vmatpush1.bf16.msra.mxu1 %v9948_v33  ;;  %v3488_v6 = vld [vmem:[#allocation5 + $0xb50] sm:$0xff]  ;;  %v3505_v33 = vld [vmem:[#allocation5 + $0xbd8] sm:$0xff] }
 0x335   :  { %5856 = vmatprep.subr.bf16.mxu0 %v9979_v45  ;;  %5897 = vmatprep.subr.bf16.mxu1 %v9981_v50  ;;  %v10075_v45 = vcombine.high %v3488_v6, %v3504_v23  ;;  %v10077_v50 = vcombine.high %v3489_v29, %v3505_v33  ;;  %v10074_v52 = vcombine.low %v3488_v6, %v3504_v23  ;;  %v3218_v6 = vld [vmem:[#allocation5 + $0x2e0] sm:$0xff]  ;;  %v3203_v23 = vld [vmem:[#allocation5 + $0x268] sm:$0xff] }
 0x336   :  { %v10076_v47 = vcombine.low %v3489_v29, %v3505_v33  ;;  %v3219_v29 = vld [vmem:[#allocation5 + $0x2e8] sm:$0xff] }
 0x338   :  { %5857 = vmatpush1.bf16.msra.mxu0 %v9978_v49  ;;  %5898 = vmatpush1.bf16.msra.mxu1 %v9980_v55  ;;  %v3138_v49 = vld [vmem:[#allocation5 + $0x60] sm:$0xff]  ;;  %v3155_v55 = vld [vmem:[#allocation5 + $0xe8] sm:$0xff] }
 0x339   :  { %5858 = vmatprep.subr.bf16.mxu0 %v10011_v11  ;;  %5899 = vmatprep.subr.bf16.mxu1 %v10013_v19  ;;  %v9727_v11 = vcombine.high %v3138_v49, %v3154_v51  ;;  %v9729_v19 = vcombine.high %v3139_v58, %v3155_v55  ;;  %v9726_v57 = vcombine.low %v3138_v49, %v3154_v51  ;;  %v3234_v49 = vld [vmem:[#allocation5 + $0x360] sm:$0xff] }
 0x33a   :  { %v9728_v12 = vcombine.low %v3139_v58, %v3155_v55  ;;  %v3250_v51 = vld [vmem:[#allocation5 + $0x3e0] sm:$0xff]  ;;  %v3235_v58 = vld [vmem:[#allocation5 + $0x368] sm:$0xff] }
 0x33b   :  { %v3251_v55 = vld [vmem:[#allocation5 + $0x3e8] sm:$0xff] }
 0x33c   :  { %5859 = vmatpush1.bf16.msra.mxu0 %v10010_v1  ;;  %5900 = vmatpush1.bf16.msra.mxu1 %v10012_v2  ;;  %v3170_v1 = vld [vmem:[#allocation5 + $0x160] sm:$0xff]  ;;  %v3187_v2 = vld [vmem:[#allocation5 + $0x1e8] sm:$0xff] }
 0x33d   :  { %5860 = vmatprep.subr.bf16.mxu0 %v10043_v13  ;;  %5901 = vmatprep.subr.bf16.mxu1 %v10045_v20  ;;  %v9759_v13 = vcombine.high %v3170_v1, %v3186_v7  ;;  %v9761_v20 = vcombine.high %v3171_v56, %v3187_v2  ;;  %v9758_v33 = vcombine.low %v3170_v1, %v3186_v7  ;;  %v3266_v1 = vld [vmem:[#allocation5 + $0x460] sm:$0xff] }
 0x33e   :  { %v3282_v7 = vld [vmem:[#allocation5 + $0x4e0] sm:$0xff] }
 0x340   :  { %5861 = vmatpush1.bf16.msra.mxu0 %v10042_v61  ;;  %5902 = vmatpush1.bf16.msra.mxu1 %v10044_v3  ;;  %v3202_v61 = vld [vmem:[#allocation5 + $0x260] sm:$0xff]  ;;  %v9760_v3 = vcombine.low %v3171_v56, %v3187_v2  ;;  %v3267_v56 = vld [vmem:[#allocation5 + $0x468] sm:$0xff] }
 0x341   :  { %5862 = vmatprep.subr.bf16.mxu0 %v10075_v45  ;;  %5903 = vmatprep.subr.bf16.mxu1 %v10077_v50  ;;  %v9791_v45 = vcombine.high %v3202_v61, %v3218_v6  ;;  %v9793_v50 = vcombine.high %v3203_v23, %v3219_v29  ;;  %v3283_v2 = vld [vmem:[#allocation5 + $0x4e8] sm:$0xff] }
 0x344   :  { %5863 = vmatpush1.bf16.msra.mxu0 %v10074_v52  ;;  %5904 = vmatpush1.bf16.msra.mxu1 %v10076_v47  ;;  %v9790_v52 = vcombine.low %v3202_v61, %v3218_v6  ;;  %v9792_v47 = vcombine.low %v3203_v23, %v3219_v29  ;;  %v3314_v61 = vld [vmem:[#allocation5 + $0x5e0] sm:$0xff]  ;;  %v3299_v6 = vld [vmem:[#allocation5 + $0x568] sm:$0xff]  ;;  %v9854_v23 = vcombine.low %v3266_v1, %v3282_v7 }
 0x345   :  { %5922 = vmatprep.subr.bf16.mxu0 %v9727_v11  ;;  %5963 = vmatprep.subr.bf16.mxu1 %v9729_v19  ;;  %v9823_v11 = vcombine.high %v3234_v49, %v3250_v51  ;;  %v9825_v19 = vcombine.high %v3235_v58, %v3251_v55  ;;  %v9856_v29 = vcombine.low %v3267_v56, %v3283_v2 }
 0x347   :  { %5873 = vmatmul.mubr.bf16.vlgmr.msra.gmra.mrb[52].mxu0 %v11693_v30  ;;  %5914 = vmatmul.mubr.bf16.vlgmr.msra.gmra.mrb[52].mxu1 %v11693_v30 }
 0x348   :  { %5923 = vmatpush1.bf16.msra.mxu0 %v9726_v57  ;;  %5964 = vmatpush1.bf16.msra.mxu1 %v9728_v12  ;;  %v9822_v57 = vcombine.low %v3234_v49, %v3250_v51  ;;  %v9824_v12 = vcombine.low %v3235_v58, %v3251_v55  ;;  %v3346_v49 = vld [vmem:[#allocation5 + $0x6e0] sm:$0xff]  ;;  %v3331_v51 = vld [vmem:[#allocation5 + $0x668] sm:$0xff] }
 0x349   :  { %5924 = vmatprep.subr.bf16.mxu0 %v9759_v13  ;;  %5965 = vmatprep.subr.bf16.mxu1 %v9761_v20  ;;  %v9855_v13 = vcombine.high %v3266_v1, %v3282_v7  ;;  %v9857_v20 = vcombine.high %v3267_v56, %v3283_v2  ;;  %v3362_v7 = vld [vmem:[#allocation5 + $0x760] sm:$0xff] }
 0x34a   :  { %10098 = vmatprep.mubr.msk.bf16.mxu0 %vm2466_vm0, %v11533_v46  ;;  %10099 = vmatprep.mubr.msk.bf16.mxu1 %vm2466_vm0, %v11533_v46 }
 0x34c   :  { %5925 = vmatpush1.bf16.msra.mxu0 %v9758_v33  ;;  %5966 = vmatpush1.bf16.msra.mxu1 %v9760_v3  ;;  %v3298_v33 = vld [vmem:[#allocation5 + $0x560] sm:$0xff]  ;;  %v3315_v3 = vld [vmem:[#allocation5 + $0x5e8] sm:$0xff] }
 0x34d   :  { %5926 = vmatprep.subr.bf16.mxu0 %v9791_v45  ;;  %5967 = vmatprep.subr.bf16.mxu1 %v9793_v50  ;;  %v9887_v45 = vcombine.high %v3298_v33, %v3314_v61  ;;  %v9889_v50 = vcombine.high %v3299_v6, %v3315_v3  ;;  %v9886_v58 = vcombine.low %v3298_v33, %v3314_v61  ;;  %v3395_v61 = vld [vmem:[#allocation5 + $0x868] sm:$0xff] }
 0x34e   :  { %v9888_v55 = vcombine.low %v3299_v6, %v3315_v3 }
 0x350   :  { %5927 = vmatpush1.bf16.msra.mxu0 %v9790_v52  ;;  %5968 = vmatpush1.bf16.msra.mxu1 %v9792_v47  ;;  %v3330_v52 = vld [vmem:[#allocation5 + $0x660] sm:$0xff]  ;;  %v3347_v47 = vld [vmem:[#allocation5 + $0x6e8] sm:$0xff] }
 0x351   :  { %5928 = vmatprep.subr.bf16.mxu0 %v9823_v11  ;;  %5969 = vmatprep.subr.bf16.mxu1 %v9825_v19  ;;  %v9919_v11 = vcombine.high %v3330_v52, %v3346_v49  ;;  %v9921_v1 = vcombine.high %v3331_v51, %v3347_v47  ;;  %v9920_v56 = vcombine.low %v3331_v51, %v3347_v47  ;;  %v3443_v51 = vld [vmem:[#allocation5 + $0x9e8] sm:$0xff] }
 0x352   :  { %v9984_v47 = vcombine.low %v3395_v61, %v3411_v34 }
 0x354   :  { %5929 = vmatpush1.bf16.msra.mxu0 %v9822_v57  ;;  %5970 = vmatpush1.bf16.msra.mxu1 %v9824_v12  ;;  %v3378_v57 = vld [vmem:[#allocation5 + $0x7e0] sm:$0xff] }
 0x355   :  { %5930 = vmatprep.subr.bf16.mxu0 %v9855_v13  ;;  %5971 = vmatprep.subr.bf16.mxu1 %v9857_v20  ;;  %v3363_v13 = vld [vmem:[#allocation5 + $0x768] sm:$0xff]  ;;  %v9951_v8 = vcombine.high %v3362_v7, %v3378_v57 }
 0x356   :  { %v3379_v20 = vld [vmem:[#allocation5 + $0x7e8] sm:$0xff] }
 0x357   :  { %v9953_v33 = vcombine.high %v3363_v13, %v3379_v20 }
 0x358   :  { %5931 = vmatpush1.bf16.msra.mxu0 %v9854_v23  ;;  %5972 = vmatpush1.bf16.msra.mxu1 %v9856_v29  ;;  %v9918_v23 = vcombine.low %v3330_v52, %v3346_v49  ;;  %v9952_v52 = vcombine.low %v3363_v13, %v3379_v20  ;;  %v9983_v49 = vcombine.high %v3394_v36, %v3410_v38 }
 0x359   :  { %5932 = vmatprep.subr.bf16.mxu0 %v9887_v45  ;;  %5973 = vmatprep.subr.bf16.mxu1 %v9889_v50 }
 0x35a   :  { %v11723_v19 = vpop.f32.mrb[36].mxu0  ;;  %v11727_v2 = vpop.f32.mrb[36].mxu1 }
 0x35b   :  { %v11729_v12 = vpop.f32.mrb[37].mxu0  ;;  %v11735_v6 = vpop.f32.mrb[37].mxu1 }
 0x35c   :  { %v5550_v3 = vpop.f32.mrb[38].mxu0  ;;  %5933 = vmatpush1.bf16.msra.mxu0 %v9886_v58  ;;  %v5591_v45 = vpop.f32.mrb[38].mxu1  ;;  %5974 = vmatpush1.bf16.msra.mxu1 %v9888_v55  ;;  %v9985_v58 = vcombine.high %v3395_v61, %v3411_v34  ;;  %v3426_v55 = vld [vmem:[#allocation5 + $0x960] sm:$0xff] }
 0x35d   :  { %v5551_v50 = vpop.f32.mrb[39].mxu0  ;;  %5934 = vmatprep.subr.bf16.mxu0 %v9919_v11  ;;  %v5592_v4 = vpop.f32.mrb[39].mxu1  ;;  %5975 = vmatprep.subr.bf16.mxu1 %v9921_v1  ;;  %v9950_v3 = vcombine.low %v3362_v7, %v3378_v57  ;;  %v3442_v45 = vld [vmem:[#allocation5 + $0x9e0] sm:$0xff]  ;;  %v3427_v11 = vld [vmem:[#allocation5 + $0x968] sm:$0xff] }
 0x35e   :  { %v9982_v4 = vcombine.low %v3394_v36, %v3410_v38  ;;  %v10015_v1 = vcombine.high %v3426_v55, %v3442_v45  ;;  %v10017_v50 = vcombine.high %v3427_v11, %v3443_v51  ;;  %v3474_v7 = vld [vmem:[#allocation5 + $0xae0] sm:$0xff]  ;;  %v3459_v57 = vld [vmem:[#allocation5 + $0xa68] sm:$0xff]  ;;  %v10016_v13 = vcombine.low %v3427_v11, %v3443_v51 }
 0x35f   :  { %v3506_v38 = vld [vmem:[#allocation5 + $0xbe0] sm:$0xff]  ;;  %v3491_v36 = vld [vmem:[#allocation5 + $0xb68] sm:$0xff] }
 0x360   :  { %5935 = vmatpush1.bf16.msra.mxu0 %v9918_v23  ;;  %5976 = vmatpush1.bf16.msra.mxu1 %v9920_v56  ;;  %v3458_v23 = vld [vmem:[#allocation5 + $0xa60] sm:$0xff]  ;;  %v10014_v56 = vcombine.low %v3426_v55, %v3442_v45  ;;  %v3156_v55 = vld [vmem:[#allocation5 + $0xf0] sm:$0xff]  ;;  %v3141_v45 = vld [vmem:[#allocation5 + $0x78] sm:$0xff] }
 0x361   :  { %5936 = vmatprep.subr.bf16.mxu0 %v9951_v8  ;;  %5977 = vmatprep.subr.bf16.mxu1 %v9953_v33  ;;  %v3475_v8 = vld [vmem:[#allocation5 + $0xae8] sm:$0xff]  ;;  %v10047_v20 = vcombine.high %v3458_v23, %v3474_v7  ;;  %v10046_v34 = vcombine.low %v3458_v23, %v3474_v7  ;;  %v3188_v23 = vld [vmem:[#allocation5 + $0x1f0] sm:$0xff]  ;;  %v3173_v7 = vld [vmem:[#allocation5 + $0x178] sm:$0xff] }
 0x362   :  { %v10049_v33 = vcombine.high %v3459_v57, %v3475_v8  ;;  %v10048_v61 = vcombine.low %v3459_v57, %v3475_v8 }
 0x364   :  { %5937 = vmatpush1.bf16.msra.mxu0 %v9950_v3  ;;  %5978 = vmatpush1.bf16.msra.mxu1 %v9952_v52  ;;  %v3490_v3 = vld [vmem:[#allocation5 + $0xb60] sm:$0xff]  ;;  %v3507_v52 = vld [vmem:[#allocation5 + $0xbe8] sm:$0xff] }
 0x365   :  { %5938 = vmatprep.subr.bf16.mxu0 %v9983_v49  ;;  %5979 = vmatprep.subr.bf16.mxu1 %v9985_v58  ;;  %v10079_v49 = vcombine.high %v3490_v3, %v3506_v38  ;;  %v10081_v58 = vcombine.high %v3491_v36, %v3507_v52  ;;  %v10078_v11 = vcombine.low %v3490_v3, %v3506_v38  ;;  %v3220_v3 = vld [vmem:[#allocation5 + $0x2f0] sm:$0xff]  ;;  %v3205_v38 = vld [vmem:[#allocation5 + $0x278] sm:$0xff] }
 0x366   :  { %v10080_v51 = vcombine.low %v3491_v36, %v3507_v52  ;;  %v3221_v36 = vld [vmem:[#allocation5 + $0x2f8] sm:$0xff] }
 0x368   :  { %5939 = vmatpush1.bf16.msra.mxu0 %v9982_v4  ;;  %5980 = vmatpush1.bf16.msra.mxu1 %v9984_v47  ;;  %v3140_v4 = vld [vmem:[#allocation5 + $0x70] sm:$0xff]  ;;  %v3157_v47 = vld [vmem:[#allocation5 + $0xf8] sm:$0xff] }
 0x369   :  { %5940 = vmatprep.subr.bf16.mxu0 %v10015_v1  ;;  %5981 = vmatprep.subr.bf16.mxu1 %v10017_v50  ;;  %v9731_v1 = vcombine.high %v3140_v4, %v3156_v55  ;;  %v9733_v50 = vcombine.high %v3141_v45, %v3157_v47  ;;  %v9730_v57 = vcombine.low %v3140_v4, %v3156_v55  ;;  %v3236_v4 = vld [vmem:[#allocation5 + $0x370] sm:$0xff] }
 0x36a   :  { %v9732_v8 = vcombine.low %v3141_v45, %v3157_v47  ;;  %v3252_v55 = vld [vmem:[#allocation5 + $0x3f0] sm:$0xff]  ;;  %v3237_v45 = vld [vmem:[#allocation5 + $0x378] sm:$0xff] }
 0x36b   :  { %v3253_v47 = vld [vmem:[#allocation5 + $0x3f8] sm:$0xff] }
 0x36c   :  { %5941 = vmatpush1.bf16.msra.mxu0 %v10014_v56  ;;  %5982 = vmatpush1.bf16.msra.mxu1 %v10016_v13  ;;  %v3172_v56 = vld [vmem:[#allocation5 + $0x170] sm:$0xff]  ;;  %v3189_v13 = vld [vmem:[#allocation5 + $0x1f8] sm:$0xff] }
 0x36d   :  { %5942 = vmatprep.subr.bf16.mxu0 %v10047_v20  ;;  %5983 = vmatprep.subr.bf16.mxu1 %v10049_v33  ;;  %v9763_v20 = vcombine.high %v3172_v56, %v3188_v23  ;;  %v9765_v33 = vcombine.high %v3173_v7, %v3189_v13  ;;  %v9762_v52 = vcombine.low %v3172_v56, %v3188_v23  ;;  %v3268_v56 = vld [vmem:[#allocation5 + $0x470] sm:$0xff] }
 0x36e   :  { %v3284_v23 = vld [vmem:[#allocation5 + $0x4f0] sm:$0xff] }
 0x370   :  { %5943 = vmatpush1.bf16.msra.mxu0 %v10046_v34  ;;  %5984 = vmatpush1.bf16.msra.mxu1 %v10048_v61  ;;  %v3204_v34 = vld [vmem:[#allocation5 + $0x270] sm:$0xff]  ;;  %v9764_v61 = vcombine.low %v3173_v7, %v3189_v13  ;;  %v3269_v7 = vld [vmem:[#allocation5 + $0x478] sm:$0xff] }
 0x371   :  { %5944 = vmatprep.subr.bf16.mxu0 %v10079_v49  ;;  %5985 = vmatprep.subr.bf16.mxu1 %v10081_v58  ;;  %v9795_v49 = vcombine.high %v3204_v34, %v3220_v3  ;;  %v9797_v58 = vcombine.high %v3205_v38, %v3221_v36  ;;  %v3285_v13 = vld [vmem:[#allocation5 + $0x4f8] sm:$0xff] }
 0x374   :  { %5945 = vmatpush1.bf16.msra.mxu0 %v10078_v11  ;;  %5986 = vmatpush1.bf16.msra.mxu1 %v10080_v51  ;;  %v9794_v11 = vcombine.low %v3204_v34, %v3220_v3  ;;  %v9796_v51 = vcombine.low %v3205_v38, %v3221_v36  ;;  %v3316_v34 = vld [vmem:[#allocation5 + $0x5f0] sm:$0xff]  ;;  %v3301_v3 = vld [vmem:[#allocation5 + $0x578] sm:$0xff]  ;;  %v9858_v38 = vcombine.low %v3268_v56, %v3284_v23 }
 0x375   :  { %6004 = vmatprep.subr.bf16.mxu0 %v9731_v1  ;;  %6045 = vmatprep.subr.bf16.mxu1 %v9733_v50  ;;  %v9827_v1 = vcombine.high %v3236_v4, %v3252_v55  ;;  %v9829_v50 = vcombine.high %v3237_v45, %v3253_v47  ;;  %v9860_v36 = vcombine.low %v3269_v7, %v3285_v13 }
 0x377   :  { %5955 = vmatmul.mubr.bf16.vlgmr.msra.gmra.mrb[56].mxu0 %v11693_v30  ;;  %5996 = vmatmul.mubr.bf16.vlgmr.msra.gmra.mrb[56].mxu1 %v11693_v30 }
 0x378   :  { %6005 = vmatpush1.bf16.msra.mxu0 %v9730_v57  ;;  %6046 = vmatpush1.bf16.msra.mxu1 %v9732_v8  ;;  %v9826_v57 = vcombine.low %v3236_v4, %v3252_v55  ;;  %v9828_v8 = vcombine.low %v3237_v45, %v3253_v47  ;;  %v3348_v4 = vld [vmem:[#allocation5 + $0x6f0] sm:$0xff]  ;;  %v3333_v55 = vld [vmem:[#allocation5 + $0x678] sm:$0xff] }
 0x379   :  { %6006 = vmatprep.subr.bf16.mxu0 %v9763_v20  ;;  %6047 = vmatprep.subr.bf16.mxu1 %v9765_v33  ;;  %v9859_v20 = vcombine.high %v3268_v56, %v3284_v23  ;;  %v3300_v33 = vld [vmem:[#allocation5 + $0x570] sm:$0xff] }
 0x37a   :  { %10100 = vmatprep.mubr.msk.bf16.mxu0 %vm2466_vm0, %v11533_v46  ;;  %10101 = vmatprep.mubr.msk.bf16.mxu1 %vm2466_vm0, %v11533_v46  ;;  %v9861_v46 = vcombine.high %v3269_v7, %v3285_v13  ;;  %v9890_v45 = vcombine.low %v3300_v33, %v3316_v34  ;;  %v3364_v56 = vld [vmem:[#allocation5 + $0x770] sm:$0xff] }
 0x37b   :  { %v3380_v23 = vld [vmem:[#allocation5 + $0x7f0] sm:$0xff] }
 0x37c   :  { %6007 = vmatpush1.bf16.msra.mxu0 %v9762_v52  ;;  %6048 = vmatpush1.bf16.msra.mxu1 %v9764_v61  ;;  %v3317_v52 = vld [vmem:[#allocation5 + $0x5f8] sm:$0xff]  ;;  %v9891_v61 = vcombine.high %v3300_v33, %v3316_v34  ;;  %v9955_v7 = vcombine.high %v3364_v56, %v3380_v23 }
 0x37d   :  { %6008 = vmatprep.subr.bf16.mxu0 %v9795_v49  ;;  %6049 = vmatprep.subr.bf16.mxu1 %v9797_v58  ;;  %v9893_v49 = vcombine.high %v3301_v3, %v3317_v52  ;;  %v3332_v58 = vld [vmem:[#allocation5 + $0x670] sm:$0xff]  ;;  %v9892_v47 = vcombine.low %v3301_v3, %v3317_v52  ;;  %v3397_v33 = vld [vmem:[#allocation5 + $0x878] sm:$0xff] }
 0x37e   :  { %v9922_v52 = vcombine.low %v3332_v58, %v3348_v4 }
 0x380   :  { %6009 = vmatpush1.bf16.msra.mxu0 %v9794_v11  ;;  %6050 = vmatpush1.bf16.msra.mxu1 %v9796_v51  ;;  %v3349_v11 = vld [vmem:[#allocation5 + $0x6f8] sm:$0xff]  ;;  %v9923_v51 = vcombine.high %v3332_v58, %v3348_v4  ;;  %v9987_v4 = vcombine.high %v3396_v27, %v3412_v48 }
 0x381   :  { %6010 = vmatprep.subr.bf16.mxu0 %v9827_v1  ;;  %6051 = vmatprep.subr.bf16.mxu1 %v9829_v50  ;;  %v9925_v50 = vcombine.high %v3333_v55, %v3349_v11 }
 0x384   :  { %6011 = vmatpush1.bf16.msra.mxu0 %v9826_v57  ;;  %6052 = vmatpush1.bf16.msra.mxu1 %v9828_v8  ;;  %v3365_v8 = vld [vmem:[#allocation5 + $0x778] sm:$0xff] }
 0x385   :  { %6012 = vmatprep.subr.bf16.mxu0 %v9859_v20  ;;  %6053 = vmatprep.subr.bf16.mxu1 %v9861_v46  ;;  %v3381_v20 = vld [vmem:[#allocation5 + $0x7f8] sm:$0xff] }
 0x386   :  { %v9957_v46 = vcombine.high %v3365_v8, %v3381_v20  ;;  %v9956_v58 = vcombine.low %v3365_v8, %v3381_v20  ;;  %v3461_v8 = vld [vmem:[#allocation5 + $0xa78] sm:$0xff] }
 0x387   :  { %v3477_v20 = vld [vmem:[#allocation5 + $0xaf8] sm:$0xff] }
 0x388   :  { %6013 = vmatpush1.bf16.msra.mxu0 %v9858_v38  ;;  %6054 = vmatpush1.bf16.msra.mxu1 %v9860_v36 }
 0x389   :  { %6014 = vmatprep.subr.bf16.mxu0 %v9891_v61  ;;  %6055 = vmatprep.subr.bf16.mxu1 %v9893_v49  ;;  %v9924_v49 = vcombine.low %v3333_v55, %v3349_v11  ;;  %v3429_v55 = vld [vmem:[#allocation5 + $0x978] sm:$0xff] }
 0x38a   :  { %v11745_v1 = vpop.f32.mrb[40].mxu0  ;;  %v11749_v13 = vpop.f32.mrb[40].mxu1  ;;  %v3445_v11 = vld [vmem:[#allocation5 + $0x9f8] sm:$0xff] }
 0x38b   :  { %v11751_v57 = vpop.f32.mrb[41].mxu0  ;;  %v11757_v34 = vpop.f32.mrb[41].mxu1 }
 0x38c   :  { %v5632_v3 = vpop.f32.mrb[42].mxu0  ;;  %6015 = vmatpush1.bf16.msra.mxu0 %v9890_v45  ;;  %v5673_v36 = vpop.f32.mrb[42].mxu1  ;;  %6056 = vmatpush1.bf16.msra.mxu1 %v9892_v47  ;;  %v9989_v45 = vcombine.high %v3397_v33, %v3413_v44  ;;  %v3428_v47 = vld [vmem:[#allocation5 + $0x970] sm:$0xff] }
 0x38d   :  { %v5633_v61 = vpop.f32.mrb[43].mxu0  ;;  %6016 = vmatprep.subr.bf16.mxu0 %v9923_v51  ;;  %v5674_v29 = vpop.f32.mrb[43].mxu1  ;;  %6057 = vmatprep.subr.bf16.mxu1 %v9925_v50  ;;  %v9954_v3 = vcombine.low %v3364_v56, %v3380_v23  ;;  %v3444_v36 = vld [vmem:[#allocation5 + $0x9f0] sm:$0xff]  ;;  %v6126_v51 = vlaneseq  ;;  %v9988_v50 = vcombine.low %v3397_v33, %v3413_v44  ;;  %v3493_v33 = vld [vmem:[#allocation5 + $0xb78] sm:$0xff] }
 0x38e   :  { %v9986_v29 = vcombine.low %v3396_v27, %v3412_v48  ;;  %v10019_v61 = vcombine.high %v3428_v47, %v3444_v36  ;;  %v3460_v56 = vld [vmem:[#allocation5 + $0xa70] sm:$0xff]  ;;  %v10053_v48 = vcombine.high %v3461_v8, %v3477_v20 }
 0x38f   :  { %v3476_v23 = vld [vmem:[#allocation5 + $0xaf0] sm:$0xff] }
 0x390   :  { %6017 = vmatpush1.bf16.msra.mxu0 %v9922_v52  ;;  %6058 = vmatpush1.bf16.msra.mxu1 %v9924_v49  ;;  %v10021_v52 = vcombine.high %v3429_v55, %v3445_v11  ;;  %v10020_v49 = vcombine.low %v3429_v55, %v3445_v11  ;;  %v10051_v38 = vcombine.high %v3460_v56, %v3476_v23  ;;  %v3492_v27 = vld [vmem:[#allocation5 + $0xb70] sm:$0xff] }
 0x391   :  { %6018 = vmatprep.subr.bf16.mxu0 %v9955_v7  ;;  %6059 = vmatprep.subr.bf16.mxu1 %v9957_v46  ;;  %v11761_v7 = vshrl.u32 %v6126_v51, 7  ;;  %v10018_v46 = vcombine.low %v3428_v47, %v3444_v36  ;;  %v10050_v47 = vcombine.low %v3460_v56, %v3476_v23  ;;  %v10052_v36 = vcombine.low %v3461_v8, %v3477_v20  ;;  %v10805_v56 = vld [vmem:[#allocation8 + $0xc0] sm:$0xff]  }
 0x392   :  { %v12071_v8 = vmax.f32 %v11580_v42, %v11713_v5  ;;  %v10811_v42 = vld [vmem:[#allocation8 + $0x88] sm:$0xff]   ;;  %v10813_v5 = vld [vmem:[#allocation8 + $0xd0] sm:$0xff]  }
 0x393   :  { %v11764_v44 = vsub.s32 1, %v11761_v7 }
 0x394   :  { %6019 = vmatpush1.bf16.msra.mxu0 %v9954_v3  ;;  %6060 = vmatpush1.bf16.msra.mxu1 %v9956_v58  ;;  %v3508_v3 = vld [vmem:[#allocation5 + $0xbf0] sm:$0xff]  ;;  %v3509_v58 = vld [vmem:[#allocation5 + $0xbf8] sm:$0xff] }
 0x395   :  { %6020 = vmatprep.subr.bf16.mxu0 %v9987_v4  ;;  %6061 = vmatprep.subr.bf16.mxu1 %v9989_v45  ;;  %v11766_v4 = vld [vmem:[#allocation7] sm:$0xff]  ;;  %v11769_v45 = vsub.s32 3, %v11761_v7  ;;  %v10083_v51 = vcombine.high %v3492_v27, %v3508_v3  ;;  %v10085_v55 = vcombine.high %v3493_v33, %v3509_v58 }
 0x396   :  { %v6133_v11 = vrot.slane %v11766_v4, %v11764_v44 }
 0x398   :  { %6021 = vmatpush1.bf16.msra.mxu0 %v9986_v29  ;;  %6062 = vmatpush1.bf16.msra.mxu1 %v9988_v50  ;;  %v6141_v29 = vrot.slane %v11766_v4, %v11769_v45  ;;  %v10082_v50 = vcombine.low %v3492_v27, %v3508_v3  ;;  %v10809_v3 = vld [vmem:[#allocation8 + $0xc8] sm:$0xff]  }
 0x399   :  { %6022 = vmatprep.subr.bf16.mxu0 %v10019_v61  ;;  %6063 = vmatprep.subr.bf16.mxu1 %v10021_v52  ;;  %v10084_v61 = vcombine.low %v3493_v33, %v3509_v58  ;;  %v10804_v52 = vld [vmem:[#allocation8 + $0x40] sm:$0xff]   ;;  %v10814_v58 = vld [vmem:[#allocation8 + $0x10] sm:$0xff]  }
 0x39a   :  { %v6289_v20 = vadd.f32 %v6141_v29, %v12071_v8  ;;  %v10821_v29 = vld [vmem:[#allocation8 + $0xe0] sm:$0xff]   ;;  %v10827_v8 = vld [vmem:[#allocation8 + $0xa8] sm:$0xff]  }
 0x39c   :  { %6023 = vmatpush1.bf16.msra.mxu0 %v10018_v46  ;;  %6064 = vmatpush1.bf16.msra.mxu1 %v10020_v49  ;;  %v10806_v46 = vld [vmem:[#allocation8] sm:$0xff]   ;;  %v6321_v33 = vpack.c.bf16 %v6289_v20, %v6289_v20  ;;  %v10828_v20 = vld [vmem:[#allocation8 + $0x70] sm:$0xff]  }
 0x39d   :  { %6024 = vmatprep.subr.bf16.mxu0 %v10051_v38  ;;  %6065 = vmatprep.subr.bf16.mxu1 %v10053_v48  ;;  %v12070_v38 = vmax.f32 %v11578_v41, %v11707_v0  ;;  %v10807_v49 = vld [vmem:[#allocation8 + $0x80] sm:$0xff]   ;;  %v10808_v48 = vld [vmem:[#allocation8 + $0x48] sm:$0xff]   ;;  %v10812_v0 = vld [vmem:[#allocation8 + $0x50] sm:$0xff]  }
 0x39e   :  { %v10810_v41 = vld [vmem:[#allocation8 + $0x8] sm:$0xff]  }
 0x39f   :  { %v6287_v23 = vadd.f32 %v6133_v11, %v12070_v38  ;;  %v10820_v11 = vld [vmem:[#allocation8 + $0x60] sm:$0xff]   ;;  %v10826_v38 = vld [vmem:[#allocation8 + $0x28] sm:$0xff]  }
 0x3a0   :  { %6025 = vmatpush1.bf16.msra.mxu0 %v10050_v47  ;;  %6066 = vmatpush1.bf16.msra.mxu1 %v10052_v36  ;;  %v10815_v47 = vld [vmem:[#allocation8 + $0x90] sm:$0xff]   ;;  %v10816_v36 = vld [vmem:[#allocation8 + $0x58] sm:$0xff]  }
 0x3a1   :  { %6026 = vmatprep.subr.bf16.mxu0 %v10083_v51  ;;  %6067 = vmatprep.subr.bf16.mxu1 %v10085_v55  ;;  %v6319_v27 = vpack.c.bf16 %v6287_v23, %v6287_v23  ;;  %v10817_v51 = vld [vmem:[#allocation8 + $0xd8] sm:$0xff]   ;;  %v11784_v23 = vsub.s32 0, %v11761_v7 }
 0x3a2   :  { %v10819_v55 = vld [vmem:[#allocation8 + $0x98] sm:$0xff]  }
 0x3a4   :  { %6027 = vmatpush1.bf16.msra.mxu0 %v10082_v50  ;;  %6068 = vmatpush1.bf16.msra.mxu1 %v10084_v61  ;;  %v10822_v50 = vld [vmem:[#allocation8 + $0x20] sm:$0xff]  }
 0x3a5   :  { %10378 = vmatprep.subr.bf16.mxu0 %v10804_v52  ;;  %10400 = vmatprep.subr.bf16.mxu1 %v10805_v56  ;;  %v10823_v61 = vld [vmem:[#allocation8 + $0xa0] sm:$0xff]   ;;  %v10824_v52 = vld [vmem:[#allocation8 + $0x68] sm:$0xff]  }
 0x3a6   :  { %v10825_v56 = vld [vmem:[#allocation8 + $0xe8] sm:$0xff]  }
 0x3a7   :  { %6037 = vmatmul.mubr.bf16.vlgmr.msra.gmra.mrb[60].mxu0 %v11693_v30  ;;  %6078 = vmatmul.mubr.bf16.vlgmr.msra.gmra.mrb[60].mxu1 %v11693_v30  ;;  %v10818_v30 = vld [vmem:[#allocation8 + $0x18] sm:$0xff]  }
 0x3a8   :  { %10379 = vmatpush3.bf16.msra.mxu0 %v10806_v46  ;;  %8430 = vmatprep.mubr.bf16.mxu0 %v6319_v27  ;;  %v11787_v46 = vsub.s32 2, %v11761_v7  ;;  %v11792_v27 = vsub.s32 5, %v11761_v7 }
 0x3a9   :  { %10401 = vmatpush3.bf16.msra.mxu1 %v10807_v49  ;;  %8470 = vmatprep.mubr.bf16.mxu1 %v6321_v33 }
 0x3aa   :  { %10380 = vmatprep.subr.bf16.mxu0 %v10808_v48  ;;  %10402 = vmatprep.subr.bf16.mxu1 %v10809_v3  ;;  %v10829_v48 = vld [vmem:[#allocation8 + $0xf0] sm:$0xff]   ;;  %v10837_v3 = vld [vmem:[#allocation8 + $0x1c0] sm:$0xff]  }
 0x3ac   :  { %10381 = vmatpush3.bf16.msra.mxu0 %v10810_v41 }
 0x3ad   :  { %10403 = vmatpush3.bf16.msra.mxu1 %v10811_v42  ;;  %10382 = vmatprep.subr.bf16.mxu0 %v10812_v0  ;;  %v11801_v42 = vsub.s32 7, %v11761_v7  ;;  %v10834_v0 = vld [vmem:[#allocation8 + $0x38] sm:$0xff]  }
 0x3ae   :  { %10404 = vmatprep.subr.bf16.mxu1 %v10813_v5 }
 0x3b0   :  { %10383 = vmatpush3.bf16.msra.mxu0 %v10814_v58 }
 0x3b1   :  { %10405 = vmatpush3.bf16.msra.mxu1 %v10815_v47  ;;  %10384 = vmatprep.subr.bf16.mxu0 %v10816_v36  ;;  %v10830_v36 = vld [vmem:[#allocation8 + $0x30] sm:$0xff]  }
 0x3b2   :  { %10406 = vmatprep.subr.bf16.mxu1 %v10817_v51  ;;  %v6129_v51 = vrot.slane %v11766_v4, %v11784_v23 }
 0x3b4   :  { %10385 = vmatpush3.bf16.msra.mxu0 %v10818_v30  ;;  %v12074_v30 = vmax.f32 %v11597_v25, %v11729_v12  ;;  %v10842_v25 = vld [vmem:[#allocation8 + $0x108] sm:$0xff]   ;;  %v10844_v12 = vld [vmem:[#allocation8 + $0x150] sm:$0xff]  }
 0x3b5   :  { %10407 = vmatpush3.bf16.msra.mxu1 %v10819_v55  ;;  %10386 = vmatprep.subr.bf16.mxu0 %v10820_v11 }
 0x3b6   :  { %10408 = vmatprep.subr.bf16.mxu1 %v10821_v29  ;;  %v10831_v29 = vld [vmem:[#allocation8 + $0xb0] sm:$0xff]  }
 0x3b8   :  { %10387 = vmatpush3.bf16.msra.mxu0 %v10822_v50  ;;  %v10832_v50 = vld [vmem:[#allocation8 + $0x78] sm:$0xff]  }
 0x3b9   :  { %10409 = vmatpush3.bf16.msra.mxu1 %v10823_v61  ;;  %10388 = vmatprep.subr.bf16.mxu0 %v10824_v52  ;;  %v6137_v61 = vrot.slane %v11766_v4, %v11787_v46 }
 0x3ba   :  { %v11789_v49 = vpop.f32.mrb[44].mxu0  ;;  %10410 = vmatprep.subr.bf16.mxu1 %v10825_v56  ;;  %v11796_v33 = vpop.f32.mrb[44].mxu1  ;;  %v10833_v56 = vld [vmem:[#allocation8 + $0xf8] sm:$0xff]  }
 0x3bb   :  { %v11798_v41 = vpop.f32.mrb[45].mxu0  ;;  %v11807_v58 = vpop.f32.mrb[45].mxu1 }
 0x3bc   :  { %v5714_v47 = vpop.f32.mrb[46].mxu0  ;;  %10389 = vmatpush3.bf16.msra.mxu0 %v10826_v38  ;;  %v5755_v55 = vpop.f32.mrb[46].mxu1  ;;  %v6149_v38 = vrot.slane %v11766_v4, %v11792_v27 }
 0x3bd   :  { %10411 = vmatpush3.bf16.msra.mxu1 %v10827_v8  ;;  %v5715_v11 = vpop.f32.mrb[47].mxu0  ;;  %10390 = vmatprep.subr.bf16.mxu0 %v10828_v20  ;;  %v5756_v52 = vpop.f32.mrb[47].mxu1  ;;  %v6157_v47 = vrot.slane %v11766_v4, %v11801_v42  ;;  %v12072_v8 = vmax.f32 %v11574_v37, %v11701_v53  ;;  %v10835_v55 = vld [vmem:[#allocation8 + $0xb8] sm:$0xff]   ;;  %v10838_v37 = vld [vmem:[#allocation8 + $0x100] sm:$0xff]  }
 0x3be   :  { %10412 = vmatprep.subr.bf16.mxu1 %v10829_v48  ;;  %v10836_v11 = vld [vmem:[#allocation8 + $0x140] sm:$0xff]   ;;  %v12073_v48 = vmax.f32 %v11576_v40, %v11705_v62  ;;  %v6291_v5 = vadd.f32 %v6149_v38, %v12074_v30  ;;  %v10840_v40 = vld [vmem:[#allocation8 + $0x148] sm:$0xff]   ;;  %v10849_v30 = vld [vmem:[#allocation8 + $0x1d8] sm:$0xff]  }
 0x3bf   :  { %v6286_v20 = vadd.f32 %v6129_v51, %v12072_v8  ;;  %v10839_v51 = vld [vmem:[#allocation8 + $0x180] sm:$0xff]  }
 0x3c0   :  { %10391 = vmatpush3.bf16.msra.mxu0 %v10830_v36  ;;  %v6288_v52 = vadd.f32 %v6137_v61, %v12073_v48  ;;  %v12075_v36 = vmax.f32 %v11599_v26, %v11735_v6  ;;  %v6323_v62 = vpack.c.bf16 %v6291_v5, %v6291_v5  ;;  %v10843_v26 = vld [vmem:[#allocation8 + $0x188] sm:$0xff]   ;;  %v10845_v6 = vld [vmem:[#allocation8 + $0x1d0] sm:$0xff]   ;;  %v10848_v5 = vld [vmem:[#allocation8 + $0x158] sm:$0xff]  }
 0x3c1   :  { %10413 = vmatpush3.bf16.msra.mxu1 %v10831_v29  ;;  %10392 = vmatprep.subr.bf16.mxu0 %v10832_v50  ;;  %v6318_v53 = vpack.c.bf16 %v6286_v20, %v6286_v20  ;;  %v10841_v50 = vld [vmem:[#allocation8 + $0x1c8] sm:$0xff]   ;;  %v10852_v38 = vld [vmem:[#allocation8 + $0x160] sm:$0xff]  }
 0x3c2   :  { %10414 = vmatprep.subr.bf16.mxu1 %v10833_v56  ;;  %v6293_v39 = vadd.f32 %v6157_v47, %v12075_v36  ;;  %v6320_v29 = vpack.c.bf16 %v6288_v52, %v6288_v52  ;;  %v10851_v56 = vld [vmem:[#allocation8 + $0x198] sm:$0xff]   ;;  %v10853_v47 = vld [vmem:[#allocation8 + $0x1e0] sm:$0xff]   ;;  %v10858_v48 = vld [vmem:[#allocation8 + $0x128] sm:$0xff]   ;;  %v11832_v52 = vsub.s32 4, %v11761_v7 }
 0x3c3   :  { %v10854_v8 = vld [vmem:[#allocation8 + $0x120] sm:$0xff]   ;;  %v10859_v36 = vld [vmem:[#allocation8 + $0x1a8] sm:$0xff]  }
 0x3c4   :  { %10393 = vmatpush3.bf16.msra.mxu0 %v10834_v0  ;;  %v6325_v61 = vpack.c.bf16 %v6293_v39, %v6293_v39  ;;  %v10846_v0 = vld [vmem:[#allocation8 + $0x110] sm:$0xff]   ;;  %v10850_v39 = vld [vmem:[#allocation8 + $0x118] sm:$0xff]   ;;  %v10855_v20 = vld [vmem:[#allocation8 + $0x1a0] sm:$0xff]  }
 0x3c5   :  { %10415 = vmatpush3.bf16.msra.mxu1 %v10835_v55  ;;  %10422 = vmatprep.subr.bf16.mxu0 %v10836_v11  ;;  %v10856_v55 = vld [vmem:[#allocation8 + $0x168] sm:$0xff]  }
 0x3c6   :  { %10444 = vmatprep.subr.bf16.mxu1 %v10837_v3  ;;  %v10847_v3 = vld [vmem:[#allocation8 + $0x190] sm:$0xff]   ;;  %v10857_v11 = vld [vmem:[#allocation8 + $0x1e8] sm:$0xff]  }
 0x3c7   :  { %8431 = vmatmul.mubr.bf16.vlgmr.msra.gmra.mrb[64].mxu0 %v6318_v53  ;;  %v11835_v53 = vsub.s32 6, %v11761_v7 }
 0x3c8   :  { %8471 = vmatmul.mubr.bf16.vlgmr.msra.gmra.mrb[64].mxu1 %v6320_v29  ;;  %10423 = vmatpush3.bf16.msra.mxu0 %v10838_v37  ;;  %v10860_v37 = vld [vmem:[#allocation8 + $0x170] sm:$0xff]   ;;  %v11837_v29 = vld [vmem:[#allocation7 + $0x8] sm:$0xff] }
 0x3c9   :  { %8510 = vmatprep.mubr.bf16.mxu0 %v6323_v62  ;;  %10445 = vmatpush3.bf16.msra.mxu1 %v10839_v51  ;;  %v10861_v51 = vld [vmem:[#allocation8 + $0x1f0] sm:$0xff]   ;;  %v6145_v62 = vrot.slane %v11766_v4, %v11832_v52  ;;  %v6165_v7 = vrot.slane %v11837_v29, %v11764_v44 }
 0x3ca   :  { %8550 = vmatprep.mubr.bf16.mxu1 %v6325_v61  ;;  %10424 = vmatprep.subr.bf16.mxu0 %v10840_v40  ;;  %v10862_v40 = vld [vmem:[#allocation8 + $0x130] sm:$0xff]   ;;  %v10864_v61 = vld [vmem:[#allocation8 + $0x178] sm:$0xff]  }
 0x3cb   :  { %10446 = vmatprep.subr.bf16.mxu1 %v10841_v50  ;;  %v10863_v50 = vld [vmem:[#allocation8 + $0x1b0] sm:$0xff]  }
 0x3cc   :  { %10425 = vmatpush3.bf16.msra.mxu0 %v10842_v25  ;;  %v6153_v25 = vrot.slane %v11766_v4, %v11835_v53  ;;  %v12077_v4 = vmax.f32 %v11595_v24, %v11727_v2  ;;  %v10872_v24 = vld [vmem:[#allocation8 + $0x248] sm:$0xff]  }
 0x3cd   :  { %10447 = vmatpush3.bf16.msra.mxu1 %v10843_v26  ;;  %10426 = vmatprep.subr.bf16.mxu0 %v10844_v12  ;;  %v10865_v26 = vld [vmem:[#allocation8 + $0x1f8] sm:$0xff]   ;;  %v6173_v12 = vrot.slane %v11837_v29, %v11769_v45 }
 0x3ce   :  { %10448 = vmatprep.subr.bf16.mxu1 %v10845_v6  ;;  %v10866_v6 = vld [vmem:[#allocation8 + $0x138] sm:$0xff]  }
 0x3d0   :  { %10427 = vmatpush3.bf16.msra.mxu0 %v10846_v0  ;;  %v12076_v0 = vmax.f32 %v11593_v21, %v11723_v19  ;;  %v10870_v21 = vld [vmem:[#allocation8 + $0x200] sm:$0xff]  }
 0x3d1   :  { %10449 = vmatpush3.bf16.msra.mxu1 %v10847_v3  ;;  %10428 = vmatprep.subr.bf16.mxu0 %v10848_v5  ;;  %v10867_v5 = vld [vmem:[#allocation8 + $0x1b8] sm:$0xff]  }
 0x3d2   :  { %10450 = vmatprep.subr.bf16.mxu1 %v10849_v30  ;;  %v6290_v3 = vadd.f32 %v6145_v62, %v12076_v0  ;;  %v10868_v30 = vld [vmem:[#allocation8 + $0x240] sm:$0xff]  }
 0x3d4   :  { %10429 = vmatpush3.bf16.msra.mxu0 %v10850_v39  ;;  %v6292_v39 = vadd.f32 %v6153_v25, %v12077_v4  ;;  %v6322_v19 = vpack.c.bf16 %v6290_v3, %v6290_v3  ;;  %v10879_v3 = vld [vmem:[#allocation8 + $0x290] sm:$0xff]   ;;  %v10881_v4 = vld [vmem:[#allocation8 + $0x2d8] sm:$0xff]  }
 0x3d5   :  { %10451 = vmatpush3.bf16.msra.mxu1 %v10851_v56  ;;  %10430 = vmatprep.subr.bf16.mxu0 %v10852_v38  ;;  %v10869_v56 = vld [vmem:[#allocation8 + $0x2c0] sm:$0xff]   ;;  %v12078_v38 = vmax.f32 %v11611_v15, %v11751_v57  ;;  %v10874_v15 = vld [vmem:[#allocation8 + $0x208] sm:$0xff]   ;;  %v10876_v57 = vld [vmem:[#allocation8 + $0x250] sm:$0xff]  }
 0x3d6   :  { %10452 = vmatprep.subr.bf16.mxu1 %v10853_v47 }
 0x3d7   :  { %v6295_v47 = vadd.f32 %v6165_v7, %v12078_v38  ;;  %v10878_v7 = vld [vmem:[#allocation8 + $0x210] sm:$0xff]   ;;  %v10884_v38 = vld [vmem:[#allocation8 + $0x260] sm:$0xff]  }
 0x3d8   :  { %10431 = vmatpush3.bf16.msra.mxu0 %v10854_v8  ;;  %v12079_v8 = vmax.f32 %v11613_v18, %v11757_v34  ;;  %v10875_v18 = vld [vmem:[#allocation8 + $0x288] sm:$0xff]  }
 0x3d9   :  { %10453 = vmatpush3.bf16.msra.mxu1 %v10855_v20  ;;  %10432 = vmatprep.subr.bf16.mxu0 %v10856_v55  ;;  %v10871_v55 = vld [vmem:[#allocation8 + $0x280] sm:$0xff]   ;;  %v6327_v2 = vpack.c.bf16 %v6295_v47, %v6295_v47 }
 0x3da   :  { %10454 = vmatprep.subr.bf16.mxu1 %v10857_v11  ;;  %v6297_v20 = vadd.f32 %v6173_v12, %v12079_v8  ;;  %v6324_v11 = vpack.c.bf16 %v6292_v39, %v6292_v39  ;;  %v10882_v39 = vld [vmem:[#allocation8 + $0x218] sm:$0xff]   ;;  %v10885_v47 = vld [vmem:[#allocation8 + $0x2e0] sm:$0xff]  }
 0x3db   :  { %v10886_v8 = vld [vmem:[#allocation8 + $0x220] sm:$0xff]  }
 0x3dc   :  { %10433 = vmatpush3.bf16.msra.mxu0 %v10858_v48  ;;  %v10873_v48 = vld [vmem:[#allocation8 + $0x2c8] sm:$0xff]  }
 0x3dd   :  { %10455 = vmatpush3.bf16.msra.mxu1 %v10859_v36  ;;  %10434 = vmatprep.subr.bf16.mxu0 %v10860_v37  ;;  %v6329_v36 = vpack.c.bf16 %v6297_v20, %v6297_v20  ;;  %v10877_v37 = vld [vmem:[#allocation8 + $0x2d0] sm:$0xff]   ;;  %v10887_v20 = vld [vmem:[#allocation8 + $0x2a0] sm:$0xff]  }
 0x3de   :  { %10456 = vmatprep.subr.bf16.mxu1 %v10861_v51 }
 0x3e0   :  { %10435 = vmatpush3.bf16.msra.mxu0 %v10862_v40 }
 0x3e1   :  { %10457 = vmatpush3.bf16.msra.mxu1 %v10863_v50  ;;  %10436 = vmatprep.subr.bf16.mxu0 %v10864_v61 }
 0x3e2   :  { %10458 = vmatprep.subr.bf16.mxu1 %v10865_v26 }
 0x3e4   :  { %10437 = vmatpush3.bf16.msra.mxu0 %v10866_v6 }
 0x3e5   :  { %10459 = vmatpush3.bf16.msra.mxu1 %v10867_v5  ;;  %10466 = vmatprep.subr.bf16.mxu0 %v10868_v30  ;;  %v10880_v5 = vld [vmem:[#allocation8 + $0x258] sm:$0xff]  }
 0x3e6   :  { %10488 = vmatprep.subr.bf16.mxu1 %v10869_v56  ;;  %v10883_v56 = vld [vmem:[#allocation8 + $0x298] sm:$0xff]  }
 0x3e7   :  { %8511 = vmatmul.mubr.bf16.vlgmr.msra.gmra.mrb[68].mxu0 %v6322_v19  ;;  %v10889_v19 = vld [vmem:[#allocation8 + $0x2e8] sm:$0xff]  }
 0x3e8   :  { %8551 = vmatmul.mubr.bf16.vlgmr.msra.gmra.mrb[68].mxu1 %v6324_v11  ;;  %10467 = vmatpush3.bf16.msra.mxu0 %v10870_v21  ;;  %v10888_v21 = vld [vmem:[#allocation8 + $0x268] sm:$0xff]  }
 0x3e9   :  { %8590 = vmatprep.mubr.bf16.mxu0 %v6327_v2  ;;  %10489 = vmatpush3.bf16.msra.mxu1 %v10871_v55  ;;  %v10890_v55 = vld [vmem:[#allocation8 + $0x228] sm:$0xff]   ;;  %v10893_v2 = vld [vmem:[#allocation8 + $0x2f0] sm:$0xff]  }
 0x3ea   :  { %8630 = vmatprep.mubr.bf16.mxu1 %v6329_v36  ;;  %v11859_v34 = vpop.f32.mrb[48].mxu0  ;;  %10468 = vmatprep.subr.bf16.mxu0 %v10872_v24  ;;  %v11863_v40 = vpop.f32.mrb[48].mxu1  ;;  %v10891_v11 = vld [vmem:[#allocation8 + $0x2a8] sm:$0xff]   ;;  %v10892_v24 = vld [vmem:[#allocation8 + $0x270] sm:$0xff]   ;;  %v6161_v36 = vrot.slane %v11837_v29, %v11784_v23 }
 0x3eb   :  { %v6102_v51 = vmax.f32 %v11640_v28, %v11859_v34  ;;  %v11865_v62 = vpop.f32.mrb[49].mxu0  ;;  %10490 = vmatprep.subr.bf16.mxu1 %v10873_v48  ;;  %v6104_v50 = vmax.f32 %v11642_v43, %v11863_v40  ;;  %v11871_v25 = vpop.f32.mrb[49].mxu1  ;;  %v10894_v48 = vld [vmem:[#allocation8 + $0x230] sm:$0xff]   ;;  %v10966_v28 = vld [vmem:[#allocation8 + $0x500] sm:$0xff]   ;;  %v10968_v43 = vld [vmem:[#allocation8 + $0x548] sm:$0xff]  }
 0x3ec   :  { %v6103_v61 = vmax.f32 %v11644_v32, %v11865_v62  ;;  %v5796_v26 = vpop.f32.mrb[50].mxu0  ;;  %10469 = vmatpush3.bf16.msra.mxu0 %v10874_v15  ;;  %v6105_v12 = vmax.f32 %v11646_v35, %v11871_v25  ;;  %v5837_v6 = vpop.f32.mrb[50].mxu1  ;;  %v10895_v15 = vld [vmem:[#allocation8 + $0x2b0] sm:$0xff]   ;;  %v10938_v32 = vld [vmem:[#allocation8 + $0x408] sm:$0xff]  }
 0x3ed   :  { %10491 = vmatpush3.bf16.msra.mxu1 %v10875_v18  ;;  %v5797_v0 = vpop.f32.mrb[51].mxu0  ;;  %10470 = vmatprep.subr.bf16.mxu0 %v10876_v57  ;;  %v5838_v30 = vpop.f32.mrb[51].mxu1  ;;  %v10896_v18 = vld [vmem:[#allocation8 + $0x278] sm:$0xff]   ;;  %v6169_v57 = vrot.slane %v11837_v29, %v11787_v46  ;;  %v6181_v26 = vrot.slane %v11837_v29, %v11792_v27  ;;  %v10939_v35 = vld [vmem:[#allocation8 + $0x488] sm:$0xff]   ;;  %v10940_v62 = vld [vmem:[#allocation8 + $0x450] sm:$0xff]  }
 0x3ee   :  { %10492 = vmatprep.subr.bf16.mxu1 %v10877_v37  ;;  %v10897_v37 = vld [vmem:[#allocation8 + $0x2f8] sm:$0xff]   ;;  %v12080_v0 = vmax.f32 %v11607_v10, %v11745_v1  ;;  %v10900_v30 = vld [vmem:[#allocation8 + $0x340] sm:$0xff]   ;;  %v10942_v25 = vld [vmem:[#allocation8 + $0x410] sm:$0xff]  }
 0x3ef   :  { %v10898_v6 = vld [vmem:[#allocation8 + $0x238] sm:$0xff]   ;;  %v10902_v10 = vld [vmem:[#allocation8 + $0x300] sm:$0xff]  }
 0x3f0   :  { %10471 = vmatpush3.bf16.msra.mxu0 %v10878_v7  ;;  %v6189_v7 = vrot.slane %v11837_v29, %v11801_v42 }
 0x3f1   :  { %10493 = vmatpush3.bf16.msra.mxu1 %v10879_v3  ;;  %10472 = vmatprep.subr.bf16.mxu0 %v10880_v5  ;;  %v6294_v3 = vadd.f32 %v6161_v36, %v12080_v0  ;;  %v10899_v5 = vld [vmem:[#allocation8 + $0x2b8] sm:$0xff]   ;;  %v10921_v0 = vld [vmem:[#allocation8 + $0x3e8] sm:$0xff]  }
 0x3f2   :  { %10494 = vmatprep.subr.bf16.mxu1 %v10881_v4  ;;  %v12081_v4 = vmax.f32 %v11609_v14, %v11749_v13  ;;  %v10904_v14 = vld [vmem:[#allocation8 + $0x348] sm:$0xff]   ;;  %v10913_v36 = vld [vmem:[#allocation8 + $0x3d8] sm:$0xff]  }
 0x3f3   :  { %v6326_v1 = vpack.c.bf16 %v6294_v3, %v6294_v3  ;;  %v10922_v3 = vld [vmem:[#allocation8 + $0x328] sm:$0xff]  }
 0x3f4   :  { %10473 = vmatpush3.bf16.msra.mxu0 %v10882_v39  ;;  %v6296_v39 = vadd.f32 %v6169_v57, %v12081_v4  ;;  %v10916_v57 = vld [vmem:[#allocation8 + $0x360] sm:$0xff]  }
 0x3f5   :  { %10495 = vmatpush3.bf16.msra.mxu1 %v10883_v56  ;;  %10474 = vmatprep.subr.bf16.mxu0 %v10884_v38  ;;  %v10901_v56 = vld [vmem:[#allocation8 + $0x3c0] sm:$0xff]   ;;  %v12082_v38 = vmax.f32 %v11625_v17, %v11798_v41  ;;  %v10906_v17 = vld [vmem:[#allocation8 + $0x308] sm:$0xff]   ;;  %v10908_v41 = vld [vmem:[#allocation8 + $0x350] sm:$0xff]  }
 0x3f6   :  { %10496 = vmatprep.subr.bf16.mxu1 %v10885_v47 }
 0x3f7   :  { %v6299_v47 = vadd.f32 %v6181_v26, %v12082_v38  ;;  %v10918_v26 = vld [vmem:[#allocation8 + $0x320] sm:$0xff]  }
 0x3f8   :  { %10475 = vmatpush3.bf16.msra.mxu0 %v10886_v8  ;;  %v12083_v8 = vmax.f32 %v11627_v22, %v11807_v58  ;;  %v10907_v22 = vld [vmem:[#allocation8 + $0x388] sm:$0xff]   ;;  %v10909_v58 = vld [vmem:[#allocation8 + $0x3d0] sm:$0xff]  }
 0x3f9   :  { %10497 = vmatpush3.bf16.msra.mxu1 %v10887_v20  ;;  %10476 = vmatprep.subr.bf16.mxu0 %v10888_v21  ;;  %v10903_v21 = vld [vmem:[#allocation8 + $0x380] sm:$0xff]   ;;  %v6331_v13 = vpack.c.bf16 %v6299_v47, %v6299_v47 }
 0x3fa   :  { %10498 = vmatprep.subr.bf16.mxu1 %v10889_v19  ;;  %v6301_v20 = vadd.f32 %v6189_v7, %v12083_v8  ;;  %v6328_v19 = vpack.c.bf16 %v6296_v39, %v6296_v39  ;;  %v10919_v7 = vld [vmem:[#allocation8 + $0x3a0] sm:$0xff]   ;;  %v10925_v39 = vld [vmem:[#allocation8 + $0x3f0] sm:$0xff]  }
 0x3fb   :  { %v11903_v8 = vld [vmem:[#allocation7 + $0x10] sm:$0xff] }
 0x3fc   :  { %10477 = vmatpush3.bf16.msra.mxu0 %v10890_v55  ;;  %v10905_v55 = vld [vmem:[#allocation8 + $0x3c8] sm:$0xff]  }
 0x3fd   :  { %10499 = vmatpush3.bf16.msra.mxu1 %v10891_v11  ;;  %10478 = vmatprep.subr.bf16.mxu0 %v10892_v24  ;;  %v6333_v11 = vpack.c.bf16 %v6301_v20, %v6301_v20  ;;  %v10910_v24 = vld [vmem:[#allocation8 + $0x310] sm:$0xff]  }
 0x3fe   :  { %10500 = vmatprep.subr.bf16.mxu1 %v10893_v2  ;;  %v10911_v2 = vld [vmem:[#allocation8 + $0x390] sm:$0xff]  }
 0x400   :  { %10479 = vmatpush3.bf16.msra.mxu0 %v10894_v48  ;;  %v10912_v48 = vld [vmem:[#allocation8 + $0x358] sm:$0xff]  }
 0x401   :  { %10501 = vmatpush3.bf16.msra.mxu1 %v10895_v15  ;;  %10480 = vmatprep.subr.bf16.mxu0 %v10896_v18  ;;  %v10914_v15 = vld [vmem:[#allocation8 + $0x318] sm:$0xff]  }
 0x402   :  { %10502 = vmatprep.subr.bf16.mxu1 %v10897_v37  ;;  %v10915_v18 = vld [vmem:[#allocation8 + $0x398] sm:$0xff]   ;;  %v10917_v37 = vld [vmem:[#allocation8 + $0x3e0] sm:$0xff]  }
 0x404   :  { %10481 = vmatpush3.bf16.msra.mxu0 %v10898_v6  ;;  %v10920_v6 = vld [vmem:[#allocation8 + $0x368] sm:$0xff]  }
 0x405   :  { %10503 = vmatpush3.bf16.msra.mxu1 %v10899_v5  ;;  %10510 = vmatprep.subr.bf16.mxu0 %v10900_v30  ;;  %v10923_v5 = vld [vmem:[#allocation8 + $0x3a8] sm:$0xff]   ;;  %v10924_v30 = vld [vmem:[#allocation8 + $0x370] sm:$0xff]  }
 0x406   :  { %10532 = vmatprep.subr.bf16.mxu1 %v10901_v56 }
 0x407   :  { %8591 = vmatmul.mubr.bf16.vlgmr.msra.gmra.mrb[72].mxu0 %v6326_v1 }
 0x408   :  { %8631 = vmatmul.mubr.bf16.vlgmr.msra.gmra.mrb[72].mxu1 %v6328_v19  ;;  %10511 = vmatpush3.bf16.msra.mxu0 %v10902_v10  ;;  %v10926_v19 = vld [vmem:[#allocation8 + $0x330] sm:$0xff]  }
 0x409   :  { %8670 = vmatprep.mubr.bf16.mxu0 %v6331_v13  ;;  %10533 = vmatpush3.bf16.msra.mxu1 %v10903_v21 }
 0x40a   :  { %8710 = vmatprep.mubr.bf16.mxu1 %v6333_v11  ;;  %10512 = vmatprep.subr.bf16.mxu0 %v10904_v14  ;;  %v6177_v14 = vrot.slane %v11837_v29, %v11832_v52 }
 0x40b   :  { %10534 = vmatprep.subr.bf16.mxu1 %v10905_v55 }
 0x40c   :  { %10513 = vmatpush3.bf16.msra.mxu0 %v10906_v17  ;;  %v10927_v17 = vld [vmem:[#allocation8 + $0x3b0] sm:$0xff]  }
 0x40d   :  { %10535 = vmatpush3.bf16.msra.mxu1 %v10907_v22  ;;  %10514 = vmatprep.subr.bf16.mxu0 %v10908_v41  ;;  %v10928_v22 = vld [vmem:[#allocation8 + $0x378] sm:$0xff]   ;;  %v6185_v41 = vrot.slane %v11837_v29, %v11835_v53  ;;  %v12085_v29 = vmax.f32 %v11623_v16, %v11796_v33  ;;  %v10936_v16 = vld [vmem:[#allocation8 + $0x448] sm:$0xff]  }
 0x40e   :  { %10536 = vmatprep.subr.bf16.mxu1 %v10909_v58 }
 0x410   :  { %10515 = vmatpush3.bf16.msra.mxu0 %v10910_v24  ;;  %v10929_v24 = vld [vmem:[#allocation8 + $0x3f8] sm:$0xff]  }
 0x411   :  { %10537 = vmatpush3.bf16.msra.mxu1 %v10911_v2  ;;  %10516 = vmatprep.subr.bf16.mxu0 %v10912_v48  ;;  %v6197_v2 = vrot.slane %v11903_v8, %v11764_v44  ;;  %v6205_v48 = vrot.slane %v11903_v8, %v11769_v45 }
 0x412   :  { %10538 = vmatprep.subr.bf16.mxu1 %v10913_v36  ;;  %v10930_v36 = vld [vmem:[#allocation8 + $0x338] sm:$0xff]  }
 0x414   :  { %10517 = vmatpush3.bf16.msra.mxu0 %v10914_v15  ;;  %v12084_v15 = vmax.f32 %v11621_v9, %v11789_v49  ;;  %v10934_v9 = vld [vmem:[#allocation8 + $0x400] sm:$0xff]  }
 0x415   :  { %10539 = vmatpush3.bf16.msra.mxu1 %v10915_v18  ;;  %10518 = vmatprep.subr.bf16.mxu0 %v10916_v57  ;;  %v10931_v57 = vld [vmem:[#allocation8 + $0x3b8] sm:$0xff]  }
 0x416   :  { %10540 = vmatprep.subr.bf16.mxu1 %v10917_v37  ;;  %v6298_v18 = vadd.f32 %v6177_v14, %v12084_v15  ;;  %v10932_v37 = vld [vmem:[#allocation8 + $0x440] sm:$0xff]   ;;  %v10946_v14 = vld [vmem:[#allocation8 + $0x418] sm:$0xff]   ;;  %v10957_v15 = vld [vmem:[#allocation8 + $0x4f0] sm:$0xff]  }
 0x418   :  { %10519 = vmatpush3.bf16.msra.mxu0 %v10918_v26  ;;  %v6300_v26 = vadd.f32 %v6185_v41, %v12085_v29  ;;  %v6330_v49 = vpack.c.bf16 %v6298_v18, %v6298_v18  ;;  %v10951_v41 = vld [vmem:[#allocation8 + $0x4a0] sm:$0xff]   ;;  %v10958_v18 = vld [vmem:[#allocation8 + $0x430] sm:$0xff]   ;;  %v10960_v29 = vld [vmem:[#allocation8 + $0x478] sm:$0xff]  }
 0x419   :  { %10541 = vmatpush3.bf16.msra.mxu1 %v10919_v7  ;;  %10520 = vmatprep.subr.bf16.mxu0 %v10920_v6  ;;  %v10933_v7 = vld [vmem:[#allocation8 + $0x4c0] sm:$0xff]   ;;  %v6303_v6 = vadd.f32 %v6197_v2, %v6103_v61  ;;  %v10941_v61 = vld [vmem:[#allocation8 + $0x4d0] sm:$0xff]   ;;  %v10954_v2 = vld [vmem:[#allocation8 + $0x428] sm:$0xff]  }
 0x41a   :  { %v11895_v4 = vpop.f32.mrb[52].mxu0  ;;  %10542 = vmatprep.subr.bf16.mxu1 %v10921_v0  ;;  %v11899_v38 = vpop.f32.mrb[52].mxu1  ;;  %v6305_v0 = vadd.f32 %v6205_v48, %v6105_v12  ;;  %v10943_v12 = vld [vmem:[#allocation8 + $0x490] sm:$0xff]   ;;  %v10955_v48 = vld [vmem:[#allocation8 + $0x4a8] sm:$0xff]  }
 0x41b   :  { %v6106_v56 = vmax.f32 %v11654_v54, %v11895_v4  ;;  %v11901_v47 = vpop.f32.mrb[53].mxu0  ;;  %v6108_v20 = vmax.f32 %v11656_v59, %v11899_v38  ;;  %v11909_v1 = vpop.f32.mrb[53].mxu1  ;;  %v6335_v33 = vpack.c.bf16 %v6303_v6, %v6303_v6  ;;  %v6213_v6 = vrot.slane %v11903_v8, %v11792_v27  ;;  %v11000_v4 = vld [vmem:[#allocation8 + $0x648] sm:$0xff]  }
 0x41c   :  { %v6107_v10 = vmax.f32 %v11658_v60, %v11901_v47  ;;  %v5878_v21 = vpop.f32.mrb[54].mxu0  ;;  %10521 = vmatpush3.bf16.msra.mxu0 %v10922_v3  ;;  %v6109_v13 = vmax.f32 %v11660_v63, %v11909_v1  ;;  %v5919_v55 = vpop.f32.mrb[54].mxu1  ;;  %v10935_v3 = vld [vmem:[#allocation8 + $0x480] sm:$0xff]   ;;  %v10970_v60 = vld [vmem:[#allocation8 + $0x508] sm:$0xff]   ;;  %v10972_v47 = vld [vmem:[#allocation8 + $0x550] sm:$0xff]  }
 0x41d   :  { %10543 = vmatpush3.bf16.msra.mxu1 %v10923_v5  ;;  %v5879_v11 = vpop.f32.mrb[55].mxu0  ;;  %10522 = vmatprep.subr.bf16.mxu0 %v10924_v30  ;;  %v5920_v58 = vpop.f32.mrb[55].mxu1  ;;  %v6332_v5 = vpack.c.bf16 %v6300_v26, %v6300_v26  ;;  %v10937_v30 = vld [vmem:[#allocation8 + $0x4c8] sm:$0xff]   ;;  %v10944_v21 = vld [vmem:[#allocation8 + $0x458] sm:$0xff]   ;;  %v6201_v26 = vrot.slane %v11903_v8, %v11787_v46  ;;  %v10973_v1 = vld [vmem:[#allocation8 + $0x5d0] sm:$0xff]  }
 0x41e   :  { %10544 = vmatprep.subr.bf16.mxu1 %v10925_v39  ;;  %v6337_v39 = vpack.c.bf16 %v6305_v0, %v6305_v0  ;;  %v10947_v55 = vld [vmem:[#allocation8 + $0x498] sm:$0xff]   ;;  %v10948_v11 = vld [vmem:[#allocation8 + $0x460] sm:$0xff]   ;;  %v10952_v58 = vld [vmem:[#allocation8 + $0x468] sm:$0xff]   ;;  %v6221_v0 = vrot.slane %v11903_v8, %v11801_v42 }
 0x41f   :  { %v10971_v63 = vld [vmem:[#allocation8 + $0x588] sm:$0xff]  }
 0x420   :  { %10523 = vmatpush3.bf16.msra.mxu0 %v10926_v19  ;;  %v10945_v19 = vld [vmem:[#allocation8 + $0x4d8] sm:$0xff]   ;;  %v11002_v59 = vld [vmem:[#allocation8 + $0x608] sm:$0xff]  }
 0x421   :  { %10545 = vmatpush3.bf16.msra.mxu1 %v10927_v17  ;;  %10524 = vmatprep.subr.bf16.mxu0 %v10928_v22  ;;  %v10949_v17 = vld [vmem:[#allocation8 + $0x4e0] sm:$0xff]   ;;  %v11003_v38 = vld [vmem:[#allocation8 + $0x688] sm:$0xff]  }
 0x422   :  { %10546 = vmatprep.subr.bf16.mxu1 %v10929_v24  ;;  %v10950_v22 = vld [vmem:[#allocation8 + $0x420] sm:$0xff]   ;;  %v10953_v24 = vld [vmem:[#allocation8 + $0x4e8] sm:$0xff]  }
 0x424   :  { %10525 = vmatpush3.bf16.msra.mxu0 %v10930_v36  ;;  %v10956_v36 = vld [vmem:[#allocation8 + $0x470] sm:$0xff]  }
 0x425   :  { %10547 = vmatpush3.bf16.msra.mxu1 %v10931_v57  ;;  %10554 = vmatprep.subr.bf16.mxu0 %v10932_v37  ;;  %v6193_v57 = vrot.slane %v11903_v8, %v11784_v23  ;;  %v10959_v37 = vld [vmem:[#allocation8 + $0x4b0] sm:$0xff]  }
 0x426   :  { %10576 = vmatprep.subr.bf16.mxu1 %v10933_v7  ;;  %v10961_v7 = vld [vmem:[#allocation8 + $0x4f8] sm:$0xff]  }
 0x427   :  { %8671 = vmatmul.mubr.bf16.vlgmr.msra.gmra.mrb[76].mxu0 %v6330_v49  ;;  %v6302_v49 = vadd.f32 %v6193_v57, %v6102_v51  ;;  %v10967_v51 = vld [vmem:[#allocation8 + $0x580] sm:$0xff]  }
 0x428   :  { %8711 = vmatmul.mubr.bf16.vlgmr.msra.gmra.mrb[76].mxu1 %v6332_v5  ;;  %10555 = vmatpush3.bf16.msra.mxu0 %v10934_v9  ;;  %v10962_v9 = vld [vmem:[#allocation8 + $0x438] sm:$0xff]   ;;  %v10964_v5 = vld [vmem:[#allocation8 + $0x540] sm:$0xff]  }
 0x429   :  { %8750 = vmatprep.mubr.bf16.mxu0 %v6335_v33  ;;  %10577 = vmatpush3.bf16.msra.mxu1 %v10935_v3  ;;  %v10963_v3 = vld [vmem:[#allocation8 + $0x4b8] sm:$0xff]   ;;  %v10965_v33 = vld [vmem:[#allocation8 + $0x5c0] sm:$0xff]   ;;  %v6334_v34 = vpack.c.bf16 %v6302_v49, %v6302_v49  ;;  %v10988_v49 = vld [vmem:[#allocation8 + $0x570] sm:$0xff]  }
 0x42a   :  { %8790 = vmatprep.mubr.bf16.mxu1 %v6337_v39  ;;  %10556 = vmatprep.subr.bf16.mxu0 %v10936_v16  ;;  %v6304_v16 = vadd.f32 %v6201_v26, %v6104_v50  ;;  %v6309_v39 = vadd.f32 %v6221_v0, %v6109_v13  ;;  %v10969_v50 = vld [vmem:[#allocation8 + $0x5c8] sm:$0xff]   ;;  %v10980_v57 = vld [vmem:[#allocation8 + $0x560] sm:$0xff]  }
 0x42b   :  { %10578 = vmatprep.subr.bf16.mxu1 %v10937_v30  ;;  %v6307_v30 = vadd.f32 %v6213_v6, %v6107_v10  ;;  %v10983_v26 = vld [vmem:[#allocation8 + $0x5a0] sm:$0xff]   ;;  %v10985_v6 = vld [vmem:[#allocation8 + $0x5e8] sm:$0xff]  }
 0x42c   :  { %10557 = vmatpush3.bf16.msra.mxu0 %v10938_v32  ;;  %v6336_v32 = vpack.c.bf16 %v6304_v16, %v6304_v16  ;;  %v10986_v0 = vld [vmem:[#allocation8 + $0x528] sm:$0xff]   ;;  %v10990_v16 = vld [vmem:[#allocation8 + $0x530] sm:$0xff]  }
 0x42d   :  { %10579 = vmatpush3.bf16.msra.mxu1 %v10939_v35  ;;  %10558 = vmatprep.subr.bf16.mxu0 %v10940_v62  ;;  %v6339_v40 = vpack.c.bf16 %v6307_v30, %v6307_v30  ;;  %v6341_v35 = vpack.c.bf16 %v6309_v39, %v6309_v39  ;;  %v10991_v30 = vld [vmem:[#allocation8 + $0x5b0] sm:$0xff]   ;;  %v10992_v39 = vld [vmem:[#allocation8 + $0x578] sm:$0xff]  }
 0x42e   :  { %10580 = vmatprep.subr.bf16.mxu1 %v10941_v61 }
 0x430   :  { %10559 = vmatpush3.bf16.msra.mxu0 %v10942_v25  ;;  %v12086_v25 = vld [vmem:[#allocation24_spill] sm:$0xff] }
 0x431   :  { %10581 = vmatpush3.bf16.msra.mxu1 %v10943_v12  ;;  %10560 = vmatprep.subr.bf16.mxu0 %v10944_v21  ;;  %v12087_v21 = vld [vmem:[#allocation25_spill] sm:$0xff] }
 0x432   :  { %10582 = vmatprep.subr.bf16.mxu1 %v10945_v19 }
 0x434   :  { %10561 = vmatpush3.bf16.msra.mxu0 %v10946_v14 }
 0x435   :  { %10583 = vmatpush3.bf16.msra.mxu1 %v10947_v55  ;;  %10562 = vmatprep.subr.bf16.mxu0 %v10948_v11  ;;  %v10974_v11 = vld [vmem:[#allocation8 + $0x510] sm:$0xff]  }
 0x436   :  { %10584 = vmatprep.subr.bf16.mxu1 %v10949_v17  ;;  %v12088_v17 = vld [vmem:[#allocation26_spill] sm:$0xff] }
 0x438   :  { %10563 = vmatpush3.bf16.msra.mxu0 %v10950_v22 }
 0x439   :  { %10585 = vmatpush3.bf16.msra.mxu1 %v10951_v41  ;;  %10564 = vmatprep.subr.bf16.mxu0 %v10952_v58 }
 0x43a   :  { %10586 = vmatprep.subr.bf16.mxu1 %v10953_v24  ;;  %v10975_v24 = vld [vmem:[#allocation8 + $0x590] sm:$0xff]  }
 0x43c   :  { %10565 = vmatpush3.bf16.msra.mxu0 %v10954_v2  ;;  %v10976_v2 = vld [vmem:[#allocation8 + $0x558] sm:$0xff]  }
 0x43d   :  { %10587 = vmatpush3.bf16.msra.mxu1 %v10955_v48  ;;  %10566 = vmatprep.subr.bf16.mxu0 %v10956_v36  ;;  %v10977_v36 = vld [vmem:[#allocation8 + $0x5d8] sm:$0xff]  }
 0x43e   :  { %10588 = vmatprep.subr.bf16.mxu1 %v10957_v15  ;;  %v10978_v15 = vld [vmem:[#allocation8 + $0x518] sm:$0xff]  }
 0x440   :  { %10567 = vmatpush3.bf16.msra.mxu0 %v10958_v18  ;;  %v10979_v18 = vld [vmem:[#allocation8 + $0x598] sm:$0xff]  }
 0x441   :  { %10589 = vmatpush3.bf16.msra.mxu1 %v10959_v37  ;;  %10568 = vmatprep.subr.bf16.mxu0 %v10960_v29  ;;  %v10981_v37 = vld [vmem:[#allocation8 + $0x5e0] sm:$0xff]  }
 0x442   :  { %10590 = vmatprep.subr.bf16.mxu1 %v10961_v7  ;;  %v10982_v29 = vld [vmem:[#allocation8 + $0x520] sm:$0xff]   ;;  %v10984_v7 = vld [vmem:[#allocation8 + $0x568] sm:$0xff]  }
 0x444   :  { %10569 = vmatpush3.bf16.msra.mxu0 %v10962_v9  ;;  %v10987_v9 = vld [vmem:[#allocation8 + $0x5a8] sm:$0xff]  }
 0x445   :  { %10591 = vmatpush3.bf16.msra.mxu1 %v10963_v3  ;;  %10598 = vmatprep.subr.bf16.mxu0 %v10964_v5  ;;  %v10989_v3 = vld [vmem:[#allocation8 + $0x5f0] sm:$0xff]   ;;  %v11969_v5 = vld [vmem:[#allocation7 + $0x18] sm:$0xff] }
 0x446   :  { %10620 = vmatprep.subr.bf16.mxu1 %v10965_v33  ;;  %v6209_v33 = vrot.slane %v11903_v8, %v11832_v52 }
 0x447   :  { %8751 = vmatmul.mubr.bf16.vlgmr.msra.gmra.mrb[80].mxu0 %v6334_v34  ;;  %v10993_v34 = vld [vmem:[#allocation8 + $0x5f8] sm:$0xff]  }
 0x448   :  { %8791 = vmatmul.mubr.bf16.vlgmr.msra.gmra.mrb[80].mxu1 %v6336_v32  ;;  %10599 = vmatpush3.bf16.msra.mxu0 %v10966_v28  ;;  %v6217_v28 = vrot.slane %v11903_v8, %v11835_v53  ;;  %v6237_v32 = vrot.slane %v11969_v5, %v11769_v45  ;;  %v10998_v45 = vld [vmem:[#allocation8 + $0x600] sm:$0xff]  }
 0x449   :  { %8830 = vmatprep.mubr.bf16.mxu0 %v6339_v40  ;;  %10621 = vmatpush3.bf16.msra.mxu1 %v10967_v51  ;;  %v6229_v51 = vrot.slane %v11969_v5, %v11764_v44  ;;  %v6306_v40 = vadd.f32 %v6209_v33, %v6106_v56 }
 0x44a   :  { %8870 = vmatprep.mubr.bf16.mxu1 %v6341_v35  ;;  %v11953_v10 = vpop.f32.mrb[56].mxu0  ;;  %10600 = vmatprep.subr.bf16.mxu0 %v10968_v43  ;;  %v11957_v62 = vpop.f32.mrb[56].mxu1  ;;  %v10994_v43 = vld [vmem:[#allocation8 + $0x538] sm:$0xff]   ;;  %v10996_v35 = vld [vmem:[#allocation8 + $0x640] sm:$0xff]   ;;  %v6308_v8 = vadd.f32 %v6217_v28, %v6108_v20  ;;  %v11004_v20 = vld [vmem:[#allocation8 + $0x650] sm:$0xff]  }
 0x44b   :  { %v6110_v13 = vmax.f32 %v11668_v31, %v11953_v10  ;;  %v11959_v61 = vpop.f32.mrb[57].mxu0  ;;  %10622 = vmatprep.subr.bf16.mxu1 %v10969_v50  ;;  %v6112_v12 = vmax.f32 %v12086_v25, %v11957_v62  ;;  %v11965_v14 = vpop.f32.mrb[57].mxu1  ;;  %v10995_v50 = vld [vmem:[#allocation8 + $0x5b8] sm:$0xff]   ;;  %v11022_v28 = vld [vmem:[#allocation8 + $0x630] sm:$0xff]   ;;  %v11032_v10 = vld [vmem:[#allocation8 + $0x748] sm:$0xff]  }
 0x44c   :  { %v6111_v19 = vmax.f32 %v12087_v21, %v11959_v61  ;;  %v5960_v55 = vpop.f32.mrb[58].mxu0  ;;  %10601 = vmatpush3.bf16.msra.mxu0 %v10970_v60  ;;  %v6113_v22 = vmax.f32 %v12088_v17, %v11965_v14  ;;  %v6001_v41 = vpop.f32.mrb[58].mxu1  ;;  %v10997_v60 = vld [vmem:[#allocation8 + $0x6c0] sm:$0xff]   ;;  %v6340_v54 = vpack.c.bf16 %v6308_v8, %v6308_v8  ;;  %v11001_v61 = vld [vmem:[#allocation8 + $0x6c8] sm:$0xff]   ;;  %v11006_v14 = vld [vmem:[#allocation8 + $0x610] sm:$0xff]   ;;  %v6233_v8 = vrot.slane %v11969_v5, %v11787_v46 }
 0x44d   :  { %10623 = vmatpush3.bf16.msra.mxu1 %v10971_v63  ;;  %v5961_v58 = vpop.f32.mrb[59].mxu0  ;;  %10602 = vmatprep.subr.bf16.mxu0 %v10972_v47  ;;  %v6002_v48 = vpop.f32.mrb[59].mxu1  ;;  %v6338_v47 = vpack.c.bf16 %v6306_v40, %v6306_v40  ;;  %v11007_v55 = vld [vmem:[#allocation8 + $0x690] sm:$0xff]   ;;  %v11009_v17 = vld [vmem:[#allocation8 + $0x6d8] sm:$0xff]   ;;  %v11034_v62 = vld [vmem:[#allocation8 + $0x708] sm:$0xff]  }
 0x44e   :  { %10624 = vmatprep.subr.bf16.mxu1 %v10973_v1  ;;  %v6311_v44 = vadd.f32 %v6229_v51, %v6111_v19  ;;  %v6313_v63 = vadd.f32 %v6237_v32, %v6113_v22  ;;  %v10999_v1 = vld [vmem:[#allocation8 + $0x680] sm:$0xff]   ;;  %v11005_v19 = vld [vmem:[#allocation8 + $0x6d0] sm:$0xff]   ;;  %v11010_v22 = vld [vmem:[#allocation8 + $0x618] sm:$0xff]   ;;  %v6312_v46 = vadd.f32 %v6233_v8, %v6112_v12 }
 0x44f   :  { %v11011_v41 = vld [vmem:[#allocation8 + $0x698] sm:$0xff]   ;;  %v11012_v58 = vld [vmem:[#allocation8 + $0x660] sm:$0xff]   ;;  %v11035_v25 = vld [vmem:[#allocation8 + $0x788] sm:$0xff]  }
 0x450   :  { %10603 = vmatpush3.bf16.msra.mxu0 %v10974_v11  ;;  %v6343_v56 = vpack.c.bf16 %v6311_v44, %v6311_v44  ;;  %v6345_v21 = vpack.c.bf16 %v6313_v63, %v6313_v63  ;;  %v11008_v11 = vld [vmem:[#allocation8 + $0x658] sm:$0xff]   ;;  %v11015_v48 = vld [vmem:[#allocation8 + $0x6a0] sm:$0xff]   ;;  %v6245_v63 = vrot.slane %v11969_v5, %v11792_v27  ;;  %v6344_v31 = vpack.c.bf16 %v6312_v46, %v6312_v46  ;;  %v11036_v12 = vld [vmem:[#allocation8 + $0x750] sm:$0xff]  }
 0x451   :  { %10625 = vmatpush3.bf16.msra.mxu1 %v10975_v24  ;;  %10604 = vmatprep.subr.bf16.mxu0 %v10976_v2  ;;  %v11013_v24 = vld [vmem:[#allocation8 + $0x6e0] sm:$0xff]   ;;  %v12092_v51 = vld [vmem:[#allocation30_spill] sm:$0xff] }
 0x452   :  { %10626 = vmatprep.subr.bf16.mxu1 %v10977_v36  ;;  %v11014_v2 = vld [vmem:[#allocation8 + $0x620] sm:$0xff]   ;;  %v11016_v36 = vld [vmem:[#allocation8 + $0x668] sm:$0xff]   ;;  %v11025_v44 = vld [vmem:[#allocation8 + $0x6f8] sm:$0xff]  }
 0x454   :  { %10605 = vmatpush3.bf16.msra.mxu0 %v10978_v15  ;;  %v11017_v15 = vld [vmem:[#allocation8 + $0x6e8] sm:$0xff]  }
 0x455   :  { %10627 = vmatpush3.bf16.msra.mxu1 %v10979_v18  ;;  %10606 = vmatprep.subr.bf16.mxu0 %v10980_v57  ;;  %v11018_v18 = vld [vmem:[#allocation8 + $0x628] sm:$0xff]  }
 0x456   :  { %10628 = vmatprep.subr.bf16.mxu1 %v10981_v37  ;;  %v11019_v57 = vld [vmem:[#allocation8 + $0x6a8] sm:$0xff]   ;;  %v11020_v37 = vld [vmem:[#allocation8 + $0x670] sm:$0xff]  }
 0x458   :  { %10607 = vmatpush3.bf16.msra.mxu0 %v10982_v29 }
 0x459   :  { %10629 = vmatpush3.bf16.msra.mxu1 %v10983_v26  ;;  %10608 = vmatprep.subr.bf16.mxu0 %v10984_v7  ;;  %v11021_v26 = vld [vmem:[#allocation8 + $0x6f0] sm:$0xff]   ;;  %v12089_v7 = vld [vmem:[#allocation27_spill] sm:$0xff] }
 0x45a   :  { %10630 = vmatprep.subr.bf16.mxu1 %v10985_v6 }
 0x45c   :  { %10609 = vmatpush3.bf16.msra.mxu0 %v10986_v0 }
 0x45d   :  { %10631 = vmatpush3.bf16.msra.mxu1 %v10987_v9  ;;  %10610 = vmatprep.subr.bf16.mxu0 %v10988_v49  ;;  %v12090_v49 = vld [vmem:[#allocation28_spill] sm:$0xff] }
 0x45e   :  { %10632 = vmatprep.subr.bf16.mxu1 %v10989_v3 }
 0x460   :  { %10611 = vmatpush3.bf16.msra.mxu0 %v10990_v16  ;;  %v12091_v16 = vld [vmem:[#allocation29_spill] sm:$0xff] }
 0x461   :  { %10633 = vmatpush3.bf16.msra.mxu1 %v10991_v30  ;;  %10612 = vmatprep.subr.bf16.mxu0 %v10992_v39 }
 0x462   :  { %10634 = vmatprep.subr.bf16.mxu1 %v10993_v34  ;;  %v6225_v34 = vrot.slane %v11969_v5, %v11784_v23  ;;  %v6253_v23 = vrot.slane %v11969_v5, %v11801_v42  ;;  %v11030_v42 = vld [vmem:[#allocation8 + $0x700] sm:$0xff]  }
 0x464   :  { %10613 = vmatpush3.bf16.msra.mxu0 %v10994_v43 }
 0x465   :  { %10635 = vmatpush3.bf16.msra.mxu1 %v10995_v50  ;;  %10642 = vmatprep.subr.bf16.mxu0 %v10996_v35  ;;  %v11023_v50 = vld [vmem:[#allocation8 + $0x6b0] sm:$0xff]   ;;  %v11024_v35 = vld [vmem:[#allocation8 + $0x678] sm:$0xff]  }
 0x466   :  { %10664 = vmatprep.subr.bf16.mxu1 %v10997_v60 }
 0x467   :  { %8831 = vmatmul.mubr.bf16.vlgmr.msra.gmra.mrb[84].mxu0 %v6338_v47  ;;  %v6310_v47 = vadd.f32 %v6225_v34, %v6110_v13  ;;  %v6241_v34 = vrot.slane %v11969_v5, %v11832_v52 }
 0x468   :  { %8871 = vmatmul.mubr.bf16.vlgmr.msra.gmra.mrb[84].mxu1 %v6340_v54  ;;  %10643 = vmatpush3.bf16.msra.mxu0 %v10998_v45  ;;  %v11026_v45 = vld [vmem:[#allocation8 + $0x638] sm:$0xff]   ;;  %v11028_v54 = vld [vmem:[#allocation8 + $0x740] sm:$0xff]  }
 0x469   :  { %8910 = vmatprep.mubr.bf16.mxu0 %v6343_v56  ;;  %10665 = vmatpush3.bf16.msra.mxu1 %v10999_v1  ;;  %v11027_v1 = vld [vmem:[#allocation8 + $0x6b8] sm:$0xff]  }
 0x46a   :  { %8950 = vmatprep.mubr.bf16.mxu1 %v6345_v21  ;;  %10644 = vmatprep.subr.bf16.mxu0 %v11000_v4  ;;  %v11029_v4 = vld [vmem:[#allocation8 + $0x7c0] sm:$0xff]  }
 0x46b   :  { %10666 = vmatprep.subr.bf16.mxu1 %v11001_v61  ;;  %v6342_v61 = vpack.c.bf16 %v6310_v47, %v6310_v47  ;;  %v11031_v21 = vld [vmem:[#allocation8 + $0x780] sm:$0xff]  }
 0x46c   :  { %10645 = vmatpush3.bf16.msra.mxu0 %v11002_v59  ;;  %v11033_v59 = vld [vmem:[#allocation8 + $0x7c8] sm:$0xff]  }
 0x46d   :  { %10667 = vmatpush3.bf16.msra.mxu1 %v11003_v38  ;;  %10646 = vmatprep.subr.bf16.mxu0 %v11004_v20  ;;  %v11037_v20 = vld [vmem:[#allocation8 + $0x7d0] sm:$0xff]  }
 0x46e   :  { %10668 = vmatprep.subr.bf16.mxu1 %v11005_v19  ;;  %v11038_v19 = vld [vmem:[#allocation8 + $0x710] sm:$0xff]  }
 0x470   :  { %10647 = vmatpush3.bf16.msra.mxu0 %v11006_v14  ;;  %v11039_v14 = vld [vmem:[#allocation8 + $0x790] sm:$0xff]  }
 0x471   :  { %10669 = vmatpush3.bf16.msra.mxu1 %v11007_v55  ;;  %10648 = vmatprep.subr.bf16.mxu0 %v11008_v11  ;;  %v11040_v55 = vld [vmem:[#allocation8 + $0x758] sm:$0xff]  }
 0x472   :  { %10670 = vmatprep.subr.bf16.mxu1 %v11009_v17  ;;  %v11041_v11 = vld [vmem:[#allocation8 + $0x7d8] sm:$0xff]  }
 0x473   :  { %v11042_v17 = vld [vmem:[#allocation8 + $0x718] sm:$0xff]  }
 0x474   :  { %10649 = vmatpush3.bf16.msra.mxu0 %v11010_v22  ;;  %v11043_v22 = vld [vmem:[#allocation8 + $0x798] sm:$0xff]  }
 0x475   :  { %10671 = vmatpush3.bf16.msra.mxu1 %v11011_v41  ;;  %10650 = vmatprep.subr.bf16.mxu0 %v11012_v58  ;;  %v11044_v41 = vld [vmem:[#allocation8 + $0x760] sm:$0xff]  }
 0x476   :  { %10672 = vmatprep.subr.bf16.mxu1 %v11013_v24  ;;  %v11045_v58 = vld [vmem:[#allocation8 + $0x7e0] sm:$0xff]  }
 0x477   :  { %v11046_v24 = vld [vmem:[#allocation8 + $0x720] sm:$0xff]  }
 0x478   :  { %10651 = vmatpush3.bf16.msra.mxu0 %v11014_v2  ;;  %v11047_v2 = vld [vmem:[#allocation8 + $0x7a0] sm:$0xff]  }
 0x479   :  { %10673 = vmatpush3.bf16.msra.mxu1 %v11015_v48  ;;  %10652 = vmatprep.subr.bf16.mxu0 %v11016_v36  ;;  %v11048_v48 = vld [vmem:[#allocation8 + $0x768] sm:$0xff]  }
 0x47a   :  { %v11985_v29 = vpop.f32.mrb[60].mxu0  ;;  %10674 = vmatprep.subr.bf16.mxu1 %v11017_v15  ;;  %v11989_v0 = vpop.f32.mrb[60].mxu1  ;;  %v11049_v36 = vld [vmem:[#allocation8 + $0x7e8] sm:$0xff]  }
 0x47b   :  { %v6114_v6 = vmax.f32 %v12089_v7, %v11985_v29  ;;  %v6040_v9 = vpop.f32.mrb[61].mxu0  ;;  %v6116_v3 = vmax.f32 %v12090_v49, %v11989_v0  ;;  %v6081_v30 = vpop.f32.mrb[61].mxu1  ;;  %v11050_v15 = vld [vmem:[#allocation8 + $0x728] sm:$0xff]  }
 0x47c   :  { %v6115_v33 = vmax.f32 %v12091_v16, %v6040_v9  ;;  %v6042_v39 = vpop.f32.mrb[62].mxu0  ;;  %10653 = vmatpush3.bf16.msra.mxu0 %v11018_v18  ;;  %v6117_v32 = vmax.f32 %v12092_v51, %v6081_v30  ;;  %v6083_v43 = vpop.f32.mrb[62].mxu1  ;;  %v11051_v18 = vld [vmem:[#allocation8 + $0x7a8] sm:$0xff]  }
 0x47d   :  { %10675 = vmatpush3.bf16.msra.mxu1 %v11019_v57  ;;  %v6043_v40 = vpop.f32.mrb[63].mxu0  ;;  %10654 = vmatprep.subr.bf16.mxu0 %v11020_v37  ;;  %v6084_v60 = vpop.f32.mrb[63].mxu1  ;;  %v11052_v57 = vld [vmem:[#allocation8 + $0x770] sm:$0xff]   ;;  %v6314_v52 = vadd.f32 %v6241_v34, %v6114_v6  ;;  %v11071_v34 = vld [vmem:[#allocation14 + $0x18] sm:$0xff]  }
 0x47e   :  { %10676 = vmatprep.subr.bf16.mxu1 %v11021_v26  ;;  %v6315_v27 = vadd.f32 %v6245_v63, %v6115_v33  ;;  %v6317_v56 = vadd.f32 %v6253_v23, %v6117_v32  ;;  %v11053_v26 = vld [vmem:[#allocation8 + $0x7f0] sm:$0xff]   ;;  %v11057_v60 = vld [vmem:[#allocation8 + $0x7f8] sm:$0xff]  }
 0x47f   :  { %v11055_v40 = vld [vmem:[#allocation8 + $0x7b0] sm:$0xff]   ;;  %v11058_v63 = vld [vmem:[#allocation8 + $0x738] sm:$0xff]  }
 0x480   :  { %10655 = vmatpush3.bf16.msra.mxu0 %v11022_v28  ;;  %v6347_v13 = vpack.c.bf16 %v6315_v27, %v6315_v27  ;;  %v6349_v38 = vpack.c.bf16 %v6317_v56, %v6317_v56  ;;  %v11054_v28 = vld [vmem:[#allocation8 + $0x730] sm:$0xff]   ;;  %v11059_v23 = vld [vmem:[#allocation8 + $0x7b8] sm:$0xff]  }
 0x481   :  { %10677 = vmatpush3.bf16.msra.mxu1 %v11023_v50  ;;  %10656 = vmatprep.subr.bf16.mxu0 %v11024_v35  ;;  %v11056_v50 = vld [vmem:[#allocation8 + $0x778] sm:$0xff]   ;;  %v6249_v35 = vrot.slane %v11969_v5, %v11835_v53  ;;  %v6346_v53 = vpack.c.bf16 %v6314_v52, %v6314_v52 }
 0x482   :  { %10678 = vmatprep.subr.bf16.mxu1 %v11025_v44 }
 0x484   :  { %10657 = vmatpush3.bf16.msra.mxu0 %v11026_v45  ;;  %v6316_v45 = vadd.f32 %v6249_v35, %v6116_v3 }
 0x485   :  { %10679 = vmatpush3.bf16.msra.mxu1 %v11027_v1  ;;  %10686 = vmatprep.subr.bf16.mxu0 %v11028_v54 }
 0x486   :  { %10708 = vmatprep.subr.bf16.mxu1 %v11029_v4  ;;  %v6348_v5 = vpack.c.bf16 %v6316_v45, %v6316_v45 }
 0x487   :  { %8911 = vmatmul.mubr.bf16.vlgmr.msra.gmra.mrb[88].mxu0 %v6342_v61 }
 0x488   :  { %8951 = vmatmul.mubr.bf16.vlgmr.msra.gmra.mrb[88].mxu1 %v6344_v31  ;;  %10687 = vmatpush3.bf16.msra.mxu0 %v11030_v42 }
 0x489   :  { %8990 = vmatprep.mubr.bf16.mxu0 %v6347_v13  ;;  %10709 = vmatpush3.bf16.msra.mxu1 %v11031_v21 }
 0x48a   :  { %9030 = vmatprep.mubr.bf16.mxu1 %v6349_v38  ;;  %10688 = vmatprep.subr.bf16.mxu0 %v11032_v10 }
 0x48b   :  { %10710 = vmatprep.subr.bf16.mxu1 %v11033_v59 }
 0x48c   :  { %10689 = vmatpush3.bf16.msra.mxu0 %v11034_v62 }
 0x48d   :  { %10711 = vmatpush3.bf16.msra.mxu1 %v11035_v25  ;;  %10690 = vmatprep.subr.bf16.mxu0 %v11036_v12 }
 0x48e   :  { %10712 = vmatprep.subr.bf16.mxu1 %v11037_v20  ;;  %v11060_v20 = vld [vmem:[#allocation11] sm:$0xff]  }
 0x490   :  { %10691 = vmatpush3.bf16.msra.mxu0 %v11038_v19  ;;  %v11331_v19 = vmov 0.0  }
 0x491   :  { %10713 = vmatpush3.bf16.msra.mxu1 %v11039_v14  ;;  %10692 = vmatprep.subr.bf16.mxu0 %v11040_v55  ;;  %v11061_v14 = vld [vmem:[#allocation11 + $0x8] sm:$0xff]   ;;  %v11062_v55 = vld [vmem:[#allocation11 + $0x10] sm:$0xff]  }
 0x492   :  { %10714 = vmatprep.subr.bf16.mxu1 %v11041_v11  ;;  %v11063_v11 = vld [vmem:[#allocation11 + $0x18] sm:$0xff]  }
 0x494   :  { %10693 = vmatpush3.bf16.msra.mxu0 %v11042_v17 }
 0x495   :  { %10715 = vmatpush3.bf16.msra.mxu1 %v11043_v22  ;;  %10694 = vmatprep.subr.bf16.mxu0 %v11044_v41 }
 0x496   :  { %10716 = vmatprep.subr.bf16.mxu1 %v11045_v58  ;;  %v11064_v58 = vld [vmem:[#allocation11 + $0x20] sm:$0xff]  }
 0x498   :  { %10695 = vmatpush3.bf16.msra.mxu0 %v11046_v24 }
 0x499   :  { %10717 = vmatpush3.bf16.msra.mxu1 %v11047_v2  ;;  %10696 = vmatprep.subr.bf16.mxu0 %v11048_v48 }
 0x49a   :  { %v10394_v37 = vpop.f32.mrb[64].mxu0  ;;  %10718 = vmatprep.subr.bf16.mxu1 %v11049_v36 }
 0x49b   :  { %v10416_v9 = vpop.f32.mrb[64].mxu1  ;;  %v10395_v16 = vpop.f32.mrb[65].mxu0 }
 0x49c   :  { %v10396_v33 = vadd.f32 %v10395_v16, %v10394_v37  ;;  %v10417_v30 = vpop.f32.mrb[65].mxu1  ;;  %v10397_v39 = vpop.f32.mrb[66].mxu0  ;;  %10697 = vmatpush3.bf16.msra.mxu0 %v11050_v15  ;;  %v11066_v16 = vld [vmem:[#allocation11 + $0x30] sm:$0xff]  }
 0x49d   :  { %v10418_v51 = vadd.f32 %v10417_v30, %v10416_v9  ;;  %v10419_v32 = vpop.f32.mrb[66].mxu1  ;;  %10719 = vmatpush3.bf16.msra.mxu1 %v11051_v18  ;;  %v10398_v43 = vpop.f32.mrb[67].mxu0  ;;  %10698 = vmatprep.subr.bf16.mxu0 %v11052_v57  ;;  %v11068_v30 = vld [vmem:[#allocation14] sm:$0xff]   ;;  %v11069_v39 = vld [vmem:[#allocation14 + $0x8] sm:$0xff]  }
 0x49e   :  { %v10420_v8 = vpop.f32.mrb[67].mxu1  ;;  %10720 = vmatprep.subr.bf16.mxu1 %v11053_v26  ;;  %v11065_v26 = vld [vmem:[#allocation11 + $0x28] sm:$0xff]  }
 0x49f   :  { %v8473_v44 = vadd.f32 %v10418_v51, %v10396_v33  ;;  %v11067_v33 = vld [vmem:[#allocation11 + $0x38] sm:$0xff]  }
 0x4a0   :  { %10699 = vmatpush3.bf16.msra.mxu0 %v11054_v28  ;;  %v11070_v28 = vld [vmem:[#allocation14 + $0x10] sm:$0xff]  }
 0x4a1   :  { %10721 = vmatpush3.bf16.msra.mxu1 %v11055_v40  ;;  %10700 = vmatprep.subr.bf16.mxu0 %v11056_v50 }
 0x4a2   :  { %10722 = vmatprep.subr.bf16.mxu1 %v11057_v60 }
 0x4a4   :  { %10701 = vmatpush3.bf16.msra.mxu0 %v11058_v63 }
 0x4a5   :  { %10723 = vmatpush3.bf16.msra.mxu1 %v11059_v23  ;;  %10748 = vmatprep.subr.bf16.mxu0 %v11331_v19 }
 0x4a6   :  { %10768 = vmatprep.subr.bf16.mxu1 %v11331_v19 }
 0x4a7   :  { %8991 = vmatmul.mubr.bf16.vlgmr.msra.gmra.mrb[92].mxu0 %v6346_v53 }
 0x4a8   :  { %9031 = vmatmul.mubr.bf16.vlgmr.msra.gmra.mrb[92].mxu1 %v6348_v5  ;;  %10749 = vmatpush3.bf16.msra.mxu0 %v11060_v20 }
 0x4a9   :  { %10750 = vmatprep.subr.bf16.mxu0 %v11331_v19  ;;  %10764 = vmatprep.mubr.msk.bf16.mxu0 %vm11332_vm1, %v11331_v19 }
 0x4aa   :  { %10784 = vmatprep.mubr.msk.bf16.mxu1 %vm11332_vm1, %v11331_v19  ;;  %10769 = vmatpush3.bf16.msra.mxu1 %v11068_v30 }
 0x4ab   :  { %10770 = vmatprep.subr.bf16.mxu1 %v11331_v19 }
 0x4ac   :  { %10751 = vmatpush3.bf16.msra.mxu0 %v11061_v14 }
 0x4ad   :  { %10752 = vmatprep.subr.bf16.mxu0 %v11331_v19 }
 0x4ae   :  { %10771 = vmatpush3.bf16.msra.mxu1 %v11069_v39 }
 0x4af   :  { %10772 = vmatprep.subr.bf16.mxu1 %v11331_v19 }
 0x4b0   :  { %10753 = vmatpush3.bf16.msra.mxu0 %v11062_v55 }
 0x4b1   :  { %10754 = vmatprep.subr.bf16.mxu0 %v11331_v19 }
 0x4b2   :  { %10773 = vmatpush3.bf16.msra.mxu1 %v11070_v28 }
 0x4b3   :  { %10774 = vmatprep.subr.bf16.mxu1 %v11331_v19 }
 0x4b4   :  { %10755 = vmatpush3.bf16.msra.mxu0 %v11063_v11 }
 0x4b5   :  { %10756 = vmatprep.subr.bf16.mxu0 %v11331_v19 }
 0x4b6   :  { %10775 = vmatpush3.bf16.msra.mxu1 %v11071_v34 }
 0x4b7   :  { %10776 = vmatprep.subr.bf16.mxu1 %v11331_v19 }
 0x4b8   :  { %10757 = vmatpush3.bf16.msra.mxu0 %v11064_v58 }
 0x4b9   :  { %10758 = vmatprep.subr.bf16.mxu0 %v11331_v19 }
 0x4ba   :  { %v10438_v47 = vpop.f32.mrb[68].mxu0 }
 0x4bb   :  { %v10460_v1 = vpop.f32.mrb[68].mxu1  ;;  %v10439_v54 = vpop.f32.mrb[69].mxu0 }
 0x4bc   :  { %v10440_v46 = vadd.f32 %v10439_v54, %v10438_v47  ;;  %v10461_v29 = vpop.f32.mrb[69].mxu1  ;;  %v10441_v7 = vpop.f32.mrb[70].mxu0  ;;  %10759 = vmatpush3.bf16.msra.mxu0 %v11065_v26  ;;  %v11074_v26 = vld [vmem:[#allocation14 + $0x30] sm:$0xff]  }
 0x4bd   :  { %v10462_v6 = vadd.f32 %v10461_v29, %v10460_v1  ;;  %v10463_v4 = vpop.f32.mrb[70].mxu1  ;;  %v10442_v27 = vpop.f32.mrb[71].mxu0  ;;  %10760 = vmatprep.subr.bf16.mxu0 %v11331_v19 }
 0x4be   :  { %v8513_v56 = vadd.f32 %v10440_v46, %v8473_v44  ;;  %v10464_v42 = vpop.f32.mrb[71].mxu1 }
 0x4c0   :  { %v8553_v0 = vadd.f32 %v10462_v6, %v8513_v56  ;;  %10761 = vmatpush3.bf16.msra.mxu0 %v11066_v16  ;;  %v10359_v16 = vld [vmem:[#allocation13] ss:$0 sm:$0xff] }
 0x4c1   :  { %10762 = vmatprep.subr.bf16.mxu0 %v11331_v19 }
 0x4c4   :  { %10763 = vmatpush3.bf16.msra.mxu0 %v11067_v33 }
 0x4da   :  { %v10482_v49 = vpop.f32.mrb[72].mxu0 }
 0x4db   :  { %v10504_v3 = vpop.f32.mrb[72].mxu1  ;;  %v10483_v61 = vpop.f32.mrb[73].mxu0 }
 0x4dc   :  { %v10484_v21 = vadd.f32 %v10483_v61, %v10482_v49  ;;  %v10505_v31 = vpop.f32.mrb[73].mxu1  ;;  %v10485_v10 = vpop.f32.mrb[74].mxu0 }
 0x4dd   :  { %v10506_v13 = vadd.f32 %v10505_v31, %v10504_v3  ;;  %v10507_v59 = vpop.f32.mrb[74].mxu1  ;;  %v10486_v38 = vpop.f32.mrb[75].mxu0 }
 0x4de   :  { %v8593_v62 = vadd.f32 %v10484_v21, %v8553_v0  ;;  %v10508_v25 = vpop.f32.mrb[75].mxu1 }
 0x4e0   :  { %v8633_v12 = vadd.f32 %v10506_v13, %v8593_v62 }
 0x4fa   :  { %v10526_v17 = vpop.f32.mrb[76].mxu0 }
 0x4fb   :  { %v10548_v22 = vpop.f32.mrb[76].mxu1  ;;  %v10527_v41 = vpop.f32.mrb[77].mxu0 }
 0x4fc   :  { %v10528_v24 = vadd.f32 %v10527_v41, %v10526_v17  ;;  %v10549_v2 = vpop.f32.mrb[77].mxu1  ;;  %v10529_v48 = vpop.f32.mrb[78].mxu0 }
 0x4fd   :  { %v10550_v36 = vadd.f32 %v10549_v2, %v10548_v22  ;;  %v10551_v15 = vpop.f32.mrb[78].mxu1  ;;  %v10530_v18 = vpop.f32.mrb[79].mxu0  ;;  %v10358_v48 = vld [vmem:[#allocation10] ss:$0 sm:$0xff] }
 0x4fe   :  { %v8673_v57 = vadd.f32 %v10528_v24, %v8633_v12  ;;  %v10552_v37 = vpop.f32.mrb[79].mxu1 }
 0x4ff   :  { %v11073_v37 = vld [vmem:[#allocation14 + $0x28] sm:$0xff]  }
 0x500   :  { %v8713_v9 = vadd.f32 %v10550_v36, %v8673_v57  ;;  %v11072_v57 = vld [vmem:[#allocation14 + $0x20] sm:$0xff]  }
 0x501   :  { %10777 = vmatpush3.bf16.msra.mxu1 %v11072_v57 }
 0x502   :  { %10778 = vmatprep.subr.bf16.mxu1 %v11331_v19 }
 0x505   :  { %10779 = vmatpush3.bf16.msra.mxu1 %v11073_v37 }
 0x506   :  { %10780 = vmatprep.subr.bf16.mxu1 %v11331_v19 }
 0x509   :  { %10781 = vmatpush3.bf16.msra.mxu1 %v11074_v26 }
 0x50a   :  { %10782 = vmatprep.subr.bf16.mxu1 %v11331_v19 }
 0x51a   :  { %v10570_v51 = vpop.f32.mrb[80].mxu0 }
 0x51b   :  { %v10592_v32 = vpop.f32.mrb[80].mxu1  ;;  %v10571_v43 = vpop.f32.mrb[81].mxu0 }
 0x51c   :  { %v10572_v40 = vadd.f32 %v10571_v43, %v10570_v51  ;;  %v10593_v50 = vpop.f32.mrb[81].mxu1  ;;  %v10573_v35 = vpop.f32.mrb[82].mxu0  ;;  %v10368_v43 = vld [vmem:[#allocation16] ss:$0 sm:$0xff] }
 0x51d   :  { %v10594_v8 = vadd.f32 %v10593_v50, %v10592_v32  ;;  %v10595_v60 = vpop.f32.mrb[82].mxu1  ;;  %v10574_v44 = vpop.f32.mrb[83].mxu0 }
 0x51e   :  { %v8753_v63 = vadd.f32 %v10572_v40, %v8713_v9  ;;  %v10596_v52 = vpop.f32.mrb[83].mxu1  ;;  %v11075_v9 = vld [vmem:[#allocation14 + $0x38] sm:$0xff]  }
 0x51f   :  { %10783 = vmatpush3.bf16.msra.mxu1 %v11075_v9 }
 0x520   :  { %v8793_v23 = vadd.f32 %v10594_v8, %v8753_v63 }
 0x53a   :  { %v10614_v45 = vpop.f32.mrb[84].mxu0 }
 0x53b   :  { %v10636_v53 = vpop.f32.mrb[84].mxu1  ;;  %v10615_v5 = vpop.f32.mrb[85].mxu0 }
 0x53c   :  { %v10616_v47 = vadd.f32 %v10615_v5, %v10614_v45  ;;  %v10637_v1 = vpop.f32.mrb[85].mxu1  ;;  %v10617_v54 = vpop.f32.mrb[86].mxu0 }
 0x53d   :  { %v10638_v46 = vadd.f32 %v10637_v1, %v10636_v53  ;;  %v10639_v29 = vpop.f32.mrb[86].mxu1  ;;  %v10618_v7 = vpop.f32.mrb[87].mxu0 }
 0x53e   :  { %v8833_v6 = vadd.f32 %v10616_v47, %v8793_v23  ;;  %v10640_v4 = vpop.f32.mrb[87].mxu1 }
 0x540   :  { %v8873_v27 = vadd.f32 %v10638_v46, %v8833_v6 }
 0x55a   :  { %v10658_v56 = vpop.f32.mrb[88].mxu0 }
 0x55b   :  { %v10680_v42 = vpop.f32.mrb[88].mxu1  ;;  %v10659_v0 = vpop.f32.mrb[89].mxu0 }
 0x55c   :  { %v10660_v49 = vadd.f32 %v10659_v0, %v10658_v56  ;;  %v10681_v3 = vpop.f32.mrb[89].mxu1  ;;  %v10661_v61 = vpop.f32.mrb[90].mxu0 }
 0x55d   :  { %v10682_v21 = vadd.f32 %v10681_v3, %v10680_v42  ;;  %v10683_v31 = vpop.f32.mrb[90].mxu1  ;;  %v10662_v10 = vpop.f32.mrb[91].mxu0 }
 0x55e   :  { %v8913_v13 = vadd.f32 %v10660_v49, %v8873_v27  ;;  %v10684_v59 = vpop.f32.mrb[91].mxu1 }
 0x560   :  { %v8953_v38 = vadd.f32 %v10682_v21, %v8913_v13 }
 0x57a   :  { %v10702_v62 = vpop.f32.mrb[92].mxu0 }
 0x57b   :  { %v10724_v25 = vpop.f32.mrb[92].mxu1  ;;  %v10703_v12 = vpop.f32.mrb[93].mxu0 }
 0x57c   :  { %v10704_v20 = vadd.f32 %v10703_v12, %v10702_v62  ;;  %v10725_v14 = vpop.f32.mrb[93].mxu1  ;;  %v10705_v55 = vpop.f32.mrb[94].mxu0 }
 0x57d   :  { %v10726_v11 = vadd.f32 %v10725_v14, %v10724_v25  ;;  %v10727_v17 = vpop.f32.mrb[94].mxu1  ;;  %v10706_v22 = vpop.f32.mrb[95].mxu0 }
 0x57e   :  { %v8993_v41 = vadd.f32 %v10704_v20, %v8953_v38  ;;  %v10728_v58 = vpop.f32.mrb[95].mxu1 }
 0x580   :  { %v9033_v24 = vadd.f32 %v10726_v11, %v8993_v41 }
 0x582   :  { %v9039_v2 = vrot.slane %v9033_v24, 2 }
 0x584   :  { %v9041_v36 = vmax.f32 %v9033_v24, %v9039_v2 }
 0x586   :  { %v9049_v15 = vadd.f32 %v10358_v48, %v9041_v36 }
 0x588   :  { %v9050_v18 = vpack.c.bf16 %v9049_v15, %v9049_v15 }
 0x58a   :  { %10765 = vmatmul.mubr.bf16.vlgmr.msra.gmra.mrb[96].mxu0 %v9050_v18 }
 0x65d   :  { %v9156_v33 = vpop.f32.mrb[96].mxu0 }
 0x65e   :  { %v9157_v30 = vadd.f32 %v10359_v16, %v9156_v33  ;;  %v10766_v39 = vpop.f32.mrb[97].mxu0 }
 0x65f   :  { %v9159_v28 = vpop.f32.mrb[98].mxu0 }
 0x660   :  { %11076 = vtanh.f32 %v9157_v30  ;;  %v10767_v34 = vpop.f32.mrb[99].mxu0 }
 0x66a   :  { %v11077_v51 = vpop.eup %11076 }
 0x66b   :  { %v9163_v32 = vpack.c.bf16 %v11077_v51, %v11077_v51 }
 0x66d   :  { %10785 = vmatmul.mubr.bf16.vlgmr.msra.gmra.mrb[96].mxu1 %v9163_v32 }
 0x740   :  { %v9269_v40 = vpop.f32.mrb[96].mxu1 }
 0x741   :  { %v9270_v50 = vadd.f32 %v10368_v43, %v9269_v40  ;;  %v10786_v35 = vpop.f32.mrb[97].mxu1 }
 0x742   :  { %v9272_v8 = vpop.f32.mrb[98].mxu1 }
 0x743   :  { %v10377_v60 = vmul.f32 -1.442695, %v9270_v50  ;;  %v10787_v44 = vpop.f32.mrb[99].mxu1 }
 0x745   :  { %11078 = vpow2.f32 %v10377_v60 }
 0x74f   :  { %v11079_v19 = vpop.eup %11078 }
 0x750   :  { %v9278_v63 = vadd.f32 1.0, %v11079_v19 }
 0x752   :  { %11080 = vrcp.f32 %v9278_v63 }
 0x75c   :  { %v11081_v52 = vpop.eup %11080 }
 0x75d   :  { %9281 = vst [vmem:[#allocation17] sm:$0x3] %v11081_v52 }
 0x75e   :  { %11295 = shalt.err (!%p11292_p6)
}
 0x75f   :  { %s11296_s5 = scalar_lea.hbm %s12059_s10, 32 }
 0x760   :  { %p11297_p7 = scmp.ne.s32.totalorder %s12059_s10, %s11296_s5  ;;  %p11300_p8 = scmp.lt.u32.totalorder %s11296_s5, %s12059_s10 }
 0x762   :  { %p11302_p9 = pnand %p11300_p8, %p11297_p7 }
 0x764   :  { %11305 = shalt.err (!%p11302_p9)
}
 0x765   :  { %9291 = dma.vmem_to_hbm [thread:$0]  %s9289_s27, 32, %s12059_s10, [#allocation4]  }
 0x766   :  { %11316 = dma.done.wait [#allocation4], 32  }
 0x767   :  { %11317 = vsyncadd [#allocation4], 4294967264 }
 0x768   :  { %9295 = vsyncpa [#allocation3], 1 }
 0x769   :  { %9296 = vsyncpa [#allocation6], 1 }
 0x76a   :  { %9297 = vsyncpa [#allocation9], 1 }
 0x76b   :  { %9298 = vsyncpa [#allocation12], 1 }
 0x76c   :  { %9299 = vsyncpa [#allocation15], 1 }
 0x76d   :  { %9300 = vsyncpa [#allocation4], 1 }

</bundles_post_ra>
